<compile_context>
chip_gen: v7x
topology: tpu7x:2x2x1
jax: 0.10.0
libtpu: 0.0.40
codegen_flags: <defaults>
</compile_context>

<pallas_src>
import jax
import jax.numpy as jnp
from jax.experimental import pallas as pl
from jax.experimental.pallas import tpu as pltpu

C = 32              # start_channels (module default)
H, W = 13, 3        # spatial extent implied by the forward pass
HW = H * W          # 39
HALF = C * HW       # 1248  (one channel-group of the flattened feature map)
FEAT = 2 * HALF     # 2496  (linear_layers / final_conv_2d fan-in)
BLK = 1280          # HALF padded up to a multiple of 128 lanes
NCAT = 1024 + C     # 1056: lin1 (1024) and final_conv_2d (32) outputs fused
PACK_W = 1152       # 9*128 lanes — width of the packed small-constants array
# pack rows (all slice starts are multiples of 128 lanes):
#   0: s1   [0:1056]                       per-column int8 scale, fused lin1|fconv2d
#   1: b1   [0:1056]                       fused lin1|fconv2d bias
#   2: s2 [0:512] | b2 [512:1024] | b4 [1024:1152]
#   3: s3 [0:256] | b3 [256:512] | w5 [512:640] | wf1 [640:672] | (b5+bf1) [768]


# ----------------------------------------------------------------------------
# Fused kernel: feature stage + full MLP head + final convs + residual + tanh/10
# ----------------------------------------------------------------------------
def _fused_kernel(xf_ref, fw_ref, fb_ref, wa_ref, wb_ref, w2_hbm, w3_hbm,
                  w4_ref, pk_ref, out_ref, w2_buf, w3_buf, dma_sem):
    f32, bf16 = jnp.float32, jnp.bfloat16

    # Kick off the tail-layer weight DMAs first: they stream from HBM while the
    # feature stage / lin1 matmuls (and the wa/wb int8->bf16 dequant) run.
    cp2 = pltpu.make_async_copy(w2_hbm, w2_buf, dma_sem.at[0])
    cp3 = pltpu.make_async_copy(w3_hbm, w3_buf, dma_sem.at[1])
    cp2.start()
    cp3.start()

    # ---- feature stage: expand / score / district convs + per-channel outer product
    xf = xf_ref[...].astype(bf16)                                     # (1, 39)
    u = jnp.tanh(jnp.dot(xf, fw_ref[...], preferred_element_type=f32)
                 + fb_ref[...])                                       # (1, 3*BLK)
    fe = u[:, :BLK]                            # tanh(expand), flattened (c,h,w); pads = 0
    fx = u[:, BLK:2 * BLK] * u[:, 2 * BLK:]    # tanh(xw)*tanh(xh) = xhw, flattened (c,h,w)

    # ---- lin1 + final_conv_2d fused: int8 weights, per-output-column scale ----------
    z1 = (jnp.dot(fe.astype(bf16), wa_ref[...].astype(bf16), preferred_element_type=f32)
          + jnp.dot(fx.astype(bf16), wb_ref[...].astype(bf16), preferred_element_type=f32))
    a1 = jnp.tanh(z1 * pk_ref[0:1, :NCAT] + pk_ref[1:2, :NCAT])       # (1, 1056)
    h = a1[:, :1024]                                                  # tanh(lin1(v))
    f2 = a1[:, 1024:NCAT]                                             # tanh(final_conv_2d(v))

    # ---- lin2 (int8) -----------------------------------------------------------------
    cp2.wait()
    z2 = jnp.dot(h.astype(bf16), w2_buf[...].astype(bf16), preferred_element_type=f32)
    h = jnp.tanh(z2 * pk_ref[2:3, :512] + pk_ref[2:3, 512:1024])      # (1, 512)

    # ---- lin3 (int8) -----------------------------------------------------------------
    cp3.wait()
    z3 = jnp.dot(h.astype(bf16), w3_buf[...].astype(bf16), preferred_element_type=f32)
    h = jnp.tanh(z3 * pk_ref[3:4, :256] + pk_ref[3:4, 256:512])       # (1, 256)

    # ---- lin4 (bf16) -----------------------------------------------------------------
    z4 = jnp.dot(h.astype(bf16), w4_ref[...], preferred_element_type=f32)
    h = jnp.tanh(z4 + pk_ref[2:3, 1024:PACK_W])                       # (1, 128)

    # ---- lin5 + final_conv_1d + residual + tanh/10 (lane reductions, f32) -------------
    linear_x = jnp.sum(h * pk_ref[3:4, 512:640], axis=-1, keepdims=True)      # (1, 1)
    c1 = jnp.sum(f2 * pk_ref[3:4, 640:640 + C], axis=-1, keepdims=True)       # (1, 1)
    out_ref[...] = jnp.tanh(linear_x + c1 + pk_ref[3:4, 768:769]) / 10.0


# ----------------------------------------------------------------------------
# One-time parameter preparation (layout, int8 quantization, packing)
# ----------------------------------------------------------------------------
def _quantize_cols(w):
    """Symmetric per-output-column int8 quantization. w: (K, N) f32 -> (q int8, s f32[N])."""
    s = jnp.maximum(jnp.max(jnp.abs(w), axis=0), 1e-20) / 127.0
    q = jnp.clip(jnp.round(w / s[None, :]), -127.0, 127.0).astype(jnp.int8)
    return q, s.astype(jnp.float32)


def prepare_params(p):
    f32, bf16 = jnp.float32, jnp.bfloat16

    wd = p['district_w'].reshape(C, H).astype(f32)   # (C, 13)
    bd = p['district_b'].astype(f32)
    ws = p['score_w'].reshape(C, W).astype(f32)      # (C, 3)
    bs = p['score_b'].astype(f32)
    we = p['expand_w'].reshape(C).astype(f32)
    be = p['expand_b'].astype(f32)

    # Flattened-feature lane bookkeeping: output lane j (< HALF) holds channel c_idx[j]
    # at spatial (h_idx[j], w_idx[j]); matrix row r holds input position (hp[r], wp[r]).
    j = jnp.arange(HALF)
    c_idx, l_idx = j // HW, j % HW
    h_idx, w_idx = l_idx // W, l_idx % W
    r = jnp.arange(HW)
    hp, wp = r // W, r % W

    # expand conv:   out[j] = we[c] * x[h, w]
    a0 = ((hp[:, None] == h_idx[None, :]) & (wp[:, None] == w_idx[None, :])
          ).astype(f32) * we[c_idx][None, :]
    # score conv (xw spread over w):    out[j] = sum_{w'} ws[c, w'] * x[h, w']
    a1 = (hp[:, None] == h_idx[None, :]).astype(f32) * ws[c_idx[None, :], wp[:, None]]
    # district conv (xh spread over h): out[j] = sum_{h'} wd[c, h'] * x[h', w]
    a2 = (wp[:, None] == w_idx[None, :]).astype(f32) * wd[c_idx[None, :], hp[:, None]]

    pad = BLK - HALF
    feat_w = jnp.concatenate(
        [jnp.pad(m, ((0, 0), (0, pad))) for m in (a0, a1, a2)], axis=1).astype(bf16)
    feat_b = jnp.concatenate(
        [jnp.pad(v, (0, pad)) for v in (be[c_idx], bs[c_idx], bd[c_idx])]
    ).reshape(1, 3 * BLK).astype(f32)

    # lin1 and final_conv_2d fused column-wise, int8-quantized per output column, then
    # split into the two 1248-row halves of v (torch flatten order is (c, h, w)).
    w1 = p['lin1_w'].T.astype(f32)                                # (2496, 1024)
    wf2 = p['fconv2d_w'].reshape(C, FEAT).T.astype(f32)           # (2496, 32)
    wcat = jnp.concatenate([w1, wf2], axis=1)                     # (2496, 1056)
    q1, s1 = _quantize_cols(wcat)
    wa_q = jnp.pad(q1[:HALF], ((0, pad), (0, 0)))                 # (1280, 1056) int8
    wb_q = jnp.pad(q1[HALF:], ((0, pad), (0, 0)))                 # (1280, 1056) int8
    b1 = jnp.concatenate([p['lin1_b'], p['fconv2d_b']]).astype(f32)   # (1056,)

    q2, s2 = _quantize_cols(p['lin2_w'].T.astype(f32))            # (1024, 512) int8
    q3, s3 = _quantize_cols(p['lin3_w'].T.astype(f32))            # (512, 256) int8
    w4 = p['lin4_w'].T.astype(bf16)                               # (256, 128) bf16

    w5 = p['lin5_w'].reshape(128).astype(f32)
    wf1 = p['fconv1d_w'].reshape(C).astype(f32)
    bsum = (p['lin5_b'].reshape(()) + p['fconv1d_b'].reshape(())).astype(f32)

    pack = jnp.zeros((4, PACK_W), f32)
    pack = pack.at[0, :NCAT].set(s1)
    pack = pack.at[1, :NCAT].set(b1)
    pack = pack.at[2, :512].set(s2)
    pack = pack.at[2, 512:1024].set(p['lin2_b'].astype(f32))
    pack = pack.at[2, 1024:PACK_W].set(p['lin4_b'].astype(f32))
    pack = pack.at[3, :256].set(s3)
    pack = pack.at[3, 256:512].set(p['lin3_b'].astype(f32))
    pack = pack.at[3, 512:640].set(w5)
    pack = pack.at[3, 640:640 + C].set(wf1)
    pack = pack.at[3, 768].set(bsum)

    return dict(feat_w=feat_w, feat_b=feat_b, wa_q=wa_q, wb_q=wb_q,
                w2_q=q2, w3_q=q3, w4=w4, pack=pack)


# ----------------------------------------------------------------------------
# Forward wrapper: one pallas_call, no per-call weight re-layout
# ----------------------------------------------------------------------------
def bert_regressor_forward(x, w):
    """x: (13, 3) f32 post-BERT mean-pooled class logits; w: prepare_params() output."""
    xf = x.astype(jnp.float32).reshape(1, HW)
    vmem = pl.BlockSpec(memory_space=pltpu.MemorySpace.VMEM)
    hbm = pl.BlockSpec(memory_space=pl.ANY)   # lin2/lin3 weights: manual overlapped DMA
    return pl.pallas_call(
        _fused_kernel,
        out_shape=jax.ShapeDtypeStruct((1, 1), jnp.float32),
        in_specs=[vmem, vmem, vmem, vmem, vmem, hbm, hbm, vmem, vmem],
        out_specs=pl.BlockSpec(memory_space=pltpu.MemorySpace.VMEM),
        scratch_shapes=[pltpu.VMEM((1024, 512), jnp.int8),
                        pltpu.VMEM((512, 256), jnp.int8),
                        pltpu.SemaphoreType.DMA((2,))],
        compiler_params=pltpu.CompilerParams(vmem_limit_bytes=32 * 1024 * 1024),
    )(xf, w['feat_w'], w['feat_b'], w['wa_q'], w['wb_q'],
      w['w2_q'], w['w3_q'], w['w4'], w['pack'])


# ----------------------------------------------------------------------------
# Deterministic parameter init (torch-convention shapes, uniform(-1/sqrt(fan_in), .))
# ----------------------------------------------------------------------------
def init_params(key):
    specs = {
        'district_w': ((C, 1, H, 1), 13),  'district_b': ((C,), 13),
        'score_w':    ((C, 1, 1, W), 3),   'score_b':    ((C,), 3),
        'expand_w':   ((C, 1, 1, 1), 1),   'expand_b':   ((C,), 1),
        'lin1_w': ((1024, FEAT), FEAT),    'lin1_b': ((1024,), FEAT),
        'lin2_w': ((512, 1024), 1024),     'lin2_b': ((512,), 1024),
        'lin3_w': ((256, 512), 512),       'lin3_b': ((256,), 512),
        'lin4_w': ((128, 256), 256),       'lin4_b': ((128,), 256),
        'lin5_w': ((1, 128), 128),         'lin5_b': ((1,), 128),
        'fconv2d_w': ((C, 2 * C, H, W), 2 * C * H * W),
        'fconv2d_b': ((C,), 2 * C * H * W),
        'fconv1d_w': ((1, 1, C), C),       'fconv1d_b': ((1,), C),
    }
    keys = jax.random.split(key, len(specs))
    params = {}
    for k, (name, (shape, fan_in)) in zip(keys, specs.items()):
        bound = float(1.0 / (fan_in ** 0.5))
        params[name] = jax.random.uniform(k, shape, jnp.float32, -bound, bound)
    return params


# ----------------------------------------------------------------------------
# Pure-JAX f32 reference of the same math (correctness smoke check)
# ----------------------------------------------------------------------------
def reference_forward(x, p):
    wd = p['district_w'].reshape(C, H)
    xh = jnp.tanh(jnp.einsum('ch,hw->cw', wd, x) + p['district_b'][:, None])    # (C, 3)
    ws = p['score_w'].reshape(C, W)
    xw = jnp.tanh(jnp.einsum('cw,hw->ch', ws, x) + p['score_b'][:, None])       # (C, 13)
    xhw = xw[:, :, None] * xh[:, None, :]                                       # (C, 13, 3)
    xe = jnp.tanh(p['expand_w'].reshape(C, 1, 1) * x[None] + p['expand_b'].reshape(C, 1, 1))
    v = jnp.concatenate([xe, xhw], axis=0).reshape(1, FEAT)
    h = jnp.tanh(v @ p['lin1_w'].T + p['lin1_b'])
    h = jnp.tanh(h @ p['lin2_w'].T + p['lin2_b'])
    h = jnp.tanh(h @ p['lin3_w'].T + p['lin3_b'])
    h = jnp.tanh(h @ p['lin4_w'].T + p['lin4_b'])
    linear_x = h @ p['lin5_w'].T + p['lin5_b']
    f2 = jnp.tanh(v @ p['fconv2d_w'].reshape(C, FEAT).T + p['fconv2d_b'][None])
    c1 = f2 @ p['fconv1d_w'].reshape(C, 1) + p['fconv1d_b'][None]
    return jnp.tanh(linear_x + c1) / 10.0


if __name__ == "__main__":
    key = jax.random.PRNGKey(0)
    kx, kp = jax.random.split(key)

    # TODO(synk): the frozen pretrained FinBERT (BertForSequenceClassification) feature
    # extractor has no Pallas equivalent here; the kernel consumes the (13, 3) matrix of
    # mean-pooled class logits it would produce.
    x = jax.random.normal(kx, (H, W), jnp.float32)
    params = init_params(kp)

    prepped = jax.block_until_ready(prepare_params(params))   # one-time layout/quant prep
    fwd = jax.jit(bert_regressor_forward)

    y = jax.block_until_ready(fwd(x, prepped))
    y_ref = reference_forward(x, params)

    assert y.shape == (1, 1), y.shape
    assert jnp.allclose(y, y_ref, atol=5e-3, rtol=1e-2), (y, y_ref)
    print("KERNEL_OK")
</pallas_src>

<mosaic_0001>
module attributes {stable_mosaic.version = 11 : i64} {
  func.func @_fused_kernel(%arg0: memref<1x39xf32, #tpu.memory_space<vmem>>, %arg1: memref<39x3840xbf16, #tpu.memory_space<vmem>>, %arg2: memref<1x3840xf32, #tpu.memory_space<vmem>>, %arg3: memref<1280x1056xi8, #tpu.memory_space<vmem>>, %arg4: memref<1280x1056xi8, #tpu.memory_space<vmem>>, %arg5: memref<1024x512xi8, #tpu.memory_space<any>>, %arg6: memref<512x256xi8, #tpu.memory_space<any>>, %arg7: memref<256x128xbf16, #tpu.memory_space<vmem>>, %arg8: memref<4x1152xf32, #tpu.memory_space<vmem>>, %arg9: memref<1x1xf32, #tpu.memory_space<vmem>>, %arg10: memref<1024x512xi8, #tpu.memory_space<vmem>>, %arg11: memref<512x256xi8, #tpu.memory_space<vmem>>, %arg12: memref<2x!tpu.dma_semaphore, #tpu.memory_space<semaphore_mem>>) attributes {dimension_semantics = [], scalar_prefetch = 0 : i64, scratch_operands = 3 : i64, tpu.core_type = #tpu.core_type<tc>} {
    %c0_i32 = arith.constant 0 : i32
    %0 = tpu.memref_slice %arg12[%c0_i32] : memref<2x!tpu.dma_semaphore, #tpu.memory_space<semaphore_mem>> -> memref<1x!tpu.dma_semaphore, #tpu.memory_space<semaphore_mem>>
    %1 = tpu.memref_squeeze %0 : memref<1x!tpu.dma_semaphore, #tpu.memory_space<semaphore_mem>> -> memref<!tpu.dma_semaphore, #tpu.memory_space<semaphore_mem>>
    tpu.enqueue_dma source(%arg5 : memref<1024x512xi8, #tpu.memory_space<any>>) target(%arg10 : memref<1024x512xi8, #tpu.memory_space<vmem>>) target_semaphore(%1 : memref<!tpu.dma_semaphore, #tpu.memory_space<semaphore_mem>>)
    %c1_i32 = arith.constant 1 : i32
    %2 = tpu.memref_slice %arg12[%c1_i32] : memref<2x!tpu.dma_semaphore, #tpu.memory_space<semaphore_mem>> -> memref<1x!tpu.dma_semaphore, #tpu.memory_space<semaphore_mem>>
    %3 = tpu.memref_squeeze %2 : memref<1x!tpu.dma_semaphore, #tpu.memory_space<semaphore_mem>> -> memref<!tpu.dma_semaphore, #tpu.memory_space<semaphore_mem>>
    tpu.enqueue_dma source(%arg6 : memref<512x256xi8, #tpu.memory_space<any>>) target(%arg11 : memref<512x256xi8, #tpu.memory_space<vmem>>) target_semaphore(%3 : memref<!tpu.dma_semaphore, #tpu.memory_space<semaphore_mem>>)
    %c0 = arith.constant 0 : index
    %c0_0 = arith.constant 0 : index
    %4 = vector.load %arg0[%c0, %c0_0] : memref<1x39xf32, #tpu.memory_space<vmem>>, vector<1x39xf32>
    %5 = arith.truncf %4 : vector<1x39xf32> to vector<1x39xbf16>
    %c0_1 = arith.constant 0 : index
    %c0_2 = arith.constant 0 : index
    %6 = vector.load %arg1[%c0_1, %c0_2] : memref<39x3840xbf16, #tpu.memory_space<vmem>>, vector<39x3840xbf16>
    %cst = arith.constant dense<0.000000e+00> : vector<1x3840xf32>
    %7 = tpu.matmul %5, %6, %cst {dimension_numbers = #tpu.dot_dimension_numbers<[1], [0], [0], [1], [0, 0, 1, 1], [], []>} : vector<1x39xbf16>, vector<39x3840xbf16>, vector<1x3840xf32> -> vector<1x3840xf32>
    %c0_3 = arith.constant 0 : index
    %c0_4 = arith.constant 0 : index
    %8 = vector.load %arg2[%c0_3, %c0_4] : memref<1x3840xf32, #tpu.memory_space<vmem>>, vector<1x3840xf32>
    %9 = arith.addf %7, %8 : vector<1x3840xf32>
    %10 = math.tanh %9 : vector<1x3840xf32>
    %11 = vector.extract_strided_slice %10 {offsets = [0, 0], sizes = [1, 1280], strides = [1, 1]} : vector<1x3840xf32> to vector<1x1280xf32>
    %12 = vector.extract_strided_slice %10 {offsets = [0, 1280], sizes = [1, 1280], strides = [1, 1]} : vector<1x3840xf32> to vector<1x1280xf32>
    %13 = vector.extract_strided_slice %10 {offsets = [0, 2560], sizes = [1, 1280], strides = [1, 1]} : vector<1x3840xf32> to vector<1x1280xf32>
    %14 = arith.mulf %12, %13 : vector<1x1280xf32>
    %15 = arith.truncf %11 : vector<1x1280xf32> to vector<1x1280xbf16>
    %c0_5 = arith.constant 0 : index
    %c0_6 = arith.constant 0 : index
    %16 = vector.load %arg3[%c0_5, %c0_6] : memref<1280x1056xi8, #tpu.memory_space<vmem>>, vector<1280x1056xi8>
    %17 = arith.sitofp %16 : vector<1280x1056xi8> to vector<1280x1056xbf16>
    %cst_7 = arith.constant dense<0.000000e+00> : vector<1x1056xf32>
    %18 = tpu.matmul %15, %17, %cst_7 {dimension_numbers = #tpu.dot_dimension_numbers<[1], [0], [0], [1], [0, 0, 1, 1], [], []>} : vector<1x1280xbf16>, vector<1280x1056xbf16>, vector<1x1056xf32> -> vector<1x1056xf32>
    %19 = arith.truncf %14 : vector<1x1280xf32> to vector<1x1280xbf16>
    %c0_8 = arith.constant 0 : index
    %c0_9 = arith.constant 0 : index
    %20 = vector.load %arg4[%c0_8, %c0_9] : memref<1280x1056xi8, #tpu.memory_space<vmem>>, vector<1280x1056xi8>
    %21 = arith.sitofp %20 : vector<1280x1056xi8> to vector<1280x1056xbf16>
    %cst_10 = arith.constant dense<0.000000e+00> : vector<1x1056xf32>
    %22 = tpu.matmul %19, %21, %cst_10 {dimension_numbers = #tpu.dot_dimension_numbers<[1], [0], [0], [1], [0, 0, 1, 1], [], []>} : vector<1x1280xbf16>, vector<1280x1056xbf16>, vector<1x1056xf32> -> vector<1x1056xf32>
    %23 = arith.addf %18, %22 : vector<1x1056xf32>
    %c0_11 = arith.constant 0 : index
    %c0_12 = arith.constant 0 : index
    %24 = vector.load %arg8[%c0_11, %c0_12] : memref<4x1152xf32, #tpu.memory_space<vmem>>, vector<1x1056xf32>
    %25 = arith.mulf %23, %24 : vector<1x1056xf32>
    %c1 = arith.constant 1 : index
    %c0_13 = arith.constant 0 : index
    %26 = vector.load %arg8[%c1, %c0_13] : memref<4x1152xf32, #tpu.memory_space<vmem>>, vector<1x1056xf32>
    %27 = arith.addf %25, %26 : vector<1x1056xf32>
    %28 = math.tanh %27 : vector<1x1056xf32>
    %29 = vector.extract_strided_slice %28 {offsets = [0, 0], sizes = [1, 1024], strides = [1, 1]} : vector<1x1056xf32> to vector<1x1024xf32>
    %30 = vector.extract_strided_slice %28 {offsets = [0, 1024], sizes = [1, 32], strides = [1, 1]} : vector<1x1056xf32> to vector<1x32xf32>
    %c0_i32_14 = arith.constant 0 : i32
    %31 = tpu.memref_slice %arg12[%c0_i32_14] : memref<2x!tpu.dma_semaphore, #tpu.memory_space<semaphore_mem>> -> memref<1x!tpu.dma_semaphore, #tpu.memory_space<semaphore_mem>>
    %32 = tpu.memref_squeeze %31 : memref<1x!tpu.dma_semaphore, #tpu.memory_space<semaphore_mem>> -> memref<!tpu.dma_semaphore, #tpu.memory_space<semaphore_mem>>
    tpu.wait_dma2 semaphore(%32 : memref<!tpu.dma_semaphore, #tpu.memory_space<semaphore_mem>>) src(%arg5 : memref<1024x512xi8, #tpu.memory_space<any>>) dst(%arg10 : memref<1024x512xi8, #tpu.memory_space<vmem>>)
    %33 = arith.truncf %29 : vector<1x1024xf32> to vector<1x1024xbf16>
    %c0_15 = arith.constant 0 : index
    %c0_16 = arith.constant 0 : index
    %34 = vector.load %arg10[%c0_15, %c0_16] : memref<1024x512xi8, #tpu.memory_space<vmem>>, vector<1024x512xi8>
    %35 = arith.sitofp %34 : vector<1024x512xi8> to vector<1024x512xbf16>
    %cst_17 = arith.constant dense<0.000000e+00> : vector<1x512xf32>
    %36 = tpu.matmul %33, %35, %cst_17 {dimension_numbers = #tpu.dot_dimension_numbers<[1], [0], [0], [1], [0, 0, 1, 1], [], []>} : vector<1x1024xbf16>, vector<1024x512xbf16>, vector<1x512xf32> -> vector<1x512xf32>
    %c2 = arith.constant 2 : index
    %c0_18 = arith.constant 0 : index
    %37 = vector.load %arg8[%c2, %c0_18] : memref<4x1152xf32, #tpu.memory_space<vmem>>, vector<1x512xf32>
    %38 = arith.mulf %36, %37 : vector<1x512xf32>
    %c2_19 = arith.constant 2 : index
    %c512 = arith.constant 512 : index
    %39 = vector.load %arg8[%c2_19, %c512] : memref<4x1152xf32, #tpu.memory_space<vmem>>, vector<1x512xf32>
    %40 = arith.addf %38, %39 : vector<1x512xf32>
    %41 = math.tanh %40 : vector<1x512xf32>
    %c1_i32_20 = arith.constant 1 : i32
    %42 = tpu.memref_slice %arg12[%c1_i32_20] : memref<2x!tpu.dma_semaphore, #tpu.memory_space<semaphore_mem>> -> memref<1x!tpu.dma_semaphore, #tpu.memory_space<semaphore_mem>>
    %43 = tpu.memref_squeeze %42 : memref<1x!tpu.dma_semaphore, #tpu.memory_space<semaphore_mem>> -> memref<!tpu.dma_semaphore, #tpu.memory_space<semaphore_mem>>
    tpu.wait_dma2 semaphore(%43 : memref<!tpu.dma_semaphore, #tpu.memory_space<semaphore_mem>>) src(%arg6 : memref<512x256xi8, #tpu.memory_space<any>>) dst(%arg11 : memref<512x256xi8, #tpu.memory_space<vmem>>)
    %44 = arith.truncf %41 : vector<1x512xf32> to vector<1x512xbf16>
    %c0_21 = arith.constant 0 : index
    %c0_22 = arith.constant 0 : index
    %45 = vector.load %arg11[%c0_21, %c0_22] : memref<512x256xi8, #tpu.memory_space<vmem>>, vector<512x256xi8>
    %46 = arith.sitofp %45 : vector<512x256xi8> to vector<512x256xbf16>
    %cst_23 = arith.constant dense<0.000000e+00> : vector<1x256xf32>
    %47 = tpu.matmul %44, %46, %cst_23 {dimension_numbers = #tpu.dot_dimension_numbers<[1], [0], [0], [1], [0, 0, 1, 1], [], []>} : vector<1x512xbf16>, vector<512x256xbf16>, vector<1x256xf32> -> vector<1x256xf32>
    %c3 = arith.constant 3 : index
    %c0_24 = arith.constant 0 : index
    %48 = vector.load %arg8[%c3, %c0_24] : memref<4x1152xf32, #tpu.memory_space<vmem>>, vector<1x256xf32>
    %49 = arith.mulf %47, %48 : vector<1x256xf32>
    %c3_25 = arith.constant 3 : index
    %c256 = arith.constant 256 : index
    %50 = vector.load %arg8[%c3_25, %c256] : memref<4x1152xf32, #tpu.memory_space<vmem>>, vector<1x256xf32>
    %51 = arith.addf %49, %50 : vector<1x256xf32>
    %52 = math.tanh %51 : vector<1x256xf32>
    %53 = arith.truncf %52 : vector<1x256xf32> to vector<1x256xbf16>
    %c0_26 = arith.constant 0 : index
    %c0_27 = arith.constant 0 : index
    %54 = vector.load %arg7[%c0_26, %c0_27] : memref<256x128xbf16, #tpu.memory_space<vmem>>, vector<256x128xbf16>
    %cst_28 = arith.constant dense<0.000000e+00> : vector<1x128xf32>
    %55 = tpu.matmul %53, %54, %cst_28 {dimension_numbers = #tpu.dot_dimension_numbers<[1], [0], [0], [1], [0, 0, 1, 1], [], []>} : vector<1x256xbf16>, vector<256x128xbf16>, vector<1x128xf32> -> vector<1x128xf32>
    %c2_29 = arith.constant 2 : index
    %c1024 = arith.constant 1024 : index
    %56 = vector.load %arg8[%c2_29, %c1024] : memref<4x1152xf32, #tpu.memory_space<vmem>>, vector<1x128xf32>
    %57 = arith.addf %55, %56 : vector<1x128xf32>
    %58 = math.tanh %57 : vector<1x128xf32>
    %c3_30 = arith.constant 3 : index
    %c512_31 = arith.constant 512 : index
    %59 = vector.load %arg8[%c3_30, %c512_31] : memref<4x1152xf32, #tpu.memory_space<vmem>>, vector<1x128xf32>
    %60 = arith.mulf %58, %59 : vector<1x128xf32>
    %cst_32 = arith.constant dense<0.000000e+00> : vector<1xf32>
    %61 = vector.multi_reduction <add>, %60, %cst_32 [1] : vector<1x128xf32> to vector<1xf32>
    %62 = vector.shape_cast %61 : vector<1xf32> to vector<1x1xf32>
    %c3_33 = arith.constant 3 : index
    %c640 = arith.constant 640 : index
    %63 = vector.load %arg8[%c3_33, %c640] : memref<4x1152xf32, #tpu.memory_space<vmem>>, vector<1x32xf32>
    %64 = arith.mulf %30, %63 : vector<1x32xf32>
    %cst_34 = arith.constant dense<0.000000e+00> : vector<1xf32>
    %65 = vector.multi_reduction <add>, %64, %cst_34 [1] : vector<1x32xf32> to vector<1xf32>
    %66 = vector.shape_cast %65 : vector<1xf32> to vector<1x1xf32>
    %67 = arith.addf %62, %66 : vector<1x1xf32>
    %c3_35 = arith.constant 3 : index
    %c768 = arith.constant 768 : index
    %68 = vector.load %arg8[%c3_35, %c768] : memref<4x1152xf32, #tpu.memory_space<vmem>>, vector<1x1xf32>
    %69 = arith.addf %67, %68 : vector<1x1xf32>
    %70 = math.tanh %69 : vector<1x1xf32>
    %cst_36 = arith.constant 1.000000e+01 : f32
    %71 = vector.broadcast %cst_36 : f32 to vector<1x1xf32>
    %72 = arith.divf %70, %71 : vector<1x1xf32>
    %c0_37 = arith.constant 0 : index
    %c0_38 = arith.constant 0 : index
    %73 = vector.load %arg9[%c0_37, %c0_38] : memref<1x1xf32, #tpu.memory_space<vmem>>, vector<1x1xf32>
    tpu.vector_store %arg9[%c0_37, %c0_38], %72 {strides = array<i32>} : memref<1x1xf32, #tpu.memory_space<vmem>>, vector<1x1xf32>,
    return
  }
}

</mosaic_0001>

<bundles_post_ra>
// kernel: bert_regressor_forward.1
= control target key start
LH: loop header
LB: loop body
LE: loop exit
PB: predicated region body
PF: predicated region fallthrough
CT: control target
= control target key end

     0   :  { %14 = vsyncpa [#allocation6], 0  ;;  %s12357_s0 = inlined_call_operand.vmem [shape: f32[1,39], index: 0, kind: input, shape index: {}]   ;;  %s12358_s1 = inlined_call_operand.vmem [shape: bf16[39,3840], index: 1, kind: input, shape index: {}]   ;;  %s12359_s2 = inlined_call_operand.vmem [shape: f32[1,3840], index: 2, kind: input, shape index: {}]   ;;  %s12360_s3 = inlined_call_operand.vmem [shape: s8[1280,1056], index: 3, kind: input, shape index: {}]   ;;  %s12361_s4 = inlined_call_operand.vmem [shape: s8[1280,1056], index: 4, kind: input, shape index: {}]   ;;  %s12362_s5 = inlined_call_operand.vmem [shape: s8[1024,512], index: 5, kind: input, shape index: {}]   ;;  %s12363_s6 = inlined_call_operand.vmem [shape: s8[512,256], index: 6, kind: input, shape index: {}]   ;;  %s12364_s7 = inlined_call_operand.vmem [shape: bf16[256,128], index: 7, kind: input, shape index: {}]   ;;  %s12365_s8 = inlined_call_operand.vmem [shape: f32[4,1152], index: 8, kind: input, shape index: {}]   ;;  %s12366_s9 = inlined_call_operand.hbm [shape: f32[1,1], index: 9, kind: output, shape index: {}]  }
   0x1   :  { %v8241_v0 = vld [vmem:[%s12362_s5] sm:$0xff]  ;;  %v8246_v1 = vld [vmem:[%s12362_s5 + $0x8] sm:$0xff]  ;;  %v8251_v2 = vld [vmem:[%s12362_s5 + $0x10] sm:$0xff] }
   0x2   :  { %v8256_v3 = vld [vmem:[%s12362_s5 + $0x18] sm:$0xff]  ;;  %v8261_v4 = vld [vmem:[%s12362_s5 + $0x20] sm:$0xff]  ;;  %v8266_v5 = vld [vmem:[%s12362_s5 + $0x28] sm:$0xff] }
   0x3   :  { %v8271_v6 = vld [vmem:[%s12362_s5 + $0x30] sm:$0xff]  ;;  %v8276_v7 = vld [vmem:[%s12362_s5 + $0x38] sm:$0xff]  ;;  %v8281_v8 = vld [vmem:[%s12362_s5 + $0x40] sm:$0xff] }
   0x4   :  { %v8286_v9 = vld [vmem:[%s12362_s5 + $0x48] sm:$0xff]  ;;  %v8291_v10 = vld [vmem:[%s12362_s5 + $0x50] sm:$0xff]  ;;  %v8296_v11 = vld [vmem:[%s12362_s5 + $0x58] sm:$0xff] }
   0x5   :  { %v8301_v12 = vld [vmem:[%s12362_s5 + $0x60] sm:$0xff]  ;;  %v8306_v13 = vld [vmem:[%s12362_s5 + $0x68] sm:$0xff]  ;;  %v8311_v14 = vld [vmem:[%s12362_s5 + $0x70] sm:$0xff] }
   0x6   :  { %12515 = vst [vmem:[#allocation12_spill] sm:$0xff] %v8301_v12  ;;  %12516 = vst [vmem:[#allocation13_spill] sm:$0xff] %v8311_v14  ;;  %v8316_v15 = vld [vmem:[%s12362_s5 + $0x78] sm:$0xff]  ;;  %v8321_v16 = vld [vmem:[%s12362_s5 + $0x80] sm:$0xff] }
   0x7   :  { %12517 = vst [vmem:[#allocation14_spill] sm:$0xff] %v8321_v16  ;;  %v8326_v17 = vld [vmem:[%s12362_s5 + $0x88] sm:$0xff]  ;;  %v8331_v18 = vld [vmem:[%s12362_s5 + $0x90] sm:$0xff]  ;;  %v8336_v19 = vld [vmem:[%s12362_s5 + $0x98] sm:$0xff] }
   0x8   :  { %12518 = vst [vmem:[#allocation15_spill] sm:$0xff] %v8326_v17  ;;  %12519 = vst [vmem:[#allocation16_spill] sm:$0xff] %v8331_v18  ;;  %v8341_v20 = vld [vmem:[%s12362_s5 + $0xa0] sm:$0xff]  ;;  %v8346_v21 = vld [vmem:[%s12362_s5 + $0xa8] sm:$0xff] }
   0x9   :  { %12520 = vst [vmem:[#allocation17_spill] sm:$0xff] %v8336_v19  ;;  %12521 = vst [vmem:[#allocation18_spill] sm:$0xff] %v8341_v20  ;;  %v8351_v22 = vld [vmem:[%s12362_s5 + $0xb0] sm:$0xff]  ;;  %v8356_v23 = vld [vmem:[%s12362_s5 + $0xb8] sm:$0xff] }
   0xa   :  { %12522 = vst [vmem:[#allocation19_spill] sm:$0xff] %v8346_v21  ;;  %12523 = vst [vmem:[#allocation20_spill] sm:$0xff] %v8351_v22  ;;  %v8361_v24 = vld [vmem:[%s12362_s5 + $0xc0] sm:$0xff]  ;;  %v8366_v25 = vld [vmem:[%s12362_s5 + $0xc8] sm:$0xff] }
   0xb   :  { %12524 = vst [vmem:[#allocation21_spill] sm:$0xff] %v8356_v23  ;;  %12525 = vst [vmem:[#allocation22_spill] sm:$0xff] %v8361_v24  ;;  %v8371_v26 = vld [vmem:[%s12362_s5 + $0xd0] sm:$0xff]  ;;  %v8376_v27 = vld [vmem:[%s12362_s5 + $0xd8] sm:$0xff] }
   0xc   :  { %12526 = vst [vmem:[#allocation23_spill] sm:$0xff] %v8366_v25  ;;  %12527 = vst [vmem:[#allocation24_spill] sm:$0xff] %v8371_v26  ;;  %v8381_v28 = vld [vmem:[%s12362_s5 + $0xe0] sm:$0xff]  ;;  %v8386_v29 = vld [vmem:[%s12362_s5 + $0xe8] sm:$0xff] }
   0xd   :  { %12528 = vst [vmem:[#allocation25_spill] sm:$0xff] %v8376_v27  ;;  %12529 = vst [vmem:[#allocation26_spill] sm:$0xff] %v8381_v28  ;;  %v8391_v30 = vld [vmem:[%s12362_s5 + $0xf0] sm:$0xff]  ;;  %v8396_v31 = vld [vmem:[%s12362_s5 + $0xf8] sm:$0xff] }
   0xe   :  { %12530 = vst [vmem:[#allocation27_spill] sm:$0xff] %v8386_v29  ;;  %12531 = vst [vmem:[#allocation28_spill] sm:$0xff] %v8391_v30  ;;  %v8401_v32 = vld [vmem:[%s12362_s5 + $0x100] sm:$0xff]  ;;  %v8406_v33 = vld [vmem:[%s12362_s5 + $0x108] sm:$0xff] }
   0xf   :  { %12532 = vst [vmem:[#allocation29_spill] sm:$0xff] %v8396_v31  ;;  %12533 = vst [vmem:[#allocation30_spill] sm:$0xff] %v8401_v32  ;;  %v8411_v34 = vld [vmem:[%s12362_s5 + $0x110] sm:$0xff]  ;;  %v8416_v35 = vld [vmem:[%s12362_s5 + $0x118] sm:$0xff] }
  0x10   :  { %12534 = vst [vmem:[#allocation31_spill] sm:$0xff] %v8406_v33  ;;  %12535 = vst [vmem:[#allocation32_spill] sm:$0xff] %v8411_v34  ;;  %v8421_v36 = vld [vmem:[%s12362_s5 + $0x120] sm:$0xff]  ;;  %v8426_v37 = vld [vmem:[%s12362_s5 + $0x128] sm:$0xff] }
  0x11   :  { %12536 = vst [vmem:[#allocation33_spill] sm:$0xff] %v8416_v35  ;;  %12537 = vst [vmem:[#allocation34_spill] sm:$0xff] %v8421_v36  ;;  %v8431_v38 = vld [vmem:[%s12362_s5 + $0x130] sm:$0xff]  ;;  %v8436_v39 = vld [vmem:[%s12362_s5 + $0x138] sm:$0xff] }
  0x12   :  { %12538 = vst [vmem:[#allocation35_spill] sm:$0xff] %v8426_v37  ;;  %12539 = vst [vmem:[#allocation36_spill] sm:$0xff] %v8431_v38  ;;  %v8441_v40 = vld [vmem:[%s12362_s5 + $0x140] sm:$0xff]  ;;  %v8446_v41 = vld [vmem:[%s12362_s5 + $0x148] sm:$0xff] }
  0x13   :  { %12540 = vst [vmem:[#allocation37_spill] sm:$0xff] %v8436_v39  ;;  %12541 = vst [vmem:[#allocation38_spill] sm:$0xff] %v8441_v40  ;;  %v8451_v42 = vld [vmem:[%s12362_s5 + $0x150] sm:$0xff]  ;;  %v8456_v43 = vld [vmem:[%s12362_s5 + $0x158] sm:$0xff] }
  0x14   :  { %12542 = vst [vmem:[#allocation39_spill] sm:$0xff] %v8446_v41  ;;  %12543 = vst [vmem:[#allocation40_spill] sm:$0xff] %v8451_v42  ;;  %v8461_v44 = vld [vmem:[%s12362_s5 + $0x160] sm:$0xff]  ;;  %v8466_v45 = vld [vmem:[%s12362_s5 + $0x168] sm:$0xff] }
  0x15   :  { %12544 = vst [vmem:[#allocation41_spill] sm:$0xff] %v8456_v43  ;;  %12545 = vst [vmem:[#allocation42_spill] sm:$0xff] %v8461_v44  ;;  %v8471_v46 = vld [vmem:[%s12362_s5 + $0x170] sm:$0xff]  ;;  %v8476_v47 = vld [vmem:[%s12362_s5 + $0x178] sm:$0xff] }
  0x16   :  { %12546 = vst [vmem:[#allocation43_spill] sm:$0xff] %v8466_v45  ;;  %12547 = vst [vmem:[#allocation44_spill] sm:$0xff] %v8471_v46  ;;  %v8481_v48 = vld [vmem:[%s12362_s5 + $0x180] sm:$0xff]  ;;  %v8486_v49 = vld [vmem:[%s12362_s5 + $0x188] sm:$0xff] }
  0x17   :  { %12548 = vst [vmem:[#allocation45_spill] sm:$0xff] %v8476_v47  ;;  %12549 = vst [vmem:[#allocation46_spill] sm:$0xff] %v8481_v48  ;;  %v8491_v50 = vld [vmem:[%s12362_s5 + $0x190] sm:$0xff]  ;;  %v8496_v51 = vld [vmem:[%s12362_s5 + $0x198] sm:$0xff] }
  0x18   :  { %12550 = vst [vmem:[#allocation47_spill] sm:$0xff] %v8486_v49  ;;  %12551 = vst [vmem:[#allocation48_spill] sm:$0xff] %v8491_v50  ;;  %v8501_v52 = vld [vmem:[%s12362_s5 + $0x1a0] sm:$0xff]  ;;  %v8506_v53 = vld [vmem:[%s12362_s5 + $0x1a8] sm:$0xff] }
  0x19   :  { %12552 = vst [vmem:[#allocation49_spill] sm:$0xff] %v8496_v51  ;;  %12553 = vst [vmem:[#allocation50_spill] sm:$0xff] %v8501_v52  ;;  %v8511_v54 = vld [vmem:[%s12362_s5 + $0x1b0] sm:$0xff]  ;;  %v8516_v55 = vld [vmem:[%s12362_s5 + $0x1b8] sm:$0xff] }
  0x1a   :  { %12554 = vst [vmem:[#allocation51_spill] sm:$0xff] %v8506_v53  ;;  %12555 = vst [vmem:[#allocation52_spill] sm:$0xff] %v8511_v54  ;;  %v8521_v56 = vld [vmem:[%s12362_s5 + $0x1c0] sm:$0xff]  ;;  %v8526_v57 = vld [vmem:[%s12362_s5 + $0x1c8] sm:$0xff] }
  0x1b   :  { %12556 = vst [vmem:[#allocation53_spill] sm:$0xff] %v8516_v55  ;;  %12557 = vst [vmem:[#allocation54_spill] sm:$0xff] %v8521_v56  ;;  %v8531_v58 = vld [vmem:[%s12362_s5 + $0x1d0] sm:$0xff]  ;;  %v8536_v59 = vld [vmem:[%s12362_s5 + $0x1d8] sm:$0xff] }
  0x1c   :  { %12558 = vst [vmem:[#allocation55_spill] sm:$0xff] %v8526_v57  ;;  %12559 = vst [vmem:[#allocation56_spill] sm:$0xff] %v8531_v58  ;;  %v8541_v60 = vld [vmem:[%s12362_s5 + $0x1e0] sm:$0xff]  ;;  %v8546_v61 = vld [vmem:[%s12362_s5 + $0x1e8] sm:$0xff] }
  0x1d   :  { %12560 = vst [vmem:[#allocation57_spill] sm:$0xff] %v8536_v59  ;;  %12561 = vst [vmem:[#allocation58_spill] sm:$0xff] %v8541_v60  ;;  %v8551_v62 = vld [vmem:[%s12362_s5 + $0x1f0] sm:$0xff]  ;;  %v8556_v63 = vld [vmem:[%s12362_s5 + $0x1f8] sm:$0xff] }
  0x1e   :  { %12562 = vst [vmem:[#allocation59_spill] sm:$0xff] %v8546_v61  ;;  %12563 = vst [vmem:[#allocation60_spill] sm:$0xff] %v8551_v62  ;;  %v8561_v58 = vld [vmem:[%s12362_s5 + $0x200] sm:$0xff]  ;;  %v8566_v60 = vld [vmem:[%s12362_s5 + $0x208] sm:$0xff] }
  0x1f   :  { %12564 = vst [vmem:[#allocation61_spill] sm:$0xff] %v8556_v63  ;;  %12565 = vst [vmem:[#allocation62_spill] sm:$0xff] %v8561_v58  ;;  %v8571_v61 = vld [vmem:[%s12362_s5 + $0x210] sm:$0xff]  ;;  %v8576_v62 = vld [vmem:[%s12362_s5 + $0x218] sm:$0xff] }
  0x20   :  { %12566 = vst [vmem:[#allocation63_spill] sm:$0xff] %v8566_v60  ;;  %12567 = vst [vmem:[#allocation64_spill] sm:$0xff] %v8571_v61  ;;  %v8581_v63 = vld [vmem:[%s12362_s5 + $0x220] sm:$0xff]  ;;  %v8586_v58 = vld [vmem:[%s12362_s5 + $0x228] sm:$0xff] }
  0x21   :  { %12568 = vst [vmem:[#allocation65_spill] sm:$0xff] %v8576_v62  ;;  %12569 = vst [vmem:[#allocation66_spill] sm:$0xff] %v8581_v63  ;;  %v8591_v60 = vld [vmem:[%s12362_s5 + $0x230] sm:$0xff]  ;;  %v8596_v61 = vld [vmem:[%s12362_s5 + $0x238] sm:$0xff] }
  0x22   :  { %12570 = vst [vmem:[#allocation67_spill] sm:$0xff] %v8586_v58  ;;  %12571 = vst [vmem:[#allocation68_spill] sm:$0xff] %v8591_v60  ;;  %v8601_v62 = vld [vmem:[%s12362_s5 + $0x240] sm:$0xff]  ;;  %v8606_v63 = vld [vmem:[%s12362_s5 + $0x248] sm:$0xff] }
  0x23   :  { %12572 = vst [vmem:[#allocation69_spill] sm:$0xff] %v8596_v61  ;;  %12573 = vst [vmem:[#allocation70_spill] sm:$0xff] %v8601_v62  ;;  %v8611_v58 = vld [vmem:[%s12362_s5 + $0x250] sm:$0xff]  ;;  %v8616_v60 = vld [vmem:[%s12362_s5 + $0x258] sm:$0xff] }
  0x24   :  { %12574 = vst [vmem:[#allocation71_spill] sm:$0xff] %v8606_v63  ;;  %12575 = vst [vmem:[#allocation72_spill] sm:$0xff] %v8611_v58  ;;  %v8621_v61 = vld [vmem:[%s12362_s5 + $0x260] sm:$0xff]  ;;  %v8626_v62 = vld [vmem:[%s12362_s5 + $0x268] sm:$0xff] }
  0x25   :  { %12576 = vst [vmem:[#allocation73_spill] sm:$0xff] %v8616_v60  ;;  %12577 = vst [vmem:[#allocation74_spill] sm:$0xff] %v8621_v61  ;;  %v8631_v63 = vld [vmem:[%s12362_s5 + $0x270] sm:$0xff]  ;;  %v8636_v58 = vld [vmem:[%s12362_s5 + $0x278] sm:$0xff] }
  0x26   :  { %12578 = vst [vmem:[#allocation75_spill] sm:$0xff] %v8626_v62  ;;  %12579 = vst [vmem:[#allocation76_spill] sm:$0xff] %v8631_v63  ;;  %v8641_v60 = vld [vmem:[%s12362_s5 + $0x280] sm:$0xff]  ;;  %v8646_v61 = vld [vmem:[%s12362_s5 + $0x288] sm:$0xff] }
  0x27   :  { %12580 = vst [vmem:[#allocation77_spill] sm:$0xff] %v8636_v58  ;;  %12581 = vst [vmem:[#allocation78_spill] sm:$0xff] %v8641_v60  ;;  %v8651_v62 = vld [vmem:[%s12362_s5 + $0x290] sm:$0xff]  ;;  %v8656_v63 = vld [vmem:[%s12362_s5 + $0x298] sm:$0xff] }
  0x28   :  { %12582 = vst [vmem:[#allocation79_spill] sm:$0xff] %v8646_v61  ;;  %12583 = vst [vmem:[#allocation80_spill] sm:$0xff] %v8651_v62  ;;  %v8661_v58 = vld [vmem:[%s12362_s5 + $0x2a0] sm:$0xff]  ;;  %v8666_v60 = vld [vmem:[%s12362_s5 + $0x2a8] sm:$0xff] }
  0x29   :  { %12584 = vst [vmem:[#allocation81_spill] sm:$0xff] %v8656_v63  ;;  %12585 = vst [vmem:[#allocation82_spill] sm:$0xff] %v8661_v58  ;;  %v8671_v61 = vld [vmem:[%s12362_s5 + $0x2b0] sm:$0xff]  ;;  %v8676_v62 = vld [vmem:[%s12362_s5 + $0x2b8] sm:$0xff] }
  0x2a   :  { %12586 = vst [vmem:[#allocation83_spill] sm:$0xff] %v8666_v60  ;;  %12587 = vst [vmem:[#allocation84_spill] sm:$0xff] %v8671_v61  ;;  %v8681_v63 = vld [vmem:[%s12362_s5 + $0x2c0] sm:$0xff]  ;;  %v8686_v58 = vld [vmem:[%s12362_s5 + $0x2c8] sm:$0xff] }
  0x2b   :  { %12588 = vst [vmem:[#allocation85_spill] sm:$0xff] %v8676_v62  ;;  %12589 = vst [vmem:[#allocation86_spill] sm:$0xff] %v8681_v63  ;;  %v8691_v60 = vld [vmem:[%s12362_s5 + $0x2d0] sm:$0xff]  ;;  %v8696_v61 = vld [vmem:[%s12362_s5 + $0x2d8] sm:$0xff] }
  0x2c   :  { %12590 = vst [vmem:[#allocation87_spill] sm:$0xff] %v8686_v58  ;;  %12591 = vst [vmem:[#allocation88_spill] sm:$0xff] %v8691_v60  ;;  %v8701_v62 = vld [vmem:[%s12362_s5 + $0x2e0] sm:$0xff]  ;;  %v8706_v63 = vld [vmem:[%s12362_s5 + $0x2e8] sm:$0xff] }
  0x2d   :  { %12592 = vst [vmem:[#allocation89_spill] sm:$0xff] %v8696_v61  ;;  %12593 = vst [vmem:[#allocation90_spill] sm:$0xff] %v8701_v62  ;;  %v8711_v58 = vld [vmem:[%s12362_s5 + $0x2f0] sm:$0xff]  ;;  %v8716_v60 = vld [vmem:[%s12362_s5 + $0x2f8] sm:$0xff] }
  0x2e   :  { %12594 = vst [vmem:[#allocation91_spill] sm:$0xff] %v8706_v63  ;;  %12595 = vst [vmem:[#allocation92_spill] sm:$0xff] %v8711_v58  ;;  %v8721_v61 = vld [vmem:[%s12362_s5 + $0x300] sm:$0xff]  ;;  %v8726_v62 = vld [vmem:[%s12362_s5 + $0x308] sm:$0xff] }
  0x2f   :  { %12596 = vst [vmem:[#allocation93_spill] sm:$0xff] %v8716_v60  ;;  %12597 = vst [vmem:[#allocation94_spill] sm:$0xff] %v8721_v61  ;;  %v8731_v63 = vld [vmem:[%s12362_s5 + $0x310] sm:$0xff]  ;;  %v8736_v58 = vld [vmem:[%s12362_s5 + $0x318] sm:$0xff] }
  0x30   :  { %12598 = vst [vmem:[#allocation95_spill] sm:$0xff] %v8726_v62  ;;  %12599 = vst [vmem:[#allocation96_spill] sm:$0xff] %v8731_v63  ;;  %v8741_v60 = vld [vmem:[%s12362_s5 + $0x320] sm:$0xff]  ;;  %v8746_v61 = vld [vmem:[%s12362_s5 + $0x328] sm:$0xff] }
  0x31   :  { %12600 = vst [vmem:[#allocation97_spill] sm:$0xff] %v8736_v58  ;;  %12601 = vst [vmem:[#allocation98_spill] sm:$0xff] %v8741_v60  ;;  %v8751_v62 = vld [vmem:[%s12362_s5 + $0x330] sm:$0xff]  ;;  %v8756_v63 = vld [vmem:[%s12362_s5 + $0x338] sm:$0xff] }
  0x32   :  { %12602 = vst [vmem:[#allocation99_spill] sm:$0xff] %v8746_v61  ;;  %12603 = vst [vmem:[#allocation100_spill] sm:$0xff] %v8751_v62  ;;  %v8761_v58 = vld [vmem:[%s12362_s5 + $0x340] sm:$0xff]  ;;  %v8766_v60 = vld [vmem:[%s12362_s5 + $0x348] sm:$0xff] }
  0x33   :  { %12604 = vst [vmem:[#allocation101_spill] sm:$0xff] %v8756_v63  ;;  %12605 = vst [vmem:[#allocation102_spill] sm:$0xff] %v8761_v58  ;;  %v8771_v61 = vld [vmem:[%s12362_s5 + $0x350] sm:$0xff]  ;;  %v8776_v62 = vld [vmem:[%s12362_s5 + $0x358] sm:$0xff] }
  0x34   :  { %12606 = vst [vmem:[#allocation103_spill] sm:$0xff] %v8766_v60  ;;  %12607 = vst [vmem:[#allocation104_spill] sm:$0xff] %v8771_v61  ;;  %v8781_v63 = vld [vmem:[%s12362_s5 + $0x360] sm:$0xff]  ;;  %v8786_v58 = vld [vmem:[%s12362_s5 + $0x368] sm:$0xff] }
  0x35   :  { %12608 = vst [vmem:[#allocation105_spill] sm:$0xff] %v8776_v62  ;;  %12609 = vst [vmem:[#allocation106_spill] sm:$0xff] %v8781_v63  ;;  %v8791_v60 = vld [vmem:[%s12362_s5 + $0x370] sm:$0xff]  ;;  %v8796_v61 = vld [vmem:[%s12362_s5 + $0x378] sm:$0xff] }
  0x36   :  { %12610 = vst [vmem:[#allocation107_spill] sm:$0xff] %v8786_v58  ;;  %12611 = vst [vmem:[#allocation108_spill] sm:$0xff] %v8791_v60  ;;  %v8801_v62 = vld [vmem:[%s12362_s5 + $0x380] sm:$0xff]  ;;  %v8806_v63 = vld [vmem:[%s12362_s5 + $0x388] sm:$0xff] }
  0x37   :  { %12612 = vst [vmem:[#allocation109_spill] sm:$0xff] %v8796_v61  ;;  %12613 = vst [vmem:[#allocation110_spill] sm:$0xff] %v8801_v62  ;;  %v8811_v58 = vld [vmem:[%s12362_s5 + $0x390] sm:$0xff]  ;;  %v8816_v60 = vld [vmem:[%s12362_s5 + $0x398] sm:$0xff] }
  0x38   :  { %12614 = vst [vmem:[#allocation111_spill] sm:$0xff] %v8806_v63  ;;  %12615 = vst [vmem:[#allocation112_spill] sm:$0xff] %v8811_v58  ;;  %v8821_v61 = vld [vmem:[%s12362_s5 + $0x3a0] sm:$0xff]  ;;  %v8826_v62 = vld [vmem:[%s12362_s5 + $0x3a8] sm:$0xff] }
  0x39   :  { %12616 = vst [vmem:[#allocation113_spill] sm:$0xff] %v8816_v60  ;;  %12617 = vst [vmem:[#allocation114_spill] sm:$0xff] %v8821_v61  ;;  %v8831_v63 = vld [vmem:[%s12362_s5 + $0x3b0] sm:$0xff]  ;;  %v8836_v58 = vld [vmem:[%s12362_s5 + $0x3b8] sm:$0xff] }
  0x3a   :  { %12618 = vst [vmem:[#allocation115_spill] sm:$0xff] %v8826_v62  ;;  %12619 = vst [vmem:[#allocation116_spill] sm:$0xff] %v8831_v63  ;;  %v8841_v60 = vld [vmem:[%s12362_s5 + $0x3c0] sm:$0xff]  ;;  %v8846_v61 = vld [vmem:[%s12362_s5 + $0x3c8] sm:$0xff] }
  0x3b   :  { %12620 = vst [vmem:[#allocation117_spill] sm:$0xff] %v8836_v58  ;;  %12621 = vst [vmem:[#allocation118_spill] sm:$0xff] %v8841_v60  ;;  %v8851_v62 = vld [vmem:[%s12362_s5 + $0x3d0] sm:$0xff]  ;;  %v8856_v63 = vld [vmem:[%s12362_s5 + $0x3d8] sm:$0xff] }
  0x3c   :  { %12622 = vst [vmem:[#allocation119_spill] sm:$0xff] %v8846_v61  ;;  %12623 = vst [vmem:[#allocation120_spill] sm:$0xff] %v8851_v62  ;;  %v8861_v58 = vld [vmem:[%s12362_s5 + $0x3e0] sm:$0xff]  ;;  %v8866_v60 = vld [vmem:[%s12362_s5 + $0x3e8] sm:$0xff] }
  0x3d   :  { %12624 = vst [vmem:[#allocation121_spill] sm:$0xff] %v8856_v63  ;;  %12625 = vst [vmem:[#allocation122_spill] sm:$0xff] %v8861_v58  ;;  %v8871_v61 = vld [vmem:[%s12362_s5 + $0x3f0] sm:$0xff]  ;;  %v8876_v62 = vld [vmem:[%s12362_s5 + $0x3f8] sm:$0xff] }
  0x3e   :  { %12626 = vst [vmem:[#allocation123_spill] sm:$0xff] %v8866_v60  ;;  %12627 = vst [vmem:[#allocation124_spill] sm:$0xff] %v8871_v61 }
  0x3f   :  { %12628 = vst [vmem:[#allocation125_spill] sm:$0xff] %v8876_v62 }
  0x40   :  { %325 = vsyncadd [#allocation4], 16384  ;;  %v8881_v58 = vld [vmem:[%s12363_s6] sm:$0xff]  ;;  %v8886_v60 = vld [vmem:[%s12363_s6 + $0x8] sm:$0xff] }
  0x41   :  { %12629 = vst [vmem:[#allocation126_spill] sm:$0xff] %v8881_v58  ;;  %12630 = vst [vmem:[#allocation127_spill] sm:$0xff] %v8886_v60  ;;  %v8891_v61 = vld [vmem:[%s12363_s6 + $0x10] sm:$0xff]  ;;  %v8896_v62 = vld [vmem:[%s12363_s6 + $0x18] sm:$0xff] }
  0x42   :  { %12631 = vst [vmem:[#allocation128_spill] sm:$0xff] %v8891_v61  ;;  %12632 = vst [vmem:[#allocation129_spill] sm:$0xff] %v8896_v62  ;;  %v8901_v63 = vld [vmem:[%s12363_s6 + $0x20] sm:$0xff]  ;;  %v8906_v58 = vld [vmem:[%s12363_s6 + $0x28] sm:$0xff] }
  0x43   :  { %12633 = vst [vmem:[#allocation130_spill] sm:$0xff] %v8901_v63  ;;  %12634 = vst [vmem:[#allocation131_spill] sm:$0xff] %v8906_v58  ;;  %v8911_v60 = vld [vmem:[%s12363_s6 + $0x30] sm:$0xff]  ;;  %v8916_v61 = vld [vmem:[%s12363_s6 + $0x38] sm:$0xff] }
  0x44   :  { %12635 = vst [vmem:[#allocation132_spill] sm:$0xff] %v8911_v60  ;;  %12636 = vst [vmem:[#allocation133_spill] sm:$0xff] %v8916_v61  ;;  %v8921_v62 = vld [vmem:[%s12363_s6 + $0x40] sm:$0xff]  ;;  %v8926_v63 = vld [vmem:[%s12363_s6 + $0x48] sm:$0xff] }
  0x45   :  { %12637 = vst [vmem:[#allocation134_spill] sm:$0xff] %v8921_v62  ;;  %12638 = vst [vmem:[#allocation135_spill] sm:$0xff] %v8926_v63  ;;  %v8931_v58 = vld [vmem:[%s12363_s6 + $0x50] sm:$0xff]  ;;  %v8936_v60 = vld [vmem:[%s12363_s6 + $0x58] sm:$0xff] }
  0x46   :  { %12639 = vst [vmem:[#allocation136_spill] sm:$0xff] %v8931_v58  ;;  %12640 = vst [vmem:[#allocation137_spill] sm:$0xff] %v8936_v60  ;;  %v8941_v61 = vld [vmem:[%s12363_s6 + $0x60] sm:$0xff]  ;;  %v8946_v62 = vld [vmem:[%s12363_s6 + $0x68] sm:$0xff] }
  0x47   :  { %12641 = vst [vmem:[#allocation138_spill] sm:$0xff] %v8941_v61  ;;  %12642 = vst [vmem:[#allocation139_spill] sm:$0xff] %v8946_v62  ;;  %v8951_v63 = vld [vmem:[%s12363_s6 + $0x70] sm:$0xff]  ;;  %v8956_v58 = vld [vmem:[%s12363_s6 + $0x78] sm:$0xff] }
  0x48   :  { %12643 = vst [vmem:[#allocation140_spill] sm:$0xff] %v8951_v63  ;;  %12644 = vst [vmem:[#allocation141_spill] sm:$0xff] %v8956_v58  ;;  %v8961_v60 = vld [vmem:[%s12363_s6 + $0x80] sm:$0xff]  ;;  %v8966_v61 = vld [vmem:[%s12363_s6 + $0x88] sm:$0xff] }
  0x49   :  { %12645 = vst [vmem:[#allocation142_spill] sm:$0xff] %v8961_v60  ;;  %12646 = vst [vmem:[#allocation143_spill] sm:$0xff] %v8966_v61  ;;  %v8971_v62 = vld [vmem:[%s12363_s6 + $0x90] sm:$0xff]  ;;  %v8976_v63 = vld [vmem:[%s12363_s6 + $0x98] sm:$0xff] }
  0x4a   :  { %12647 = vst [vmem:[#allocation144_spill] sm:$0xff] %v8971_v62  ;;  %12648 = vst [vmem:[#allocation145_spill] sm:$0xff] %v8976_v63  ;;  %v8981_v58 = vld [vmem:[%s12363_s6 + $0xa0] sm:$0xff]  ;;  %v8986_v60 = vld [vmem:[%s12363_s6 + $0xa8] sm:$0xff] }
  0x4b   :  { %12649 = vst [vmem:[#allocation146_spill] sm:$0xff] %v8981_v58  ;;  %12650 = vst [vmem:[#allocation147_spill] sm:$0xff] %v8986_v60  ;;  %v8991_v61 = vld [vmem:[%s12363_s6 + $0xb0] sm:$0xff]  ;;  %v8996_v62 = vld [vmem:[%s12363_s6 + $0xb8] sm:$0xff] }
  0x4c   :  { %12651 = vst [vmem:[#allocation148_spill] sm:$0xff] %v8991_v61  ;;  %12652 = vst [vmem:[#allocation149_spill] sm:$0xff] %v8996_v62  ;;  %v9001_v63 = vld [vmem:[%s12363_s6 + $0xc0] sm:$0xff]  ;;  %v9006_v58 = vld [vmem:[%s12363_s6 + $0xc8] sm:$0xff] }
  0x4d   :  { %12653 = vst [vmem:[#allocation150_spill] sm:$0xff] %v9001_v63  ;;  %12654 = vst [vmem:[#allocation151_spill] sm:$0xff] %v9006_v58  ;;  %v9011_v60 = vld [vmem:[%s12363_s6 + $0xd0] sm:$0xff]  ;;  %v9016_v61 = vld [vmem:[%s12363_s6 + $0xd8] sm:$0xff] }
  0x4e   :  { %12655 = vst [vmem:[#allocation152_spill] sm:$0xff] %v9011_v60  ;;  %12656 = vst [vmem:[#allocation153_spill] sm:$0xff] %v9016_v61  ;;  %v9021_v62 = vld [vmem:[%s12363_s6 + $0xe0] sm:$0xff]  ;;  %v9026_v63 = vld [vmem:[%s12363_s6 + $0xe8] sm:$0xff] }
  0x4f   :  { %12657 = vst [vmem:[#allocation154_spill] sm:$0xff] %v9021_v62  ;;  %12658 = vst [vmem:[#allocation155_spill] sm:$0xff] %v9026_v63  ;;  %v9031_v58 = vld [vmem:[%s12363_s6 + $0xf0] sm:$0xff]  ;;  %v9036_v60 = vld [vmem:[%s12363_s6 + $0xf8] sm:$0xff] }
  0x50   :  { %12659 = vst [vmem:[#allocation156_spill] sm:$0xff] %v9031_v58  ;;  %12660 = vst [vmem:[#allocation157_spill] sm:$0xff] %v9036_v60 }
  0x51   :  { %430 = vsyncadd [#allocation4 + $0x1], 4096  ;;  %vm1045_vm0 = vcmask 1042432   ;;  %vm1046_vm1 = vcmask 1043456   ;;  %v7924_v62 = vld [vmem:[%s12358_s1 + $0x4] ss:$120 sps:$4 sm:$0xff]  }
  0x52   :  { %v7926_v63 = vld [vmem:[%s12358_s1 + $0x1c] ss:$120 sps:$4 sm:$0xff]   ;;  %v7928_v58 = vld [vmem:[%s12358_s1] ss:$120 sps:$4 sm:$0xff]   ;;  %v12473_v60 = vmov 0   ;;  %1139 = vmatprep.subr.bf16.mxu0 %v7924_v62  ;;  %v8186_v59 = vmov 65535  }
  0x53   :  { %v7929_v61 = vld [vmem:[%s12358_s1 + $0x18] ss:$120 sps:$4 sm:$0xff]   ;;  %1171 = vmatprep.mubr.bf16.mxu0 %v12473_v60  ;;  %1294 = vmatprep.mubr.bf16.mxu1 %v12473_v60  ;;  %v7930_v56 = vld [vmem:[%s12358_s1 + $0xf4] ss:$120 sps:$4 sm:$0xff]   ;;  %v1047_v57 = vsel %vm1045_vm0, 4294967295, %v8186_v59  ;;  %v493_v59 = vld [vmem:[%s12358_s1 + $0x1e0] sm:$0xff] }
  0x54   :  { %1262 = vmatprep.subr.bf16.mxu1 %v7926_v63  ;;  %1140 = vmatpush1.bf16.msra.mxu0 %v7928_v58  ;;  %v7932_v54 = vld [vmem:[%s12358_s1 + $0x10c] ss:$120 sps:$4 sm:$0xff]   ;;  %v7934_v52 = vld [vmem:[%s12358_s1 + $0xf0] ss:$120 sps:$4 sm:$0xff]   ;;  %v9068_v58 = vsel %vm1046_vm1, %v1047_v57, 0  ;;  %v7438_v63 = vcombine.high %v493_v59, %v493_v59  ;;  %vm1041_vm2 = vcmask 318464  }
  0x55   :  { %1263 = vmatpush1.bf16.msra.mxu1 %v7929_v61  ;;  %1141 = vmatprep.subr.bf16.mxu0 %v7930_v56  ;;  %v7935_v62 = vld [vmem:[%s12358_s1 + $0x108] ss:$120 sps:$4 sm:$0xff]   ;;  %v496_v56 = vld [vmem:[%s12358_s1 + $0x1f8] sm:$0xff]  ;;  %v7437_v61 = vcombine.low %v493_v59, %v493_v59  ;;  %v7942_v59 = vld [vmem:[%s12358_s1 + $0xc] ss:$120 sps:$4 sm:$0xff]   ;;  %v12661_v49 = vmov 0  }
  0x56   :  { %1264 = vmatprep.subr.bf16.mxu1 %v7932_v54  ;;  %v7444_v60 = vcombine.high %v496_v56, %v496_v56  ;;  %v7443_v55 = vcombine.low %v496_v56, %v496_v56  ;;  %v1053_v53 = vand.u32 %v7438_v63, %v9068_v58  ;;  %v431_v48 = vld [vmem:[%s12357_s0] sm:$0x1]  ;;  %v7951_v56 = vld [vmem:[%s12358_s1 + $0x11c] ss:$120 sps:$4 sm:$0xff]  }
  0x57   :  { %v1050_v50 = vand.u32 %v7437_v61, %v9068_v58  ;;  %v9086_v63 = vpack.c.bf16 %v431_v48, %v431_v48  ;;  %v7943_v48 = vld [vmem:[%s12358_s1 + $0x28] ss:$120 sps:$4 sm:$0xff]   ;;  %v9535_v18 = vld [vmem:[%s12359_s2 + $0x18] sm:$0x3f] }
  0x58   :  { %1142 = vmatpush1.bf16.msra.mxu0 %v7934_v52  ;;  %v1071_v54 = vand.u32 %v7444_v60, %v9068_v58  ;;  %v1068_v57 = vand.u32 %v7443_v55, %v9068_v58  ;;  %v7945_v52 = vld [vmem:[%s12358_s1 + $0x2c] ss:$120 sps:$4 sm:$0xff]   ;;  %v7948_v60 = vld [vmem:[%s12358_s1 + $0xfc] ss:$120 sps:$4 sm:$0xff]  }
  0x59   :  { %1265 = vmatpush1.bf16.msra.mxu1 %v7935_v62  ;;  %1143 = vmatprep.subr.bf16.mxu0 %v1053_v53  ;;  %v7940_v62 = vld [vmem:[%s12358_s1 + $0x8] ss:$120 sps:$4 sm:$0xff]  }
  0x5a   :  { %1266 = vmatprep.subr.bf16.mxu1 %v1071_v54  ;;  %v494_v55 = vld [vmem:[%s12358_s1 + $0x1e8] sm:$0xff]  ;;  %v7946_v54 = vld [vmem:[%s12358_s1 + $0xf8] ss:$120 sps:$4 sm:$0xff]  }
  0x5b   :  { %v498_v53 = vld [vmem:[%s12358_s1 + $0x208] sm:$0xff] }
  0x5c   :  { %1144 = vmatpush1.bf16.msra.mxu0 %v1050_v50  ;;  %v7440_v50 = vcombine.high %v494_v55, %v494_v55  ;;  %v7448_v61 = vcombine.high %v498_v53, %v498_v53  ;;  %v7447_v51 = vcombine.low %v498_v53, %v498_v53  ;;  %v7961_v53 = vld [vmem:[%s12358_s1 + $0x3c] ss:$120 sps:$4 sm:$0xff]  }
  0x5d   :  { %1267 = vmatpush1.bf16.msra.mxu1 %v1068_v57  ;;  %1180 = vmatprep.subr.bf16.mxu0 %v7942_v59  ;;  %v7439_v57 = vcombine.low %v494_v55, %v494_v55  ;;  %v7949_v59 = vld [vmem:[%s12358_s1 + $0x118] ss:$120 sps:$4 sm:$0xff]  }
  0x5e   :  { %1344 = vmatprep.subr.bf16.mxu1 %v7945_v52  ;;  %v1059_v52 = vand.u32 %v7440_v50, %v9068_v58  ;;  %v1080_v55 = vand.u32 %v7447_v51, %v9068_v58  ;;  %v500_v50 = vld [vmem:[%s12358_s1 + $0x218] sm:$0xff]  ;;  %v7956_v51 = vld [vmem:[%s12358_s1 + $0x10] ss:$120 sps:$4 sm:$0xff]  }
  0x5f   :  { %7467 = vmatmul.mubr.msk.bf16.vlgmr.msra.gmra.mrb[0].mxu0 %vm1041_vm2, %v9086_v63  ;;  %v1056_v46 = vand.u32 %v7439_v57, %v9068_v58  ;;  %v7452_v57 = vcombine.high %v500_v50, %v500_v50 }
  0x60   :  { %1181 = vmatpush1.bf16.msra.mxu0 %v7940_v62  ;;  %7470 = vmatmul.mubr.msk.bf16.vlgmr.msra.gmra.mrb[0].mxu1 %vm1041_vm2, %v9086_v63  ;;  %v1083_v62 = vand.u32 %v7448_v61, %v9068_v58  ;;  %v7964_v61 = vld [vmem:[%s12358_s1 + $0x104] ss:$120 sps:$4 sm:$0xff]  }
  0x61   :  { %1345 = vmatpush1.bf16.msra.mxu1 %v7943_v48  ;;  %1182 = vmatprep.subr.bf16.mxu0 %v7948_v60  ;;  %v7958_v48 = vld [vmem:[%s12358_s1 + $0x14] ss:$120 sps:$4 sm:$0xff]  }
  0x62   :  { %1346 = vmatprep.subr.bf16.mxu1 %v7951_v56  ;;  %1212 = vmatprep.mubr.bf16.mxu0 %v12661_v49  ;;  %v495_v60 = vld [vmem:[%s12358_s1 + $0x1f0] sm:$0xff] }
  0x63   :  { %1376 = vmatprep.mubr.bf16.mxu1 %v12661_v49  ;;  %v7959_v56 = vld [vmem:[%s12358_s1 + $0x38] ss:$120 sps:$4 sm:$0xff]  }
  0x64   :  { %1183 = vmatpush1.bf16.msra.mxu0 %v7946_v54  ;;  %v7442_v54 = vcombine.high %v495_v60, %v495_v60 }
  0x65   :  { %1347 = vmatpush1.bf16.msra.mxu1 %v7949_v59  ;;  %1184 = vmatprep.subr.bf16.mxu0 %v1059_v52  ;;  %v7962_v59 = vld [vmem:[%s12358_s1 + $0x100] ss:$120 sps:$4 sm:$0xff]   ;;  %v7441_v52 = vcombine.low %v495_v60, %v495_v60 }
  0x66   :  { %1348 = vmatprep.subr.bf16.mxu1 %v1083_v62  ;;  %v7965_v62 = vld [vmem:[%s12358_s1 + $0x128] ss:$120 sps:$4 sm:$0xff]  }
  0x68   :  { %1185 = vmatpush1.bf16.msra.mxu0 %v1056_v46  ;;  %v7967_v46 = vld [vmem:[%s12358_s1 + $0x12c] ss:$120 sps:$4 sm:$0xff]  }
  0x69   :  { %1349 = vmatpush1.bf16.msra.mxu1 %v1080_v55  ;;  %1221 = vmatprep.subr.bf16.mxu0 %v7958_v48  ;;  %v1065_v55 = vand.u32 %v7442_v54, %v9068_v58  ;;  %v7451_v48 = vcombine.low %v500_v50, %v500_v50  ;;  %v7977_v50 = vld [vmem:[%s12358_s1 + $0x4c] ss:$120 sps:$4 sm:$0xff]  }
  0x6a   :  { %1426 = vmatprep.subr.bf16.mxu1 %v7961_v53  ;;  %v1095_v53 = vand.u32 %v7452_v57, %v9068_v58  ;;  %v502_v54 = vld [vmem:[%s12358_s1 + $0x228] sm:$0xff] }
  0x6b   :  { %7468 = vmatmul.mubr.msk.bf16.vlgmr.msra.gmra.mrb[4].mxu0 %vm1041_vm2, %v9086_v63  ;;  %v1092_v60 = vand.u32 %v7451_v48, %v9068_v58  ;;  %v7975_v57 = vld [vmem:[%s12358_s1 + $0x48] ss:$120 sps:$4 sm:$0xff]  }
  0x6c   :  { %1222 = vmatpush1.bf16.msra.mxu0 %v7956_v51  ;;  %7472 = vmatmul.mubr.msk.bf16.vlgmr.msra.gmra.mrb[4].mxu1 %vm1041_vm2, %v9086_v63  ;;  %v1062_v51 = vand.u32 %v7441_v52, %v9068_v58  ;;  %v7978_v48 = vld [vmem:[%s12358_s1 + $0x110] ss:$120 sps:$4 sm:$0xff]  }
  0x6d   :  { %1427 = vmatpush1.bf16.msra.mxu1 %v7959_v56  ;;  %1223 = vmatprep.subr.bf16.mxu0 %v7964_v61  ;;  %v7974_v56 = vld [vmem:[%s12358_s1 + $0x24] ss:$120 sps:$4 sm:$0xff]  }
  0x6e   :  { %1428 = vmatprep.subr.bf16.mxu1 %v7967_v46  ;;  %1253 = vmatprep.mubr.bf16.mxu0 %v12661_v49  ;;  %v497_v61 = vld [vmem:[%s12358_s1 + $0x200] sm:$0xff] }
  0x6f   :  { %1458 = vmatprep.mubr.bf16.mxu1 %v12661_v49  ;;  %v7972_v46 = vld [vmem:[%s12358_s1 + $0x20] ss:$120 sps:$4 sm:$0xff]   ;;  %v7446_v52 = vcombine.high %v497_v61, %v497_v61 }
  0x70   :  { %1224 = vmatpush1.bf16.msra.mxu0 %v7962_v59  ;;  %v7980_v59 = vld [vmem:[%s12358_s1 + $0x114] ss:$120 sps:$4 sm:$0xff]  }
  0x71   :  { %1429 = vmatpush1.bf16.msra.mxu1 %v7965_v62  ;;  %1225 = vmatprep.subr.bf16.mxu0 %v1065_v55  ;;  %v7983_v62 = vld [vmem:[%s12358_s1 + $0x13c] ss:$120 sps:$4 sm:$0xff]   ;;  %v7456_v55 = vcombine.high %v502_v54, %v502_v54 }
  0x72   :  { %1430 = vmatprep.subr.bf16.mxu1 %v1095_v53  ;;  %v7445_v53 = vcombine.low %v497_v61, %v497_v61 }
  0x74   :  { %1226 = vmatpush1.bf16.msra.mxu0 %v1062_v51  ;;  %v7981_v51 = vld [vmem:[%s12358_s1 + $0x138] ss:$120 sps:$4 sm:$0xff]  }
  0x75   :  { %1431 = vmatpush1.bf16.msra.mxu1 %v1092_v60  ;;  %1303 = vmatprep.subr.bf16.mxu0 %v7974_v56  ;;  %v1077_v60 = vand.u32 %v7446_v52, %v9068_v58  ;;  %v7455_v56 = vcombine.low %v502_v54, %v502_v54  ;;  %v7993_v54 = vld [vmem:[%s12358_s1 + $0x5c] ss:$120 sps:$4 sm:$0xff]  }
  0x76   :  { %1508 = vmatprep.subr.bf16.mxu1 %v7977_v50  ;;  %v1107_v50 = vand.u32 %v7456_v55, %v9068_v58  ;;  %v504_v52 = vld [vmem:[%s12358_s1 + $0x238] sm:$0xff] }
  0x77   :  { %7469 = vmatmul.mubr.msk.bf16.vlgmr.msra.gmra.mrb[8].mxu0 %vm1041_vm2, %v9086_v63  ;;  %v1104_v61 = vand.u32 %v7455_v56, %v9068_v58  ;;  %v7991_v55 = vld [vmem:[%s12358_s1 + $0x58] ss:$120 sps:$4 sm:$0xff]  }
  0x78   :  { %1304 = vmatpush1.bf16.msra.mxu0 %v7972_v46  ;;  %7474 = vmatmul.mubr.msk.bf16.vlgmr.msra.gmra.mrb[8].mxu1 %vm1041_vm2, %v9086_v63  ;;  %v1074_v46 = vand.u32 %v7445_v53, %v9068_v58  ;;  %v7994_v56 = vld [vmem:[%s12358_s1 + $0x120] ss:$120 sps:$4 sm:$0xff]  }
  0x79   :  { %1509 = vmatpush1.bf16.msra.mxu1 %v7975_v57  ;;  %1305 = vmatprep.subr.bf16.mxu0 %v7980_v59  ;;  %v7990_v57 = vld [vmem:[%s12358_s1 + $0x34] ss:$120 sps:$4 sm:$0xff]  }
  0x7a   :  { %1510 = vmatprep.subr.bf16.mxu1 %v7983_v62  ;;  %1335 = vmatprep.mubr.bf16.mxu0 %v12661_v49  ;;  %v499_v59 = vld [vmem:[%s12358_s1 + $0x210] sm:$0xff] }
  0x7b   :  { %1540 = vmatprep.mubr.bf16.mxu1 %v12661_v49  ;;  %v7988_v62 = vld [vmem:[%s12358_s1 + $0x30] ss:$120 sps:$4 sm:$0xff]   ;;  %v7450_v53 = vcombine.high %v499_v59, %v499_v59 }
  0x7c   :  { %1306 = vmatpush1.bf16.msra.mxu0 %v7978_v48  ;;  %v7996_v48 = vld [vmem:[%s12358_s1 + $0x124] ss:$120 sps:$4 sm:$0xff]  }
  0x7d   :  { %1511 = vmatpush1.bf16.msra.mxu1 %v7981_v51  ;;  %1307 = vmatprep.subr.bf16.mxu0 %v1077_v60  ;;  %v7999_v51 = vld [vmem:[%s12358_s1 + $0x14c] ss:$120 sps:$4 sm:$0xff]   ;;  %v7460_v60 = vcombine.high %v504_v52, %v504_v52 }
  0x7e   :  { %1512 = vmatprep.subr.bf16.mxu1 %v1107_v50  ;;  %v7449_v50 = vcombine.low %v499_v59, %v499_v59 }
  0x80   :  { %1308 = vmatpush1.bf16.msra.mxu0 %v1074_v46  ;;  %v7997_v46 = vld [vmem:[%s12358_s1 + $0x148] ss:$120 sps:$4 sm:$0xff]  }
  0x81   :  { %1513 = vmatpush1.bf16.msra.mxu1 %v1104_v61  ;;  %1385 = vmatprep.subr.bf16.mxu0 %v7990_v57  ;;  %v1089_v61 = vand.u32 %v7450_v53, %v9068_v58  ;;  %v7459_v57 = vcombine.low %v504_v52, %v504_v52  ;;  %v8009_v52 = vld [vmem:[%s12358_s1 + $0x6c] ss:$120 sps:$4 sm:$0xff]  }
  0x82   :  { %1590 = vmatprep.subr.bf16.mxu1 %v7993_v54  ;;  %v1119_v54 = vand.u32 %v7460_v60, %v9068_v58  ;;  %v506_v53 = vld [vmem:[%s12358_s1 + $0x248] sm:$0xff] }
  0x83   :  { %7471 = vmatmul.mubr.msk.bf16.vlgmr.msra.gmra.mrb[12].mxu0 %vm1041_vm2, %v9086_v63  ;;  %v1116_v59 = vand.u32 %v7459_v57, %v9068_v58  ;;  %v8007_v60 = vld [vmem:[%s12358_s1 + $0x68] ss:$120 sps:$4 sm:$0xff]  }
  0x84   :  { %1386 = vmatpush1.bf16.msra.mxu0 %v7988_v62  ;;  %7476 = vmatmul.mubr.msk.bf16.vlgmr.msra.gmra.mrb[12].mxu1 %vm1041_vm2, %v9086_v63  ;;  %v1086_v62 = vand.u32 %v7449_v50, %v9068_v58  ;;  %v8010_v57 = vld [vmem:[%s12358_s1 + $0x130] ss:$120 sps:$4 sm:$0xff]  }
  0x85   :  { %1591 = vmatpush1.bf16.msra.mxu1 %v7991_v55  ;;  %1387 = vmatprep.subr.bf16.mxu0 %v7996_v48  ;;  %v8006_v55 = vld [vmem:[%s12358_s1 + $0x44] ss:$120 sps:$4 sm:$0xff]  }
  0x86   :  { %1592 = vmatprep.subr.bf16.mxu1 %v7999_v51  ;;  %1417 = vmatprep.mubr.bf16.mxu0 %v12661_v49  ;;  %v501_v48 = vld [vmem:[%s12358_s1 + $0x220] sm:$0xff] }
  0x87   :  { %1622 = vmatprep.mubr.bf16.mxu1 %v12661_v49  ;;  %v8004_v51 = vld [vmem:[%s12358_s1 + $0x40] ss:$120 sps:$4 sm:$0xff]   ;;  %v7454_v50 = vcombine.high %v501_v48, %v501_v48 }
  0x88   :  { %1388 = vmatpush1.bf16.msra.mxu0 %v7994_v56  ;;  %v8012_v56 = vld [vmem:[%s12358_s1 + $0x134] ss:$120 sps:$4 sm:$0xff]  }
  0x89   :  { %1593 = vmatpush1.bf16.msra.mxu1 %v7997_v46  ;;  %1389 = vmatprep.subr.bf16.mxu0 %v1089_v61  ;;  %v8015_v46 = vld [vmem:[%s12358_s1 + $0x15c] ss:$120 sps:$4 sm:$0xff]   ;;  %v7464_v61 = vcombine.high %v506_v53, %v506_v53 }
  0x8a   :  { %1594 = vmatprep.subr.bf16.mxu1 %v1119_v54  ;;  %v7453_v54 = vcombine.low %v501_v48, %v501_v48 }
  0x8c   :  { %1390 = vmatpush1.bf16.msra.mxu0 %v1086_v62  ;;  %v8013_v62 = vld [vmem:[%s12358_s1 + $0x158] ss:$120 sps:$4 sm:$0xff]  }
  0x8d   :  { %1595 = vmatpush1.bf16.msra.mxu1 %v1116_v59  ;;  %1467 = vmatprep.subr.bf16.mxu0 %v8006_v55  ;;  %v1101_v59 = vand.u32 %v7454_v50, %v9068_v58  ;;  %v7463_v55 = vcombine.low %v506_v53, %v506_v53  ;;  %v503_v53 = vld [vmem:[%s12358_s1 + $0x230] sm:$0xff]  ;;  %v8025_v50 = vld [vmem:[%s12358_s1 + $0x144] ss:$120 sps:$4 sm:$0xff]  }
  0x8e   :  { %1672 = vmatprep.subr.bf16.mxu1 %v8009_v52  ;;  %v1131_v52 = vand.u32 %v7464_v61, %v9068_v58  ;;  %v8023_v61 = vld [vmem:[%s12358_s1 + $0x140] ss:$120 sps:$4 sm:$0xff]  }
  0x8f   :  { %7473 = vmatmul.mubr.msk.bf16.vlgmr.msra.gmra.mrb[16].mxu0 %vm1041_vm2, %v9086_v63  ;;  %v1128_v48 = vand.u32 %v7463_v55, %v9068_v58  ;;  %v505_v55 = vld [vmem:[%s12358_s1 + $0x240] sm:$0xff] }
  0x90   :  { %7478 = vmatmul.mubr.msk.bf16.vlgmr.msra.gmra.mrb[16].mxu1 %vm1041_vm2, %v9086_v63  ;;  %1468 = vmatpush1.bf16.msra.mxu0 %v8004_v51  ;;  %v1098_v51 = vand.u32 %v7453_v54, %v9068_v58 }
  0x91   :  { %1673 = vmatpush1.bf16.msra.mxu1 %v8007_v60  ;;  %1469 = vmatprep.subr.bf16.mxu0 %v8012_v56  ;;  %v8022_v60 = vld [vmem:[%s12358_s1 + $0x54] ss:$120 sps:$4 sm:$0xff]   ;;  %v8020_v56 = vld [vmem:[%s12358_s1 + $0x50] ss:$120 sps:$4 sm:$0xff]  }
  0x92   :  { %1674 = vmatprep.subr.bf16.mxu1 %v8015_v46  ;;  %1499 = vmatprep.mubr.bf16.mxu0 %v12661_v49  ;;  %v7458_v46 = vcombine.high %v503_v53, %v503_v53 }
  0x93   :  { %1704 = vmatprep.mubr.bf16.mxu1 %v12661_v49 }
  0x94   :  { %1470 = vmatpush1.bf16.msra.mxu0 %v8010_v57  ;;  %v7457_v57 = vcombine.low %v503_v53, %v503_v53  ;;  %v1113_v54 = vand.u32 %v7458_v46, %v9068_v58  ;;  %v7461_v53 = vcombine.low %v505_v55, %v505_v55  ;;  %v8038_v46 = vld [vmem:[%s12358_s1 + $0x74] ss:$120 sps:$4 sm:$0xff]  }
  0x95   :  { %1675 = vmatpush1.bf16.msra.mxu1 %v8013_v62  ;;  %1471 = vmatprep.subr.bf16.mxu0 %v1101_v59  ;;  %v8030_v59 = vld [vmem:[%s12358_s1 + $0x64] ss:$120 sps:$4 sm:$0xff]  }
  0x96   :  { %1676 = vmatprep.subr.bf16.mxu1 %v1131_v52  ;;  %v1110_v62 = vand.u32 %v7457_v57, %v9068_v58  ;;  %v8028_v52 = vld [vmem:[%s12358_s1 + $0x60] ss:$120 sps:$4 sm:$0xff]   ;;  %v8036_v57 = vld [vmem:[%s12358_s1 + $0x70] ss:$120 sps:$4 sm:$0xff]  }
  0x98   :  { %1472 = vmatpush1.bf16.msra.mxu0 %v1098_v51  ;;  %v8033_v51 = vld [vmem:[%s12358_s1 + $0x154] ss:$120 sps:$4 sm:$0xff]  }
  0x99   :  { %1677 = vmatpush1.bf16.msra.mxu1 %v1128_v48  ;;  %1549 = vmatprep.subr.bf16.mxu0 %v8022_v60  ;;  %v7462_v48 = vcombine.high %v505_v55, %v505_v55  ;;  %v8031_v60 = vld [vmem:[%s12358_s1 + $0x150] ss:$120 sps:$4 sm:$0xff]  }
  0x9b   :  { %7475 = vmatmul.mubr.msk.bf16.vlgmr.msra.gmra.mrb[20].mxu0 %vm1041_vm2, %v9086_v63 }
  0x9c   :  { %7480 = vmatmul.mubr.msk.bf16.vlgmr.msra.gmra.mrb[20].mxu1 %vm1041_vm2, %v9086_v63  ;;  %1550 = vmatpush1.bf16.msra.mxu0 %v8020_v56  ;;  %v1125_v56 = vand.u32 %v7462_v48, %v9068_v58  ;;  %v2895_v48 = vld [vmem:[%s12361_s4 + $0x8] sm:$0xff] }
  0x9d   :  { %1551 = vmatprep.subr.bf16.mxu0 %v8025_v50  ;;  %1581 = vmatprep.mubr.bf16.mxu0 %v12661_v49  ;;  %v1122_v50 = vand.u32 %v7461_v53, %v9068_v58 }
  0xa0   :  { %1552 = vmatpush1.bf16.msra.mxu0 %v8023_v61  ;;  %v507_v61 = vld [vmem:[%s12358_s1 + $0x250] sm:$0xff] }
  0xa1   :  { %1553 = vmatprep.subr.bf16.mxu0 %v1113_v54  ;;  %v8041_v54 = vld [vmem:[%s12358_s1 + $0x164] ss:$120 sps:$4 sm:$0xff]   ;;  %v7465_v55 = vcombine.low %v507_v61, %v507_v61 }
  0xa4   :  { %1554 = vmatpush1.bf16.msra.mxu0 %v1110_v62  ;;  %v7466_v62 = vcombine.high %v507_v61, %v507_v61 }
  0xa5   :  { %1631 = vmatprep.subr.bf16.mxu0 %v8030_v59  ;;  %v8039_v59 = vld [vmem:[%s12358_s1 + $0x160] ss:$120 sps:$4 sm:$0xff]  }
  0xa7   :  { %7477 = vmatmul.mubr.msk.bf16.vlgmr.msra.gmra.mrb[24].mxu0 %vm1041_vm2, %v9086_v63 }
  0xa8   :  { %1632 = vmatpush1.bf16.msra.mxu0 %v8028_v52  ;;  %1663 = vmatprep.mubr.bf16.mxu0 %v12661_v49  ;;  %v1137_v52 = vand.u32 %v7466_v62, %v9068_v58  ;;  %v2904_v62 = vld [vmem:[%s12361_s4 + $0x50] sm:$0xff] }
  0xa9   :  { %1633 = vmatprep.subr.bf16.mxu0 %v8033_v51  ;;  %v1134_v51 = vand.u32 %v7465_v55, %v9068_v58  ;;  %v2896_v58 = vld [vmem:[%s12361_s4 + $0x10] sm:$0xff]  ;;  %v3273_v55 = vunpack.c.l.s8.bf16 %v2904_v62 }
  0xac   :  { %1634 = vmatpush1.bf16.msra.mxu0 %v8031_v60  ;;  %v2897_v60 = vld [vmem:[%s12361_s4 + $0x18] sm:$0xff] }
  0xad   :  { %1635 = vmatprep.subr.bf16.mxu0 %v1125_v56  ;;  %v3257_v53 = vunpack.c.l.s8.bf16 %v2897_v60  ;;  %v2894_v56 = vld [vmem:[%s12361_s4] sm:$0xff]  ;;  %v3266_v61 = vunpack.c.h.s8.bf16 %v2897_v60 }
  0xb0   :  { %1636 = vmatpush1.bf16.msra.mxu0 %v1122_v50  ;;  %v3254_v50 = vunpack.c.l.s8.bf16 %v2894_v56 }
  0xb1   :  { %1713 = vmatprep.subr.bf16.mxu0 %v8038_v46  ;;  %v3264_v46 = vunpack.c.h.s8.bf16 %v2895_v48 }
  0xb3   :  { %7479 = vmatmul.mubr.msk.bf16.vlgmr.msra.gmra.mrb[28].mxu0 %vm1041_vm2, %v9086_v63 }
  0xb4   :  { %1714 = vmatpush1.bf16.msra.mxu0 %v8036_v57  ;;  %1745 = vmatprep.mubr.bf16.mxu0 %v12661_v49  ;;  %v3255_v49 = vunpack.c.l.s8.bf16 %v2895_v48  ;;  %v3263_v57 = vunpack.c.h.s8.bf16 %v2894_v56  ;;  %v2905_v48 = vld [vmem:[%s12361_s4 + $0x58] sm:$0xff] }
  0xb5   :  { %1715 = vmatprep.subr.bf16.mxu0 %v8041_v54  ;;  %v3265_v54 = vunpack.c.h.s8.bf16 %v2896_v58 }
  0xb6   :  { %3974 = vmatprep.subr.bf16.mxu1 %v3255_v49  ;;  %v3274_v49 = vunpack.c.l.s8.bf16 %v2905_v48 }
  0xb7   :  { %3975 = vmatpush1.bf16.msra.mxu1 %v3254_v50  ;;  %v3283_v50 = vunpack.c.h.s8.bf16 %v2905_v48 }
  0xb8   :  { %1716 = vmatpush1.bf16.msra.mxu0 %v8039_v59  ;;  %3976 = vmatprep.subr.bf16.mxu1 %v3264_v46  ;;  %v2906_v59 = vld [vmem:[%s12361_s4 + $0x60] sm:$0xff]  ;;  %v2915_v46 = vld [vmem:[%s12361_s4 + $0xa8] sm:$0xff] }
  0xb9   :  { %1717 = vmatprep.subr.bf16.mxu0 %v1137_v52  ;;  %v3275_v52 = vunpack.c.l.s8.bf16 %v2906_v59  ;;  %v3284_v56 = vunpack.c.h.s8.bf16 %v2906_v59 }
  0xbb   :  { %3977 = vmatpush1.bf16.msra.mxu1 %v3263_v57  ;;  %v3293_v57 = vunpack.c.l.s8.bf16 %v2915_v46 }
  0xbc   :  { %1718 = vmatpush1.bf16.msra.mxu0 %v1134_v51  ;;  %v2903_v51 = vld [vmem:[%s12361_s4 + $0x48] sm:$0xff]  ;;  %3978 = vmatprep.subr.bf16.mxu1 %v3273_v55 }
  0xbd   :  { %4179 = vmatprep.subr.bf16.mxu0 %v3257_v53  ;;  %v3272_v60 = vunpack.c.l.s8.bf16 %v2903_v51  ;;  %v3282_v53 = vunpack.c.h.s8.bf16 %v2904_v62  ;;  %v2914_v62 = vld [vmem:[%s12361_s4 + $0xa0] sm:$0xff] }
  0xbe   :  { %v3292_v55 = vunpack.c.l.s8.bf16 %v2914_v62 }
  0xbf   :  { %7481 = vmatmul.mubr.msk.bf16.vlgmr.msra.gmra.mrb[32].mxu0 %vm1041_vm2, %v9086_v63  ;;  %v3256_v63 = vunpack.c.l.s8.bf16 %v2896_v58  ;;  %3979 = vmatpush1.bf16.msra.mxu1 %v3272_v60  ;;  %v3281_v58 = vunpack.c.h.s8.bf16 %v2903_v51  ;;  %v3302_v51 = vunpack.c.h.s8.bf16 %v2915_v46  ;;  %v3301_v60 = vunpack.c.h.s8.bf16 %v2914_v62 }
  0xc0   :  { %3980 = vmatprep.subr.bf16.mxu1 %v3282_v53  ;;  %v2924_v53 = vld [vmem:[%s12361_s4 + $0xf0] sm:$0xff] }
  0xc1   :  { %4180 = vmatpush1.bf16.msra.mxu0 %v3256_v63  ;;  %v2913_v63 = vld [vmem:[%s12361_s4 + $0x98] sm:$0xff] }
  0xc2   :  { %4181 = vmatprep.subr.bf16.mxu0 %v3266_v61  ;;  %v3291_v61 = vunpack.c.l.s8.bf16 %v2913_v63 }
  0xc3   :  { %3981 = vmatpush1.bf16.msra.mxu1 %v3281_v58  ;;  %v2923_v58 = vld [vmem:[%s12361_s4 + $0xe8] sm:$0xff] }
  0xc4   :  { %3982 = vmatprep.subr.bf16.mxu1 %v3291_v61  ;;  %v3310_v61 = vunpack.c.l.s8.bf16 %v2923_v58 }
  0xc5   :  { %4182 = vmatpush1.bf16.msra.mxu0 %v3265_v54  ;;  %v2912_v54 = vld [vmem:[%s12361_s4 + $0x90] sm:$0xff] }
  0xc6   :  { %4183 = vmatprep.subr.bf16.mxu0 %v3275_v52  ;;  %v3290_v59 = vunpack.c.l.s8.bf16 %v2912_v54  ;;  %v3300_v52 = vunpack.c.h.s8.bf16 %v2913_v63  ;;  %v3299_v48 = vunpack.c.h.s8.bf16 %v2912_v54  ;;  %v3311_v63 = vunpack.c.l.s8.bf16 %v2924_v53 }
  0xc7   :  { %v3320_v54 = vunpack.c.h.s8.bf16 %v2924_v53 }
  0xc8   :  { %3983 = vmatpush1.bf16.msra.mxu1 %v3290_v59  ;;  %v3319_v59 = vunpack.c.h.s8.bf16 %v2923_v58 }
  0xc9   :  { %4184 = vmatpush1.bf16.msra.mxu0 %v3274_v49  ;;  %3984 = vmatprep.subr.bf16.mxu1 %v3300_v52  ;;  %v2922_v49 = vld [vmem:[%s12361_s4 + $0xe0] sm:$0xff]  ;;  %v2933_v52 = vld [vmem:[%s12361_s4 + $0x138] sm:$0xff] }
  0xca   :  { %4185 = vmatprep.subr.bf16.mxu0 %v3284_v56  ;;  %v2921_v56 = vld [vmem:[%s12361_s4 + $0xd8] sm:$0xff] }
  0xcb   :  { %v3308_v46 = vunpack.c.l.s8.bf16 %v2921_v56  ;;  %v3317_v62 = vunpack.c.h.s8.bf16 %v2921_v56 }
  0xcc   :  { %3985 = vmatpush1.bf16.msra.mxu1 %v3299_v48  ;;  %v3329_v48 = vunpack.c.l.s8.bf16 %v2933_v52 }
  0xcd   :  { %4186 = vmatpush1.bf16.msra.mxu0 %v3283_v50  ;;  %v3309_v50 = vunpack.c.l.s8.bf16 %v2922_v49 }
  0xce   :  { %4187 = vmatprep.subr.bf16.mxu0 %v3293_v57  ;;  %v3318_v57 = vunpack.c.h.s8.bf16 %v2922_v49  ;;  %v2932_v49 = vld [vmem:[%s12361_s4 + $0x130] sm:$0xff] }
  0xcf   :  { %3986 = vmatprep.subr.bf16.mxu1 %v3309_v50  ;;  %v3328_v56 = vunpack.c.l.s8.bf16 %v2932_v49  ;;  %v3338_v50 = vunpack.c.h.s8.bf16 %v2933_v52 }
  0xd0   :  { %3987 = vmatpush1.bf16.msra.mxu1 %v3308_v46  ;;  %v3337_v46 = vunpack.c.h.s8.bf16 %v2932_v49 }
  0xd1   :  { %4188 = vmatpush1.bf16.msra.mxu0 %v3292_v55  ;;  %3988 = vmatprep.subr.bf16.mxu1 %v3318_v57  ;;  %v2931_v55 = vld [vmem:[%s12361_s4 + $0x128] sm:$0xff]  ;;  %v2942_v57 = vld [vmem:[%s12361_s4 + $0x180] sm:$0xff] }
  0xd2   :  { %4189 = vmatprep.subr.bf16.mxu0 %v3302_v51  ;;  %v3327_v51 = vunpack.c.l.s8.bf16 %v2931_v55  ;;  %v3336_v58 = vunpack.c.h.s8.bf16 %v2931_v55  ;;  %v2941_v55 = vld [vmem:[%s12361_s4 + $0x178] sm:$0xff] }
  0xd4   :  { %3989 = vmatpush1.bf16.msra.mxu1 %v3317_v62  ;;  %v3347_v62 = vunpack.c.l.s8.bf16 %v2942_v57 }
  0xd5   :  { %4190 = vmatpush1.bf16.msra.mxu0 %v3301_v60  ;;  %v2930_v60 = vld [vmem:[%s12361_s4 + $0x120] sm:$0xff]  ;;  %3990 = vmatprep.subr.bf16.mxu1 %v3327_v51  ;;  %v3346_v51 = vunpack.c.l.s8.bf16 %v2941_v55 }
  0xd6   :  { %4191 = vmatprep.subr.bf16.mxu0 %v3311_v63  ;;  %v3326_v53 = vunpack.c.l.s8.bf16 %v2930_v60  ;;  %v3335_v63 = vunpack.c.h.s8.bf16 %v2930_v60  ;;  %v3356_v60 = vunpack.c.h.s8.bf16 %v2942_v57 }
  0xd8   :  { %3991 = vmatpush1.bf16.msra.mxu1 %v3326_v53  ;;  %v3355_v53 = vunpack.c.h.s8.bf16 %v2941_v55 }
  0xd9   :  { %4192 = vmatpush1.bf16.msra.mxu0 %v3310_v61  ;;  %3992 = vmatprep.subr.bf16.mxu1 %v3336_v58  ;;  %v2940_v61 = vld [vmem:[%s12361_s4 + $0x170] sm:$0xff]  ;;  %v2951_v58 = vld [vmem:[%s12361_s4 + $0x1c8] sm:$0xff] }
  0xda   :  { %4193 = vmatprep.subr.bf16.mxu0 %v3320_v54  ;;  %v3345_v54 = vunpack.c.l.s8.bf16 %v2940_v61 }
  0xdc   :  { %3993 = vmatpush1.bf16.msra.mxu1 %v3335_v63  ;;  %v3365_v63 = vunpack.c.l.s8.bf16 %v2951_v58 }
  0xdd   :  { %4194 = vmatpush1.bf16.msra.mxu0 %v3319_v59  ;;  %v2939_v59 = vld [vmem:[%s12361_s4 + $0x168] sm:$0xff]  ;;  %3994 = vmatprep.subr.bf16.mxu1 %v3345_v54 }
  0xde   :  { %4195 = vmatprep.subr.bf16.mxu0 %v3329_v48  ;;  %v3344_v52 = vunpack.c.l.s8.bf16 %v2939_v59  ;;  %v3354_v48 = vunpack.c.h.s8.bf16 %v2940_v61  ;;  %v3353_v49 = vunpack.c.h.s8.bf16 %v2939_v59  ;;  %v2950_v61 = vld [vmem:[%s12361_s4 + $0x1c0] sm:$0xff]  ;;  %v3374_v59 = vunpack.c.h.s8.bf16 %v2951_v58 }
  0xdf   :  { %v3364_v54 = vunpack.c.l.s8.bf16 %v2950_v61 }
  0xe0   :  { %3995 = vmatpush1.bf16.msra.mxu1 %v3344_v52  ;;  %v3373_v52 = vunpack.c.h.s8.bf16 %v2950_v61 }
  0xe1   :  { %4196 = vmatpush1.bf16.msra.mxu0 %v3328_v56  ;;  %3996 = vmatprep.subr.bf16.mxu1 %v3354_v48  ;;  %v2949_v56 = vld [vmem:[%s12361_s4 + $0x1b8] sm:$0xff]  ;;  %v2960_v48 = vld [vmem:[%s12361_s4 + $0x210] sm:$0xff] }
  0xe2   :  { %4197 = vmatprep.subr.bf16.mxu0 %v3338_v50  ;;  %v3363_v50 = vunpack.c.l.s8.bf16 %v2949_v56 }
  0xe4   :  { %3997 = vmatpush1.bf16.msra.mxu1 %v3353_v49  ;;  %v3383_v49 = vunpack.c.l.s8.bf16 %v2960_v48 }
  0xe5   :  { %4198 = vmatpush1.bf16.msra.mxu0 %v3337_v46  ;;  %v2948_v46 = vld [vmem:[%s12361_s4 + $0x1b0] sm:$0xff]  ;;  %3998 = vmatprep.subr.bf16.mxu1 %v3363_v50 }
  0xe6   :  { %4199 = vmatprep.subr.bf16.mxu0 %v3347_v62  ;;  %v3362_v57 = vunpack.c.l.s8.bf16 %v2948_v46  ;;  %v3372_v62 = vunpack.c.h.s8.bf16 %v2949_v56  ;;  %v3371_v55 = vunpack.c.h.s8.bf16 %v2948_v46  ;;  %v2959_v56 = vld [vmem:[%s12361_s4 + $0x208] sm:$0xff]  ;;  %v3392_v46 = vunpack.c.h.s8.bf16 %v2960_v48 }
  0xe7   :  { %v3382_v50 = vunpack.c.l.s8.bf16 %v2959_v56 }
  0xe8   :  { %3999 = vmatpush1.bf16.msra.mxu1 %v3362_v57  ;;  %v3391_v57 = vunpack.c.h.s8.bf16 %v2959_v56 }
  0xe9   :  { %4200 = vmatpush1.bf16.msra.mxu0 %v3346_v51  ;;  %4000 = vmatprep.subr.bf16.mxu1 %v3372_v62  ;;  %v2958_v51 = vld [vmem:[%s12361_s4 + $0x200] sm:$0xff]  ;;  %v9450_v62 = vld [vmem:[%s12361_s4 + $0x258] sm:$0xff] }
  0xea   :  { %4201 = vmatprep.subr.bf16.mxu0 %v3356_v60  ;;  %v3381_v60 = vunpack.c.l.s8.bf16 %v2958_v51 }
  0xec   :  { %4001 = vmatpush1.bf16.msra.mxu1 %v3371_v55  ;;  %v3401_v55 = vunpack.c.l.s8.bf16 %v9450_v62 }
  0xed   :  { %4202 = vmatpush1.bf16.msra.mxu0 %v3355_v53  ;;  %v2957_v53 = vld [vmem:[%s12361_s4 + $0x1f8] sm:$0xff]  ;;  %4002 = vmatprep.subr.bf16.mxu1 %v3381_v60 }
  0xee   :  { %4203 = vmatprep.subr.bf16.mxu0 %v3365_v63  ;;  %v3380_v58 = vunpack.c.l.s8.bf16 %v2957_v53  ;;  %v3390_v63 = vunpack.c.h.s8.bf16 %v2958_v51  ;;  %v3389_v61 = vunpack.c.h.s8.bf16 %v2957_v53 }
  0xf0   :  { %4003 = vmatpush1.bf16.msra.mxu1 %v3380_v58 }
  0xf1   :  { %4204 = vmatpush1.bf16.msra.mxu0 %v3364_v54  ;;  %4004 = vmatprep.subr.bf16.mxu1 %v3390_v63  ;;  %v9445_v54 = vld [vmem:[%s12361_s4 + $0x248] sm:$0xff] }
  0xf2   :  { %4205 = vmatprep.subr.bf16.mxu0 %v3374_v59  ;;  %v3399_v59 = vunpack.c.l.s8.bf16 %v9445_v54 }
  0xf4   :  { %4005 = vmatpush1.bf16.msra.mxu1 %v3389_v61  ;;  %v891_v61 = vlaneseq }
  0xf5   :  { %4206 = vmatpush1.bf16.msra.mxu0 %v3373_v52  ;;  %4015 = vmatprep.subr.bf16.mxu1 %v3399_v59 }
  0xf6   :  { %4207 = vmatprep.subr.bf16.mxu0 %v3383_v49  ;;  %v892_v45 = vshrl.u32 %v891_v61, 7 }
  0xf8   :  { %v9472_v42 = vsub.s32 7, %v892_v45  ;;  %v9491_v39 = vsub.s32 0, %v892_v45  ;;  %v9493_v37 = vsub.s32 1, %v892_v45  ;;  %v9495_v34 = vsub.s32 2, %v892_v45 }
  0xf9   :  { %4208 = vmatpush1.bf16.msra.mxu0 %v3382_v50  ;;  %v9497_v32 = vsub.s32 3, %v892_v45  ;;  %v9520_v25 = vsub.s32 4, %v892_v45  ;;  %v9522_v22 = vsub.s32 5, %v892_v45 }
  0xfa   :  { %4209 = vmatprep.subr.bf16.mxu0 %v3392_v46 }
  0xfd   :  { %4210 = vmatpush1.bf16.msra.mxu0 %v3391_v57 }
  0xfe   :  { %4220 = vmatprep.subr.bf16.mxu0 %v3401_v55 }
 0x132   :  { %v9454_v52 = vpop.f32.mrb[0].mxu0 }
 0x133   :  { %v9456_v51 = vpop.f32.mrb[1].mxu0  ;;  %v9458_v48 = vpop.f32.mrb[0].mxu1 }
 0x134   :  { %v1177_v60 = vpop.f32.mrb[2].mxu0  ;;  %v9460_v49 = vpop.f32.mrb[1].mxu1 }
 0x135   :  { %v1178_v53 = vpop.f32.mrb[3].mxu0  ;;  %v1300_v56 = vpop.f32.mrb[2].mxu1  ;;  %v9470_v60 = vsub.s32 6, %v892_v45 }
 0x136   :  { %v1301_v58 = vpop.f32.mrb[3].mxu1  ;;  %v9477_v53 = vld [vmem:[%s12359_s2 + $0x8] sm:$0xff] }
 0x137   :  { %v950_v56 = vrot.slane %v9477_v53, %v9470_v60  ;;  %v954_v58 = vrot.slane %v9477_v53, %v9472_v42  ;;  %v926_v35 = vrot.slane %v9477_v53, %v9491_v39 }
 0x13e   :  { %v9462_v50 = vpop.f32.mrb[4].mxu0 }
 0x13f   :  { %v9464_v63 = vpop.f32.mrb[5].mxu0  ;;  %v9466_v46 = vpop.f32.mrb[4].mxu1 }
 0x140   :  { %v1218_v57 = vpop.f32.mrb[6].mxu0  ;;  %v9468_v59 = vpop.f32.mrb[5].mxu1 }
 0x141   :  { %v1219_v55 = vpop.f32.mrb[7].mxu0  ;;  %v1382_v44 = vpop.f32.mrb[6].mxu1 }
 0x142   :  { %v1383_v47 = vpop.f32.mrb[7].mxu1 }
 0x14a   :  { %v9483_v57 = vpop.f32.mrb[8].mxu0 }
 0x14b   :  { %v9485_v44 = vpop.f32.mrb[9].mxu0  ;;  %v1460_v47 = vpop.f32.mrb[8].mxu1 }
 0x14c   :  { %v1259_v61 = vpop.f32.mrb[10].mxu0  ;;  %v9487_v55 = vadd.f32 %v1460_v47, %v950_v56  ;;  %v1462_v40 = vpop.f32.mrb[9].mxu1  ;;  %v9504_v56 = vld [vmem:[%s12359_s2 + $0x10] sm:$0xff] }
 0x14d   :  { %v1260_v43 = vpop.f32.mrb[11].mxu0  ;;  %v9489_v41 = vadd.f32 %v1462_v40, %v954_v58  ;;  %v1464_v38 = vpop.f32.mrb[10].mxu1  ;;  %v970_v40 = vrot.slane %v9504_v56, %v9497_v32 }
 0x14e   :  { %v1465_v36 = vpop.f32.mrb[11].mxu1  ;;  %v930_v38 = vrot.slane %v9477_v53, %v9493_v37 }
 0x14f   :  { %v966_v36 = vrot.slane %v9504_v56, %v9495_v34 }
 0x156   :  { %v1337_v43 = vpop.f32.mrb[12].mxu0 }
 0x157   :  { %v9512_v58 = vadd.f32 %v1337_v43, %v926_v35  ;;  %v1339_v47 = vpop.f32.mrb[13].mxu0  ;;  %v1542_v61 = vpop.f32.mrb[12].mxu1  ;;  %v942_v35 = vrot.slane %v9477_v53, %v9520_v25 }
 0x158   :  { %v9514_v33 = vadd.f32 %v1339_v47, %v930_v38  ;;  %v1341_v30 = vpop.f32.mrb[14].mxu0  ;;  %v9516_v28 = vadd.f32 %v1542_v61, %v966_v36  ;;  %v1544_v31 = vpop.f32.mrb[13].mxu1  ;;  %v982_v38 = vrot.slane %v9504_v56, %v9470_v60 }
 0x159   :  { %v1342_v29 = vpop.f32.mrb[15].mxu0  ;;  %v9518_v26 = vadd.f32 %v1544_v31, %v970_v40  ;;  %v1546_v24 = vpop.f32.mrb[14].mxu1  ;;  %v946_v30 = vrot.slane %v9477_v53, %v9522_v22 }
 0x15a   :  { %v1547_v27 = vpop.f32.mrb[15].mxu1  ;;  %v986_v29 = vrot.slane %v9504_v56, %v9472_v42 }
 0x162   :  { %v1419_v31 = vpop.f32.mrb[16].mxu0 }
 0x163   :  { %v1420_v36 = vadd.f32 %v1419_v31, %v942_v35  ;;  %v1624_v24 = vpop.f32.mrb[16].mxu1  ;;  %v1421_v27 = vpop.f32.mrb[17].mxu0  ;;  %v958_v35 = vrot.slane %v9504_v56, %v9491_v39 }
 0x164   :  { %v1625_v40 = vadd.f32 %v1624_v24, %v982_v38  ;;  %v1422_v43 = vadd.f32 %v1421_v27, %v946_v30  ;;  %v1626_v45 = vpop.f32.mrb[17].mxu1  ;;  %v1423_v47 = vpop.f32.mrb[18].mxu0  ;;  %v998_v38 = vrot.slane %v9535_v18, %v9495_v34  ;;  %v962_v30 = vrot.slane %v9504_v56, %v9493_v37 }
 0x165   :  { %8044 = vtanh.f32 %v1420_v36  ;;  %v1627_v61 = vadd.f32 %v1626_v45, %v986_v29  ;;  %v1424_v20 = vpop.f32.mrb[19].mxu0  ;;  %v1628_v23 = vpop.f32.mrb[18].mxu1 }
 0x166   :  { %8046 = vtanh.f32 %v1625_v40  ;;  %v1629_v21 = vpop.f32.mrb[19].mxu1  ;;  %v1002_v20 = vrot.slane %v9535_v18, %v9497_v32 }
 0x167   :  { %8048 = vtanh.f32 %v1422_v43 }
 0x168   :  { %8050 = vtanh.f32 %v1627_v61 }
 0x16e   :  { %v1501_v21 = vpop.f32.mrb[20].mxu0 }
 0x16f   :  { %v8045_v23 = vpop.eup %8044  ;;  %v1502_v29 = vadd.f32 %v1501_v21, %v958_v35  ;;  %v1706_v31 = vpop.f32.mrb[20].mxu1  ;;  %v934_v35 = vrot.slane %v9477_v53, %v9495_v34 }
 0x170   :  { %v1503_v36 = vpop.f32.mrb[21].mxu0  ;;  %v8047_v24 = vpop.eup %8046  ;;  %v1707_v27 = vadd.f32 %v1706_v31, %v998_v38  ;;  %v938_v38 = vrot.slane %v9477_v53, %v9497_v32 }
 0x171   :  { %v1504_v40 = vadd.f32 %v1503_v36, %v962_v30  ;;  %v1708_v43 = vpop.f32.mrb[21].mxu1  ;;  %v1505_v45 = vpop.f32.mrb[22].mxu0  ;;  %v9545_v61 = vmul.f32 %v8047_v24, %v8045_v23  ;;  %8052 = vtanh.f32 %v1502_v29  ;;  %v1379_v30 = vadd.f32 %v9466_v46, %v934_v35 }
 0x172   :  { %v8049_v47 = vpop.eup %8048  ;;  %v1709_v16 = vadd.f32 %v1708_v43, %v1002_v20  ;;  %v1506_v19 = vpop.f32.mrb[23].mxu0  ;;  %8054 = vtanh.f32 %v1707_v27  ;;  %v974_v23 = vrot.slane %v9504_v56, %v9520_v25 }
 0x173   :  { %v1710_v17 = vpop.f32.mrb[22].mxu1  ;;  %v8051_v14 = vpop.eup %8050  ;;  %8056 = vtanh.f32 %v1504_v40  ;;  %v1381_v19 = vadd.f32 %v9468_v59, %v938_v38  ;;  %v994_v40 = vrot.slane %v9535_v18, %v9493_v37 }
 0x174   :  { %v1711_v12 = vpop.f32.mrb[23].mxu1  ;;  %v1787_v21 = vmul.f32 %v8051_v14, %v8049_v47  ;;  %8058 = vtanh.f32 %v1709_v16  ;;  %v978_v17 = vrot.slane %v9504_v56, %v9522_v22  ;;  %v990_v56 = vrot.slane %v9535_v18, %v9491_v39 }
 0x175   :  { %8060 = vtanh.f32 %v1379_v30 }
 0x176   :  { %8062 = vtanh.f32 %v1381_v19 }
 0x17a   :  { %v1583_v12 = vpop.f32.mrb[24].mxu0 }
 0x17b   :  { %v8053_v20 = vpop.eup %8052  ;;  %v1584_v29 = vadd.f32 %v1583_v12, %v974_v23  ;;  %v1585_v14 = vpop.f32.mrb[25].mxu0  ;;  %v2968_v12 = vld [vmem:[%s12361_s4 + $0x250] sm:$0xff] }
 0x17c   :  { %v8055_v31 = vpop.eup %8054  ;;  %v1586_v36 = vadd.f32 %v1585_v14, %v978_v17  ;;  %v1587_v53 = vpop.f32.mrb[26].mxu0  ;;  %v2966_v17 = vld [vmem:[%s12361_s4 + $0x240] sm:$0xff] }
 0x17d   :  { %v8057_v16 = vpop.eup %8056  ;;  %v9557_v24 = vmul.f32 %v8055_v31, %v8053_v20  ;;  %8064 = vtanh.f32 %v1584_v29  ;;  %v1588_v46 = vpop.f32.mrb[27].mxu0  ;;  %v3400_v53 = vunpack.c.l.s8.bf16 %v2968_v12 }
 0x17e   :  { %v8059_v27 = vpop.eup %8058  ;;  %8066 = vtanh.f32 %v1586_v36  ;;  %v3398_v36 = vunpack.c.l.s8.bf16 %v2966_v17  ;;  %v3410_v46 = vunpack.c.h.s8.bf16 %v9450_v62  ;;  %v2975_v62 = vld [vmem:[%s12361_s4 + $0x288] sm:$0xff] }
 0x17f   :  { %v9559_v59 = vmul.f32 %v8059_v27, %v8057_v16  ;;  %v8061_v43 = vpop.eup %8060  ;;  %8068 = vtanh.f32 %v9487_v55  ;;  %v3408_v16 = vunpack.c.h.s8.bf16 %v9445_v54  ;;  %v2976_v27 = vld [vmem:[%s12361_s4 + $0x290] sm:$0xff]  ;;  %v3409_v54 = vunpack.c.h.s8.bf16 %v2968_v12 }
 0x180   :  { %v8063_v45 = vpop.eup %8062  ;;  %8070 = vtanh.f32 %v9489_v41 }
 0x186   :  { %v1665_v47 = vpop.f32.mrb[28].mxu0 }
 0x187   :  { %v8065_v35 = vpop.eup %8064  ;;  %v1666_v38 = vadd.f32 %v1665_v47, %v990_v56  ;;  %v1667_v30 = vpop.f32.mrb[29].mxu0  ;;  %v2978_v56 = vld [vmem:[%s12361_s4 + $0x2a0] sm:$0xff]  ;;  %v3417_v47 = vunpack.c.l.s8.bf16 %v2976_v27 }
 0x188   :  { %v8067_v23 = vpop.eup %8066  ;;  %v1784_v19 = vmul.f32 %v8065_v35, %v8061_v43  ;;  %v1668_v20 = vadd.f32 %v1667_v30, %v994_v40  ;;  %v1669_v29 = vpop.f32.mrb[30].mxu0  ;;  %v9589_v40 = vpack.c.bf16 %v1787_v21, %v1787_v21  ;;  %v3407_v43 = vunpack.c.h.s8.bf16 %v2966_v17  ;;  %v2977_v21 = vld [vmem:[%s12361_s4 + $0x298] sm:$0xff] }
 0x189   :  { %v1785_v14 = vmul.f32 %v8067_v23, %v8063_v45  ;;  %8072 = vtanh.f32 %v1666_v38  ;;  %v1670_v31 = vpop.f32.mrb[31].mxu0  ;;  %v1006_v45 = vrot.slane %v9535_v18, %v9520_v25  ;;  %v3419_v35 = vunpack.c.l.s8.bf16 %v2978_v56  ;;  %v8069_v30 = vpop.eup %8068 }
 0x18a   :  { %8074 = vtanh.f32 %v1668_v20  ;;  %v9575_v41 = vpack.c.bf16 %v1784_v19, %v1784_v19  ;;  %v1010_v38 = vrot.slane %v9535_v18, %v9522_v22  ;;  %v8071_v23 = vpop.eup %8070  ;;  %v3416_v19 = vunpack.c.l.s8.bf16 %v2975_v62 }
 0x18b   :  { %v9573_v55 = vpack.c.bf16 %v1785_v14, %v1785_v14  ;;  %8076 = vtanh.f32 %v9516_v28  ;;  %v3418_v20 = vunpack.c.l.s8.bf16 %v2977_v21  ;;  %v3426_v29 = vunpack.c.h.s8.bf16 %v2976_v27  ;;  %v2985_v28 = vld [vmem:[%s12361_s4 + $0x2d8] sm:$0xff]  ;;  %v2987_v27 = vld [vmem:[%s12361_s4 + $0x2e8] sm:$0xff] }
 0x18c   :  { %8078 = vtanh.f32 %v9518_v26  ;;  %v3428_v18 = vunpack.c.h.s8.bf16 %v2978_v56  ;;  %v3425_v26 = vunpack.c.h.s8.bf16 %v2975_v62  ;;  %v3427_v56 = vunpack.c.h.s8.bf16 %v2977_v21 }
 0x18d   :  { %4006 = vmatprep.mubr.bf16.mxu1 %v9573_v55  ;;  %4211 = vmatprep.mubr.bf16.mxu0 %v9573_v55  ;;  %v3444_v62 = vunpack.c.h.s8.bf16 %v2985_v28  ;;  %v3446_v21 = vunpack.c.h.s8.bf16 %v2987_v27 }
 0x18e   :  { %4007 = vmatmul.mubr.bf16.vlgmr.msra.gmra.mrb[24].mxu1 %v9575_v41  ;;  %4212 = vmatmul.mubr.bf16.vlgmr.msra.gmra.mrb[36].mxu0 %v9575_v41 }
 0x18f   :  { %4016 = vmatpush1.bf16.msra.mxu1 %v3398_v36  ;;  %4221 = vmatpush1.bf16.msra.mxu0 %v3400_v53 }
 0x190   :  { %4047 = vmatprep.mubr.bf16.mxu1 %v9589_v40  ;;  %4252 = vmatprep.mubr.bf16.mxu0 %v9589_v40 }
 0x191   :  { %4017 = vmatprep.subr.bf16.mxu1 %v3408_v16  ;;  %4222 = vmatprep.subr.bf16.mxu0 %v3410_v46 }
 0x192   :  { %v1747_v17 = vpop.f32.mrb[32].mxu0 }
 0x193   :  { %v8073_v12 = vpop.eup %8072  ;;  %4018 = vmatpush1.bf16.msra.mxu1 %v3407_v43  ;;  %4223 = vmatpush1.bf16.msra.mxu0 %v3409_v54  ;;  %v1748_v14 = vadd.f32 %v1747_v17, %v1006_v45  ;;  %v1749_v31 = vpop.f32.mrb[33].mxu0  ;;  %v3435_v45 = vunpack.c.l.s8.bf16 %v2985_v28  ;;  %v2994_v17 = vld [vmem:[%s12361_s4 + $0x320] sm:$0xff]  ;;  %v2995_v28 = vld [vmem:[%s12361_s4 + $0x328] sm:$0xff] }
 0x194   :  { %v8075_v36 = vpop.eup %8074  ;;  %4019 = vmatprep.subr.bf16.mxu1 %v3417_v47  ;;  %4224 = vmatprep.subr.bf16.mxu0 %v3419_v35  ;;  %v9605_v53 = vmul.f32 %v8073_v12, %v8069_v30  ;;  %v1750_v16 = vadd.f32 %v1749_v31, %v1010_v38  ;;  %v1751_v46 = vpop.f32.mrb[34].mxu0  ;;  %v3437_v47 = vunpack.c.l.s8.bf16 %v2987_v27  ;;  %v2984_v35 = vld [vmem:[%s12361_s4 + $0x2d0] sm:$0xff]  ;;  %v2986_v38 = vld [vmem:[%s12361_s4 + $0x2e0] sm:$0xff] }
 0x195   :  { %v9613_v43 = vmul.f32 %v8075_v36, %v8071_v23  ;;  %8080 = vtanh.f32 %v1748_v14  ;;  %v1752_v54 = vpop.f32.mrb[35].mxu0  ;;  %v3434_v30 = vunpack.c.l.s8.bf16 %v2984_v35  ;;  %v3436_v23 = vunpack.c.l.s8.bf16 %v2986_v38  ;;  %v2996_v12 = vld [vmem:[%s12361_s4 + $0x330] sm:$0xff]  ;;  %v2993_v46 = vld [vmem:[%s12361_s4 + $0x318] sm:$0xff] }
 0x196   :  { %8082 = vtanh.f32 %v1750_v16  ;;  %v3443_v14 = vunpack.c.h.s8.bf16 %v2984_v35  ;;  %v3445_v31 = vunpack.c.h.s8.bf16 %v2986_v38  ;;  %v3455_v16 = vunpack.c.l.s8.bf16 %v2996_v12  ;;  %v3003_v35 = vld [vmem:[%s12361_s4 + $0x368] sm:$0xff]  ;;  %v3005_v38 = vld [vmem:[%s12361_s4 + $0x378] sm:$0xff] }
 0x197   :  { %4020 = vmatpush1.bf16.msra.mxu1 %v3416_v19  ;;  %4225 = vmatpush1.bf16.msra.mxu0 %v3418_v20  ;;  %v8077_v19 = vpop.eup %8076 }
 0x198   :  { %4021 = vmatprep.subr.bf16.mxu1 %v3426_v29  ;;  %4226 = vmatprep.subr.bf16.mxu0 %v3428_v18  ;;  %v8079_v20 = vpop.eup %8078  ;;  %v3453_v18 = vunpack.c.l.s8.bf16 %v2994_v17 }
 0x19b   :  { %4022 = vmatpush1.bf16.msra.mxu1 %v3425_v26  ;;  %4227 = vmatpush1.bf16.msra.mxu0 %v3427_v56  ;;  %v3452_v26 = vunpack.c.l.s8.bf16 %v2993_v46  ;;  %v3454_v56 = vunpack.c.l.s8.bf16 %v2995_v28 }
 0x19c   :  { %4023 = vmatprep.subr.bf16.mxu1 %v3435_v45  ;;  %4228 = vmatprep.subr.bf16.mxu0 %v3437_v47  ;;  %v3462_v45 = vunpack.c.h.s8.bf16 %v2994_v17  ;;  %v3464_v47 = vunpack.c.h.s8.bf16 %v2996_v12  ;;  %v3004_v17 = vld [vmem:[%s12361_s4 + $0x370] sm:$0xff] }
 0x19f   :  { %v8081_v29 = vpop.eup %8080  ;;  %4024 = vmatpush1.bf16.msra.mxu1 %v3434_v30  ;;  %4229 = vmatpush1.bf16.msra.mxu0 %v3436_v23  ;;  %v3461_v30 = vunpack.c.h.s8.bf16 %v2993_v46  ;;  %v3463_v23 = vunpack.c.h.s8.bf16 %v2995_v28 }
 0x1a0   :  { %v8083_v36 = vpop.eup %8082  ;;  %4025 = vmatprep.subr.bf16.mxu1 %v3444_v62  ;;  %4230 = vmatprep.subr.bf16.mxu0 %v3446_v21  ;;  %v9633_v27 = vmul.f32 %v8081_v29, %v8077_v19  ;;  %v3471_v62 = vunpack.c.l.s8.bf16 %v3003_v35  ;;  %v3473_v21 = vunpack.c.l.s8.bf16 %v3005_v38  ;;  %v3002_v19 = vld [vmem:[%s12361_s4 + $0x360] sm:$0xff]  ;;  %v3480_v29 = vunpack.c.h.s8.bf16 %v3003_v35 }
 0x1a1   :  { %v9635_v54 = vmul.f32 %v8083_v36, %v8079_v20  ;;  %v3470_v12 = vunpack.c.l.s8.bf16 %v3002_v19  ;;  %v3472_v20 = vunpack.c.l.s8.bf16 %v3004_v17  ;;  %v3014_v36 = vld [vmem:[%s12361_s4 + $0x3c0] sm:$0xff] }
 0x1a2   :  { %v3491_v28 = vunpack.c.l.s8.bf16 %v3014_v36 }
 0x1a3   :  { %4026 = vmatpush1.bf16.msra.mxu1 %v3443_v14  ;;  %4231 = vmatpush1.bf16.msra.mxu0 %v3445_v31  ;;  %v3482_v14 = vunpack.c.h.s8.bf16 %v3005_v38  ;;  %v3012_v31 = vld [vmem:[%s12361_s4 + $0x3b0] sm:$0xff]  ;;  %v3500_v38 = vunpack.c.h.s8.bf16 %v3014_v36 }
 0x1a4   :  { %4027 = vmatprep.subr.bf16.mxu1 %v3453_v18  ;;  %4232 = vmatprep.subr.bf16.mxu0 %v3455_v16  ;;  %v3479_v18 = vunpack.c.h.s8.bf16 %v3002_v19  ;;  %v3481_v16 = vunpack.c.h.s8.bf16 %v3004_v17  ;;  %v3489_v46 = vunpack.c.l.s8.bf16 %v3012_v31  ;;  %v3498_v35 = vunpack.c.h.s8.bf16 %v3012_v31 }
 0x1a7   :  { %4028 = vmatpush1.bf16.msra.mxu1 %v3452_v26  ;;  %4233 = vmatpush1.bf16.msra.mxu0 %v3454_v56  ;;  %v3011_v26 = vld [vmem:[%s12361_s4 + $0x3a8] sm:$0xff]  ;;  %v3013_v56 = vld [vmem:[%s12361_s4 + $0x3b8] sm:$0xff] }
 0x1a8   :  { %4029 = vmatprep.subr.bf16.mxu1 %v3462_v45  ;;  %4234 = vmatprep.subr.bf16.mxu0 %v3464_v47  ;;  %v3488_v45 = vunpack.c.l.s8.bf16 %v3011_v26  ;;  %v3490_v47 = vunpack.c.l.s8.bf16 %v3013_v56 }
 0x1ab   :  { %4030 = vmatpush1.bf16.msra.mxu1 %v3461_v30  ;;  %4235 = vmatpush1.bf16.msra.mxu0 %v3463_v23  ;;  %v3021_v30 = vld [vmem:[%s12361_s4 + $0x3f8] sm:$0xff]  ;;  %v3023_v23 = vld [vmem:[%s12361_s4 + $0x408] sm:$0xff] }
 0x1ac   :  { %4031 = vmatprep.subr.bf16.mxu1 %v3471_v62  ;;  %4236 = vmatprep.subr.bf16.mxu0 %v3473_v21  ;;  %v3497_v62 = vunpack.c.h.s8.bf16 %v3011_v26  ;;  %v3499_v21 = vunpack.c.h.s8.bf16 %v3013_v56  ;;  %v3507_v19 = vunpack.c.l.s8.bf16 %v3021_v30  ;;  %v3509_v17 = vunpack.c.l.s8.bf16 %v3023_v23 }
 0x1ad   :  { %v3516_v31 = vunpack.c.h.s8.bf16 %v3021_v30  ;;  %v3518_v36 = vunpack.c.h.s8.bf16 %v3023_v23 }
 0x1af   :  { %4032 = vmatpush1.bf16.msra.mxu1 %v3470_v12  ;;  %4237 = vmatpush1.bf16.msra.mxu0 %v3472_v20  ;;  %v3020_v12 = vld [vmem:[%s12361_s4 + $0x3f0] sm:$0xff]  ;;  %v3022_v20 = vld [vmem:[%s12361_s4 + $0x400] sm:$0xff] }
 0x1b0   :  { %4033 = vmatprep.subr.bf16.mxu1 %v3480_v29  ;;  %4238 = vmatprep.subr.bf16.mxu0 %v3482_v14  ;;  %v3506_v29 = vunpack.c.l.s8.bf16 %v3020_v12  ;;  %v3508_v14 = vunpack.c.l.s8.bf16 %v3022_v20 }
 0x1b3   :  { %4034 = vmatpush1.bf16.msra.mxu1 %v3479_v18  ;;  %4239 = vmatpush1.bf16.msra.mxu0 %v3481_v16  ;;  %v3030_v18 = vld [vmem:[%s12361_s4 + $0x440] sm:$0xff]  ;;  %v3032_v16 = vld [vmem:[%s12361_s4 + $0x450] sm:$0xff] }
 0x1b4   :  { %4035 = vmatprep.subr.bf16.mxu1 %v3489_v46  ;;  %4240 = vmatprep.subr.bf16.mxu0 %v3491_v28  ;;  %v3515_v46 = vunpack.c.h.s8.bf16 %v3020_v12  ;;  %v3517_v28 = vunpack.c.h.s8.bf16 %v3022_v20  ;;  %v3525_v26 = vunpack.c.l.s8.bf16 %v3030_v18  ;;  %v3527_v56 = vunpack.c.l.s8.bf16 %v3032_v16 }
 0x1b5   :  { %v3534_v30 = vunpack.c.h.s8.bf16 %v3030_v18  ;;  %v3536_v23 = vunpack.c.h.s8.bf16 %v3032_v16  ;;  %v9703_v16 = vpack.c.bf16 %v9613_v43, %v9613_v43 }
 0x1b7   :  { %4036 = vmatpush1.bf16.msra.mxu1 %v3488_v45  ;;  %4241 = vmatpush1.bf16.msra.mxu0 %v3490_v47  ;;  %v3029_v45 = vld [vmem:[%s12361_s4 + $0x438] sm:$0xff]  ;;  %v3031_v47 = vld [vmem:[%s12361_s4 + $0x448] sm:$0xff] }
 0x1b8   :  { %4037 = vmatprep.subr.bf16.mxu1 %v3498_v35  ;;  %4242 = vmatprep.subr.bf16.mxu0 %v3500_v38  ;;  %v3524_v35 = vunpack.c.l.s8.bf16 %v3029_v45  ;;  %v3526_v38 = vunpack.c.l.s8.bf16 %v3031_v47 }
 0x1bb   :  { %4038 = vmatpush1.bf16.msra.mxu1 %v3497_v62  ;;  %4243 = vmatpush1.bf16.msra.mxu0 %v3499_v21  ;;  %v3039_v62 = vld [vmem:[%s12361_s4 + $0x488] sm:$0xff]  ;;  %v3041_v21 = vld [vmem:[%s12361_s4 + $0x498] sm:$0xff] }
 0x1bc   :  { %4039 = vmatprep.subr.bf16.mxu1 %v3507_v19  ;;  %4244 = vmatprep.subr.bf16.mxu0 %v3509_v17  ;;  %v3533_v19 = vunpack.c.h.s8.bf16 %v3029_v45  ;;  %v3535_v17 = vunpack.c.h.s8.bf16 %v3031_v47  ;;  %v3543_v12 = vunpack.c.l.s8.bf16 %v3039_v62  ;;  %v3545_v20 = vunpack.c.l.s8.bf16 %v3041_v21  ;;  %v3047_v47 = vld [vmem:[%s12361_s4 + $0x4c8] sm:$0xff] }
 0x1bf   :  { %4040 = vmatpush1.bf16.msra.mxu1 %v3506_v29  ;;  %4245 = vmatpush1.bf16.msra.mxu0 %v3508_v14  ;;  %v3038_v29 = vld [vmem:[%s12361_s4 + $0x480] sm:$0xff]  ;;  %v3040_v14 = vld [vmem:[%s12361_s4 + $0x490] sm:$0xff] }
 0x1c0   :  { %4041 = vmatprep.subr.bf16.mxu1 %v3516_v31  ;;  %4246 = vmatprep.subr.bf16.mxu0 %v3518_v36  ;;  %v3542_v31 = vunpack.c.l.s8.bf16 %v3038_v29  ;;  %v9699_v36 = vpack.c.bf16 %v9545_v61, %v9545_v61  ;;  %v3544_v18 = vunpack.c.l.s8.bf16 %v3040_v14  ;;  %v3050_v61 = vld [vmem:[%s12361_s4 + $0x4e0] sm:$0xff]  ;;  %v3553_v43 = vunpack.c.h.s8.bf16 %v3040_v14  ;;  %v3056_v14 = vld [vmem:[%s12361_s4 + $0x510] sm:$0xff] }
 0x1c3   :  { %4042 = vmatpush1.bf16.msra.mxu1 %v3515_v46  ;;  %4247 = vmatpush1.bf16.msra.mxu0 %v3517_v28  ;;  %v3552_v46 = vunpack.c.h.s8.bf16 %v3039_v62  ;;  %v3554_v28 = vunpack.c.h.s8.bf16 %v3041_v21  ;;  %v3572_v21 = vunpack.c.h.s8.bf16 %v3050_v61 }
 0x1c4   :  { %4043 = vmatprep.subr.bf16.mxu1 %v3525_v26  ;;  %4248 = vmatprep.subr.bf16.mxu0 %v3527_v56  ;;  %v3048_v26 = vld [vmem:[%s12361_s4 + $0x4d0] sm:$0xff]  ;;  %v3551_v56 = vunpack.c.h.s8.bf16 %v3038_v29 }
 0x1c5   :  { %v3561_v45 = vunpack.c.l.s8.bf16 %v3048_v26  ;;  %v3570_v62 = vunpack.c.h.s8.bf16 %v3048_v26 }
 0x1c7   :  { %4044 = vmatpush1.bf16.msra.mxu1 %v3524_v35  ;;  %4249 = vmatpush1.bf16.msra.mxu0 %v3526_v38  ;;  %v3563_v35 = vunpack.c.l.s8.bf16 %v3050_v61  ;;  %v3049_v38 = vld [vmem:[%s12361_s4 + $0x4d8] sm:$0xff] }
 0x1c8   :  { %4045 = vmatprep.subr.bf16.mxu1 %v3534_v30  ;;  %4250 = vmatprep.subr.bf16.mxu0 %v3536_v23  ;;  %v3560_v30 = vunpack.c.l.s8.bf16 %v3047_v47  ;;  %v3562_v23 = vunpack.c.l.s8.bf16 %v3049_v38 }
 0x1cb   :  { %4046 = vmatpush1.bf16.msra.mxu1 %v3533_v19  ;;  %4251 = vmatpush1.bf16.msra.mxu0 %v3535_v17  ;;  %v3057_v19 = vld [vmem:[%s12361_s4 + $0x518] sm:$0xff]  ;;  %v3059_v17 = vld [vmem:[%s12361_s4 + $0x528] sm:$0xff] }
 0x1cc   :  { %4056 = vmatprep.subr.bf16.mxu1 %v3543_v12  ;;  %4261 = vmatprep.subr.bf16.mxu0 %v3545_v20  ;;  %v3569_v12 = vunpack.c.h.s8.bf16 %v3047_v47  ;;  %v3571_v20 = vunpack.c.h.s8.bf16 %v3049_v38  ;;  %v3579_v29 = vunpack.c.l.s8.bf16 %v3057_v19  ;;  %v3588_v26 = vunpack.c.h.s8.bf16 %v3057_v19  ;;  %v3065_v38 = vld [vmem:[%s12361_s4 + $0x558] sm:$0xff] }
 0x1cd   :  { %v3590_v61 = vunpack.c.h.s8.bf16 %v3059_v17 }
 0x1ce   :  { %4048 = vmatmul.mubr.bf16.vlgmr.msra.gmra.mrb[24].mxu1 %v9699_v36  ;;  %4253 = vmatmul.mubr.bf16.vlgmr.msra.gmra.mrb[36].mxu0 %v9699_v36 }
 0x1cf   :  { %4057 = vmatpush1.bf16.msra.mxu1 %v3542_v31  ;;  %4088 = vmatprep.mubr.bf16.mxu1 %v9703_v16  ;;  %v3581_v31 = vunpack.c.l.s8.bf16 %v3059_v17 }
 0x1d0   :  { %4262 = vmatpush1.bf16.msra.mxu0 %v3544_v18  ;;  %4293 = vmatprep.mubr.bf16.mxu0 %v9703_v16  ;;  %v3058_v18 = vld [vmem:[%s12361_s4 + $0x520] sm:$0xff] }
 0x1d1   :  { %4058 = vmatprep.subr.bf16.mxu1 %v3552_v46  ;;  %4263 = vmatprep.subr.bf16.mxu0 %v3554_v28  ;;  %v3578_v46 = vunpack.c.l.s8.bf16 %v3056_v14  ;;  %v3580_v28 = vunpack.c.l.s8.bf16 %v3058_v18  ;;  %v3589_v47 = vunpack.c.h.s8.bf16 %v3058_v18  ;;  %v3074_v18 = vld [vmem:[%s12361_s4 + $0x5a0] sm:$0xff] }
 0x1d3   :  { %4059 = vmatpush1.bf16.msra.mxu1 %v3551_v56  ;;  %v3066_v56 = vld [vmem:[%s12361_s4 + $0x560] sm:$0xff] }
 0x1d4   :  { %4264 = vmatpush1.bf16.msra.mxu0 %v3553_v43  ;;  %4060 = vmatprep.subr.bf16.mxu1 %v3561_v45  ;;  %v3068_v43 = vld [vmem:[%s12361_s4 + $0x570] sm:$0xff]  ;;  %v3587_v45 = vunpack.c.h.s8.bf16 %v3056_v14  ;;  %v3606_v19 = vunpack.c.h.s8.bf16 %v3066_v56 }
 0x1d5   :  { %4265 = vmatprep.subr.bf16.mxu0 %v3563_v35  ;;  %v3597_v35 = vunpack.c.l.s8.bf16 %v3066_v56  ;;  %v3608_v17 = vunpack.c.h.s8.bf16 %v3068_v43 }
 0x1d7   :  { %4061 = vmatpush1.bf16.msra.mxu1 %v3560_v30  ;;  %v3599_v30 = vunpack.c.l.s8.bf16 %v3068_v43 }
 0x1d8   :  { %4266 = vmatpush1.bf16.msra.mxu0 %v3562_v23  ;;  %4062 = vmatprep.subr.bf16.mxu1 %v3570_v62  ;;  %v3067_v23 = vld [vmem:[%s12361_s4 + $0x568] sm:$0xff]  ;;  %v3596_v62 = vunpack.c.l.s8.bf16 %v3065_v38 }
 0x1d9   :  { %4267 = vmatprep.subr.bf16.mxu0 %v3572_v21  ;;  %v3598_v21 = vunpack.c.l.s8.bf16 %v3067_v23  ;;  %v3607_v14 = vunpack.c.h.s8.bf16 %v3067_v23  ;;  %v3083_v23 = vld [vmem:[%s12361_s4 + $0x5e8] sm:$0xff] }
 0x1db   :  { %4063 = vmatpush1.bf16.msra.mxu1 %v3569_v12  ;;  %v3075_v12 = vld [vmem:[%s12361_s4 + $0x5a8] sm:$0xff] }
 0x1dc   :  { %4268 = vmatpush1.bf16.msra.mxu0 %v3571_v20  ;;  %4064 = vmatprep.subr.bf16.mxu1 %v3579_v29  ;;  %v3077_v20 = vld [vmem:[%s12361_s4 + $0x5b8] sm:$0xff]  ;;  %v3605_v29 = vunpack.c.h.s8.bf16 %v3065_v38  ;;  %v3624_v56 = vunpack.c.h.s8.bf16 %v3075_v12 }
 0x1dd   :  { %4269 = vmatprep.subr.bf16.mxu0 %v3581_v31  ;;  %v3615_v31 = vunpack.c.l.s8.bf16 %v3075_v12  ;;  %v3626_v43 = vunpack.c.h.s8.bf16 %v3077_v20 }
 0x1df   :  { %4065 = vmatpush1.bf16.msra.mxu1 %v3578_v46  ;;  %v3617_v46 = vunpack.c.l.s8.bf16 %v3077_v20 }
 0x1e0   :  { %4270 = vmatpush1.bf16.msra.mxu0 %v3580_v28  ;;  %4066 = vmatprep.subr.bf16.mxu1 %v3588_v26  ;;  %v3076_v28 = vld [vmem:[%s12361_s4 + $0x5b0] sm:$0xff]  ;;  %v3614_v26 = vunpack.c.l.s8.bf16 %v3074_v18 }
 0x1e1   :  { %4271 = vmatprep.subr.bf16.mxu0 %v3590_v61  ;;  %v3616_v61 = vunpack.c.l.s8.bf16 %v3076_v28  ;;  %v3625_v38 = vunpack.c.h.s8.bf16 %v3076_v28  ;;  %v3092_v28 = vld [vmem:[%s12361_s4 + $0x630] sm:$0xff] }
 0x1e3   :  { %4067 = vmatpush1.bf16.msra.mxu1 %v3587_v45  ;;  %v3084_v45 = vld [vmem:[%s12361_s4 + $0x5f0] sm:$0xff] }
 0x1e4   :  { %4272 = vmatpush1.bf16.msra.mxu0 %v3589_v47  ;;  %4068 = vmatprep.subr.bf16.mxu1 %v3597_v35  ;;  %v3086_v47 = vld [vmem:[%s12361_s4 + $0x600] sm:$0xff]  ;;  %v3623_v35 = vunpack.c.h.s8.bf16 %v3074_v18  ;;  %v3642_v12 = vunpack.c.h.s8.bf16 %v3084_v45 }
 0x1e5   :  { %4273 = vmatprep.subr.bf16.mxu0 %v3599_v30  ;;  %v3633_v30 = vunpack.c.l.s8.bf16 %v3084_v45  ;;  %v3644_v20 = vunpack.c.h.s8.bf16 %v3086_v47 }
 0x1e7   :  { %4069 = vmatpush1.bf16.msra.mxu1 %v3596_v62  ;;  %v3635_v62 = vunpack.c.l.s8.bf16 %v3086_v47 }
 0x1e8   :  { %4274 = vmatpush1.bf16.msra.mxu0 %v3598_v21  ;;  %4070 = vmatprep.subr.bf16.mxu1 %v3606_v19  ;;  %v3085_v21 = vld [vmem:[%s12361_s4 + $0x5f8] sm:$0xff]  ;;  %v3632_v19 = vunpack.c.l.s8.bf16 %v3083_v23 }
 0x1e9   :  { %4275 = vmatprep.subr.bf16.mxu0 %v3608_v17  ;;  %v3634_v17 = vunpack.c.l.s8.bf16 %v3085_v21  ;;  %v3643_v18 = vunpack.c.h.s8.bf16 %v3085_v21  ;;  %v3101_v21 = vld [vmem:[%s12361_s4 + $0x678] sm:$0xff] }
 0x1eb   :  { %4071 = vmatpush1.bf16.msra.mxu1 %v3605_v29  ;;  %v3093_v29 = vld [vmem:[%s12361_s4 + $0x638] sm:$0xff] }
 0x1ec   :  { %4276 = vmatpush1.bf16.msra.mxu0 %v3607_v14  ;;  %4072 = vmatprep.subr.bf16.mxu1 %v3615_v31  ;;  %v3095_v14 = vld [vmem:[%s12361_s4 + $0x648] sm:$0xff]  ;;  %v3641_v31 = vunpack.c.h.s8.bf16 %v3083_v23  ;;  %v3660_v45 = vunpack.c.h.s8.bf16 %v3093_v29 }
 0x1ed   :  { %4277 = vmatprep.subr.bf16.mxu0 %v3617_v46  ;;  %v3651_v46 = vunpack.c.l.s8.bf16 %v3093_v29  ;;  %v3662_v47 = vunpack.c.h.s8.bf16 %v3095_v14 }
 0x1ef   :  { %4073 = vmatpush1.bf16.msra.mxu1 %v3614_v26  ;;  %v3653_v26 = vunpack.c.l.s8.bf16 %v3095_v14 }
 0x1f0   :  { %4278 = vmatpush1.bf16.msra.mxu0 %v3616_v61  ;;  %4074 = vmatprep.subr.bf16.mxu1 %v3624_v56  ;;  %v3094_v61 = vld [vmem:[%s12361_s4 + $0x640] sm:$0xff]  ;;  %v3650_v56 = vunpack.c.l.s8.bf16 %v3092_v28 }
 0x1f1   :  { %4279 = vmatprep.subr.bf16.mxu0 %v3626_v43  ;;  %v3652_v43 = vunpack.c.l.s8.bf16 %v3094_v61  ;;  %v3661_v23 = vunpack.c.h.s8.bf16 %v3094_v61  ;;  %v3110_v61 = vld [vmem:[%s12361_s4 + $0x6c0] sm:$0xff] }
 0x1f3   :  { %4075 = vmatpush1.bf16.msra.mxu1 %v3623_v35  ;;  %v3102_v35 = vld [vmem:[%s12361_s4 + $0x680] sm:$0xff] }
 0x1f4   :  { %4280 = vmatpush1.bf16.msra.mxu0 %v3625_v38  ;;  %4076 = vmatprep.subr.bf16.mxu1 %v3633_v30  ;;  %v3104_v38 = vld [vmem:[%s12361_s4 + $0x690] sm:$0xff]  ;;  %v3659_v30 = vunpack.c.h.s8.bf16 %v3092_v28  ;;  %v3678_v29 = vunpack.c.h.s8.bf16 %v3102_v35 }
 0x1f5   :  { %4281 = vmatprep.subr.bf16.mxu0 %v3635_v62  ;;  %v3669_v62 = vunpack.c.l.s8.bf16 %v3102_v35  ;;  %v3680_v14 = vunpack.c.h.s8.bf16 %v3104_v38 }
 0x1f7   :  { %4077 = vmatpush1.bf16.msra.mxu1 %v3632_v19  ;;  %v3671_v19 = vunpack.c.l.s8.bf16 %v3104_v38 }
 0x1f8   :  { %4282 = vmatpush1.bf16.msra.mxu0 %v3634_v17  ;;  %4078 = vmatprep.subr.bf16.mxu1 %v3642_v12  ;;  %v3103_v17 = vld [vmem:[%s12361_s4 + $0x688] sm:$0xff]  ;;  %v3668_v12 = vunpack.c.l.s8.bf16 %v3101_v21 }
 0x1f9   :  { %4283 = vmatprep.subr.bf16.mxu0 %v3644_v20  ;;  %v3670_v20 = vunpack.c.l.s8.bf16 %v3103_v17  ;;  %v3679_v28 = vunpack.c.h.s8.bf16 %v3103_v17 }
 0x1fb   :  { %4079 = vmatpush1.bf16.msra.mxu1 %v3641_v31  ;;  %v3111_v31 = vld [vmem:[%s12361_s4 + $0x6c8] sm:$0xff] }
 0x1fc   :  { %4284 = vmatpush1.bf16.msra.mxu0 %v3643_v18  ;;  %4080 = vmatprep.subr.bf16.mxu1 %v3651_v46  ;;  %v3113_v18 = vld [vmem:[%s12361_s4 + $0x6d8] sm:$0xff]  ;;  %v3677_v46 = vunpack.c.h.s8.bf16 %v3101_v21  ;;  %v3696_v38 = vunpack.c.h.s8.bf16 %v3111_v31  ;;  %v3695_v21 = vunpack.c.h.s8.bf16 %v3110_v61 }
 0x1fd   :  { %4285 = vmatprep.subr.bf16.mxu0 %v3653_v26  ;;  %v3687_v26 = vunpack.c.l.s8.bf16 %v3111_v31 }
 0x1ff   :  { %4081 = vmatpush1.bf16.msra.mxu1 %v3650_v56  ;;  %v3689_v56 = vunpack.c.l.s8.bf16 %v3113_v18 }
 0x200   :  { %4286 = vmatpush1.bf16.msra.mxu0 %v3652_v43  ;;  %4082 = vmatprep.subr.bf16.mxu1 %v3660_v45  ;;  %v3112_v43 = vld [vmem:[%s12361_s4 + $0x6d0] sm:$0xff]  ;;  %v3686_v45 = vunpack.c.l.s8.bf16 %v3110_v61 }
 0x201   :  { %4287 = vmatprep.subr.bf16.mxu0 %v3662_v47  ;;  %v9807_v47 = vpack.c.bf16 %v9605_v53, %v9605_v53  ;;  %v3688_v35 = vunpack.c.l.s8.bf16 %v3112_v43  ;;  %v3122_v53 = vld [vmem:[%s12361_s4 + $0x720] sm:$0xff] }
 0x203   :  { %4083 = vmatpush1.bf16.msra.mxu1 %v3659_v30  ;;  %v3120_v30 = vld [vmem:[%s12361_s4 + $0x710] sm:$0xff] }
 0x204   :  { %4288 = vmatpush1.bf16.msra.mxu0 %v3661_v23  ;;  %4084 = vmatprep.subr.bf16.mxu1 %v3669_v62  ;;  %v9815_v23 = vpack.c.bf16 %v9559_v59, %v9559_v59  ;;  %v3698_v62 = vunpack.c.h.s8.bf16 %v3113_v18  ;;  %v3705_v17 = vunpack.c.l.s8.bf16 %v3120_v30  ;;  %v3707_v59 = vunpack.c.l.s8.bf16 %v3122_v53 }
 0x205   :  { %4289 = vmatprep.subr.bf16.mxu0 %v3671_v19  ;;  %v3697_v19 = vunpack.c.h.s8.bf16 %v3112_v43  ;;  %v3714_v31 = vunpack.c.h.s8.bf16 %v3120_v30  ;;  %v3716_v18 = vunpack.c.h.s8.bf16 %v3122_v53  ;;  %v3128_v43 = vld [vmem:[%s12361_s4 + $0x750] sm:$0xff] }
 0x207   :  { %4085 = vmatpush1.bf16.msra.mxu1 %v3668_v12  ;;  %v3119_v12 = vld [vmem:[%s12361_s4 + $0x708] sm:$0xff] }
 0x208   :  { %4290 = vmatpush1.bf16.msra.mxu0 %v3670_v20  ;;  %4086 = vmatprep.subr.bf16.mxu1 %v3678_v29  ;;  %v3121_v20 = vld [vmem:[%s12361_s4 + $0x718] sm:$0xff]  ;;  %v3704_v29 = vunpack.c.l.s8.bf16 %v3119_v12 }
 0x209   :  { %4291 = vmatprep.subr.bf16.mxu0 %v3680_v14  ;;  %v3706_v14 = vunpack.c.l.s8.bf16 %v3121_v20  ;;  %v3715_v61 = vunpack.c.h.s8.bf16 %v3121_v20  ;;  %v3137_v20 = vld [vmem:[%s12361_s4 + $0x798] sm:$0xff] }
 0x20b   :  { %4087 = vmatpush1.bf16.msra.mxu1 %v3677_v46  ;;  %v3129_v46 = vld [vmem:[%s12361_s4 + $0x758] sm:$0xff] }
 0x20c   :  { %4292 = vmatpush1.bf16.msra.mxu0 %v3679_v28  ;;  %4097 = vmatprep.subr.bf16.mxu1 %v3687_v26  ;;  %v3131_v28 = vld [vmem:[%s12361_s4 + $0x768] sm:$0xff]  ;;  %v3713_v26 = vunpack.c.h.s8.bf16 %v3119_v12 }
 0x20d   :  { %4302 = vmatprep.subr.bf16.mxu0 %v3689_v56  ;;  %v3723_v56 = vunpack.c.l.s8.bf16 %v3129_v46  ;;  %v3734_v53 = vunpack.c.h.s8.bf16 %v3131_v28 }
 0x20e   :  { %4089 = vmatmul.mubr.bf16.vlgmr.msra.gmra.mrb[24].mxu1 %v9807_v47 }
 0x20f   :  { %4294 = vmatmul.mubr.bf16.vlgmr.msra.gmra.mrb[36].mxu0 %v9807_v47  ;;  %4098 = vmatpush1.bf16.msra.mxu1 %v3686_v45  ;;  %v3725_v45 = vunpack.c.l.s8.bf16 %v3131_v28 }
 0x210   :  { %4129 = vmatprep.mubr.bf16.mxu1 %v9815_v23  ;;  %4303 = vmatpush1.bf16.msra.mxu0 %v3688_v35  ;;  %v3130_v35 = vld [vmem:[%s12361_s4 + $0x760] sm:$0xff] }
 0x211   :  { %4334 = vmatprep.mubr.bf16.mxu0 %v9815_v23  ;;  %4099 = vmatprep.subr.bf16.mxu1 %v3696_v38  ;;  %v3722_v38 = vunpack.c.l.s8.bf16 %v3128_v43  ;;  %v3724_v30 = vunpack.c.l.s8.bf16 %v3130_v35  ;;  %v3733_v12 = vunpack.c.h.s8.bf16 %v3130_v35  ;;  %v3146_v35 = vld [vmem:[%s12361_s4 + $0x7e0] sm:$0xff] }
 0x212   :  { %4304 = vmatprep.subr.bf16.mxu0 %v3698_v62  ;;  %v3732_v62 = vunpack.c.h.s8.bf16 %v3129_v46 }
 0x213   :  { %4100 = vmatpush1.bf16.msra.mxu1 %v3695_v21  ;;  %v3138_v21 = vld [vmem:[%s12361_s4 + $0x7a0] sm:$0xff] }
 0x214   :  { %4305 = vmatpush1.bf16.msra.mxu0 %v3697_v19  ;;  %4101 = vmatprep.subr.bf16.mxu1 %v3705_v17  ;;  %v3140_v19 = vld [vmem:[%s12361_s4 + $0x7b0] sm:$0xff]  ;;  %v3731_v17 = vunpack.c.h.s8.bf16 %v3128_v43  ;;  %v3750_v46 = vunpack.c.h.s8.bf16 %v3138_v21 }
 0x215   :  { %4306 = vmatprep.subr.bf16.mxu0 %v3707_v59  ;;  %v3741_v59 = vunpack.c.l.s8.bf16 %v3138_v21  ;;  %v3752_v28 = vunpack.c.h.s8.bf16 %v3140_v19 }
 0x217   :  { %4102 = vmatpush1.bf16.msra.mxu1 %v3704_v29  ;;  %v3743_v29 = vunpack.c.l.s8.bf16 %v3140_v19 }
 0x218   :  { %4307 = vmatpush1.bf16.msra.mxu0 %v3706_v14  ;;  %4103 = vmatprep.subr.bf16.mxu1 %v3714_v31  ;;  %v3139_v14 = vld [vmem:[%s12361_s4 + $0x7a8] sm:$0xff]  ;;  %v3740_v31 = vunpack.c.l.s8.bf16 %v3137_v20 }
 0x219   :  { %4308 = vmatprep.subr.bf16.mxu0 %v3716_v18  ;;  %v3742_v18 = vunpack.c.l.s8.bf16 %v3139_v14  ;;  %v3751_v43 = vunpack.c.h.s8.bf16 %v3139_v14  ;;  %v3155_v14 = vld [vmem:[%s12361_s4 + $0x828] sm:$0xff] }
 0x21b   :  { %4104 = vmatpush1.bf16.msra.mxu1 %v3713_v26  ;;  %v3147_v26 = vld [vmem:[%s12361_s4 + $0x7e8] sm:$0xff] }
 0x21c   :  { %4309 = vmatpush1.bf16.msra.mxu0 %v3715_v61  ;;  %4105 = vmatprep.subr.bf16.mxu1 %v3723_v56  ;;  %v3149_v61 = vld [vmem:[%s12361_s4 + $0x7f8] sm:$0xff]  ;;  %v3749_v56 = vunpack.c.h.s8.bf16 %v3137_v20  ;;  %v3768_v21 = vunpack.c.h.s8.bf16 %v3147_v26 }
 0x21d   :  { %4310 = vmatprep.subr.bf16.mxu0 %v3725_v45  ;;  %v3759_v45 = vunpack.c.l.s8.bf16 %v3147_v26  ;;  %v3770_v19 = vunpack.c.h.s8.bf16 %v3149_v61 }
 0x21f   :  { %4106 = vmatpush1.bf16.msra.mxu1 %v3722_v38  ;;  %v3761_v38 = vunpack.c.l.s8.bf16 %v3149_v61 }
 0x220   :  { %4311 = vmatpush1.bf16.msra.mxu0 %v3724_v30  ;;  %4107 = vmatprep.subr.bf16.mxu1 %v3732_v62  ;;  %v3148_v30 = vld [vmem:[%s12361_s4 + $0x7f0] sm:$0xff]  ;;  %v3758_v62 = vunpack.c.l.s8.bf16 %v3146_v35 }
 0x221   :  { %4312 = vmatprep.subr.bf16.mxu0 %v3734_v53  ;;  %v3760_v53 = vunpack.c.l.s8.bf16 %v3148_v30  ;;  %v3769_v20 = vunpack.c.h.s8.bf16 %v3148_v30  ;;  %v3164_v30 = vld [vmem:[%s12361_s4 + $0x870] sm:$0xff] }
 0x223   :  { %4108 = vmatpush1.bf16.msra.mxu1 %v3731_v17  ;;  %v3156_v17 = vld [vmem:[%s12361_s4 + $0x830] sm:$0xff] }
 0x224   :  { %4313 = vmatpush1.bf16.msra.mxu0 %v3733_v12  ;;  %4109 = vmatprep.subr.bf16.mxu1 %v3741_v59  ;;  %v3158_v12 = vld [vmem:[%s12361_s4 + $0x840] sm:$0xff]  ;;  %v3767_v59 = vunpack.c.h.s8.bf16 %v3146_v35  ;;  %v3786_v26 = vunpack.c.h.s8.bf16 %v3156_v17 }
 0x225   :  { %4314 = vmatprep.subr.bf16.mxu0 %v3743_v29  ;;  %v3777_v29 = vunpack.c.l.s8.bf16 %v3156_v17  ;;  %v3788_v61 = vunpack.c.h.s8.bf16 %v3158_v12 }
 0x227   :  { %4110 = vmatpush1.bf16.msra.mxu1 %v3740_v31  ;;  %v3779_v31 = vunpack.c.l.s8.bf16 %v3158_v12 }
 0x228   :  { %4315 = vmatpush1.bf16.msra.mxu0 %v3742_v18  ;;  %4111 = vmatprep.subr.bf16.mxu1 %v3750_v46  ;;  %v3157_v18 = vld [vmem:[%s12361_s4 + $0x838] sm:$0xff]  ;;  %v3776_v46 = vunpack.c.l.s8.bf16 %v3155_v14 }
 0x229   :  { %4316 = vmatprep.subr.bf16.mxu0 %v3752_v28  ;;  %v3778_v28 = vunpack.c.l.s8.bf16 %v3157_v18  ;;  %v3787_v35 = vunpack.c.h.s8.bf16 %v3157_v18  ;;  %v3173_v18 = vld [vmem:[%s12361_s4 + $0x8b8] sm:$0xff] }
 0x22b   :  { %4112 = vmatpush1.bf16.msra.mxu1 %v3749_v56  ;;  %v3165_v56 = vld [vmem:[%s12361_s4 + $0x878] sm:$0xff] }
 0x22c   :  { %4317 = vmatpush1.bf16.msra.mxu0 %v3751_v43  ;;  %4113 = vmatprep.subr.bf16.mxu1 %v3759_v45  ;;  %v3167_v43 = vld [vmem:[%s12361_s4 + $0x888] sm:$0xff]  ;;  %v3785_v45 = vunpack.c.h.s8.bf16 %v3155_v14  ;;  %v3804_v17 = vunpack.c.h.s8.bf16 %v3165_v56 }
 0x22d   :  { %4318 = vmatprep.subr.bf16.mxu0 %v3761_v38  ;;  %v3795_v38 = vunpack.c.l.s8.bf16 %v3165_v56  ;;  %v3806_v12 = vunpack.c.h.s8.bf16 %v3167_v43 }
 0x22f   :  { %4114 = vmatpush1.bf16.msra.mxu1 %v3758_v62  ;;  %v3797_v62 = vunpack.c.l.s8.bf16 %v3167_v43 }
 0x230   :  { %4319 = vmatpush1.bf16.msra.mxu0 %v3760_v53  ;;  %4115 = vmatprep.subr.bf16.mxu1 %v3768_v21  ;;  %v3166_v53 = vld [vmem:[%s12361_s4 + $0x880] sm:$0xff]  ;;  %v3794_v21 = vunpack.c.l.s8.bf16 %v3164_v30 }
 0x231   :  { %4320 = vmatprep.subr.bf16.mxu0 %v3770_v19  ;;  %v3796_v19 = vunpack.c.l.s8.bf16 %v3166_v53  ;;  %v3805_v14 = vunpack.c.h.s8.bf16 %v3166_v53  ;;  %v3182_v53 = vld [vmem:[%s12361_s4 + $0x900] sm:$0xff] }
 0x233   :  { %4116 = vmatpush1.bf16.msra.mxu1 %v3767_v59  ;;  %v3174_v59 = vld [vmem:[%s12361_s4 + $0x8c0] sm:$0xff] }
 0x234   :  { %4321 = vmatpush1.bf16.msra.mxu0 %v3769_v20  ;;  %4117 = vmatprep.subr.bf16.mxu1 %v3777_v29  ;;  %v3176_v20 = vld [vmem:[%s12361_s4 + $0x8d0] sm:$0xff]  ;;  %v3803_v29 = vunpack.c.h.s8.bf16 %v3164_v30  ;;  %v3822_v56 = vunpack.c.h.s8.bf16 %v3174_v59 }
 0x235   :  { %4322 = vmatprep.subr.bf16.mxu0 %v3779_v31  ;;  %v3813_v31 = vunpack.c.l.s8.bf16 %v3174_v59  ;;  %v3824_v43 = vunpack.c.h.s8.bf16 %v3176_v20 }
 0x237   :  { %4118 = vmatpush1.bf16.msra.mxu1 %v3776_v46  ;;  %v3815_v46 = vunpack.c.l.s8.bf16 %v3176_v20 }
 0x238   :  { %4323 = vmatpush1.bf16.msra.mxu0 %v3778_v28  ;;  %4119 = vmatprep.subr.bf16.mxu1 %v3786_v26  ;;  %v3175_v28 = vld [vmem:[%s12361_s4 + $0x8c8] sm:$0xff]  ;;  %v3812_v26 = vunpack.c.l.s8.bf16 %v3173_v18 }
 0x239   :  { %4324 = vmatprep.subr.bf16.mxu0 %v3788_v61  ;;  %v3814_v61 = vunpack.c.l.s8.bf16 %v3175_v28  ;;  %v3823_v30 = vunpack.c.h.s8.bf16 %v3175_v28 }
 0x23b   :  { %4120 = vmatpush1.bf16.msra.mxu1 %v3785_v45  ;;  %v3183_v45 = vld [vmem:[%s12361_s4 + $0x908] sm:$0xff] }
 0x23c   :  { %4325 = vmatpush1.bf16.msra.mxu0 %v3787_v35  ;;  %4121 = vmatprep.subr.bf16.mxu1 %v3795_v38  ;;  %v3185_v35 = vld [vmem:[%s12361_s4 + $0x918] sm:$0xff]  ;;  %v3821_v38 = vunpack.c.h.s8.bf16 %v3173_v18  ;;  %v3840_v20 = vunpack.c.h.s8.bf16 %v3183_v45  ;;  %v3839_v18 = vunpack.c.h.s8.bf16 %v3182_v53 }
 0x23d   :  { %4326 = vmatprep.subr.bf16.mxu0 %v3797_v62  ;;  %v3831_v62 = vunpack.c.l.s8.bf16 %v3183_v45 }
 0x23f   :  { %4122 = vmatpush1.bf16.msra.mxu1 %v3794_v21  ;;  %v3833_v21 = vunpack.c.l.s8.bf16 %v3185_v35 }
 0x240   :  { %4327 = vmatpush1.bf16.msra.mxu0 %v3796_v19  ;;  %4123 = vmatprep.subr.bf16.mxu1 %v3804_v17  ;;  %v3184_v19 = vld [vmem:[%s12361_s4 + $0x910] sm:$0xff]  ;;  %v3830_v17 = vunpack.c.l.s8.bf16 %v3182_v53 }
 0x241   :  { %4328 = vmatprep.subr.bf16.mxu0 %v3806_v12  ;;  %v9915_v12 = vpack.c.bf16 %v9557_v24, %v9557_v24  ;;  %v3832_v59 = vunpack.c.l.s8.bf16 %v3184_v19  ;;  %v3194_v24 = vld [vmem:[%s12361_s4 + $0x960] sm:$0xff] }
 0x243   :  { %4124 = vmatpush1.bf16.msra.mxu1 %v3803_v29  ;;  %v3192_v29 = vld [vmem:[%s12361_s4 + $0x950] sm:$0xff] }
 0x244   :  { %4329 = vmatpush1.bf16.msra.mxu0 %v3805_v14  ;;  %4125 = vmatprep.subr.bf16.mxu1 %v3813_v31  ;;  %v9923_v14 = vpack.c.bf16 %v9635_v54, %v9635_v54  ;;  %v3842_v31 = vunpack.c.h.s8.bf16 %v3185_v35  ;;  %v3849_v28 = vunpack.c.l.s8.bf16 %v3192_v29  ;;  %v3851_v54 = vunpack.c.l.s8.bf16 %v3194_v24 }
 0x245   :  { %4330 = vmatprep.subr.bf16.mxu0 %v3815_v46  ;;  %v3841_v46 = vunpack.c.h.s8.bf16 %v3184_v19  ;;  %v3858_v45 = vunpack.c.h.s8.bf16 %v3192_v29  ;;  %v3860_v35 = vunpack.c.h.s8.bf16 %v3194_v24  ;;  %v3200_v19 = vld [vmem:[%s12361_s4 + $0x990] sm:$0xff] }
 0x247   :  { %4126 = vmatpush1.bf16.msra.mxu1 %v3812_v26  ;;  %v3191_v26 = vld [vmem:[%s12361_s4 + $0x948] sm:$0xff] }
 0x248   :  { %4331 = vmatpush1.bf16.msra.mxu0 %v3814_v61  ;;  %4127 = vmatprep.subr.bf16.mxu1 %v3822_v56  ;;  %v3193_v61 = vld [vmem:[%s12361_s4 + $0x958] sm:$0xff]  ;;  %v3848_v56 = vunpack.c.l.s8.bf16 %v3191_v26 }
 0x249   :  { %4332 = vmatprep.subr.bf16.mxu0 %v3824_v43  ;;  %v3850_v43 = vunpack.c.l.s8.bf16 %v3193_v61  ;;  %v3859_v53 = vunpack.c.h.s8.bf16 %v3193_v61  ;;  %v3209_v61 = vld [vmem:[%s12361_s4 + $0x9d8] sm:$0xff] }
 0x24b   :  { %4128 = vmatpush1.bf16.msra.mxu1 %v3821_v38  ;;  %v3201_v38 = vld [vmem:[%s12361_s4 + $0x998] sm:$0xff] }
 0x24c   :  { %4333 = vmatpush1.bf16.msra.mxu0 %v3823_v30  ;;  %4138 = vmatprep.subr.bf16.mxu1 %v3831_v62  ;;  %v3203_v30 = vld [vmem:[%s12361_s4 + $0x9a8] sm:$0xff]  ;;  %v3857_v62 = vunpack.c.h.s8.bf16 %v3191_v26 }
 0x24d   :  { %4343 = vmatprep.subr.bf16.mxu0 %v3833_v21  ;;  %v3867_v21 = vunpack.c.l.s8.bf16 %v3201_v38  ;;  %v3878_v24 = vunpack.c.h.s8.bf16 %v3203_v30 }
 0x24e   :  { %4130 = vmatmul.mubr.bf16.vlgmr.msra.gmra.mrb[24].mxu1 %v9915_v12 }
 0x24f   :  { %4335 = vmatmul.mubr.bf16.vlgmr.msra.gmra.mrb[36].mxu0 %v9915_v12  ;;  %4139 = vmatpush1.bf16.msra.mxu1 %v3830_v17  ;;  %v3869_v17 = vunpack.c.l.s8.bf16 %v3203_v30 }
 0x250   :  { %4170 = vmatprep.mubr.bf16.mxu1 %v9923_v14  ;;  %4344 = vmatpush1.bf16.msra.mxu0 %v3832_v59  ;;  %v3202_v59 = vld [vmem:[%s12361_s4 + $0x9a0] sm:$0xff] }
 0x251   :  { %4375 = vmatprep.mubr.bf16.mxu0 %v9923_v14  ;;  %4140 = vmatprep.subr.bf16.mxu1 %v3840_v20  ;;  %v3866_v20 = vunpack.c.l.s8.bf16 %v3200_v19  ;;  %v3868_v29 = vunpack.c.l.s8.bf16 %v3202_v59  ;;  %v3877_v26 = vunpack.c.h.s8.bf16 %v3202_v59  ;;  %v3218_v59 = vld [vmem:[%s12361_s4 + $0xa20] sm:$0xff] }
 0x252   :  { %4345 = vmatprep.subr.bf16.mxu0 %v3842_v31  ;;  %v3876_v31 = vunpack.c.h.s8.bf16 %v3201_v38 }
 0x253   :  { %4141 = vmatpush1.bf16.msra.mxu1 %v3839_v18  ;;  %v3210_v18 = vld [vmem:[%s12361_s4 + $0x9e0] sm:$0xff] }
 0x254   :  { %4346 = vmatpush1.bf16.msra.mxu0 %v3841_v46  ;;  %4142 = vmatprep.subr.bf16.mxu1 %v3849_v28  ;;  %v3212_v46 = vld [vmem:[%s12361_s4 + $0x9f0] sm:$0xff]  ;;  %v3875_v28 = vunpack.c.h.s8.bf16 %v3200_v19  ;;  %v3894_v38 = vunpack.c.h.s8.bf16 %v3210_v18 }
 0x255   :  { %4347 = vmatprep.subr.bf16.mxu0 %v3851_v54  ;;  %v3885_v54 = vunpack.c.l.s8.bf16 %v3210_v18  ;;  %v3896_v30 = vunpack.c.h.s8.bf16 %v3212_v46 }
 0x257   :  { %4143 = vmatpush1.bf16.msra.mxu1 %v3848_v56  ;;  %v3887_v56 = vunpack.c.l.s8.bf16 %v3212_v46 }
 0x258   :  { %4348 = vmatpush1.bf16.msra.mxu0 %v3850_v43  ;;  %4144 = vmatprep.subr.bf16.mxu1 %v3858_v45  ;;  %v3211_v43 = vld [vmem:[%s12361_s4 + $0x9e8] sm:$0xff]  ;;  %v3884_v45 = vunpack.c.l.s8.bf16 %v3209_v61 }
 0x259   :  { %4349 = vmatprep.subr.bf16.mxu0 %v3860_v35  ;;  %v3886_v35 = vunpack.c.l.s8.bf16 %v3211_v43  ;;  %v3895_v19 = vunpack.c.h.s8.bf16 %v3211_v43  ;;  %v3227_v43 = vld [vmem:[%s12361_s4 + $0xa68] sm:$0xff] }
 0x25b   :  { %4145 = vmatpush1.bf16.msra.mxu1 %v3857_v62  ;;  %v3219_v62 = vld [vmem:[%s12361_s4 + $0xa28] sm:$0xff] }
 0x25c   :  { %4350 = vmatpush1.bf16.msra.mxu0 %v3859_v53  ;;  %4146 = vmatprep.subr.bf16.mxu1 %v3867_v21  ;;  %v3221_v53 = vld [vmem:[%s12361_s4 + $0xa38] sm:$0xff]  ;;  %v3893_v21 = vunpack.c.h.s8.bf16 %v3209_v61  ;;  %v3912_v18 = vunpack.c.h.s8.bf16 %v3219_v62 }
 0x25d   :  { %4351 = vmatprep.subr.bf16.mxu0 %v3869_v17  ;;  %v3903_v17 = vunpack.c.l.s8.bf16 %v3219_v62  ;;  %v3914_v46 = vunpack.c.h.s8.bf16 %v3221_v53 }
 0x25f   :  { %4147 = vmatpush1.bf16.msra.mxu1 %v3866_v20  ;;  %v3905_v20 = vunpack.c.l.s8.bf16 %v3221_v53 }
 0x260   :  { %4352 = vmatpush1.bf16.msra.mxu0 %v3868_v29  ;;  %4148 = vmatprep.subr.bf16.mxu1 %v3876_v31  ;;  %v3220_v29 = vld [vmem:[%s12361_s4 + $0xa30] sm:$0xff]  ;;  %v3902_v31 = vunpack.c.l.s8.bf16 %v3218_v59 }
 0x261   :  { %4353 = vmatprep.subr.bf16.mxu0 %v3878_v24  ;;  %v3904_v24 = vunpack.c.l.s8.bf16 %v3220_v29  ;;  %v3913_v61 = vunpack.c.h.s8.bf16 %v3220_v29  ;;  %v3236_v29 = vld [vmem:[%s12361_s4 + $0xab0] sm:$0xff] }
 0x263   :  { %4149 = vmatpush1.bf16.msra.mxu1 %v3875_v28  ;;  %v3228_v28 = vld [vmem:[%s12361_s4 + $0xa70] sm:$0xff] }
 0x264   :  { %4354 = vmatpush1.bf16.msra.mxu0 %v3877_v26  ;;  %4150 = vmatprep.subr.bf16.mxu1 %v3885_v54  ;;  %v3230_v26 = vld [vmem:[%s12361_s4 + $0xa80] sm:$0xff]  ;;  %v3911_v54 = vunpack.c.h.s8.bf16 %v3218_v59  ;;  %v3930_v62 = vunpack.c.h.s8.bf16 %v3228_v28 }
 0x265   :  { %4355 = vmatprep.subr.bf16.mxu0 %v3887_v56  ;;  %v3921_v56 = vunpack.c.l.s8.bf16 %v3228_v28  ;;  %v3932_v53 = vunpack.c.h.s8.bf16 %v3230_v26 }
 0x267   :  { %4151 = vmatpush1.bf16.msra.mxu1 %v3884_v45  ;;  %v3923_v45 = vunpack.c.l.s8.bf16 %v3230_v26 }
 0x268   :  { %4356 = vmatpush1.bf16.msra.mxu0 %v3886_v35  ;;  %4152 = vmatprep.subr.bf16.mxu1 %v3894_v38  ;;  %v3229_v35 = vld [vmem:[%s12361_s4 + $0xa78] sm:$0xff]  ;;  %v3920_v38 = vunpack.c.l.s8.bf16 %v3227_v43 }
 0x269   :  { %4357 = vmatprep.subr.bf16.mxu0 %v3896_v30  ;;  %v3922_v30 = vunpack.c.l.s8.bf16 %v3229_v35  ;;  %v3931_v59 = vunpack.c.h.s8.bf16 %v3229_v35  ;;  %v3245_v35 = vld [vmem:[%s12361_s4 + $0xaf8] sm:$0xff] }
 0x26b   :  { %4153 = vmatpush1.bf16.msra.mxu1 %v3893_v21  ;;  %v3237_v21 = vld [vmem:[%s12361_s4 + $0xab8] sm:$0xff] }
 0x26c   :  { %4358 = vmatpush1.bf16.msra.mxu0 %v3895_v19  ;;  %4154 = vmatprep.subr.bf16.mxu1 %v3903_v17  ;;  %v3239_v19 = vld [vmem:[%s12361_s4 + $0xac8] sm:$0xff]  ;;  %v3929_v17 = vunpack.c.h.s8.bf16 %v3227_v43  ;;  %v3948_v28 = vunpack.c.h.s8.bf16 %v3237_v21 }
 0x26d   :  { %4359 = vmatprep.subr.bf16.mxu0 %v3905_v20  ;;  %v3939_v20 = vunpack.c.l.s8.bf16 %v3237_v21  ;;  %v3950_v26 = vunpack.c.h.s8.bf16 %v3239_v19 }
 0x26f   :  { %4155 = vmatpush1.bf16.msra.mxu1 %v3902_v31  ;;  %v3941_v31 = vunpack.c.l.s8.bf16 %v3239_v19 }
 0x270   :  { %4360 = vmatpush1.bf16.msra.mxu0 %v3904_v24  ;;  %4156 = vmatprep.subr.bf16.mxu1 %v3912_v18  ;;  %v3238_v24 = vld [vmem:[%s12361_s4 + $0xac0] sm:$0xff]  ;;  %v3938_v18 = vunpack.c.l.s8.bf16 %v3236_v29 }
 0x271   :  { %4361 = vmatprep.subr.bf16.mxu0 %v3914_v46  ;;  %v3940_v46 = vunpack.c.l.s8.bf16 %v3238_v24  ;;  %v3949_v43 = vunpack.c.h.s8.bf16 %v3238_v24  ;;  %v2898_v24 = vld [vmem:[%s12361_s4 + $0x20] sm:$0xff] }
 0x273   :  { %4157 = vmatpush1.bf16.msra.mxu1 %v3911_v54  ;;  %v3246_v54 = vld [vmem:[%s12361_s4 + $0xb00] sm:$0xff] }
 0x274   :  { %4362 = vmatpush1.bf16.msra.mxu0 %v3913_v61  ;;  %4158 = vmatprep.subr.bf16.mxu1 %v3921_v56  ;;  %v3248_v61 = vld [vmem:[%s12361_s4 + $0xb10] sm:$0xff]  ;;  %v3947_v56 = vunpack.c.h.s8.bf16 %v3236_v29  ;;  %v3966_v21 = vunpack.c.h.s8.bf16 %v3246_v54 }
 0x275   :  { %4363 = vmatprep.subr.bf16.mxu0 %v3923_v45  ;;  %v3957_v45 = vunpack.c.l.s8.bf16 %v3246_v54  ;;  %v3968_v19 = vunpack.c.h.s8.bf16 %v3248_v61 }
 0x277   :  { %4159 = vmatpush1.bf16.msra.mxu1 %v3920_v38  ;;  %v3959_v38 = vunpack.c.l.s8.bf16 %v3248_v61 }
 0x278   :  { %4364 = vmatpush1.bf16.msra.mxu0 %v3922_v30  ;;  %4160 = vmatprep.subr.bf16.mxu1 %v3930_v62  ;;  %v3247_v30 = vld [vmem:[%s12361_s4 + $0xb08] sm:$0xff]  ;;  %v3956_v62 = vunpack.c.l.s8.bf16 %v3245_v35 }
 0x279   :  { %4365 = vmatprep.subr.bf16.mxu0 %v3932_v53  ;;  %v3958_v53 = vunpack.c.l.s8.bf16 %v3247_v30  ;;  %v3967_v29 = vunpack.c.h.s8.bf16 %v3247_v30  ;;  %v2907_v30 = vld [vmem:[%s12361_s4 + $0x68] sm:$0xff] }
 0x27b   :  { %4161 = vmatpush1.bf16.msra.mxu1 %v3929_v17  ;;  %v2899_v17 = vld [vmem:[%s12361_s4 + $0x28] sm:$0xff] }
 0x27c   :  { %4366 = vmatpush1.bf16.msra.mxu0 %v3931_v59  ;;  %4162 = vmatprep.subr.bf16.mxu1 %v3939_v20  ;;  %v2901_v59 = vld [vmem:[%s12361_s4 + $0x38] sm:$0xff]  ;;  %v3965_v20 = vunpack.c.h.s8.bf16 %v3245_v35  ;;  %v3268_v61 = vunpack.c.h.s8.bf16 %v2899_v17 }
 0x27d   :  { %4367 = vmatprep.subr.bf16.mxu0 %v3941_v31  ;;  %v3259_v31 = vunpack.c.l.s8.bf16 %v2899_v17 }
 0x27f   :  { %4163 = vmatpush1.bf16.msra.mxu1 %v3938_v18  ;;  %v3261_v18 = vunpack.c.l.s8.bf16 %v2901_v59 }
 0x280   :  { %4368 = vmatpush1.bf16.msra.mxu0 %v3940_v46  ;;  %4164 = vmatprep.subr.bf16.mxu1 %v3948_v28  ;;  %v2900_v46 = vld [vmem:[%s12361_s4 + $0x30] sm:$0xff]  ;;  %v3258_v28 = vunpack.c.l.s8.bf16 %v2898_v24 }
 0x281   :  { %4369 = vmatprep.subr.bf16.mxu0 %v3950_v26  ;;  %v10023_v26 = vpack.c.bf16 %v9633_v27, %v9633_v27  ;;  %v3260_v54 = vunpack.c.l.s8.bf16 %v2900_v46  ;;  %v3267_v27 = vunpack.c.h.s8.bf16 %v2898_v24  ;;  %v3269_v35 = vunpack.c.h.s8.bf16 %v2900_v46  ;;  %v2916_v46 = vld [vmem:[%s12361_s4 + $0xb0] sm:$0xff] }
 0x283   :  { %4165 = vmatpush1.bf16.msra.mxu1 %v3947_v56  ;;  %v2908_v56 = vld [vmem:[%s12361_s4 + $0x70] sm:$0xff] }
 0x284   :  { %4370 = vmatpush1.bf16.msra.mxu0 %v3949_v43  ;;  %4166 = vmatprep.subr.bf16.mxu1 %v3957_v45  ;;  %v3270_v43 = vunpack.c.h.s8.bf16 %v2901_v59  ;;  %v2910_v45 = vld [vmem:[%s12361_s4 + $0x80] sm:$0xff]  ;;  %v3286_v17 = vunpack.c.h.s8.bf16 %v2908_v56 }
 0x285   :  { %4371 = vmatprep.subr.bf16.mxu0 %v3959_v38  ;;  %v3277_v38 = vunpack.c.l.s8.bf16 %v2908_v56  ;;  %v3288_v59 = vunpack.c.h.s8.bf16 %v2910_v45 }
 0x287   :  { %4167 = vmatpush1.bf16.msra.mxu1 %v3956_v62  ;;  %v3279_v62 = vunpack.c.l.s8.bf16 %v2910_v45 }
 0x288   :  { %4372 = vmatpush1.bf16.msra.mxu0 %v3958_v53  ;;  %4168 = vmatprep.subr.bf16.mxu1 %v3966_v21  ;;  %v2909_v53 = vld [vmem:[%s12361_s4 + $0x78] sm:$0xff]  ;;  %v3276_v21 = vunpack.c.l.s8.bf16 %v2907_v30 }
 0x289   :  { %4373 = vmatprep.subr.bf16.mxu0 %v3968_v19  ;;  %v3278_v19 = vunpack.c.l.s8.bf16 %v2909_v53  ;;  %v3287_v24 = vunpack.c.h.s8.bf16 %v2909_v53  ;;  %v2925_v53 = vld [vmem:[%s12361_s4 + $0xf8] sm:$0xff] }
 0x28b   :  { %4169 = vmatpush1.bf16.msra.mxu1 %v3965_v20  ;;  %v2917_v20 = vld [vmem:[%s12361_s4 + $0xb8] sm:$0xff] }
 0x28c   :  { %4374 = vmatpush1.bf16.msra.mxu0 %v3967_v29  ;;  %4384 = vmatprep.subr.bf16.mxu1 %v3259_v31  ;;  %v2919_v29 = vld [vmem:[%s12361_s4 + $0xc8] sm:$0xff]  ;;  %v3285_v31 = vunpack.c.h.s8.bf16 %v2907_v30 }
 0x28d   :  { %4589 = vmatprep.subr.bf16.mxu0 %v3261_v18  ;;  %v3295_v18 = vunpack.c.l.s8.bf16 %v2917_v20  ;;  %v3306_v45 = vunpack.c.h.s8.bf16 %v2919_v29 }
 0x28e   :  { %4171 = vmatmul.mubr.bf16.vlgmr.msra.gmra.mrb[24].mxu1 %v10023_v26 }
 0x28f   :  { %4376 = vmatmul.mubr.bf16.vlgmr.msra.gmra.mrb[36].mxu0 %v10023_v26  ;;  %4385 = vmatpush1.bf16.msra.mxu1 %v3258_v28  ;;  %v3297_v28 = vunpack.c.l.s8.bf16 %v2919_v29 }
 0x290   :  { %4416 = vmatprep.mubr.bf16.mxu1 %v9573_v55  ;;  %4590 = vmatpush1.bf16.msra.mxu0 %v3260_v54  ;;  %v2918_v54 = vld [vmem:[%s12361_s4 + $0xc0] sm:$0xff] }
 0x291   :  { %4621 = vmatprep.mubr.bf16.mxu0 %v9573_v55  ;;  %4386 = vmatprep.subr.bf16.mxu1 %v3268_v61  ;;  %v3294_v61 = vunpack.c.l.s8.bf16 %v2916_v46  ;;  %v3296_v56 = vunpack.c.l.s8.bf16 %v2918_v54  ;;  %v3305_v30 = vunpack.c.h.s8.bf16 %v2918_v54  ;;  %v2934_v54 = vld [vmem:[%s12361_s4 + $0x140] sm:$0xff] }
 0x292   :  { %4591 = vmatprep.subr.bf16.mxu0 %v3270_v43  ;;  %v3304_v43 = vunpack.c.h.s8.bf16 %v2917_v20 }
 0x293   :  { %4387 = vmatpush1.bf16.msra.mxu1 %v3267_v27  ;;  %v2926_v27 = vld [vmem:[%s12361_s4 + $0x100] sm:$0xff] }
 0x294   :  { %4592 = vmatpush1.bf16.msra.mxu0 %v3269_v35  ;;  %4388 = vmatprep.subr.bf16.mxu1 %v3277_v38  ;;  %v2928_v35 = vld [vmem:[%s12361_s4 + $0x110] sm:$0xff]  ;;  %v3303_v38 = vunpack.c.h.s8.bf16 %v2916_v46  ;;  %v3322_v20 = vunpack.c.h.s8.bf16 %v2926_v27 }
 0x295   :  { %4593 = vmatprep.subr.bf16.mxu0 %v3279_v62  ;;  %v3313_v62 = vunpack.c.l.s8.bf16 %v2926_v27  ;;  %v3324_v29 = vunpack.c.h.s8.bf16 %v2928_v35 }
 0x297   :  { %4389 = vmatpush1.bf16.msra.mxu1 %v3276_v21  ;;  %v3315_v21 = vunpack.c.l.s8.bf16 %v2928_v35 }
 0x298   :  { %4594 = vmatpush1.bf16.msra.mxu0 %v3278_v19  ;;  %4390 = vmatprep.subr.bf16.mxu1 %v3286_v17  ;;  %v2927_v19 = vld [vmem:[%s12361_s4 + $0x108] sm:$0xff]  ;;  %v3312_v17 = vunpack.c.l.s8.bf16 %v2925_v53 }
 0x299   :  { %4595 = vmatprep.subr.bf16.mxu0 %v3288_v59  ;;  %v3314_v59 = vunpack.c.l.s8.bf16 %v2927_v19  ;;  %v3323_v46 = vunpack.c.h.s8.bf16 %v2927_v19  ;;  %v2943_v19 = vld [vmem:[%s12361_s4 + $0x188] sm:$0xff] }
 0x29b   :  { %4391 = vmatpush1.bf16.msra.mxu1 %v3285_v31  ;;  %v2935_v31 = vld [vmem:[%s12361_s4 + $0x148] sm:$0xff] }
 0x29c   :  { %4596 = vmatpush1.bf16.msra.mxu0 %v3287_v24  ;;  %4392 = vmatprep.subr.bf16.mxu1 %v3295_v18  ;;  %v2937_v24 = vld [vmem:[%s12361_s4 + $0x158] sm:$0xff]  ;;  %v3321_v18 = vunpack.c.h.s8.bf16 %v2925_v53  ;;  %v3340_v27 = vunpack.c.h.s8.bf16 %v2935_v31 }
 0x29d   :  { %4597 = vmatprep.subr.bf16.mxu0 %v3297_v28  ;;  %v3331_v28 = vunpack.c.l.s8.bf16 %v2935_v31  ;;  %v3342_v35 = vunpack.c.h.s8.bf16 %v2937_v24 }
 0x29f   :  { %4393 = vmatpush1.bf16.msra.mxu1 %v3294_v61  ;;  %v3333_v61 = vunpack.c.l.s8.bf16 %v2937_v24 }
 0x2a0   :  { %4598 = vmatpush1.bf16.msra.mxu0 %v3296_v56  ;;  %4394 = vmatprep.subr.bf16.mxu1 %v3304_v43  ;;  %v2936_v56 = vld [vmem:[%s12361_s4 + $0x150] sm:$0xff]  ;;  %v3330_v43 = vunpack.c.l.s8.bf16 %v2934_v54 }
 0x2a1   :  { %4599 = vmatprep.subr.bf16.mxu0 %v3306_v45  ;;  %v3332_v45 = vunpack.c.l.s8.bf16 %v2936_v56  ;;  %v3341_v53 = vunpack.c.h.s8.bf16 %v2936_v56  ;;  %v2952_v56 = vld [vmem:[%s12361_s4 + $0x1d0] sm:$0xff] }
 0x2a3   :  { %4395 = vmatpush1.bf16.msra.mxu1 %v3303_v38  ;;  %v2944_v38 = vld [vmem:[%s12361_s4 + $0x190] sm:$0xff] }
 0x2a4   :  { %4600 = vmatpush1.bf16.msra.mxu0 %v3305_v30  ;;  %4396 = vmatprep.subr.bf16.mxu1 %v3313_v62  ;;  %v2946_v30 = vld [vmem:[%s12361_s4 + $0x1a0] sm:$0xff]  ;;  %v3339_v62 = vunpack.c.h.s8.bf16 %v2934_v54  ;;  %v3358_v31 = vunpack.c.h.s8.bf16 %v2944_v38 }
 0x2a5   :  { %4601 = vmatprep.subr.bf16.mxu0 %v3315_v21  ;;  %v3349_v21 = vunpack.c.l.s8.bf16 %v2944_v38  ;;  %v3360_v24 = vunpack.c.h.s8.bf16 %v2946_v30 }
 0x2a7   :  { %4397 = vmatpush1.bf16.msra.mxu1 %v3312_v17  ;;  %v3351_v17 = vunpack.c.l.s8.bf16 %v2946_v30 }
 0x2a8   :  { %4602 = vmatpush1.bf16.msra.mxu0 %v3314_v59  ;;  %4398 = vmatprep.subr.bf16.mxu1 %v3322_v20  ;;  %v2945_v59 = vld [vmem:[%s12361_s4 + $0x198] sm:$0xff]  ;;  %v3348_v20 = vunpack.c.l.s8.bf16 %v2943_v19 }
 0x2a9   :  { %4603 = vmatprep.subr.bf16.mxu0 %v3324_v29  ;;  %v3350_v29 = vunpack.c.l.s8.bf16 %v2945_v59  ;;  %v3359_v54 = vunpack.c.h.s8.bf16 %v2945_v59  ;;  %v2961_v59 = vld [vmem:[%s12361_s4 + $0x218] sm:$0xff] }
 0x2ab   :  { %4399 = vmatpush1.bf16.msra.mxu1 %v3321_v18  ;;  %v2953_v18 = vld [vmem:[%s12361_s4 + $0x1d8] sm:$0xff] }
 0x2ac   :  { %4604 = vmatpush1.bf16.msra.mxu0 %v3323_v46  ;;  %4400 = vmatprep.subr.bf16.mxu1 %v3331_v28  ;;  %v2955_v46 = vld [vmem:[%s12361_s4 + $0x1e8] sm:$0xff]  ;;  %v3357_v28 = vunpack.c.h.s8.bf16 %v2943_v19  ;;  %v3376_v38 = vunpack.c.h.s8.bf16 %v2953_v18 }
 0x2ad   :  { %4605 = vmatprep.subr.bf16.mxu0 %v3333_v61  ;;  %v3367_v61 = vunpack.c.l.s8.bf16 %v2953_v18  ;;  %v3378_v30 = vunpack.c.h.s8.bf16 %v2955_v46 }
 0x2af   :  { %4401 = vmatpush1.bf16.msra.mxu1 %v3330_v43  ;;  %v3369_v43 = vunpack.c.l.s8.bf16 %v2955_v46 }
 0x2b0   :  { %4606 = vmatpush1.bf16.msra.mxu0 %v3332_v45  ;;  %4402 = vmatprep.subr.bf16.mxu1 %v3340_v27  ;;  %v2954_v45 = vld [vmem:[%s12361_s4 + $0x1e0] sm:$0xff]  ;;  %v3366_v27 = vunpack.c.l.s8.bf16 %v2952_v56 }
 0x2b1   :  { %4607 = vmatprep.subr.bf16.mxu0 %v3342_v35  ;;  %v3368_v35 = vunpack.c.l.s8.bf16 %v2954_v45  ;;  %v3377_v19 = vunpack.c.h.s8.bf16 %v2954_v45  ;;  %v2970_v45 = vld [vmem:[%s12361_s4 + $0x260] sm:$0xff] }
 0x2b3   :  { %4403 = vmatpush1.bf16.msra.mxu1 %v3339_v62  ;;  %v2962_v62 = vld [vmem:[%s12361_s4 + $0x220] sm:$0xff] }
 0x2b4   :  { %4608 = vmatpush1.bf16.msra.mxu0 %v3341_v53  ;;  %4404 = vmatprep.subr.bf16.mxu1 %v3349_v21  ;;  %v2964_v53 = vld [vmem:[%s12361_s4 + $0x230] sm:$0xff]  ;;  %v3375_v21 = vunpack.c.h.s8.bf16 %v2952_v56  ;;  %v3394_v18 = vunpack.c.h.s8.bf16 %v2962_v62 }
 0x2b5   :  { %4609 = vmatprep.subr.bf16.mxu0 %v3351_v17  ;;  %v3385_v17 = vunpack.c.l.s8.bf16 %v2962_v62  ;;  %v3396_v46 = vunpack.c.h.s8.bf16 %v2964_v53 }
 0x2b7   :  { %4405 = vmatpush1.bf16.msra.mxu1 %v3348_v20  ;;  %v3387_v20 = vunpack.c.l.s8.bf16 %v2964_v53  ;;  %v2980_v53 = vld [vmem:[%s12361_s4 + $0x2b0] sm:$0xff] }
 0x2b8   :  { %4610 = vmatpush1.bf16.msra.mxu0 %v3350_v29  ;;  %4406 = vmatprep.subr.bf16.mxu1 %v3358_v31  ;;  %v2963_v29 = vld [vmem:[%s12361_s4 + $0x228] sm:$0xff]  ;;  %v3384_v31 = vunpack.c.l.s8.bf16 %v2961_v59 }
 0x2b9   :  { %4611 = vmatprep.subr.bf16.mxu0 %v3360_v24  ;;  %v3386_v24 = vunpack.c.l.s8.bf16 %v2963_v29  ;;  %v3395_v56 = vunpack.c.h.s8.bf16 %v2963_v29  ;;  %v2979_v29 = vld [vmem:[%s12361_s4 + $0x2a8] sm:$0xff] }
 0x2bb   :  { %4407 = vmatpush1.bf16.msra.mxu1 %v3357_v28  ;;  %v2971_v28 = vld [vmem:[%s12361_s4 + $0x268] sm:$0xff] }
 0x2bc   :  { %4612 = vmatpush1.bf16.msra.mxu0 %v3359_v54  ;;  %4408 = vmatprep.subr.bf16.mxu1 %v3367_v61  ;;  %v2973_v54 = vld [vmem:[%s12361_s4 + $0x278] sm:$0xff]  ;;  %v3393_v61 = vunpack.c.h.s8.bf16 %v2961_v59  ;;  %v3412_v62 = vunpack.c.h.s8.bf16 %v2971_v28 }
 0x2bd   :  { %4613 = vmatprep.subr.bf16.mxu0 %v3369_v43  ;;  %v3403_v43 = vunpack.c.l.s8.bf16 %v2971_v28  ;;  %v3430_v28 = vunpack.c.h.s8.bf16 %v2980_v53 }
 0x2bf   :  { %4409 = vmatpush1.bf16.msra.mxu1 %v3366_v27  ;;  %v3405_v27 = vunpack.c.l.s8.bf16 %v2973_v54 }
 0x2c0   :  { %4614 = vmatpush1.bf16.msra.mxu0 %v3368_v35  ;;  %4410 = vmatprep.subr.bf16.mxu1 %v3376_v38  ;;  %v2972_v35 = vld [vmem:[%s12361_s4 + $0x270] sm:$0xff]  ;;  %v3402_v38 = vunpack.c.l.s8.bf16 %v2970_v45 }
 0x2c1   :  { %4615 = vmatprep.subr.bf16.mxu0 %v3378_v30  ;;  %v3404_v30 = vunpack.c.l.s8.bf16 %v2972_v35  ;;  %v3413_v59 = vunpack.c.h.s8.bf16 %v2972_v35  ;;  %v2988_v35 = vld [vmem:[%s12361_s4 + $0x2f0] sm:$0xff] }
 0x2c3   :  { %4411 = vmatpush1.bf16.msra.mxu1 %v3375_v21  ;;  %v3414_v21 = vunpack.c.h.s8.bf16 %v2973_v54 }
 0x2c4   :  { %4616 = vmatpush1.bf16.msra.mxu0 %v3377_v19  ;;  %4412 = vmatprep.subr.bf16.mxu1 %v3385_v17  ;;  %v2982_v19 = vld [vmem:[%s12361_s4 + $0x2c0] sm:$0xff]  ;;  %v3411_v17 = vunpack.c.h.s8.bf16 %v2970_v45 }
 0x2c5   :  { %4617 = vmatprep.subr.bf16.mxu0 %v3387_v20  ;;  %v3421_v20 = vunpack.c.l.s8.bf16 %v2980_v53  ;;  %v3432_v54 = vunpack.c.h.s8.bf16 %v2982_v19 }
 0x2c7   :  { %4413 = vmatpush1.bf16.msra.mxu1 %v3384_v31  ;;  %v3423_v31 = vunpack.c.l.s8.bf16 %v2982_v19 }
 0x2c8   :  { %4618 = vmatpush1.bf16.msra.mxu0 %v3386_v24  ;;  %4414 = vmatprep.subr.bf16.mxu1 %v3394_v18  ;;  %v2981_v24 = vld [vmem:[%s12361_s4 + $0x2b8] sm:$0xff]  ;;  %v3420_v18 = vunpack.c.l.s8.bf16 %v2979_v29 }
 0x2c9   :  { %4619 = vmatprep.subr.bf16.mxu0 %v3396_v46  ;;  %v3422_v46 = vunpack.c.l.s8.bf16 %v2981_v24  ;;  %v3431_v45 = vunpack.c.h.s8.bf16 %v2981_v24  ;;  %v2997_v24 = vld [vmem:[%s12361_s4 + $0x338] sm:$0xff] }
 0x2cb   :  { %4415 = vmatpush1.bf16.msra.mxu1 %v3393_v61  ;;  %v2989_v61 = vld [vmem:[%s12361_s4 + $0x2f8] sm:$0xff] }
 0x2cc   :  { %4620 = vmatpush1.bf16.msra.mxu0 %v3395_v56  ;;  %4425 = vmatprep.subr.bf16.mxu1 %v3403_v43  ;;  %v2991_v56 = vld [vmem:[%s12361_s4 + $0x308] sm:$0xff]  ;;  %v3429_v43 = vunpack.c.h.s8.bf16 %v2979_v29 }
 0x2cd   :  { %4630 = vmatprep.subr.bf16.mxu0 %v3405_v27  ;;  %v3439_v27 = vunpack.c.l.s8.bf16 %v2989_v61  ;;  %v3450_v19 = vunpack.c.h.s8.bf16 %v2991_v56 }
 0x2ce   :  { %4417 = vmatmul.mubr.bf16.vlgmr.msra.gmra.mrb[28].mxu1 %v9575_v41 }
 0x2cf   :  { %4622 = vmatmul.mubr.bf16.vlgmr.msra.gmra.mrb[40].mxu0 %v9575_v41  ;;  %4426 = vmatpush1.bf16.msra.mxu1 %v3402_v38  ;;  %v3441_v38 = vunpack.c.l.s8.bf16 %v2991_v56 }
 0x2d0   :  { %4457 = vmatprep.mubr.bf16.mxu1 %v9589_v40  ;;  %4631 = vmatpush1.bf16.msra.mxu0 %v3404_v30  ;;  %v2990_v30 = vld [vmem:[%s12361_s4 + $0x300] sm:$0xff] }
 0x2d1   :  { %4662 = vmatprep.mubr.bf16.mxu0 %v9589_v40  ;;  %4427 = vmatprep.subr.bf16.mxu1 %v3412_v62  ;;  %v3438_v62 = vunpack.c.l.s8.bf16 %v2988_v35  ;;  %v3440_v53 = vunpack.c.l.s8.bf16 %v2990_v30  ;;  %v3449_v29 = vunpack.c.h.s8.bf16 %v2990_v30  ;;  %v3006_v30 = vld [vmem:[%s12361_s4 + $0x380] sm:$0xff] }
 0x2d2   :  { %4632 = vmatprep.subr.bf16.mxu0 %v3414_v21  ;;  %v3448_v21 = vunpack.c.h.s8.bf16 %v2989_v61 }
 0x2d3   :  { %4428 = vmatpush1.bf16.msra.mxu1 %v3411_v17  ;;  %v2998_v17 = vld [vmem:[%s12361_s4 + $0x340] sm:$0xff] }
 0x2d4   :  { %4633 = vmatpush1.bf16.msra.mxu0 %v3413_v59  ;;  %4429 = vmatprep.subr.bf16.mxu1 %v3421_v20  ;;  %v3000_v59 = vld [vmem:[%s12361_s4 + $0x350] sm:$0xff]  ;;  %v3447_v20 = vunpack.c.h.s8.bf16 %v2988_v35  ;;  %v3466_v61 = vunpack.c.h.s8.bf16 %v2998_v17 }
 0x2d5   :  { %4634 = vmatprep.subr.bf16.mxu0 %v3423_v31  ;;  %v3457_v31 = vunpack.c.l.s8.bf16 %v2998_v17  ;;  %v3468_v56 = vunpack.c.h.s8.bf16 %v3000_v59 }
 0x2d7   :  { %4430 = vmatpush1.bf16.msra.mxu1 %v3420_v18  ;;  %v3459_v18 = vunpack.c.l.s8.bf16 %v3000_v59 }
 0x2d8   :  { %4635 = vmatpush1.bf16.msra.mxu0 %v3422_v46  ;;  %4431 = vmatprep.subr.bf16.mxu1 %v3430_v28  ;;  %v2999_v46 = vld [vmem:[%s12361_s4 + $0x348] sm:$0xff]  ;;  %v3456_v28 = vunpack.c.l.s8.bf16 %v2997_v24 }
 0x2d9   :  { %4636 = vmatprep.subr.bf16.mxu0 %v3432_v54  ;;  %v3458_v54 = vunpack.c.l.s8.bf16 %v2999_v46  ;;  %v3467_v35 = vunpack.c.h.s8.bf16 %v2999_v46  ;;  %v3015_v46 = vld [vmem:[%s12361_s4 + $0x3c8] sm:$0xff] }
 0x2db   :  { %4432 = vmatpush1.bf16.msra.mxu1 %v3429_v43  ;;  %v3007_v43 = vld [vmem:[%s12361_s4 + $0x388] sm:$0xff] }
 0x2dc   :  { %4637 = vmatpush1.bf16.msra.mxu0 %v3431_v45  ;;  %4433 = vmatprep.subr.bf16.mxu1 %v3439_v27  ;;  %v3009_v45 = vld [vmem:[%s12361_s4 + $0x398] sm:$0xff]  ;;  %v3465_v27 = vunpack.c.h.s8.bf16 %v2997_v24  ;;  %v3484_v17 = vunpack.c.h.s8.bf16 %v3007_v43 }
 0x2dd   :  { %4638 = vmatprep.subr.bf16.mxu0 %v3441_v38  ;;  %v3475_v38 = vunpack.c.l.s8.bf16 %v3007_v43  ;;  %v3486_v59 = vunpack.c.h.s8.bf16 %v3009_v45 }
 0x2df   :  { %4434 = vmatpush1.bf16.msra.mxu1 %v3438_v62  ;;  %v3477_v62 = vunpack.c.l.s8.bf16 %v3009_v45 }
 0x2e0   :  { %4639 = vmatpush1.bf16.msra.mxu0 %v3440_v53  ;;  %4435 = vmatprep.subr.bf16.mxu1 %v3448_v21  ;;  %v3008_v53 = vld [vmem:[%s12361_s4 + $0x390] sm:$0xff]  ;;  %v3474_v21 = vunpack.c.l.s8.bf16 %v3006_v30 }
 0x2e1   :  { %4640 = vmatprep.subr.bf16.mxu0 %v3450_v19  ;;  %v3476_v19 = vunpack.c.l.s8.bf16 %v3008_v53  ;;  %v3485_v24 = vunpack.c.h.s8.bf16 %v3008_v53  ;;  %v3024_v53 = vld [vmem:[%s12361_s4 + $0x410] sm:$0xff] }
 0x2e3   :  { %4436 = vmatpush1.bf16.msra.mxu1 %v3447_v20  ;;  %v3016_v20 = vld [vmem:[%s12361_s4 + $0x3d0] sm:$0xff] }
 0x2e4   :  { %4641 = vmatpush1.bf16.msra.mxu0 %v3449_v29  ;;  %4437 = vmatprep.subr.bf16.mxu1 %v3457_v31  ;;  %v3018_v29 = vld [vmem:[%s12361_s4 + $0x3e0] sm:$0xff]  ;;  %v3483_v31 = vunpack.c.h.s8.bf16 %v3006_v30  ;;  %v3502_v43 = vunpack.c.h.s8.bf16 %v3016_v20 }
 0x2e5   :  { %4642 = vmatprep.subr.bf16.mxu0 %v3459_v18  ;;  %v3493_v18 = vunpack.c.l.s8.bf16 %v3016_v20  ;;  %v3504_v45 = vunpack.c.h.s8.bf16 %v3018_v29 }
 0x2e7   :  { %4438 = vmatpush1.bf16.msra.mxu1 %v3456_v28  ;;  %v3495_v28 = vunpack.c.l.s8.bf16 %v3018_v29 }
 0x2e8   :  { %4643 = vmatpush1.bf16.msra.mxu0 %v3458_v54  ;;  %4439 = vmatprep.subr.bf16.mxu1 %v3466_v61  ;;  %v3017_v54 = vld [vmem:[%s12361_s4 + $0x3d8] sm:$0xff]  ;;  %v3492_v61 = vunpack.c.l.s8.bf16 %v3015_v46 }
 0x2e9   :  { %4644 = vmatprep.subr.bf16.mxu0 %v3468_v56  ;;  %v3494_v56 = vunpack.c.l.s8.bf16 %v3017_v54  ;;  %v3503_v30 = vunpack.c.h.s8.bf16 %v3017_v54  ;;  %v3033_v54 = vld [vmem:[%s12361_s4 + $0x458] sm:$0xff] }
 0x2eb   :  { %4440 = vmatpush1.bf16.msra.mxu1 %v3465_v27  ;;  %v3025_v27 = vld [vmem:[%s12361_s4 + $0x418] sm:$0xff] }
 0x2ec   :  { %4645 = vmatpush1.bf16.msra.mxu0 %v3467_v35  ;;  %4441 = vmatprep.subr.bf16.mxu1 %v3475_v38  ;;  %v3027_v35 = vld [vmem:[%s12361_s4 + $0x428] sm:$0xff]  ;;  %v3501_v38 = vunpack.c.h.s8.bf16 %v3015_v46  ;;  %v3520_v20 = vunpack.c.h.s8.bf16 %v3025_v27 }
 0x2ed   :  { %4646 = vmatprep.subr.bf16.mxu0 %v3477_v62  ;;  %v3511_v62 = vunpack.c.l.s8.bf16 %v3025_v27  ;;  %v3522_v29 = vunpack.c.h.s8.bf16 %v3027_v35 }
 0x2ef   :  { %4442 = vmatpush1.bf16.msra.mxu1 %v3474_v21  ;;  %v3513_v21 = vunpack.c.l.s8.bf16 %v3027_v35 }
 0x2f0   :  { %4647 = vmatpush1.bf16.msra.mxu0 %v3476_v19  ;;  %4443 = vmatprep.subr.bf16.mxu1 %v3484_v17  ;;  %v3026_v19 = vld [vmem:[%s12361_s4 + $0x420] sm:$0xff]  ;;  %v3510_v17 = vunpack.c.l.s8.bf16 %v3024_v53 }
 0x2f1   :  { %4648 = vmatprep.subr.bf16.mxu0 %v3486_v59  ;;  %v3512_v59 = vunpack.c.l.s8.bf16 %v3026_v19  ;;  %v3521_v46 = vunpack.c.h.s8.bf16 %v3026_v19  ;;  %v3042_v19 = vld [vmem:[%s12361_s4 + $0x4a0] sm:$0xff] }
 0x2f3   :  { %4444 = vmatpush1.bf16.msra.mxu1 %v3483_v31  ;;  %v3034_v31 = vld [vmem:[%s12361_s4 + $0x460] sm:$0xff] }
 0x2f4   :  { %4649 = vmatpush1.bf16.msra.mxu0 %v3485_v24  ;;  %4445 = vmatprep.subr.bf16.mxu1 %v3493_v18  ;;  %v3036_v24 = vld [vmem:[%s12361_s4 + $0x470] sm:$0xff]  ;;  %v3519_v18 = vunpack.c.h.s8.bf16 %v3024_v53  ;;  %v3538_v27 = vunpack.c.h.s8.bf16 %v3034_v31 }
 0x2f5   :  { %4650 = vmatprep.subr.bf16.mxu0 %v3495_v28  ;;  %v3529_v28 = vunpack.c.l.s8.bf16 %v3034_v31  ;;  %v3540_v35 = vunpack.c.h.s8.bf16 %v3036_v24 }
 0x2f7   :  { %4446 = vmatpush1.bf16.msra.mxu1 %v3492_v61  ;;  %v3531_v61 = vunpack.c.l.s8.bf16 %v3036_v24  ;;  %v3052_v24 = vld [vmem:[%s12361_s4 + $0x4f0] sm:$0xff] }
 0x2f8   :  { %4651 = vmatpush1.bf16.msra.mxu0 %v3494_v56  ;;  %4447 = vmatprep.subr.bf16.mxu1 %v3502_v43  ;;  %v3035_v56 = vld [vmem:[%s12361_s4 + $0x468] sm:$0xff]  ;;  %v3528_v43 = vunpack.c.l.s8.bf16 %v3033_v54 }
 0x2f9   :  { %4652 = vmatprep.subr.bf16.mxu0 %v3504_v45  ;;  %v3530_v45 = vunpack.c.l.s8.bf16 %v3035_v56  ;;  %v3539_v53 = vunpack.c.h.s8.bf16 %v3035_v56  ;;  %v3051_v56 = vld [vmem:[%s12361_s4 + $0x4e8] sm:$0xff] }
 0x2fb   :  { %4448 = vmatpush1.bf16.msra.mxu1 %v3501_v38  ;;  %v3043_v38 = vld [vmem:[%s12361_s4 + $0x4a8] sm:$0xff] }
 0x2fc   :  { %4653 = vmatpush1.bf16.msra.mxu0 %v3503_v30  ;;  %4449 = vmatprep.subr.bf16.mxu1 %v3511_v62  ;;  %v3045_v30 = vld [vmem:[%s12361_s4 + $0x4b8] sm:$0xff]  ;;  %v3537_v62 = vunpack.c.h.s8.bf16 %v3033_v54  ;;  %v3556_v31 = vunpack.c.h.s8.bf16 %v3043_v38 }
 0x2fd   :  { %4654 = vmatprep.subr.bf16.mxu0 %v3513_v21  ;;  %v3547_v21 = vunpack.c.l.s8.bf16 %v3043_v38  ;;  %v3574_v38 = vunpack.c.h.s8.bf16 %v3052_v24 }
 0x2ff   :  { %4450 = vmatpush1.bf16.msra.mxu1 %v3510_v17  ;;  %v3549_v17 = vunpack.c.l.s8.bf16 %v3045_v30 }
 0x300   :  { %4655 = vmatpush1.bf16.msra.mxu0 %v3512_v59  ;;  %4451 = vmatprep.subr.bf16.mxu1 %v3520_v20  ;;  %v3044_v59 = vld [vmem:[%s12361_s4 + $0x4b0] sm:$0xff]  ;;  %v3546_v20 = vunpack.c.l.s8.bf16 %v3042_v19 }
 0x301   :  { %4656 = vmatprep.subr.bf16.mxu0 %v3522_v29  ;;  %v3548_v29 = vunpack.c.l.s8.bf16 %v3044_v59  ;;  %v3557_v54 = vunpack.c.h.s8.bf16 %v3044_v59  ;;  %v3060_v59 = vld [vmem:[%s12361_s4 + $0x530] sm:$0xff] }
 0x303   :  { %4452 = vmatpush1.bf16.msra.mxu1 %v3519_v18  ;;  %v3558_v18 = vunpack.c.h.s8.bf16 %v3045_v30 }
 0x304   :  { %4657 = vmatpush1.bf16.msra.mxu0 %v3521_v46  ;;  %4453 = vmatprep.subr.bf16.mxu1 %v3529_v28  ;;  %v3054_v46 = vld [vmem:[%s12361_s4 + $0x500] sm:$0xff]  ;;  %v3555_v28 = vunpack.c.h.s8.bf16 %v3042_v19 }
 0x305   :  { %4658 = vmatprep.subr.bf16.mxu0 %v3531_v61  ;;  %v3565_v61 = vunpack.c.l.s8.bf16 %v3052_v24  ;;  %v3576_v30 = vunpack.c.h.s8.bf16 %v3054_v46 }
 0x307   :  { %4454 = vmatpush1.bf16.msra.mxu1 %v3528_v43  ;;  %v3567_v43 = vunpack.c.l.s8.bf16 %v3054_v46 }
 0x308   :  { %4659 = vmatpush1.bf16.msra.mxu0 %v3530_v45  ;;  %4455 = vmatprep.subr.bf16.mxu1 %v3538_v27  ;;  %v3053_v45 = vld [vmem:[%s12361_s4 + $0x4f8] sm:$0xff]  ;;  %v3564_v27 = vunpack.c.l.s8.bf16 %v3051_v56 }
 0x309   :  { %4660 = vmatprep.subr.bf16.mxu0 %v3540_v35  ;;  %v3566_v35 = vunpack.c.l.s8.bf16 %v3053_v45  ;;  %v3575_v19 = vunpack.c.h.s8.bf16 %v3053_v45  ;;  %v3069_v45 = vld [vmem:[%s12361_s4 + $0x578] sm:$0xff] }
 0x30b   :  { %4456 = vmatpush1.bf16.msra.mxu1 %v3537_v62  ;;  %v3061_v62 = vld [vmem:[%s12361_s4 + $0x538] sm:$0xff] }
 0x30c   :  { %4661 = vmatpush1.bf16.msra.mxu0 %v3539_v53  ;;  %4466 = vmatprep.subr.bf16.mxu1 %v3547_v21  ;;  %v3063_v53 = vld [vmem:[%s12361_s4 + $0x548] sm:$0xff]  ;;  %v3573_v21 = vunpack.c.h.s8.bf16 %v3051_v56 }
 0x30d   :  { %4671 = vmatprep.subr.bf16.mxu0 %v3549_v17  ;;  %v3583_v17 = vunpack.c.l.s8.bf16 %v3061_v62  ;;  %v3594_v46 = vunpack.c.h.s8.bf16 %v3063_v53 }
 0x30e   :  { %4458 = vmatmul.mubr.bf16.vlgmr.msra.gmra.mrb[28].mxu1 %v9699_v36 }
 0x30f   :  { %4663 = vmatmul.mubr.bf16.vlgmr.msra.gmra.mrb[40].mxu0 %v9699_v36  ;;  %4467 = vmatpush1.bf16.msra.mxu1 %v3546_v20  ;;  %v3585_v20 = vunpack.c.l.s8.bf16 %v3063_v53 }
 0x310   :  { %4498 = vmatprep.mubr.bf16.mxu1 %v9703_v16  ;;  %4672 = vmatpush1.bf16.msra.mxu0 %v3548_v29  ;;  %v3062_v29 = vld [vmem:[%s12361_s4 + $0x540] sm:$0xff] }
 0x311   :  { %4703 = vmatprep.mubr.bf16.mxu0 %v9703_v16  ;;  %4468 = vmatprep.subr.bf16.mxu1 %v3556_v31  ;;  %v3582_v31 = vunpack.c.l.s8.bf16 %v3060_v59  ;;  %v3584_v24 = vunpack.c.l.s8.bf16 %v3062_v29  ;;  %v3593_v56 = vunpack.c.h.s8.bf16 %v3062_v29  ;;  %v3078_v29 = vld [vmem:[%s12361_s4 + $0x5c0] sm:$0xff] }
 0x312   :  { %4673 = vmatprep.subr.bf16.mxu0 %v3558_v18  ;;  %v3592_v18 = vunpack.c.h.s8.bf16 %v3061_v62 }
 0x313   :  { %4469 = vmatpush1.bf16.msra.mxu1 %v3555_v28  ;;  %v3070_v28 = vld [vmem:[%s12361_s4 + $0x580] sm:$0xff] }
 0x314   :  { %4674 = vmatpush1.bf16.msra.mxu0 %v3557_v54  ;;  %4470 = vmatprep.subr.bf16.mxu1 %v3565_v61  ;;  %v3072_v54 = vld [vmem:[%s12361_s4 + $0x590] sm:$0xff]  ;;  %v3591_v61 = vunpack.c.h.s8.bf16 %v3060_v59  ;;  %v3610_v62 = vunpack.c.h.s8.bf16 %v3070_v28 }
 0x315   :  { %4675 = vmatprep.subr.bf16.mxu0 %v3567_v43  ;;  %v3601_v43 = vunpack.c.l.s8.bf16 %v3070_v28  ;;  %v3612_v53 = vunpack.c.h.s8.bf16 %v3072_v54 }
 0x317   :  { %4471 = vmatpush1.bf16.msra.mxu1 %v3564_v27  ;;  %v3603_v27 = vunpack.c.l.s8.bf16 %v3072_v54 }
 0x318   :  { %4676 = vmatpush1.bf16.msra.mxu0 %v3566_v35  ;;  %4472 = vmatprep.subr.bf16.mxu1 %v3574_v38  ;;  %v3071_v35 = vld [vmem:[%s12361_s4 + $0x588] sm:$0xff]  ;;  %v3600_v38 = vunpack.c.l.s8.bf16 %v3069_v45 }
 0x319   :  { %4677 = vmatprep.subr.bf16.mxu0 %v3576_v30  ;;  %v3602_v30 = vunpack.c.l.s8.bf16 %v3071_v35  ;;  %v3611_v59 = vunpack.c.h.s8.bf16 %v3071_v35  ;;  %v3087_v35 = vld [vmem:[%s12361_s4 + $0x608] sm:$0xff] }
 0x31b   :  { %4473 = vmatpush1.bf16.msra.mxu1 %v3573_v21  ;;  %v3079_v21 = vld [vmem:[%s12361_s4 + $0x5c8] sm:$0xff] }
 0x31c   :  { %4678 = vmatpush1.bf16.msra.mxu0 %v3575_v19  ;;  %4474 = vmatprep.subr.bf16.mxu1 %v3583_v17  ;;  %v3081_v19 = vld [vmem:[%s12361_s4 + $0x5d8] sm:$0xff]  ;;  %v3609_v17 = vunpack.c.h.s8.bf16 %v3069_v45  ;;  %v3628_v28 = vunpack.c.h.s8.bf16 %v3079_v21 }
 0x31d   :  { %4679 = vmatprep.subr.bf16.mxu0 %v3585_v20  ;;  %v3619_v20 = vunpack.c.l.s8.bf16 %v3079_v21  ;;  %v3630_v54 = vunpack.c.h.s8.bf16 %v3081_v19 }
 0x31f   :  { %4475 = vmatpush1.bf16.msra.mxu1 %v3582_v31  ;;  %v3621_v31 = vunpack.c.l.s8.bf16 %v3081_v19 }
 0x320   :  { %4680 = vmatpush1.bf16.msra.mxu0 %v3584_v24  ;;  %4476 = vmatprep.subr.bf16.mxu1 %v3592_v18  ;;  %v3080_v24 = vld [vmem:[%s12361_s4 + $0x5d0] sm:$0xff]  ;;  %v3618_v18 = vunpack.c.l.s8.bf16 %v3078_v29 }
 0x321   :  { %4681 = vmatprep.subr.bf16.mxu0 %v3594_v46  ;;  %v3620_v46 = vunpack.c.l.s8.bf16 %v3080_v24  ;;  %v3629_v45 = vunpack.c.h.s8.bf16 %v3080_v24  ;;  %v3096_v24 = vld [vmem:[%s12361_s4 + $0x650] sm:$0xff] }
 0x323   :  { %4477 = vmatpush1.bf16.msra.mxu1 %v3591_v61  ;;  %v3088_v61 = vld [vmem:[%s12361_s4 + $0x610] sm:$0xff] }
 0x324   :  { %4682 = vmatpush1.bf16.msra.mxu0 %v3593_v56  ;;  %4478 = vmatprep.subr.bf16.mxu1 %v3601_v43  ;;  %v3090_v56 = vld [vmem:[%s12361_s4 + $0x620] sm:$0xff]  ;;  %v3627_v43 = vunpack.c.h.s8.bf16 %v3078_v29  ;;  %v3646_v21 = vunpack.c.h.s8.bf16 %v3088_v61 }
 0x325   :  { %4683 = vmatprep.subr.bf16.mxu0 %v3603_v27  ;;  %v3637_v27 = vunpack.c.l.s8.bf16 %v3088_v61  ;;  %v3648_v19 = vunpack.c.h.s8.bf16 %v3090_v56 }
 0x327   :  { %4479 = vmatpush1.bf16.msra.mxu1 %v3600_v38  ;;  %v3639_v38 = vunpack.c.l.s8.bf16 %v3090_v56 }
 0x328   :  { %4684 = vmatpush1.bf16.msra.mxu0 %v3602_v30  ;;  %4480 = vmatprep.subr.bf16.mxu1 %v3610_v62  ;;  %v3089_v30 = vld [vmem:[%s12361_s4 + $0x618] sm:$0xff]  ;;  %v3636_v62 = vunpack.c.l.s8.bf16 %v3087_v35 }
 0x329   :  { %4685 = vmatprep.subr.bf16.mxu0 %v3612_v53  ;;  %v3638_v53 = vunpack.c.l.s8.bf16 %v3089_v30  ;;  %v3647_v29 = vunpack.c.h.s8.bf16 %v3089_v30  ;;  %v3105_v30 = vld [vmem:[%s12361_s4 + $0x698] sm:$0xff] }
 0x32b   :  { %4481 = vmatpush1.bf16.msra.mxu1 %v3609_v17  ;;  %v3097_v17 = vld [vmem:[%s12361_s4 + $0x658] sm:$0xff] }
 0x32c   :  { %4686 = vmatpush1.bf16.msra.mxu0 %v3611_v59  ;;  %4482 = vmatprep.subr.bf16.mxu1 %v3619_v20  ;;  %v3099_v59 = vld [vmem:[%s12361_s4 + $0x668] sm:$0xff]  ;;  %v3645_v20 = vunpack.c.h.s8.bf16 %v3087_v35  ;;  %v3664_v61 = vunpack.c.h.s8.bf16 %v3097_v17 }
 0x32d   :  { %4687 = vmatprep.subr.bf16.mxu0 %v3621_v31  ;;  %v3655_v31 = vunpack.c.l.s8.bf16 %v3097_v17  ;;  %v3666_v56 = vunpack.c.h.s8.bf16 %v3099_v59 }
 0x32f   :  { %4483 = vmatpush1.bf16.msra.mxu1 %v3618_v18  ;;  %v3657_v18 = vunpack.c.l.s8.bf16 %v3099_v59 }
 0x330   :  { %4688 = vmatpush1.bf16.msra.mxu0 %v3620_v46  ;;  %4484 = vmatprep.subr.bf16.mxu1 %v3628_v28  ;;  %v3098_v46 = vld [vmem:[%s12361_s4 + $0x660] sm:$0xff]  ;;  %v3654_v28 = vunpack.c.l.s8.bf16 %v3096_v24 }
 0x331   :  { %4689 = vmatprep.subr.bf16.mxu0 %v3630_v54  ;;  %v3656_v54 = vunpack.c.l.s8.bf16 %v3098_v46  ;;  %v3665_v35 = vunpack.c.h.s8.bf16 %v3098_v46  ;;  %v3114_v46 = vld [vmem:[%s12361_s4 + $0x6e0] sm:$0xff] }
 0x333   :  { %4485 = vmatpush1.bf16.msra.mxu1 %v3627_v43  ;;  %v3106_v43 = vld [vmem:[%s12361_s4 + $0x6a0] sm:$0xff] }
 0x334   :  { %4690 = vmatpush1.bf16.msra.mxu0 %v3629_v45  ;;  %4486 = vmatprep.subr.bf16.mxu1 %v3637_v27  ;;  %v3108_v45 = vld [vmem:[%s12361_s4 + $0x6b0] sm:$0xff]  ;;  %v3663_v27 = vunpack.c.h.s8.bf16 %v3096_v24  ;;  %v3682_v17 = vunpack.c.h.s8.bf16 %v3106_v43 }
 0x335   :  { %4691 = vmatprep.subr.bf16.mxu0 %v3639_v38  ;;  %v3673_v38 = vunpack.c.l.s8.bf16 %v3106_v43  ;;  %v3684_v59 = vunpack.c.h.s8.bf16 %v3108_v45 }
 0x337   :  { %4487 = vmatpush1.bf16.msra.mxu1 %v3636_v62  ;;  %v3675_v62 = vunpack.c.l.s8.bf16 %v3108_v45  ;;  %v3124_v45 = vld [vmem:[%s12361_s4 + $0x730] sm:$0xff] }
 0x338   :  { %4692 = vmatpush1.bf16.msra.mxu0 %v3638_v53  ;;  %4488 = vmatprep.subr.bf16.mxu1 %v3646_v21  ;;  %v3107_v53 = vld [vmem:[%s12361_s4 + $0x6a8] sm:$0xff]  ;;  %v3672_v21 = vunpack.c.l.s8.bf16 %v3105_v30 }
 0x339   :  { %4693 = vmatprep.subr.bf16.mxu0 %v3648_v19  ;;  %v3674_v19 = vunpack.c.l.s8.bf16 %v3107_v53  ;;  %v3683_v24 = vunpack.c.h.s8.bf16 %v3107_v53  ;;  %v3123_v53 = vld [vmem:[%s12361_s4 + $0x728] sm:$0xff] }
 0x33b   :  { %4489 = vmatpush1.bf16.msra.mxu1 %v3645_v20  ;;  %v3115_v20 = vld [vmem:[%s12361_s4 + $0x6e8] sm:$0xff] }
 0x33c   :  { %4694 = vmatpush1.bf16.msra.mxu0 %v3647_v29  ;;  %4490 = vmatprep.subr.bf16.mxu1 %v3655_v31  ;;  %v3117_v29 = vld [vmem:[%s12361_s4 + $0x6f8] sm:$0xff]  ;;  %v3681_v31 = vunpack.c.h.s8.bf16 %v3105_v30  ;;  %v3700_v43 = vunpack.c.h.s8.bf16 %v3115_v20 }
 0x33d   :  { %4695 = vmatprep.subr.bf16.mxu0 %v3657_v18  ;;  %v3691_v18 = vunpack.c.l.s8.bf16 %v3115_v20  ;;  %v3718_v20 = vunpack.c.h.s8.bf16 %v3124_v45 }
 0x33f   :  { %4491 = vmatpush1.bf16.msra.mxu1 %v3654_v28  ;;  %v3693_v28 = vunpack.c.l.s8.bf16 %v3117_v29 }
 0x340   :  { %4696 = vmatpush1.bf16.msra.mxu0 %v3656_v54  ;;  %4492 = vmatprep.subr.bf16.mxu1 %v3664_v61  ;;  %v3116_v54 = vld [vmem:[%s12361_s4 + $0x6f0] sm:$0xff]  ;;  %v3690_v61 = vunpack.c.l.s8.bf16 %v3114_v46 }
 0x341   :  { %4697 = vmatprep.subr.bf16.mxu0 %v3666_v56  ;;  %v3692_v56 = vunpack.c.l.s8.bf16 %v3116_v54  ;;  %v3701_v30 = vunpack.c.h.s8.bf16 %v3116_v54  ;;  %v3132_v54 = vld [vmem:[%s12361_s4 + $0x770] sm:$0xff] }
 0x343   :  { %4493 = vmatpush1.bf16.msra.mxu1 %v3663_v27  ;;  %v3702_v27 = vunpack.c.h.s8.bf16 %v3117_v29 }
 0x344   :  { %4698 = vmatpush1.bf16.msra.mxu0 %v3665_v35  ;;  %4494 = vmatprep.subr.bf16.mxu1 %v3673_v38  ;;  %v3126_v35 = vld [vmem:[%s12361_s4 + $0x740] sm:$0xff]  ;;  %v3699_v38 = vunpack.c.h.s8.bf16 %v3114_v46 }
 0x345   :  { %4699 = vmatprep.subr.bf16.mxu0 %v3675_v62  ;;  %v3709_v62 = vunpack.c.l.s8.bf16 %v3124_v45  ;;  %v3720_v29 = vunpack.c.h.s8.bf16 %v3126_v35 }
 0x347   :  { %4495 = vmatpush1.bf16.msra.mxu1 %v3672_v21  ;;  %v3711_v21 = vunpack.c.l.s8.bf16 %v3126_v35 }
 0x348   :  { %4700 = vmatpush1.bf16.msra.mxu0 %v3674_v19  ;;  %4496 = vmatprep.subr.bf16.mxu1 %v3682_v17  ;;  %v3125_v19 = vld [vmem:[%s12361_s4 + $0x738] sm:$0xff]  ;;  %v3708_v17 = vunpack.c.l.s8.bf16 %v3123_v53 }
 0x349   :  { %4701 = vmatprep.subr.bf16.mxu0 %v3684_v59  ;;  %v3710_v59 = vunpack.c.l.s8.bf16 %v3125_v19  ;;  %v3719_v46 = vunpack.c.h.s8.bf16 %v3125_v19  ;;  %v3141_v19 = vld [vmem:[%s12361_s4 + $0x7b8] sm:$0xff] }
 0x34b   :  { %4497 = vmatpush1.bf16.msra.mxu1 %v3681_v31  ;;  %v3133_v31 = vld [vmem:[%s12361_s4 + $0x778] sm:$0xff] }
 0x34c   :  { %4702 = vmatpush1.bf16.msra.mxu0 %v3683_v24  ;;  %4507 = vmatprep.subr.bf16.mxu1 %v3691_v18  ;;  %v3135_v24 = vld [vmem:[%s12361_s4 + $0x788] sm:$0xff]  ;;  %v3717_v18 = vunpack.c.h.s8.bf16 %v3123_v53 }
 0x34d   :  { %4712 = vmatprep.subr.bf16.mxu0 %v3693_v28  ;;  %v3727_v28 = vunpack.c.l.s8.bf16 %v3133_v31  ;;  %v3738_v35 = vunpack.c.h.s8.bf16 %v3135_v24 }
 0x34e   :  { %4499 = vmatmul.mubr.bf16.vlgmr.msra.gmra.mrb[28].mxu1 %v9807_v47 }
 0x34f   :  { %4704 = vmatmul.mubr.bf16.vlgmr.msra.gmra.mrb[40].mxu0 %v9807_v47  ;;  %4508 = vmatpush1.bf16.msra.mxu1 %v3690_v61  ;;  %v3729_v61 = vunpack.c.l.s8.bf16 %v3135_v24 }
 0x350   :  { %4539 = vmatprep.mubr.bf16.mxu1 %v9815_v23  ;;  %4713 = vmatpush1.bf16.msra.mxu0 %v3692_v56  ;;  %v3134_v56 = vld [vmem:[%s12361_s4 + $0x780] sm:$0xff] }
 0x351   :  { %4744 = vmatprep.mubr.bf16.mxu0 %v9815_v23  ;;  %4509 = vmatprep.subr.bf16.mxu1 %v3700_v43  ;;  %v3726_v43 = vunpack.c.l.s8.bf16 %v3132_v54  ;;  %v3728_v45 = vunpack.c.l.s8.bf16 %v3134_v56  ;;  %v3737_v53 = vunpack.c.h.s8.bf16 %v3134_v56  ;;  %v3150_v56 = vld [vmem:[%s12361_s4 + $0x800] sm:$0xff] }
 0x352   :  { %4714 = vmatprep.subr.bf16.mxu0 %v3702_v27  ;;  %v3736_v27 = vunpack.c.h.s8.bf16 %v3133_v31 }
 0x353   :  { %4510 = vmatpush1.bf16.msra.mxu1 %v3699_v38  ;;  %v3142_v38 = vld [vmem:[%s12361_s4 + $0x7c0] sm:$0xff] }
 0x354   :  { %4715 = vmatpush1.bf16.msra.mxu0 %v3701_v30  ;;  %4511 = vmatprep.subr.bf16.mxu1 %v3709_v62  ;;  %v3144_v30 = vld [vmem:[%s12361_s4 + $0x7d0] sm:$0xff]  ;;  %v3735_v62 = vunpack.c.h.s8.bf16 %v3132_v54  ;;  %v3754_v31 = vunpack.c.h.s8.bf16 %v3142_v38 }
 0x355   :  { %4716 = vmatprep.subr.bf16.mxu0 %v3711_v21  ;;  %v3745_v21 = vunpack.c.l.s8.bf16 %v3142_v38  ;;  %v3756_v24 = vunpack.c.h.s8.bf16 %v3144_v30 }
 0x357   :  { %4512 = vmatpush1.bf16.msra.mxu1 %v3708_v17  ;;  %v3747_v17 = vunpack.c.l.s8.bf16 %v3144_v30 }
 0x358   :  { %4717 = vmatpush1.bf16.msra.mxu0 %v3710_v59  ;;  %4513 = vmatprep.subr.bf16.mxu1 %v3718_v20  ;;  %v3143_v59 = vld [vmem:[%s12361_s4 + $0x7c8] sm:$0xff]  ;;  %v3744_v20 = vunpack.c.l.s8.bf16 %v3141_v19 }
 0x359   :  { %4718 = vmatprep.subr.bf16.mxu0 %v3720_v29  ;;  %v3746_v29 = vunpack.c.l.s8.bf16 %v3143_v59  ;;  %v3755_v54 = vunpack.c.h.s8.bf16 %v3143_v59  ;;  %v3159_v59 = vld [vmem:[%s12361_s4 + $0x848] sm:$0xff] }
 0x35b   :  { %4514 = vmatpush1.bf16.msra.mxu1 %v3717_v18  ;;  %v3151_v18 = vld [vmem:[%s12361_s4 + $0x808] sm:$0xff] }
 0x35c   :  { %4719 = vmatpush1.bf16.msra.mxu0 %v3719_v46  ;;  %4515 = vmatprep.subr.bf16.mxu1 %v3727_v28  ;;  %v3153_v46 = vld [vmem:[%s12361_s4 + $0x818] sm:$0xff]  ;;  %v3753_v28 = vunpack.c.h.s8.bf16 %v3141_v19  ;;  %v3772_v38 = vunpack.c.h.s8.bf16 %v3151_v18 }
 0x35d   :  { %4720 = vmatprep.subr.bf16.mxu0 %v3729_v61  ;;  %v3763_v61 = vunpack.c.l.s8.bf16 %v3151_v18  ;;  %v3774_v30 = vunpack.c.h.s8.bf16 %v3153_v46 }
 0x35f   :  { %4516 = vmatpush1.bf16.msra.mxu1 %v3726_v43  ;;  %v3765_v43 = vunpack.c.l.s8.bf16 %v3153_v46 }
 0x360   :  { %4721 = vmatpush1.bf16.msra.mxu0 %v3728_v45  ;;  %4517 = vmatprep.subr.bf16.mxu1 %v3736_v27  ;;  %v3152_v45 = vld [vmem:[%s12361_s4 + $0x810] sm:$0xff]  ;;  %v3762_v27 = vunpack.c.l.s8.bf16 %v3150_v56 }
 0x361   :  { %4722 = vmatprep.subr.bf16.mxu0 %v3738_v35  ;;  %v3764_v35 = vunpack.c.l.s8.bf16 %v3152_v45  ;;  %v3773_v19 = vunpack.c.h.s8.bf16 %v3152_v45  ;;  %v3168_v45 = vld [vmem:[%s12361_s4 + $0x890] sm:$0xff] }
 0x363   :  { %4518 = vmatpush1.bf16.msra.mxu1 %v3735_v62  ;;  %v3160_v62 = vld [vmem:[%s12361_s4 + $0x850] sm:$0xff] }
 0x364   :  { %4723 = vmatpush1.bf16.msra.mxu0 %v3737_v53  ;;  %4519 = vmatprep.subr.bf16.mxu1 %v3745_v21  ;;  %v3162_v53 = vld [vmem:[%s12361_s4 + $0x860] sm:$0xff]  ;;  %v3771_v21 = vunpack.c.h.s8.bf16 %v3150_v56  ;;  %v3790_v18 = vunpack.c.h.s8.bf16 %v3160_v62 }
 0x365   :  { %4724 = vmatprep.subr.bf16.mxu0 %v3747_v17  ;;  %v3781_v17 = vunpack.c.l.s8.bf16 %v3160_v62  ;;  %v3792_v46 = vunpack.c.h.s8.bf16 %v3162_v53 }
 0x367   :  { %4520 = vmatpush1.bf16.msra.mxu1 %v3744_v20  ;;  %v3783_v20 = vunpack.c.l.s8.bf16 %v3162_v53 }
 0x368   :  { %4725 = vmatpush1.bf16.msra.mxu0 %v3746_v29  ;;  %4521 = vmatprep.subr.bf16.mxu1 %v3754_v31  ;;  %v3161_v29 = vld [vmem:[%s12361_s4 + $0x858] sm:$0xff]  ;;  %v3780_v31 = vunpack.c.l.s8.bf16 %v3159_v59 }
 0x369   :  { %4726 = vmatprep.subr.bf16.mxu0 %v3756_v24  ;;  %v3782_v24 = vunpack.c.l.s8.bf16 %v3161_v29  ;;  %v3791_v56 = vunpack.c.h.s8.bf16 %v3161_v29  ;;  %v3177_v29 = vld [vmem:[%s12361_s4 + $0x8d8] sm:$0xff] }
 0x36b   :  { %4522 = vmatpush1.bf16.msra.mxu1 %v3753_v28  ;;  %v3169_v28 = vld [vmem:[%s12361_s4 + $0x898] sm:$0xff] }
 0x36c   :  { %4727 = vmatpush1.bf16.msra.mxu0 %v3755_v54  ;;  %4523 = vmatprep.subr.bf16.mxu1 %v3763_v61  ;;  %v3171_v54 = vld [vmem:[%s12361_s4 + $0x8a8] sm:$0xff]  ;;  %v3789_v61 = vunpack.c.h.s8.bf16 %v3159_v59  ;;  %v3808_v62 = vunpack.c.h.s8.bf16 %v3169_v28 }
 0x36d   :  { %4728 = vmatprep.subr.bf16.mxu0 %v3765_v43  ;;  %v3799_v43 = vunpack.c.l.s8.bf16 %v3169_v28  ;;  %v3810_v53 = vunpack.c.h.s8.bf16 %v3171_v54 }
 0x36f   :  { %4524 = vmatpush1.bf16.msra.mxu1 %v3762_v27  ;;  %v3801_v27 = vunpack.c.l.s8.bf16 %v3171_v54 }
 0x370   :  { %4729 = vmatpush1.bf16.msra.mxu0 %v3764_v35  ;;  %4525 = vmatprep.subr.bf16.mxu1 %v3772_v38  ;;  %v3170_v35 = vld [vmem:[%s12361_s4 + $0x8a0] sm:$0xff]  ;;  %v3798_v38 = vunpack.c.l.s8.bf16 %v3168_v45 }
 0x371   :  { %4730 = vmatprep.subr.bf16.mxu0 %v3774_v30  ;;  %v3800_v30 = vunpack.c.l.s8.bf16 %v3170_v35  ;;  %v3809_v59 = vunpack.c.h.s8.bf16 %v3170_v35  ;;  %v3186_v35 = vld [vmem:[%s12361_s4 + $0x920] sm:$0xff] }
 0x373   :  { %4526 = vmatpush1.bf16.msra.mxu1 %v3771_v21  ;;  %v3178_v21 = vld [vmem:[%s12361_s4 + $0x8e0] sm:$0xff] }
 0x374   :  { %4731 = vmatpush1.bf16.msra.mxu0 %v3773_v19  ;;  %4527 = vmatprep.subr.bf16.mxu1 %v3781_v17  ;;  %v3180_v19 = vld [vmem:[%s12361_s4 + $0x8f0] sm:$0xff]  ;;  %v3807_v17 = vunpack.c.h.s8.bf16 %v3168_v45  ;;  %v3826_v28 = vunpack.c.h.s8.bf16 %v3178_v21 }
 0x375   :  { %4732 = vmatprep.subr.bf16.mxu0 %v3783_v20  ;;  %v3817_v20 = vunpack.c.l.s8.bf16 %v3178_v21  ;;  %v3828_v54 = vunpack.c.h.s8.bf16 %v3180_v19 }
 0x377   :  { %4528 = vmatpush1.bf16.msra.mxu1 %v3780_v31  ;;  %v3819_v31 = vunpack.c.l.s8.bf16 %v3180_v19  ;;  %v3196_v19 = vld [vmem:[%s12361_s4 + $0x970] sm:$0xff] }
 0x378   :  { %4733 = vmatpush1.bf16.msra.mxu0 %v3782_v24  ;;  %4529 = vmatprep.subr.bf16.mxu1 %v3790_v18  ;;  %v3179_v24 = vld [vmem:[%s12361_s4 + $0x8e8] sm:$0xff]  ;;  %v3816_v18 = vunpack.c.l.s8.bf16 %v3177_v29 }
 0x379   :  { %4734 = vmatprep.subr.bf16.mxu0 %v3792_v46  ;;  %v3818_v46 = vunpack.c.l.s8.bf16 %v3179_v24  ;;  %v3827_v45 = vunpack.c.h.s8.bf16 %v3179_v24  ;;  %v3195_v24 = vld [vmem:[%s12361_s4 + $0x968] sm:$0xff] }
 0x37b   :  { %4530 = vmatpush1.bf16.msra.mxu1 %v3789_v61  ;;  %v3187_v61 = vld [vmem:[%s12361_s4 + $0x928] sm:$0xff] }
 0x37c   :  { %4735 = vmatpush1.bf16.msra.mxu0 %v3791_v56  ;;  %4531 = vmatprep.subr.bf16.mxu1 %v3799_v43  ;;  %v3189_v56 = vld [vmem:[%s12361_s4 + $0x938] sm:$0xff]  ;;  %v3825_v43 = vunpack.c.h.s8.bf16 %v3177_v29  ;;  %v3844_v21 = vunpack.c.h.s8.bf16 %v3187_v61 }
 0x37d   :  { %4736 = vmatprep.subr.bf16.mxu0 %v3801_v27  ;;  %v3835_v27 = vunpack.c.l.s8.bf16 %v3187_v61  ;;  %v3862_v61 = vunpack.c.h.s8.bf16 %v3196_v19 }
 0x37f   :  { %4532 = vmatpush1.bf16.msra.mxu1 %v3798_v38  ;;  %v3837_v38 = vunpack.c.l.s8.bf16 %v3189_v56 }
 0x380   :  { %4737 = vmatpush1.bf16.msra.mxu0 %v3800_v30  ;;  %4533 = vmatprep.subr.bf16.mxu1 %v3808_v62  ;;  %v3188_v30 = vld [vmem:[%s12361_s4 + $0x930] sm:$0xff]  ;;  %v3834_v62 = vunpack.c.l.s8.bf16 %v3186_v35 }
 0x381   :  { %4738 = vmatprep.subr.bf16.mxu0 %v3810_v53  ;;  %v3836_v53 = vunpack.c.l.s8.bf16 %v3188_v30  ;;  %v3845_v29 = vunpack.c.h.s8.bf16 %v3188_v30  ;;  %v3204_v30 = vld [vmem:[%s12361_s4 + $0x9b0] sm:$0xff] }
 0x383   :  { %4534 = vmatpush1.bf16.msra.mxu1 %v3807_v17  ;;  %v3846_v17 = vunpack.c.h.s8.bf16 %v3189_v56 }
 0x384   :  { %4739 = vmatpush1.bf16.msra.mxu0 %v3809_v59  ;;  %4535 = vmatprep.subr.bf16.mxu1 %v3817_v20  ;;  %v3198_v59 = vld [vmem:[%s12361_s4 + $0x980] sm:$0xff]  ;;  %v3843_v20 = vunpack.c.h.s8.bf16 %v3186_v35 }
 0x385   :  { %4740 = vmatprep.subr.bf16.mxu0 %v3819_v31  ;;  %v3853_v31 = vunpack.c.l.s8.bf16 %v3196_v19  ;;  %v3864_v56 = vunpack.c.h.s8.bf16 %v3198_v59 }
 0x387   :  { %4536 = vmatpush1.bf16.msra.mxu1 %v3816_v18  ;;  %v3855_v18 = vunpack.c.l.s8.bf16 %v3198_v59 }
 0x388   :  { %4741 = vmatpush1.bf16.msra.mxu0 %v3818_v46  ;;  %4537 = vmatprep.subr.bf16.mxu1 %v3826_v28  ;;  %v3197_v46 = vld [vmem:[%s12361_s4 + $0x978] sm:$0xff]  ;;  %v3852_v28 = vunpack.c.l.s8.bf16 %v3195_v24 }
 0x389   :  { %4742 = vmatprep.subr.bf16.mxu0 %v3828_v54  ;;  %v3854_v54 = vunpack.c.l.s8.bf16 %v3197_v46  ;;  %v3863_v35 = vunpack.c.h.s8.bf16 %v3197_v46  ;;  %v3213_v46 = vld [vmem:[%s12361_s4 + $0x9f8] sm:$0xff] }
 0x38b   :  { %4538 = vmatpush1.bf16.msra.mxu1 %v3825_v43  ;;  %v3205_v43 = vld [vmem:[%s12361_s4 + $0x9b8] sm:$0xff] }
 0x38c   :  { %4743 = vmatpush1.bf16.msra.mxu0 %v3827_v45  ;;  %4548 = vmatprep.subr.bf16.mxu1 %v3835_v27  ;;  %v3207_v45 = vld [vmem:[%s12361_s4 + $0x9c8] sm:$0xff]  ;;  %v3861_v27 = vunpack.c.h.s8.bf16 %v3195_v24 }
 0x38d   :  { %4753 = vmatprep.subr.bf16.mxu0 %v3837_v38  ;;  %v3871_v38 = vunpack.c.l.s8.bf16 %v3205_v43  ;;  %v3882_v59 = vunpack.c.h.s8.bf16 %v3207_v45 }
 0x38e   :  { %4540 = vmatmul.mubr.bf16.vlgmr.msra.gmra.mrb[28].mxu1 %v9915_v12 }
 0x38f   :  { %4745 = vmatmul.mubr.bf16.vlgmr.msra.gmra.mrb[40].mxu0 %v9915_v12  ;;  %4549 = vmatpush1.bf16.msra.mxu1 %v3834_v62  ;;  %v3873_v62 = vunpack.c.l.s8.bf16 %v3207_v45 }
 0x390   :  { %4580 = vmatprep.mubr.bf16.mxu1 %v9923_v14  ;;  %4754 = vmatpush1.bf16.msra.mxu0 %v3836_v53  ;;  %v3206_v53 = vld [vmem:[%s12361_s4 + $0x9c0] sm:$0xff] }
 0x391   :  { %4785 = vmatprep.mubr.bf16.mxu0 %v9923_v14  ;;  %4550 = vmatprep.subr.bf16.mxu1 %v3844_v21  ;;  %v3870_v21 = vunpack.c.l.s8.bf16 %v3204_v30  ;;  %v3872_v19 = vunpack.c.l.s8.bf16 %v3206_v53  ;;  %v3881_v24 = vunpack.c.h.s8.bf16 %v3206_v53  ;;  %v3222_v53 = vld [vmem:[%s12361_s4 + $0xa40] sm:$0xff] }
 0x392   :  { %4755 = vmatprep.subr.bf16.mxu0 %v3846_v17  ;;  %v3880_v17 = vunpack.c.h.s8.bf16 %v3205_v43 }
 0x393   :  { %4551 = vmatpush1.bf16.msra.mxu1 %v3843_v20  ;;  %v3214_v20 = vld [vmem:[%s12361_s4 + $0xa00] sm:$0xff] }
 0x394   :  { %4756 = vmatpush1.bf16.msra.mxu0 %v3845_v29  ;;  %4552 = vmatprep.subr.bf16.mxu1 %v3853_v31  ;;  %v3216_v29 = vld [vmem:[%s12361_s4 + $0xa10] sm:$0xff]  ;;  %v3879_v31 = vunpack.c.h.s8.bf16 %v3204_v30  ;;  %v3898_v43 = vunpack.c.h.s8.bf16 %v3214_v20 }
 0x395   :  { %4757 = vmatprep.subr.bf16.mxu0 %v3855_v18  ;;  %v3889_v18 = vunpack.c.l.s8.bf16 %v3214_v20  ;;  %v3900_v45 = vunpack.c.h.s8.bf16 %v3216_v29 }
 0x397   :  { %4553 = vmatpush1.bf16.msra.mxu1 %v3852_v28  ;;  %v3891_v28 = vunpack.c.l.s8.bf16 %v3216_v29 }
 0x398   :  { %4758 = vmatpush1.bf16.msra.mxu0 %v3854_v54  ;;  %4554 = vmatprep.subr.bf16.mxu1 %v3862_v61  ;;  %v3215_v54 = vld [vmem:[%s12361_s4 + $0xa08] sm:$0xff]  ;;  %v3888_v61 = vunpack.c.l.s8.bf16 %v3213_v46 }
 0x399   :  { %4759 = vmatprep.subr.bf16.mxu0 %v3864_v56  ;;  %v3890_v56 = vunpack.c.l.s8.bf16 %v3215_v54  ;;  %v3899_v30 = vunpack.c.h.s8.bf16 %v3215_v54  ;;  %v3231_v54 = vld [vmem:[%s12361_s4 + $0xa88] sm:$0xff] }
 0x39b   :  { %4555 = vmatpush1.bf16.msra.mxu1 %v3861_v27  ;;  %v3223_v27 = vld [vmem:[%s12361_s4 + $0xa48] sm:$0xff] }
 0x39c   :  { %4760 = vmatpush1.bf16.msra.mxu0 %v3863_v35  ;;  %4556 = vmatprep.subr.bf16.mxu1 %v3871_v38  ;;  %v3225_v35 = vld [vmem:[%s12361_s4 + $0xa58] sm:$0xff]  ;;  %v3897_v38 = vunpack.c.h.s8.bf16 %v3213_v46  ;;  %v3916_v20 = vunpack.c.h.s8.bf16 %v3223_v27 }
 0x39d   :  { %4761 = vmatprep.subr.bf16.mxu0 %v3873_v62  ;;  %v3907_v62 = vunpack.c.l.s8.bf16 %v3223_v27  ;;  %v3918_v29 = vunpack.c.h.s8.bf16 %v3225_v35 }
 0x39f   :  { %4557 = vmatpush1.bf16.msra.mxu1 %v3870_v21  ;;  %v3909_v21 = vunpack.c.l.s8.bf16 %v3225_v35 }
 0x3a0   :  { %4762 = vmatpush1.bf16.msra.mxu0 %v3872_v19  ;;  %4558 = vmatprep.subr.bf16.mxu1 %v3880_v17  ;;  %v3224_v19 = vld [vmem:[%s12361_s4 + $0xa50] sm:$0xff]  ;;  %v3906_v17 = vunpack.c.l.s8.bf16 %v3222_v53 }
 0x3a1   :  { %4763 = vmatprep.subr.bf16.mxu0 %v3882_v59  ;;  %v3908_v59 = vunpack.c.l.s8.bf16 %v3224_v19  ;;  %v3917_v46 = vunpack.c.h.s8.bf16 %v3224_v19  ;;  %v3240_v19 = vld [vmem:[%s12361_s4 + $0xad0] sm:$0xff] }
 0x3a3   :  { %4559 = vmatpush1.bf16.msra.mxu1 %v3879_v31  ;;  %v3232_v31 = vld [vmem:[%s12361_s4 + $0xa90] sm:$0xff] }
 0x3a4   :  { %4764 = vmatpush1.bf16.msra.mxu0 %v3881_v24  ;;  %4560 = vmatprep.subr.bf16.mxu1 %v3889_v18  ;;  %v3234_v24 = vld [vmem:[%s12361_s4 + $0xaa0] sm:$0xff]  ;;  %v3915_v18 = vunpack.c.h.s8.bf16 %v3222_v53  ;;  %v3934_v27 = vunpack.c.h.s8.bf16 %v3232_v31 }
 0x3a5   :  { %4765 = vmatprep.subr.bf16.mxu0 %v3891_v28  ;;  %v3925_v28 = vunpack.c.l.s8.bf16 %v3232_v31  ;;  %v3936_v35 = vunpack.c.h.s8.bf16 %v3234_v24 }
 0x3a7   :  { %4561 = vmatpush1.bf16.msra.mxu1 %v3888_v61  ;;  %v3927_v61 = vunpack.c.l.s8.bf16 %v3234_v24 }
 0x3a8   :  { %4766 = vmatpush1.bf16.msra.mxu0 %v3890_v56  ;;  %4562 = vmatprep.subr.bf16.mxu1 %v3898_v43  ;;  %v3233_v56 = vld [vmem:[%s12361_s4 + $0xa98] sm:$0xff]  ;;  %v3924_v43 = vunpack.c.l.s8.bf16 %v3231_v54 }
 0x3a9   :  { %4767 = vmatprep.subr.bf16.mxu0 %v3900_v45  ;;  %v3926_v45 = vunpack.c.l.s8.bf16 %v3233_v56  ;;  %v3935_v53 = vunpack.c.h.s8.bf16 %v3233_v56  ;;  %v3249_v56 = vld [vmem:[%s12361_s4 + $0xb18] sm:$0xff] }
 0x3ab   :  { %4563 = vmatpush1.bf16.msra.mxu1 %v3897_v38  ;;  %v3241_v38 = vld [vmem:[%s12361_s4 + $0xad8] sm:$0xff] }
 0x3ac   :  { %4768 = vmatpush1.bf16.msra.mxu0 %v3899_v30  ;;  %4564 = vmatprep.subr.bf16.mxu1 %v3907_v62  ;;  %v3243_v30 = vld [vmem:[%s12361_s4 + $0xae8] sm:$0xff]  ;;  %v3933_v62 = vunpack.c.h.s8.bf16 %v3231_v54  ;;  %v3952_v31 = vunpack.c.h.s8.bf16 %v3241_v38 }
 0x3ad   :  { %4769 = vmatprep.subr.bf16.mxu0 %v3909_v21  ;;  %v3943_v21 = vunpack.c.l.s8.bf16 %v3241_v38  ;;  %v3954_v24 = vunpack.c.h.s8.bf16 %v3243_v30 }
 0x3af   :  { %4565 = vmatpush1.bf16.msra.mxu1 %v3906_v17  ;;  %v3945_v17 = vunpack.c.l.s8.bf16 %v3243_v30 }
 0x3b0   :  { %4770 = vmatpush1.bf16.msra.mxu0 %v3908_v59  ;;  %4566 = vmatprep.subr.bf16.mxu1 %v3916_v20  ;;  %v3242_v59 = vld [vmem:[%s12361_s4 + $0xae0] sm:$0xff]  ;;  %v3942_v20 = vunpack.c.l.s8.bf16 %v3240_v19 }
 0x3b1   :  { %4771 = vmatprep.subr.bf16.mxu0 %v3918_v29  ;;  %v3944_v29 = vunpack.c.l.s8.bf16 %v3242_v59  ;;  %v3953_v54 = vunpack.c.h.s8.bf16 %v3242_v59  ;;  %v3046_v59 = vld [vmem:[%s12361_s4 + $0x4c0] sm:$0xff] }
 0x3b3   :  { %4567 = vmatpush1.bf16.msra.mxu1 %v3915_v18  ;;  %v3250_v18 = vld [vmem:[%s12361_s4 + $0xb20] sm:$0xff] }
 0x3b4   :  { %4772 = vmatpush1.bf16.msra.mxu0 %v3917_v46  ;;  %4568 = vmatprep.subr.bf16.mxu1 %v3925_v28  ;;  %v3252_v46 = vld [vmem:[%s12361_s4 + $0xb30] sm:$0xff]  ;;  %v3951_v28 = vunpack.c.h.s8.bf16 %v3240_v19  ;;  %v3970_v38 = vunpack.c.h.s8.bf16 %v3250_v18 }
 0x3b5   :  { %4773 = vmatprep.subr.bf16.mxu0 %v3927_v61  ;;  %v3961_v61 = vunpack.c.l.s8.bf16 %v3250_v18  ;;  %v3972_v30 = vunpack.c.h.s8.bf16 %v3252_v46 }
 0x3b7   :  { %4569 = vmatpush1.bf16.msra.mxu1 %v3924_v43  ;;  %v3963_v43 = vunpack.c.l.s8.bf16 %v3252_v46  ;;  %v3091_v46 = vld [vmem:[%s12361_s4 + $0x628] sm:$0xff] }
 0x3b8   :  { %4774 = vmatpush1.bf16.msra.mxu0 %v3926_v45  ;;  %4570 = vmatprep.subr.bf16.mxu1 %v3934_v27  ;;  %v3251_v45 = vld [vmem:[%s12361_s4 + $0xb28] sm:$0xff]  ;;  %v3960_v27 = vunpack.c.l.s8.bf16 %v3249_v56 }
 0x3b9   :  { %4775 = vmatprep.subr.bf16.mxu0 %v3936_v35  ;;  %v3962_v35 = vunpack.c.l.s8.bf16 %v3251_v45  ;;  %v3971_v19 = vunpack.c.h.s8.bf16 %v3251_v45  ;;  %v3055_v45 = vld [vmem:[%s12361_s4 + $0x508] sm:$0xff] }
 0x3bb   :  { %4571 = vmatpush1.bf16.msra.mxu1 %v3933_v62  ;;  %v3082_v62 = vld [vmem:[%s12361_s4 + $0x5e0] sm:$0xff] }
 0x3bc   :  { %4776 = vmatpush1.bf16.msra.mxu0 %v3935_v53  ;;  %4572 = vmatprep.subr.bf16.mxu1 %v3943_v21  ;;  %v2938_v53 = vld [vmem:[%s12361_s4 + $0x160] sm:$0xff]  ;;  %v3969_v21 = vunpack.c.h.s8.bf16 %v3249_v56 }
 0x3bd   :  { %4777 = vmatprep.subr.bf16.mxu0 %v3945_v17  ;;  %v3622_v17 = vunpack.c.l.s8.bf16 %v3082_v62  ;;  %v3343_v18 = vunpack.c.h.s8.bf16 %v2938_v53 }
 0x3bf   :  { %4573 = vmatpush1.bf16.msra.mxu1 %v3942_v20  ;;  %v3334_v20 = vunpack.c.l.s8.bf16 %v2938_v53  ;;  %v3100_v53 = vld [vmem:[%s12361_s4 + $0x670] sm:$0xff] }
 0x3c0   :  { %4778 = vmatpush1.bf16.msra.mxu0 %v3944_v29  ;;  %4574 = vmatprep.subr.bf16.mxu1 %v3952_v31  ;;  %v2902_v29 = vld [vmem:[%s12361_s4 + $0x40] sm:$0xff]  ;;  %v3550_v31 = vunpack.c.l.s8.bf16 %v3046_v59 }
 0x3c1   :  { %4779 = vmatprep.subr.bf16.mxu0 %v3954_v24  ;;  %v3262_v24 = vunpack.c.l.s8.bf16 %v2902_v29  ;;  %v3271_v56 = vunpack.c.h.s8.bf16 %v2902_v29  ;;  %v2920_v29 = vld [vmem:[%s12361_s4 + $0xd0] sm:$0xff] }
 0x3c3   :  { %4575 = vmatpush1.bf16.msra.mxu1 %v3951_v28  ;;  %v3631_v28 = vunpack.c.h.s8.bf16 %v3082_v62 }
 0x3c4   :  { %4780 = vmatpush1.bf16.msra.mxu0 %v3953_v54  ;;  %4576 = vmatprep.subr.bf16.mxu1 %v3961_v61  ;;  %v2947_v54 = vld [vmem:[%s12361_s4 + $0x1a8] sm:$0xff]  ;;  %v3559_v61 = vunpack.c.h.s8.bf16 %v3046_v59  ;;  %v3064_v59 = vld [vmem:[%s12361_s4 + $0x550] sm:$0xff] }
 0x3c5   :  { %4781 = vmatprep.subr.bf16.mxu0 %v3963_v43  ;;  %v3640_v43 = vunpack.c.l.s8.bf16 %v3091_v46  ;;  %v3361_v62 = vunpack.c.h.s8.bf16 %v2947_v54 }
 0x3c7   :  { %4577 = vmatpush1.bf16.msra.mxu1 %v3960_v27  ;;  %v3352_v27 = vunpack.c.l.s8.bf16 %v2947_v54  ;;  %v2965_v54 = vld [vmem:[%s12361_s4 + $0x238] sm:$0xff] }
 0x3c8   :  { %4782 = vmatpush1.bf16.msra.mxu0 %v3962_v35  ;;  %4578 = vmatprep.subr.bf16.mxu1 %v3970_v38  ;;  %v2911_v35 = vld [vmem:[%s12361_s4 + $0x88] sm:$0xff]  ;;  %v3568_v38 = vunpack.c.l.s8.bf16 %v3055_v45 }
 0x3c9   :  { %4783 = vmatprep.subr.bf16.mxu0 %v3972_v30  ;;  %v3649_v30 = vunpack.c.h.s8.bf16 %v3091_v46 }
 0x3cb   :  { %4579 = vmatpush1.bf16.msra.mxu1 %v3969_v21  ;;  %v3577_v21 = vunpack.c.h.s8.bf16 %v3055_v45  ;;  %v3073_v45 = vld [vmem:[%s12361_s4 + $0x598] sm:$0xff] }
 0x3cc   :  { %4784 = vmatpush1.bf16.msra.mxu0 %v3971_v19  ;;  %7551 = vmatprep.subr.bf16.mxu1 %v3622_v17  ;;  %v3289_v19 = vunpack.c.h.s8.bf16 %v2911_v35  ;;  %v3658_v17 = vunpack.c.l.s8.bf16 %v3100_v53 }
 0x3cd   :  { %7507 = vmatprep.subr.bf16.mxu0 %v3334_v20 }
 0x3ce   :  { %4581 = vmatmul.mubr.bf16.vlgmr.msra.gmra.mrb[28].mxu1 %v10023_v26 }
 0x3cf   :  { %4786 = vmatmul.mubr.bf16.vlgmr.msra.gmra.mrb[40].mxu0 %v10023_v26  ;;  %7552 = vmatpush3.bf16.msra.mxu1 %v3550_v31  ;;  %v3586_v31 = vunpack.c.l.s8.bf16 %v3064_v59 }
 0x3d0   :  { %7508 = vmatpush3.bf16.msra.mxu0 %v3262_v24  ;;  %4826 = vmatprep.mubr.bf16.mxu0 %v9573_v55  ;;  %v3280_v55 = vunpack.c.l.s8.bf16 %v2911_v35  ;;  %v3298_v24 = vunpack.c.l.s8.bf16 %v2920_v29  ;;  %v2929_v35 = vld [vmem:[%s12361_s4 + $0x118] sm:$0xff] }
 0x3d1   :  { %4906 = vmatprep.mubr.bf16.mxu1 %v9703_v16  ;;  %7509 = vmatprep.subr.bf16.mxu0 %v3343_v18  ;;  %v2956_v16 = vld [vmem:[%s12361_s4 + $0x1f0] sm:$0xff]  ;;  %v3667_v18 = vunpack.c.h.s8.bf16 %v3100_v53  ;;  %v3226_v53 = vld [vmem:[%s12361_s4 + $0xa60] sm:$0xff] }
 0x3d2   :  { %7553 = vmatprep.subr.bf16.mxu1 %v3631_v28  ;;  %v3370_v20 = vunpack.c.l.s8.bf16 %v2956_v16  ;;  %v3379_v46 = vunpack.c.h.s8.bf16 %v2956_v16  ;;  %v3109_v28 = vld [vmem:[%s12361_s4 + $0x6b8] sm:$0xff]  ;;  %v3010_v16 = vld [vmem:[%s12361_s4 + $0x3a0] sm:$0xff] }
 0x3d3   :  { %7554 = vmatpush3.bf16.msra.mxu1 %v3559_v61  ;;  %v3595_v61 = vunpack.c.h.s8.bf16 %v3064_v59  ;;  %v3190_v59 = vld [vmem:[%s12361_s4 + $0x940] sm:$0xff] }
 0x3d4   :  { %7510 = vmatpush3.bf16.msra.mxu0 %v3271_v56  ;;  %7555 = vmatprep.subr.bf16.mxu1 %v3640_v43  ;;  %v3307_v56 = vunpack.c.h.s8.bf16 %v2920_v29  ;;  %v3676_v43 = vunpack.c.l.s8.bf16 %v3109_v28  ;;  %v2974_v29 = vld [vmem:[%s12361_s4 + $0x280] sm:$0xff] }
 0x3d5   :  { %7511 = vmatprep.subr.bf16.mxu0 %v3352_v27  ;;  %v3388_v27 = vunpack.c.l.s8.bf16 %v2965_v54 }
 0x3d7   :  { %7556 = vmatpush3.bf16.msra.mxu1 %v3568_v38  ;;  %v3604_v38 = vunpack.c.l.s8.bf16 %v3073_v45 }
 0x3d8   :  { %7512 = vmatpush3.bf16.msra.mxu0 %v3280_v55  ;;  %7557 = vmatprep.subr.bf16.mxu1 %v3649_v30  ;;  %v3316_v55 = vunpack.c.l.s8.bf16 %v2929_v35  ;;  %v3685_v30 = vunpack.c.h.s8.bf16 %v3109_v28  ;;  %v3919_v28 = vunpack.c.h.s8.bf16 %v3226_v53 }
 0x3d9   :  { %7513 = vmatprep.subr.bf16.mxu0 %v3361_v62  ;;  %v3397_v62 = vunpack.c.h.s8.bf16 %v2965_v54  ;;  %v3019_v54 = vld [vmem:[%s12361_s4 + $0x3e8] sm:$0xff] }
 0x3db   :  { %7558 = vmatpush3.bf16.msra.mxu1 %v3577_v21  ;;  %v3613_v21 = vunpack.c.h.s8.bf16 %v3073_v45  ;;  %v3199_v45 = vld [vmem:[%s12361_s4 + $0x988] sm:$0xff] }
 0x3dc   :  { %7514 = vmatpush3.bf16.msra.mxu0 %v3289_v19  ;;  %7559 = vmatprep.subr.bf16.mxu1 %v3658_v17  ;;  %v3325_v19 = vunpack.c.h.s8.bf16 %v2929_v35  ;;  %v3910_v17 = vunpack.c.l.s8.bf16 %v3226_v53 }
 0x3dd   :  { %7515 = vmatprep.subr.bf16.mxu0 %v3370_v20  ;;  %v3478_v20 = vunpack.c.l.s8.bf16 %v3010_v16 }
 0x3df   :  { %7560 = vmatpush3.bf16.msra.mxu1 %v3586_v31  ;;  %v3838_v31 = vunpack.c.l.s8.bf16 %v3190_v59 }
 0x3e0   :  { %7516 = vmatpush3.bf16.msra.mxu0 %v3298_v24  ;;  %7561 = vmatprep.subr.bf16.mxu1 %v3667_v18  ;;  %v3406_v24 = vunpack.c.l.s8.bf16 %v2974_v29  ;;  %v3487_v18 = vunpack.c.h.s8.bf16 %v3010_v16 }
 0x3e1   :  { %7517 = vmatprep.subr.bf16.mxu0 %v3379_v46  ;;  %v3235_v46 = vld [vmem:[%s12361_s4 + $0xaa8] sm:$0xff] }
 0x3e2   :  { %v3937_v35 = vunpack.c.h.s8.bf16 %v3235_v46 }
 0x3e3   :  { %7562 = vmatpush3.bf16.msra.mxu1 %v3595_v61  ;;  %v3847_v61 = vunpack.c.h.s8.bf16 %v3190_v59 }
 0x3e4   :  { %7518 = vmatpush3.bf16.msra.mxu0 %v3307_v56  ;;  %7563 = vmatprep.subr.bf16.mxu1 %v3676_v43  ;;  %v3415_v56 = vunpack.c.h.s8.bf16 %v2974_v29  ;;  %v3928_v43 = vunpack.c.l.s8.bf16 %v3235_v46 }
 0x3e5   :  { %7519 = vmatprep.subr.bf16.mxu0 %v3388_v27  ;;  %v2983_v27 = vld [vmem:[%s12361_s4 + $0x2c8] sm:$0xff] }
 0x3e6   :  { %v3433_v53 = vunpack.c.h.s8.bf16 %v2983_v27 }
 0x3e7   :  { %7564 = vmatpush3.bf16.msra.mxu1 %v3604_v38  ;;  %v3505_v38 = vunpack.c.h.s8.bf16 %v3019_v54 }
 0x3e8   :  { %7520 = vmatpush3.bf16.msra.mxu0 %v3316_v55  ;;  %7565 = vmatprep.subr.bf16.mxu1 %v3685_v30  ;;  %v3244_v55 = vld [vmem:[%s12361_s4 + $0xaf0] sm:$0xff]  ;;  %v10602_v30 = vld [vmem:[%s12359_s2] sm:$0xff] }
 0x3e9   :  { %7521 = vmatprep.subr.bf16.mxu0 %v3397_v62  ;;  %v3865_v62 = vunpack.c.h.s8.bf16 %v3199_v45  ;;  %v3946_v16 = vunpack.c.l.s8.bf16 %v3244_v55  ;;  %v898_v59 = vrot.slane %v10602_v30, %v9493_v37 }
 0x3eb   :  { %7566 = vmatpush3.bf16.msra.mxu1 %v3613_v21  ;;  %v3208_v21 = vld [vmem:[%s12361_s4 + $0x9d0] sm:$0xff]  ;;  %v1176_v46 = vadd.f32 %v9456_v51, %v898_v59  ;;  %v3001_v51 = vld [vmem:[%s12361_s4 + $0x358] sm:$0xff] }
 0x3ec   :  { %7522 = vmatpush3.bf16.msra.mxu0 %v3325_v19  ;;  %7595 = vmatprep.subr.bf16.mxu1 %v3910_v17  ;;  %v2992_v17 = vld [vmem:[%s12361_s4 + $0x310] sm:$0xff] }
 0x3ed   :  { %7529 = vmatprep.subr.bf16.mxu0 %v3478_v20  ;;  %v3874_v20 = vunpack.c.l.s8.bf16 %v3208_v21  ;;  %v3442_v29 = vunpack.c.l.s8.bf16 %v2992_v17  ;;  %8084 = vtanh.f32 %v1176_v46 }
 0x3ee   :  { %4907 = vmatmul.mubr.bf16.vlgmr.msra.gmra.mrb[32].mxu1 %v9807_v47  ;;  %v3496_v47 = vunpack.c.l.s8.bf16 %v3019_v54  ;;  %v3883_v54 = vunpack.c.h.s8.bf16 %v3208_v21  ;;  %v3118_v21 = vld [vmem:[%s12361_s4 + $0x700] sm:$0xff] }
 0x3ef   :  { %4827 = vmatmul.mubr.bf16.vlgmr.msra.gmra.mrb[44].mxu0 %v9575_v41  ;;  %7596 = vmatpush3.bf16.msra.mxu1 %v3838_v31  ;;  %v3856_v41 = vunpack.c.l.s8.bf16 %v3199_v45  ;;  %v3955_v31 = vunpack.c.h.s8.bf16 %v3244_v55  ;;  %v3694_v59 = vunpack.c.l.s8.bf16 %v3118_v21 }
 0x3f0   :  { %7530 = vmatpush3.bf16.msra.mxu0 %v3406_v24  ;;  %4866 = vmatprep.mubr.bf16.mxu0 %v9589_v40  ;;  %v3424_v40 = vunpack.c.l.s8.bf16 %v2983_v27  ;;  %v3460_v27 = vunpack.c.l.s8.bf16 %v3001_v51 }
 0x3f1   :  { %4986 = vmatprep.mubr.bf16.mxu1 %v9923_v14  ;;  %7531 = vmatprep.subr.bf16.mxu0 %v3487_v18  ;;  %v3028_v14 = vld [vmem:[%s12361_s4 + $0x430] sm:$0xff]  ;;  %v3253_v18 = vld [vmem:[%s12361_s4 + $0xb38] sm:$0xff] }
 0x3f2   :  { %7597 = vmatprep.subr.bf16.mxu1 %v3919_v28  ;;  %v3514_v19 = vunpack.c.l.s8.bf16 %v3028_v14  ;;  %v3523_v24 = vunpack.c.h.s8.bf16 %v3028_v14  ;;  %v3037_v28 = vld [vmem:[%s12361_s4 + $0x478] sm:$0xff]  ;;  %v3469_v14 = vunpack.c.h.s8.bf16 %v3001_v51 }
 0x3f3   :  { %7598 = vmatpush3.bf16.msra.mxu1 %v3847_v61  ;;  %v3451_v61 = vunpack.c.h.s8.bf16 %v2992_v17  ;;  %v3532_v45 = vunpack.c.l.s8.bf16 %v3037_v28  ;;  %v1823_v51 = vld [vmem:[%s12360_s3 + $0x98] sm:$0xff] }
 0x3f4   :  { %7532 = vmatpush3.bf16.msra.mxu0 %v3415_v56  ;;  %7599 = vmatprep.subr.bf16.mxu1 %v3928_v43  ;;  %v3964_v56 = vunpack.c.l.s8.bf16 %v3253_v18  ;;  %v3217_v43 = vld [vmem:[%s12361_s4 + $0xa18] sm:$0xff] }
 0x3f5   :  { %7533 = vmatprep.subr.bf16.mxu0 %v3496_v47  ;;  %v3892_v47 = vunpack.c.l.s8.bf16 %v3217_v43  ;;  %v3901_v55 = vunpack.c.h.s8.bf16 %v3217_v43 }
 0x3f7   :  { %7600 = vmatpush3.bf16.msra.mxu1 %v3856_v41  ;;  %v3973_v41 = vunpack.c.h.s8.bf16 %v3253_v18  ;;  %v8085_v17 = vpop.eup %8084 }
 0x3f8   :  { %7534 = vmatpush3.bf16.msra.mxu0 %v3424_v40  ;;  %7601 = vmatprep.subr.bf16.mxu1 %v3937_v35  ;;  %v3541_v40 = vunpack.c.h.s8.bf16 %v3037_v28  ;;  %v1805_v35 = vld [vmem:[%s12360_s3 + $0x8] sm:$0xff]  ;;  %v10644_v18 = vpack.c.bf16 %v8085_v17, %v8085_v17  ;;  %v3703_v28 = vunpack.c.h.s8.bf16 %v3118_v21  ;;  %v1832_v21 = vld [vmem:[%s12360_s3 + $0xe0] sm:$0xff] }
 0x3f9   :  { %7535 = vmatprep.subr.bf16.mxu0 %v3505_v38  ;;  %v3154_v38 = vld [vmem:[%s12361_s4 + $0x820] sm:$0xff] }
 0x3fb   :  { %7602 = vmatpush3.bf16.msra.mxu1 %v3865_v62  ;;  %v2165_v62 = vunpack.c.l.s8.bf16 %v1805_v35 }
 0x3fc   :  { %7536 = vmatpush3.bf16.msra.mxu0 %v3433_v53  ;;  %7603 = vmatprep.subr.bf16.mxu1 %v3946_v16  ;;  %v1804_v53 = vld [vmem:[%s12360_s3] sm:$0xff]  ;;  %v3766_v16 = vunpack.c.l.s8.bf16 %v3154_v38 }
 0x3fd   :  { %7537 = vmatprep.subr.bf16.mxu0 %v3514_v19  ;;  %v2164_v19 = vunpack.c.l.s8.bf16 %v1804_v53  ;;  %v2173_v46 = vunpack.c.h.s8.bf16 %v1804_v53  ;;  %v2210_v53 = vunpack.c.h.s8.bf16 %v1823_v51 }
 0x3ff   :  { %7604 = vmatpush3.bf16.msra.mxu1 %v3874_v20  ;;  %v3775_v20 = vunpack.c.h.s8.bf16 %v3154_v38 }
 0x400   :  { %7538 = vmatpush3.bf16.msra.mxu0 %v3442_v29  ;;  %7605 = vmatprep.subr.bf16.mxu1 %v3955_v31  ;;  %v1814_v29 = vld [vmem:[%s12360_s3 + $0x50] sm:$0xff]  ;;  %v2174_v31 = vunpack.c.h.s8.bf16 %v1805_v35 }
 0x401   :  { %7539 = vmatprep.subr.bf16.mxu0 %v3523_v24  ;;  %v3163_v24 = vld [vmem:[%s12361_s4 + $0x868] sm:$0xff]  ;;  %v2192_v43 = vunpack.c.h.s8.bf16 %v1814_v29  ;;  %v1822_v35 = vld [vmem:[%s12360_s3 + $0x90] sm:$0xff] }
 0x402   :  { %v2209_v17 = vunpack.c.h.s8.bf16 %v1822_v35 }
 0x403   :  { %7606 = vmatpush3.bf16.msra.mxu1 %v3883_v54  ;;  %v2183_v54 = vunpack.c.l.s8.bf16 %v1814_v29  ;;  %v1831_v29 = vld [vmem:[%s12360_s3 + $0xd8] sm:$0xff] }
 0x404   :  { %7540 = vmatpush3.bf16.msra.mxu0 %v3451_v61  ;;  %7607 = vmatprep.subr.bf16.mxu1 %v3964_v56  ;;  %v3784_v61 = vunpack.c.l.s8.bf16 %v3163_v24  ;;  %v3127_v56 = vld [vmem:[%s12361_s4 + $0x748] sm:$0xff] }
 0x405   :  { %7541 = vmatprep.subr.bf16.mxu0 %v3532_v45  ;;  %v3793_v45 = vunpack.c.h.s8.bf16 %v3163_v24  ;;  %v3145_v24 = vld [vmem:[%s12361_s4 + $0x7d8] sm:$0xff] }
 0x407   :  { %7608 = vmatpush3.bf16.msra.mxu1 %v3892_v47  ;;  %v3172_v47 = vld [vmem:[%s12361_s4 + $0x8b0] sm:$0xff] }
 0x408   :  { %7542 = vmatpush3.bf16.msra.mxu0 %v3460_v27  ;;  %7609 = vmatprep.subr.bf16.mxu1 %v3973_v41  ;;  %v3721_v41 = vunpack.c.h.s8.bf16 %v3127_v56  ;;  %v3802_v38 = vunpack.c.l.s8.bf16 %v3172_v47 }
 0x409   :  { %7543 = vmatprep.subr.bf16.mxu0 %v3541_v40  ;;  %v2201_v40 = vunpack.c.l.s8.bf16 %v1823_v51 }
 0x40b   :  { %7610 = vmatpush3.bf16.msra.mxu1 %v3901_v55  ;;  %v3136_v55 = vld [vmem:[%s12361_s4 + $0x790] sm:$0xff] }
 0x40c   :  { %7544 = vmatpush3.bf16.msra.mxu0 %v3469_v14  ;;  %4994 = vmatprep.subr.bf16.mxu1 %v2165_v62  ;;  %v2200_v14 = vunpack.c.l.s8.bf16 %v1822_v35  ;;  %v3730_v62 = vunpack.c.l.s8.bf16 %v3136_v55 }
 0x40d   :  { %7573 = vmatprep.subr.bf16.mxu0 %v3766_v16  ;;  %v3811_v16 = vunpack.c.h.s8.bf16 %v3172_v47  ;;  %v1806_v47 = vld [vmem:[%s12360_s3 + $0x10] sm:$0xff] }
 0x40e   :  { %4987 = vmatmul.mubr.bf16.vlgmr.msra.gmra.mrb[36].mxu1 %v10023_v26  ;;  %v1813_v26 = vld [vmem:[%s12360_s3 + $0x48] sm:$0xff] }
 0x40f   :  { %4867 = vmatmul.mubr.bf16.vlgmr.msra.gmra.mrb[48].mxu0 %v9699_v36  ;;  %4995 = vmatpush1.bf16.msra.mxu1 %v2164_v19  ;;  %v2182_v36 = vunpack.c.l.s8.bf16 %v1813_v26  ;;  %v2191_v27 = vunpack.c.h.s8.bf16 %v1813_v26  ;;  %v3181_v19 = vld [vmem:[%s12361_s4 + $0x8f8] sm:$0xff] }
 0x410   :  { %7574 = vmatpush3.bf16.msra.mxu0 %v3694_v59  ;;  %4946 = vmatprep.mubr.bf16.mxu0 %v9815_v23  ;;  %v3712_v23 = vunpack.c.l.s8.bf16 %v3127_v56  ;;  %v3739_v59 = vunpack.c.h.s8.bf16 %v3136_v55  ;;  %v3829_v26 = vunpack.c.h.s8.bf16 %v3181_v19  ;;  %v1807_v56 = vld [vmem:[%s12360_s3 + $0x18] sm:$0xff]  ;;  %v1816_v55 = vld [vmem:[%s12360_s3 + $0x60] sm:$0xff] }
 0x411   :  { %5026 = vmatprep.mubr.bf16.mxu1 %v10644_v18  ;;  %7575 = vmatprep.subr.bf16.mxu0 %v3775_v20  ;;  %v2219_v20 = vunpack.c.l.s8.bf16 %v1832_v21  ;;  %v2167_v51 = vunpack.c.l.s8.bf16 %v1807_v56  ;;  %v2176_v35 = vunpack.c.h.s8.bf16 %v1807_v56 }
 0x412   :  { %4996 = vmatprep.subr.bf16.mxu1 %v2174_v31  ;;  %v3820_v31 = vunpack.c.l.s8.bf16 %v3181_v19  ;;  %v1815_v19 = vld [vmem:[%s12360_s3 + $0x58] sm:$0xff] }
 0x413   :  { %4997 = vmatpush1.bf16.msra.mxu1 %v2173_v46  ;;  %v2218_v46 = vunpack.c.l.s8.bf16 %v1831_v29 }
 0x414   :  { %7576 = vmatpush3.bf16.msra.mxu0 %v3703_v28  ;;  %4998 = vmatprep.subr.bf16.mxu1 %v2183_v54  ;;  %v3748_v28 = vunpack.c.l.s8.bf16 %v3145_v24  ;;  %v2228_v54 = vunpack.c.h.s8.bf16 %v1832_v21  ;;  %v2185_v21 = vunpack.c.l.s8.bf16 %v1816_v55 }
 0x415   :  { %7577 = vmatprep.subr.bf16.mxu0 %v3784_v61  ;;  %v1841_v61 = vld [vmem:[%s12360_s3 + $0x128] sm:$0xff] }
 0x417   :  { %4999 = vmatpush1.bf16.msra.mxu1 %v2182_v36  ;;  %v2227_v36 = vunpack.c.h.s8.bf16 %v1831_v29  ;;  %v1859_v29 = vld [vmem:[%s12360_s3 + $0x1b8] sm:$0xff] }
 0x418   :  { %7578 = vmatpush3.bf16.msra.mxu0 %v3712_v23  ;;  %5000 = vmatprep.subr.bf16.mxu1 %v2192_v43  ;;  %v3757_v23 = vunpack.c.h.s8.bf16 %v3145_v24  ;;  %v2237_v43 = vunpack.c.l.s8.bf16 %v1841_v61  ;;  %v894_v24 = vrot.slane %v10602_v30, %v9491_v39 }
 0x419   :  { %7579 = vmatprep.subr.bf16.mxu0 %v3793_v45  ;;  %v1840_v45 = vld [vmem:[%s12360_s3 + $0x120] sm:$0xff] }
 0x41b   :  { %5001 = vmatpush1.bf16.msra.mxu1 %v2191_v27  ;;  %v2236_v27 = vunpack.c.l.s8.bf16 %v1840_v45 }
 0x41c   :  { %7580 = vmatpush3.bf16.msra.mxu0 %v3721_v41  ;;  %5002 = vmatprep.subr.bf16.mxu1 %v2201_v40  ;;  %v2166_v41 = vunpack.c.l.s8.bf16 %v1806_v47  ;;  %v2246_v40 = vunpack.c.h.s8.bf16 %v1841_v61  ;;  %v1858_v61 = vld [vmem:[%s12360_s3 + $0x1b0] sm:$0xff] }
 0x41d   :  { %7581 = vmatprep.subr.bf16.mxu0 %v3802_v38  ;;  %v1850_v38 = vld [vmem:[%s12360_s3 + $0x170] sm:$0xff] }
 0x41f   :  { %5003 = vmatpush1.bf16.msra.mxu1 %v2200_v14  ;;  %v2245_v14 = vunpack.c.h.s8.bf16 %v1840_v45 }
 0x420   :  { %7582 = vmatpush3.bf16.msra.mxu0 %v3730_v62  ;;  %5004 = vmatprep.subr.bf16.mxu1 %v2210_v53  ;;  %v2175_v62 = vunpack.c.h.s8.bf16 %v1806_v47  ;;  %v2255_v53 = vunpack.c.l.s8.bf16 %v1850_v38  ;;  %v2282_v47 = vunpack.c.h.s8.bf16 %v1859_v29 }
 0x421   :  { %7583 = vmatprep.subr.bf16.mxu0 %v3811_v16  ;;  %v1849_v16 = vld [vmem:[%s12360_s3 + $0x168] sm:$0xff] }
 0x423   :  { %5005 = vmatpush1.bf16.msra.mxu1 %v2209_v17  ;;  %v2184_v17 = vunpack.c.l.s8.bf16 %v1815_v19 }
 0x424   :  { %7584 = vmatpush3.bf16.msra.mxu0 %v3739_v59  ;;  %5006 = vmatprep.subr.bf16.mxu1 %v2219_v20  ;;  %v2264_v59 = vunpack.c.h.s8.bf16 %v1850_v38  ;;  %v2194_v20 = vunpack.c.h.s8.bf16 %v1816_v55  ;;  %v1867_v38 = vld [vmem:[%s12360_s3 + $0x1f8] sm:$0xff] }
 0x425   :  { %7585 = vmatprep.subr.bf16.mxu0 %v3820_v31  ;;  %v1825_v31 = vld [vmem:[%s12360_s3 + $0xa8] sm:$0xff] }
 0x426   :  { %v2203_v56 = vunpack.c.l.s8.bf16 %v1825_v31 }
 0x427   :  { %5007 = vmatpush1.bf16.msra.mxu1 %v2218_v46  ;;  %v2263_v46 = vunpack.c.h.s8.bf16 %v1849_v16 }
 0x428   :  { %7586 = vmatpush3.bf16.msra.mxu0 %v3748_v28  ;;  %5008 = vmatprep.subr.bf16.mxu1 %v2228_v54  ;;  %v906_v28 = vrot.slane %v10602_v30, %v9497_v32  ;;  %v2193_v54 = vunpack.c.h.s8.bf16 %v1815_v19  ;;  %v1877_v19 = vld [vmem:[%s12360_s3 + $0x248] sm:$0xff] }
 0x429   :  { %7587 = vmatprep.subr.bf16.mxu0 %v3829_v26  ;;  %v2273_v26 = vunpack.c.l.s8.bf16 %v1859_v29  ;;  %v1876_v29 = vld [vmem:[%s12360_s3 + $0x240] sm:$0xff] }
 0x42a   :  { %v1217_v45 = vadd.f32 %v9464_v63, %v906_v28 }
 0x42b   :  { %5009 = vmatpush1.bf16.msra.mxu1 %v2227_v36  ;;  %v1824_v36 = vld [vmem:[%s12360_s3 + $0xa0] sm:$0xff] }
 0x42c   :  { %7588 = vmatpush3.bf16.msra.mxu0 %v3757_v23  ;;  %5010 = vmatprep.subr.bf16.mxu1 %v2237_v43  ;;  %v1174_v23 = vadd.f32 %v9454_v52, %v894_v24  ;;  %v2272_v43 = vunpack.c.l.s8.bf16 %v1858_v61  ;;  %v2281_v52 = vunpack.c.h.s8.bf16 %v1858_v61  ;;  %v2211_v63 = vunpack.c.h.s8.bf16 %v1824_v36 }
 0x42d   :  { %5199 = vmatprep.subr.bf16.mxu0 %v2167_v51  ;;  %v2202_v51 = vunpack.c.l.s8.bf16 %v1824_v36 }
 0x42e   :  { %8086 = vtanh.f32 %v1174_v23 }
 0x42f   :  { %4947 = vmatmul.mubr.bf16.vlgmr.msra.gmra.mrb[52].mxu0 %v9915_v12  ;;  %5011 = vmatpush1.bf16.msra.mxu1 %v2236_v27  ;;  %v2254_v12 = vunpack.c.l.s8.bf16 %v1849_v16  ;;  %v2212_v27 = vunpack.c.h.s8.bf16 %v1825_v31  ;;  %8088 = vtanh.f32 %v1217_v45  ;;  %v1852_v45 = vld [vmem:[%s12360_s3 + $0x180] sm:$0xff] }
 0x430   :  { %5200 = vmatpush1.bf16.msra.mxu0 %v2166_v41  ;;  %5231 = vmatprep.mubr.bf16.mxu0 %v10644_v18  ;;  %v1868_v41 = vld [vmem:[%s12360_s3 + $0x200] sm:$0xff] }
 0x431   :  { %5012 = vmatprep.subr.bf16.mxu1 %v2246_v40  ;;  %5201 = vmatprep.subr.bf16.mxu0 %v2176_v35  ;;  %v1834_v40 = vld [vmem:[%s12360_s3 + $0xf0] sm:$0xff]  ;;  %v2291_v35 = vunpack.c.l.s8.bf16 %v1868_v41  ;;  %v2300_v16 = vunpack.c.h.s8.bf16 %v1868_v41  ;;  %v1885_v41 = vld [vmem:[%s12360_s3 + $0x288] sm:$0xff] }
 0x432   :  { %v2221_v55 = vunpack.c.l.s8.bf16 %v1834_v40 }
 0x433   :  { %5013 = vmatpush1.bf16.msra.mxu1 %v2245_v14  ;;  %v1833_v14 = vld [vmem:[%s12360_s3 + $0xe8] sm:$0xff] }
 0x434   :  { %5202 = vmatpush1.bf16.msra.mxu0 %v2175_v62  ;;  %5014 = vmatprep.subr.bf16.mxu1 %v2255_v53  ;;  %v2290_v62 = vunpack.c.l.s8.bf16 %v1867_v38  ;;  %v2220_v53 = vunpack.c.l.s8.bf16 %v1833_v14 }
 0x435   :  { %5203 = vmatprep.subr.bf16.mxu0 %v2185_v21  ;;  %v2230_v21 = vunpack.c.h.s8.bf16 %v1834_v40  ;;  %v2257_v40 = vunpack.c.l.s8.bf16 %v1852_v45 }
 0x437   :  { %5015 = vmatpush1.bf16.msra.mxu1 %v2254_v12  ;;  %v1843_v12 = vld [vmem:[%s12360_s3 + $0x138] sm:$0xff] }
 0x438   :  { %5204 = vmatpush1.bf16.msra.mxu0 %v2184_v17  ;;  %5016 = vmatprep.subr.bf16.mxu1 %v2264_v59  ;;  %v2299_v17 = vunpack.c.h.s8.bf16 %v1867_v38  ;;  %v2229_v59 = vunpack.c.h.s8.bf16 %v1833_v14  ;;  %v8087_v31 = vpop.eup %8086  ;;  %v2239_v24 = vunpack.c.l.s8.bf16 %v1843_v12  ;;  %v2248_v23 = vunpack.c.h.s8.bf16 %v1843_v12  ;;  %v1895_v14 = vld [vmem:[%s12360_s3 + $0x2d8] sm:$0xff] }
 0x439   :  { %5205 = vmatprep.subr.bf16.mxu0 %v2194_v20  ;;  %v2309_v20 = vunpack.c.l.s8.bf16 %v1877_v19  ;;  %v8089_v28 = vpop.eup %8088 }
 0x43a   :  { %v10749_v36 = vpack.c.bf16 %v8089_v28, %v8089_v28 }
 0x43b   :  { %5017 = vmatpush1.bf16.msra.mxu1 %v2263_v46  ;;  %v1842_v46 = vld [vmem:[%s12360_s3 + $0x130] sm:$0xff] }
 0x43c   :  { %5206 = vmatpush1.bf16.msra.mxu0 %v2193_v54  ;;  %5018 = vmatprep.subr.bf16.mxu1 %v2273_v26  ;;  %v2308_v54 = vunpack.c.l.s8.bf16 %v1876_v29  ;;  %v10747_v26 = vpack.c.bf16 %v8087_v31, %v8087_v31  ;;  %v2238_v61 = vunpack.c.l.s8.bf16 %v1842_v46 }
 0x43d   :  { %5207 = vmatprep.subr.bf16.mxu0 %v2203_v56  ;;  %v2318_v56 = vunpack.c.h.s8.bf16 %v1877_v19  ;;  %v1894_v19 = vld [vmem:[%s12360_s3 + $0x2d0] sm:$0xff] }
 0x43e   :  { %v2353_v28 = vunpack.c.h.s8.bf16 %v1894_v19 }
 0x43f   :  { %5019 = vmatpush1.bf16.msra.mxu1 %v2272_v43  ;;  %v1886_v43 = vld [vmem:[%s12360_s3 + $0x290] sm:$0xff] }
 0x440   :  { %5208 = vmatpush1.bf16.msra.mxu0 %v2202_v51  ;;  %5020 = vmatprep.subr.bf16.mxu1 %v2282_v47  ;;  %v2317_v51 = vunpack.c.h.s8.bf16 %v1876_v29  ;;  %v2247_v47 = vunpack.c.h.s8.bf16 %v1842_v46  ;;  %v2336_v38 = vunpack.c.h.s8.bf16 %v1886_v43  ;;  %v2354_v29 = vunpack.c.h.s8.bf16 %v1895_v14  ;;  %v1870_v46 = vld [vmem:[%s12360_s3 + $0x210] sm:$0xff] }
 0x441   :  { %5209 = vmatprep.subr.bf16.mxu0 %v2212_v27  ;;  %v2327_v27 = vunpack.c.l.s8.bf16 %v1886_v43  ;;  %v1869_v43 = vld [vmem:[%s12360_s3 + $0x208] sm:$0xff] }
 0x443   :  { %5021 = vmatpush1.bf16.msra.mxu1 %v2281_v52  ;;  %v1851_v52 = vld [vmem:[%s12360_s3 + $0x178] sm:$0xff] }
 0x444   :  { %5210 = vmatpush1.bf16.msra.mxu0 %v2211_v63  ;;  %5022 = vmatprep.subr.bf16.mxu1 %v2291_v35  ;;  %v2326_v63 = vunpack.c.l.s8.bf16 %v1885_v41  ;;  %v2256_v35 = vunpack.c.l.s8.bf16 %v1851_v52 }
 0x445   :  { %5211 = vmatprep.subr.bf16.mxu0 %v2221_v55  ;;  %v2266_v55 = vunpack.c.h.s8.bf16 %v1852_v45 }
 0x447   :  { %5023 = vmatpush1.bf16.msra.mxu1 %v2290_v62  ;;  %v1861_v62 = vld [vmem:[%s12360_s3 + $0x1c8] sm:$0xff] }
 0x448   :  { %5212 = vmatpush1.bf16.msra.mxu0 %v2220_v53  ;;  %5024 = vmatprep.subr.bf16.mxu1 %v2300_v16  ;;  %v2335_v53 = vunpack.c.h.s8.bf16 %v1885_v41  ;;  %v2265_v16 = vunpack.c.h.s8.bf16 %v1851_v52  ;;  %v2275_v12 = vunpack.c.l.s8.bf16 %v1861_v62  ;;  %v2284_v31 = vunpack.c.h.s8.bf16 %v1861_v62  ;;  %v1913_v41 = vld [vmem:[%s12360_s3 + $0x368] sm:$0xff] }
 0x449   :  { %5213 = vmatprep.subr.bf16.mxu0 %v2230_v21  ;;  %v2345_v21 = vunpack.c.l.s8.bf16 %v1895_v14  ;;  %v1878_v14 = vld [vmem:[%s12360_s3 + $0x250] sm:$0xff] }
 0x44b   :  { %5025 = vmatpush1.bf16.msra.mxu1 %v2299_v17  ;;  %v1860_v17 = vld [vmem:[%s12360_s3 + $0x1c0] sm:$0xff] }
 0x44c   :  { %5214 = vmatpush1.bf16.msra.mxu0 %v2229_v59  ;;  %5035 = vmatprep.subr.bf16.mxu1 %v2309_v20  ;;  %v2344_v59 = vunpack.c.l.s8.bf16 %v1894_v19  ;;  %v2274_v20 = vunpack.c.l.s8.bf16 %v1860_v17  ;;  %v1922_v19 = vld [vmem:[%s12360_s3 + $0x3b0] sm:$0xff] }
 0x44d   :  { %5215 = vmatprep.subr.bf16.mxu0 %v2239_v24  ;;  %v1904_v24 = vld [vmem:[%s12360_s3 + $0x320] sm:$0xff] }
 0x44e   :  { %5027 = vmatmul.mubr.bf16.vlgmr.msra.gmra.mrb[24].mxu1 %v10747_v26 }
 0x44f   :  { %5036 = vmatpush1.bf16.msra.mxu1 %v2308_v54  ;;  %5067 = vmatprep.mubr.bf16.mxu1 %v10749_v36  ;;  %v2283_v54 = vunpack.c.h.s8.bf16 %v1860_v17 }
 0x450   :  { %5216 = vmatpush1.bf16.msra.mxu0 %v2238_v61  ;;  %5037 = vmatprep.subr.bf16.mxu1 %v2318_v56  ;;  %v2363_v61 = vunpack.c.l.s8.bf16 %v1904_v24  ;;  %v1903_v56 = vld [vmem:[%s12360_s3 + $0x318] sm:$0xff] }
 0x451   :  { %5217 = vmatprep.subr.bf16.mxu0 %v2248_v23  ;;  %v2293_v23 = vunpack.c.l.s8.bf16 %v1870_v46  ;;  %v2362_v45 = vunpack.c.l.s8.bf16 %v1903_v56  ;;  %v2371_v52 = vunpack.c.h.s8.bf16 %v1903_v56  ;;  %v1931_v56 = vld [vmem:[%s12360_s3 + $0x3f8] sm:$0xff] }
 0x453   :  { %5038 = vmatpush1.bf16.msra.mxu1 %v2317_v51  ;;  %v2292_v51 = vunpack.c.l.s8.bf16 %v1869_v43 }
 0x454   :  { %5218 = vmatpush1.bf16.msra.mxu0 %v2247_v47  ;;  %5039 = vmatprep.subr.bf16.mxu1 %v2327_v27  ;;  %v2372_v47 = vunpack.c.h.s8.bf16 %v1904_v24  ;;  %v2302_v27 = vunpack.c.h.s8.bf16 %v1870_v46  ;;  %v1887_v24 = vld [vmem:[%s12360_s3 + $0x298] sm:$0xff] }
 0x455   :  { %5219 = vmatprep.subr.bf16.mxu0 %v2257_v40  ;;  %v1879_v40 = vld [vmem:[%s12360_s3 + $0x258] sm:$0xff] }
 0x457   :  { %5040 = vmatpush1.bf16.msra.mxu1 %v2326_v63  ;;  %v2301_v63 = vunpack.c.h.s8.bf16 %v1869_v43  ;;  %v902_v43 = vrot.slane %v10602_v30, %v9495_v34 }
 0x458   :  { %5220 = vmatpush1.bf16.msra.mxu0 %v2256_v35  ;;  %5041 = vmatprep.subr.bf16.mxu1 %v2336_v38  ;;  %v2381_v35 = vunpack.c.l.s8.bf16 %v1913_v41  ;;  %v1912_v38 = vld [vmem:[%s12360_s3 + $0x360] sm:$0xff] }
 0x459   :  { %5221 = vmatprep.subr.bf16.mxu0 %v2266_v55  ;;  %v2311_v55 = vunpack.c.l.s8.bf16 %v1879_v40  ;;  %v2380_v62 = vunpack.c.l.s8.bf16 %v1912_v38  ;;  %v2389_v17 = vunpack.c.h.s8.bf16 %v1912_v38 }
 0x45b   :  { %5042 = vmatpush1.bf16.msra.mxu1 %v2335_v53  ;;  %v2310_v53 = vunpack.c.l.s8.bf16 %v1878_v14 }
 0x45c   :  { %5222 = vmatpush1.bf16.msra.mxu0 %v2265_v16  ;;  %5043 = vmatprep.subr.bf16.mxu1 %v2345_v21  ;;  %v2390_v16 = vunpack.c.h.s8.bf16 %v1913_v41  ;;  %v2320_v21 = vunpack.c.h.s8.bf16 %v1879_v40  ;;  %v1930_v41 = vld [vmem:[%s12360_s3 + $0x3f0] sm:$0xff] }
 0x45d   :  { %5223 = vmatprep.subr.bf16.mxu0 %v2275_v12  ;;  %v1888_v12 = vld [vmem:[%s12360_s3 + $0x2a0] sm:$0xff] }
 0x45f   :  { %5044 = vmatpush1.bf16.msra.mxu1 %v2344_v59  ;;  %v2319_v59 = vunpack.c.h.s8.bf16 %v1878_v14 }
 0x460   :  { %5224 = vmatpush1.bf16.msra.mxu0 %v2274_v20  ;;  %5045 = vmatprep.subr.bf16.mxu1 %v2354_v29  ;;  %v2399_v20 = vunpack.c.l.s8.bf16 %v1922_v19  ;;  %v1921_v29 = vld [vmem:[%s12360_s3 + $0x3a8] sm:$0xff] }
 0x461   :  { %5225 = vmatprep.subr.bf16.mxu0 %v2284_v31  ;;  %v2329_v31 = vunpack.c.l.s8.bf16 %v1888_v12  ;;  %v2398_v46 = vunpack.c.l.s8.bf16 %v1921_v29 }
 0x463   :  { %5046 = vmatpush1.bf16.msra.mxu1 %v2353_v28  ;;  %v2328_v28 = vunpack.c.l.s8.bf16 %v1887_v24 }
 0x464   :  { %5226 = vmatpush1.bf16.msra.mxu0 %v2283_v54  ;;  %5047 = vmatprep.subr.bf16.mxu1 %v2363_v61  ;;  %v2408_v54 = vunpack.c.h.s8.bf16 %v1922_v19  ;;  %v2338_v61 = vunpack.c.h.s8.bf16 %v1888_v12  ;;  %v1905_v12 = vld [vmem:[%s12360_s3 + $0x328] sm:$0xff] }
 0x465   :  { %5227 = vmatprep.subr.bf16.mxu0 %v2293_v23  ;;  %v1897_v23 = vld [vmem:[%s12360_s3 + $0x2e8] sm:$0xff] }
 0x466   :  { %v2347_v40 = vunpack.c.l.s8.bf16 %v1897_v23  ;;  %v2356_v14 = vunpack.c.h.s8.bf16 %v1897_v23 }
 0x467   :  { %5048 = vmatpush1.bf16.msra.mxu1 %v2362_v45  ;;  %v2407_v45 = vunpack.c.h.s8.bf16 %v1921_v29 }
 0x468   :  { %5228 = vmatpush1.bf16.msra.mxu0 %v2292_v51  ;;  %5049 = vmatprep.subr.bf16.mxu1 %v2372_v47  ;;  %v914_v51 = vrot.slane %v10602_v30, %v9522_v22  ;;  %v2337_v47 = vunpack.c.h.s8.bf16 %v1887_v24  ;;  %v1915_v24 = vld [vmem:[%s12360_s3 + $0x378] sm:$0xff] }
 0x469   :  { %5229 = vmatprep.subr.bf16.mxu0 %v2302_v27  ;;  %v2417_v27 = vunpack.c.l.s8.bf16 %v1931_v56  ;;  %v2383_v23 = vunpack.c.l.s8.bf16 %v1915_v24 }
 0x46a   :  { %v1258_v30 = vadd.f32 %v9485_v44, %v914_v51 }
 0x46b   :  { %5050 = vmatpush1.bf16.msra.mxu1 %v2371_v52  ;;  %v1896_v52 = vld [vmem:[%s12360_s3 + $0x2e0] sm:$0xff] }
 0x46c   :  { %5230 = vmatpush1.bf16.msra.mxu0 %v2301_v63  ;;  %5051 = vmatprep.subr.bf16.mxu1 %v2381_v35  ;;  %v1215_v63 = vadd.f32 %v9462_v50, %v902_v43  ;;  %v2416_v35 = vunpack.c.l.s8.bf16 %v1930_v41  ;;  %v2346_v38 = vunpack.c.l.s8.bf16 %v1896_v52  ;;  %v2425_v50 = vunpack.c.h.s8.bf16 %v1930_v41  ;;  %v1914_v43 = vld [vmem:[%s12360_s3 + $0x370] sm:$0xff] }
 0x46d   :  { %5240 = vmatprep.subr.bf16.mxu0 %v2311_v55  ;;  %v2426_v55 = vunpack.c.h.s8.bf16 %v1931_v56  ;;  %v2355_v44 = vunpack.c.h.s8.bf16 %v1896_v52  ;;  %v2392_v52 = vunpack.c.h.s8.bf16 %v1915_v24  ;;  %v1932_v24 = vld [vmem:[%s12360_s3 + $0x400] sm:$0xff] }
 0x46e   :  { %8090 = vtanh.f32 %v1215_v63  ;;  %v1958_v63 = vld [vmem:[%s12360_s3 + $0x4d0] sm:$0xff] }
 0x46f   :  { %5232 = vmatmul.mubr.bf16.vlgmr.msra.gmra.mrb[36].mxu0 %v10747_v26  ;;  %5052 = vmatpush1.bf16.msra.mxu1 %v2380_v62  ;;  %v1940_v62 = vld [vmem:[%s12360_s3 + $0x440] sm:$0xff]  ;;  %8092 = vtanh.f32 %v1258_v30 }
 0x470   :  { %5241 = vmatpush1.bf16.msra.mxu0 %v2310_v53  ;;  %5272 = vmatprep.mubr.bf16.mxu0 %v10749_v36  ;;  %v1906_v53 = vld [vmem:[%s12360_s3 + $0x330] sm:$0xff] }
 0x471   :  { %5053 = vmatprep.subr.bf16.mxu1 %v2390_v16  ;;  %5242 = vmatprep.subr.bf16.mxu0 %v2320_v21  ;;  %v2435_v16 = vunpack.c.l.s8.bf16 %v1940_v62  ;;  %v1939_v21 = vld [vmem:[%s12360_s3 + $0x438] sm:$0xff]  ;;  %v2365_v19 = vunpack.c.l.s8.bf16 %v1906_v53  ;;  %v2374_v29 = vunpack.c.h.s8.bf16 %v1906_v53 }
 0x472   :  { %v1923_v53 = vld [vmem:[%s12360_s3 + $0x3b8] sm:$0xff] }
 0x473   :  { %5054 = vmatpush1.bf16.msra.mxu1 %v2389_v17  ;;  %v2434_v17 = vunpack.c.l.s8.bf16 %v1939_v21 }
 0x474   :  { %5243 = vmatpush1.bf16.msra.mxu0 %v2319_v59  ;;  %5055 = vmatprep.subr.bf16.mxu1 %v2399_v20  ;;  %v2364_v59 = vunpack.c.l.s8.bf16 %v1905_v12  ;;  %v2444_v20 = vunpack.c.h.s8.bf16 %v1940_v62 }
 0x475   :  { %5244 = vmatprep.subr.bf16.mxu0 %v2329_v31  ;;  %v1949_v31 = vld [vmem:[%s12360_s3 + $0x488] sm:$0xff] }
 0x476   :  { %v2462_v41 = vunpack.c.h.s8.bf16 %v1949_v31 }
 0x477   :  { %5056 = vmatpush1.bf16.msra.mxu1 %v2398_v46  ;;  %v2443_v46 = vunpack.c.h.s8.bf16 %v1939_v21 }
 0x478   :  { %5245 = vmatpush1.bf16.msra.mxu0 %v2328_v28  ;;  %5057 = vmatprep.subr.bf16.mxu1 %v2408_v54  ;;  %v2373_v28 = vunpack.c.h.s8.bf16 %v1905_v12  ;;  %v2453_v54 = vunpack.c.l.s8.bf16 %v1949_v31  ;;  %v8091_v56 = vpop.eup %8090  ;;  %v1933_v12 = vld [vmem:[%s12360_s3 + $0x408] sm:$0xff] }
 0x479   :  { %5246 = vmatprep.subr.bf16.mxu0 %v2338_v61  ;;  %v1948_v61 = vld [vmem:[%s12360_s3 + $0x480] sm:$0xff]  ;;  %v2419_v31 = vunpack.c.l.s8.bf16 %v1933_v12 }
 0x47a   :  { %v2452_v51 = vunpack.c.l.s8.bf16 %v1948_v61  ;;  %v2461_v30 = vunpack.c.h.s8.bf16 %v1948_v61  ;;  %v2428_v61 = vunpack.c.h.s8.bf16 %v1933_v12 }
 0x47b   :  { %5058 = vmatpush1.bf16.msra.mxu1 %v2407_v45  ;;  %v8093_v45 = vpop.eup %8092 }
 0x47c   :  { %5247 = vmatpush1.bf16.msra.mxu0 %v2337_v47  ;;  %5059 = vmatprep.subr.bf16.mxu1 %v2417_v27  ;;  %v10857_v47 = vpack.c.bf16 %v8091_v56, %v8091_v56  ;;  %v2382_v27 = vunpack.c.l.s8.bf16 %v1914_v43  ;;  %v1976_v56 = vld [vmem:[%s12360_s3 + $0x560] sm:$0xff] }
 0x47d   :  { %5248 = vmatprep.subr.bf16.mxu0 %v2347_v40  ;;  %v10859_v40 = vpack.c.bf16 %v8093_v45, %v8093_v45  ;;  %v2427_v45 = vunpack.c.h.s8.bf16 %v1932_v24 }
 0x47f   :  { %5060 = vmatpush1.bf16.msra.mxu1 %v2416_v35  ;;  %v1924_v35 = vld [vmem:[%s12360_s3 + $0x3c0] sm:$0xff] }
 0x480   :  { %5249 = vmatpush1.bf16.msra.mxu0 %v2346_v38  ;;  %5061 = vmatprep.subr.bf16.mxu1 %v2426_v55  ;;  %v2391_v38 = vunpack.c.h.s8.bf16 %v1914_v43  ;;  %v2471_v55 = vunpack.c.l.s8.bf16 %v1958_v63  ;;  %v2401_v62 = vunpack.c.l.s8.bf16 %v1924_v35  ;;  %v2410_v21 = vunpack.c.h.s8.bf16 %v1924_v35 }
 0x481   :  { %5250 = vmatprep.subr.bf16.mxu0 %v2356_v14  ;;  %v1957_v14 = vld [vmem:[%s12360_s3 + $0x4c8] sm:$0xff] }
 0x483   :  { %5062 = vmatpush1.bf16.msra.mxu1 %v2425_v50  ;;  %v2470_v50 = vunpack.c.l.s8.bf16 %v1957_v14 }
 0x484   :  { %5251 = vmatpush1.bf16.msra.mxu0 %v2355_v44  ;;  %5063 = vmatprep.subr.bf16.mxu1 %v2435_v16  ;;  %v2400_v44 = vunpack.c.l.s8.bf16 %v1923_v53  ;;  %v2480_v16 = vunpack.c.h.s8.bf16 %v1958_v63 }
 0x485   :  { %5252 = vmatprep.subr.bf16.mxu0 %v2365_v19  ;;  %v1967_v19 = vld [vmem:[%s12360_s3 + $0x518] sm:$0xff] }
 0x487   :  { %5064 = vmatpush1.bf16.msra.mxu1 %v2434_v17  ;;  %v2479_v17 = vunpack.c.h.s8.bf16 %v1957_v14  ;;  %v1951_v14 = vld [vmem:[%s12360_s3 + $0x498] sm:$0xff] }
 0x488   :  { %5253 = vmatpush1.bf16.msra.mxu0 %v2364_v59  ;;  %5065 = vmatprep.subr.bf16.mxu1 %v2444_v20  ;;  %v2409_v59 = vunpack.c.h.s8.bf16 %v1923_v53  ;;  %v2489_v20 = vunpack.c.l.s8.bf16 %v1967_v19 }
 0x489   :  { %5254 = vmatprep.subr.bf16.mxu0 %v2374_v29  ;;  %v1966_v29 = vld [vmem:[%s12360_s3 + $0x510] sm:$0xff] }
 0x48a   :  { %v2497_v43 = vunpack.c.h.s8.bf16 %v1966_v29 }
 0x48b   :  { %5066 = vmatpush1.bf16.msra.mxu1 %v2443_v46  ;;  %v2488_v46 = vunpack.c.l.s8.bf16 %v1966_v29  ;;  %v1960_v29 = vld [vmem:[%s12360_s3 + $0x4e0] sm:$0xff] }
 0x48c   :  { %5255 = vmatpush1.bf16.msra.mxu0 %v2373_v28  ;;  %5076 = vmatprep.subr.bf16.mxu1 %v2453_v54  ;;  %v2418_v28 = vunpack.c.l.s8.bf16 %v1932_v24  ;;  %v2498_v54 = vunpack.c.h.s8.bf16 %v1967_v19 }
 0x48d   :  { %5256 = vmatprep.subr.bf16.mxu0 %v2383_v23  ;;  %v1942_v23 = vld [vmem:[%s12360_s3 + $0x450] sm:$0xff] }
 0x48e   :  { %5068 = vmatmul.mubr.bf16.vlgmr.msra.gmra.mrb[24].mxu1 %v10857_v47 }
 0x48f   :  { %5077 = vmatpush1.bf16.msra.mxu1 %v2452_v51  ;;  %5108 = vmatprep.mubr.bf16.mxu1 %v10859_v40  ;;  %v2507_v51 = vunpack.c.l.s8.bf16 %v1976_v56 }
 0x490   :  { %5257 = vmatpush1.bf16.msra.mxu0 %v2382_v27  ;;  %5078 = vmatprep.subr.bf16.mxu1 %v2462_v41  ;;  %v1975_v27 = vld [vmem:[%s12360_s3 + $0x558] sm:$0xff]  ;;  %v2437_v41 = vunpack.c.l.s8.bf16 %v1942_v23 }
 0x491   :  { %5258 = vmatprep.subr.bf16.mxu0 %v2392_v52  ;;  %v1941_v52 = vld [vmem:[%s12360_s3 + $0x448] sm:$0xff]  ;;  %v2506_v63 = vunpack.c.l.s8.bf16 %v1975_v27 }
 0x492   :  { %v2436_v35 = vunpack.c.l.s8.bf16 %v1941_v52  ;;  %v2445_v53 = vunpack.c.h.s8.bf16 %v1941_v52 }
 0x493   :  { %5079 = vmatpush1.bf16.msra.mxu1 %v2461_v30  ;;  %v2516_v30 = vunpack.c.h.s8.bf16 %v1976_v56 }
 0x494   :  { %5259 = vmatpush1.bf16.msra.mxu0 %v2391_v38  ;;  %5080 = vmatprep.subr.bf16.mxu1 %v2471_v55  ;;  %v2446_v38 = vunpack.c.h.s8.bf16 %v1942_v23  ;;  %v1985_v55 = vld [vmem:[%s12360_s3 + $0x5a8] sm:$0xff] }
 0x495   :  { %5260 = vmatprep.subr.bf16.mxu0 %v2401_v62  ;;  %v2515_v62 = vunpack.c.h.s8.bf16 %v1975_v27  ;;  %v1969_v27 = vld [vmem:[%s12360_s3 + $0x528] sm:$0xff] }
 0x497   :  { %5081 = vmatpush1.bf16.msra.mxu1 %v2470_v50  ;;  %v2525_v50 = vunpack.c.l.s8.bf16 %v1985_v55 }
 0x498   :  { %5261 = vmatpush1.bf16.msra.mxu0 %v2400_v44  ;;  %5082 = vmatprep.subr.bf16.mxu1 %v2480_v16  ;;  %v1984_v44 = vld [vmem:[%s12360_s3 + $0x5a0] sm:$0xff]  ;;  %v2455_v16 = vunpack.c.l.s8.bf16 %v1951_v14 }
 0x499   :  { %5262 = vmatprep.subr.bf16.mxu0 %v2410_v21  ;;  %v1950_v21 = vld [vmem:[%s12360_s3 + $0x490] sm:$0xff]  ;;  %v2524_v19 = vunpack.c.l.s8.bf16 %v1984_v44 }
 0x49a   :  { %v2454_v12 = vunpack.c.l.s8.bf16 %v1950_v21  ;;  %v2463_v24 = vunpack.c.h.s8.bf16 %v1950_v21 }
 0x49b   :  { %5083 = vmatpush1.bf16.msra.mxu1 %v2479_v17  ;;  %v2534_v17 = vunpack.c.h.s8.bf16 %v1985_v55  ;;  %v2002_v55 = vld [vmem:[%s12360_s3 + $0x630] sm:$0xff] }
 0x49c   :  { %5263 = vmatpush1.bf16.msra.mxu0 %v2409_v59  ;;  %5084 = vmatprep.subr.bf16.mxu1 %v2489_v20  ;;  %v2464_v59 = vunpack.c.h.s8.bf16 %v1951_v14  ;;  %v1994_v20 = vld [vmem:[%s12360_s3 + $0x5f0] sm:$0xff]  ;;  %v2491_v14 = vunpack.c.l.s8.bf16 %v1969_v27 }
 0x49d   :  { %5264 = vmatprep.subr.bf16.mxu0 %v2419_v31  ;;  %v2533_v31 = vunpack.c.h.s8.bf16 %v1984_v44 }
 0x49f   :  { %5085 = vmatpush1.bf16.msra.mxu1 %v2488_v46  ;;  %v2543_v46 = vunpack.c.l.s8.bf16 %v1994_v20 }
 0x4a0   :  { %5265 = vmatpush1.bf16.msra.mxu0 %v2418_v28  ;;  %5086 = vmatprep.subr.bf16.mxu1 %v2498_v54  ;;  %v1993_v28 = vld [vmem:[%s12360_s3 + $0x5e8] sm:$0xff]  ;;  %v2473_v54 = vunpack.c.l.s8.bf16 %v1960_v29 }
 0x4a1   :  { %5266 = vmatprep.subr.bf16.mxu0 %v2428_v61  ;;  %v1959_v61 = vld [vmem:[%s12360_s3 + $0x4d8] sm:$0xff]  ;;  %v2542_v56 = vunpack.c.l.s8.bf16 %v1993_v28 }
 0x4a2   :  { %v2472_v23 = vunpack.c.l.s8.bf16 %v1959_v61 }
 0x4a3   :  { %5087 = vmatpush1.bf16.msra.mxu1 %v2497_v43  ;;  %v2552_v43 = vunpack.c.h.s8.bf16 %v1994_v20  ;;  %v2011_v20 = vld [vmem:[%s12360_s3 + $0x678] sm:$0xff] }
 0x4a4   :  { %5267 = vmatpush1.bf16.msra.mxu0 %v2427_v45  ;;  %5088 = vmatprep.subr.bf16.mxu1 %v2507_v51  ;;  %v2482_v45 = vunpack.c.h.s8.bf16 %v1960_v29  ;;  %v2003_v51 = vld [vmem:[%s12360_s3 + $0x638] sm:$0xff] }
 0x4a5   :  { %5268 = vmatprep.subr.bf16.mxu0 %v2437_v41  ;;  %v10934_v41 = vld [vmem:[%s12359_s2] sm:$0xff]  ;;  %v2570_v21 = vunpack.c.h.s8.bf16 %v2003_v51 }
 0x4a6   :  { %v910_v52 = vrot.slane %v10934_v41, %v9520_v25 }
 0x4a7   :  { %5089 = vmatpush1.bf16.msra.mxu1 %v2506_v63  ;;  %v2551_v63 = vunpack.c.h.s8.bf16 %v1993_v28 }
 0x4a8   :  { %5269 = vmatpush1.bf16.msra.mxu0 %v2436_v35  ;;  %5090 = vmatprep.subr.bf16.mxu1 %v2516_v30  ;;  %v922_v35 = vrot.slane %v10934_v41, %v9472_v42  ;;  %v2481_v30 = vunpack.c.h.s8.bf16 %v1959_v61 }
 0x4a9   :  { %5270 = vmatprep.subr.bf16.mxu0 %v2446_v38  ;;  %v2561_v38 = vunpack.c.l.s8.bf16 %v2003_v51 }
 0x4aa   :  { %v1299_v44 = vadd.f32 %v9460_v49, %v922_v35 }
 0x4ab   :  { %5091 = vmatpush1.bf16.msra.mxu1 %v2515_v62  ;;  %v1968_v62 = vld [vmem:[%s12360_s3 + $0x520] sm:$0xff] }
 0x4ac   :  { %5271 = vmatpush1.bf16.msra.mxu0 %v2445_v53  ;;  %5092 = vmatprep.subr.bf16.mxu1 %v2525_v50  ;;  %v1256_v53 = vadd.f32 %v9483_v57, %v910_v52  ;;  %v2560_v50 = vunpack.c.l.s8.bf16 %v2002_v55  ;;  %v2569_v57 = vunpack.c.h.s8.bf16 %v2002_v55  ;;  %v2499_v49 = vunpack.c.h.s8.bf16 %v1968_v62 }
 0x4ad   :  { %5281 = vmatprep.subr.bf16.mxu0 %v2455_v16  ;;  %v2490_v16 = vunpack.c.l.s8.bf16 %v1968_v62  ;;  %v2587_v55 = vunpack.c.h.s8.bf16 %v2011_v20 }
 0x4ae   :  { %8094 = vtanh.f32 %v1256_v53  ;;  %v2020_v53 = vld [vmem:[%s12360_s3 + $0x6c0] sm:$0xff] }
 0x4af   :  { %5273 = vmatmul.mubr.bf16.vlgmr.msra.gmra.mrb[36].mxu0 %v10857_v47  ;;  %5093 = vmatpush1.bf16.msra.mxu1 %v2524_v19  ;;  %v2500_v19 = vunpack.c.h.s8.bf16 %v1969_v27  ;;  %8096 = vtanh.f32 %v1299_v44 }
 0x4b0   :  { %5282 = vmatpush1.bf16.msra.mxu0 %v2454_v12  ;;  %5313 = vmatprep.mubr.bf16.mxu0 %v10859_v40  ;;  %v2012_v12 = vld [vmem:[%s12360_s3 + $0x680] sm:$0xff] }
 0x4b1   :  { %5094 = vmatprep.subr.bf16.mxu1 %v2534_v17  ;;  %5283 = vmatprep.subr.bf16.mxu0 %v2464_v59  ;;  %v1978_v17 = vld [vmem:[%s12360_s3 + $0x570] sm:$0xff]  ;;  %v2579_v59 = vunpack.c.l.s8.bf16 %v2012_v12  ;;  %v2588_v52 = vunpack.c.h.s8.bf16 %v2012_v12 }
 0x4b2   :  { %v2518_v35 = vunpack.c.h.s8.bf16 %v1978_v17 }
 0x4b3   :  { %5095 = vmatpush1.bf16.msra.mxu1 %v2533_v31  ;;  %v2509_v31 = vunpack.c.l.s8.bf16 %v1978_v17 }
 0x4b4   :  { %5284 = vmatpush1.bf16.msra.mxu0 %v2463_v24  ;;  %5096 = vmatprep.subr.bf16.mxu1 %v2543_v46  ;;  %v1977_v24 = vld [vmem:[%s12360_s3 + $0x568] sm:$0xff] }
 0x4b5   :  { %5285 = vmatprep.subr.bf16.mxu0 %v2473_v54  ;;  %v2508_v27 = vunpack.c.l.s8.bf16 %v1977_v24 }
 0x4b7   :  { %5097 = vmatpush1.bf16.msra.mxu1 %v2542_v56 }
 0x4b8   :  { %5286 = vmatpush1.bf16.msra.mxu0 %v2472_v23  ;;  %5098 = vmatprep.subr.bf16.mxu1 %v2552_v43  ;;  %v2578_v23 = vunpack.c.l.s8.bf16 %v2011_v20  ;;  %v2030_v20 = vld [vmem:[%s12360_s3 + $0x710] sm:$0xff] }
 0x4b9   :  { %5287 = vmatprep.subr.bf16.mxu0 %v2482_v45 }
 0x4bb   :  { %5099 = vmatpush1.bf16.msra.mxu1 %v2551_v63 }
 0x4bc   :  { %5288 = vmatpush1.bf16.msra.mxu0 %v2481_v30  ;;  %5100 = vmatprep.subr.bf16.mxu1 %v2561_v38  ;;  %v2021_v30 = vld [vmem:[%s12360_s3 + $0x6c8] sm:$0xff]  ;;  %v1987_v38 = vld [vmem:[%s12360_s3 + $0x5b8] sm:$0xff] }
 0x4bd   :  { %5289 = vmatprep.subr.bf16.mxu0 %v2491_v14  ;;  %v2517_v14 = vunpack.c.h.s8.bf16 %v1977_v24  ;;  %v2597_v62 = vunpack.c.l.s8.bf16 %v2021_v30  ;;  %v2527_v44 = vunpack.c.l.s8.bf16 %v1987_v38 }
 0x4bf   :  { %5101 = vmatpush1.bf16.msra.mxu1 %v2560_v50  ;;  %v8095_v50 = vpop.eup %8094 }
 0x4c0   :  { %5290 = vmatpush1.bf16.msra.mxu0 %v2490_v16  ;;  %5102 = vmatprep.subr.bf16.mxu1 %v2570_v21  ;;  %v1986_v16 = vld [vmem:[%s12360_s3 + $0x5b0] sm:$0xff]  ;;  %v8097_v21 = vpop.eup %8096  ;;  %v10976_v12 = vpack.c.bf16 %v8095_v50, %v8095_v50 }
 0x4c1   :  { %v7567_v29 = vpop.f32.mrb[32].mxu1  ;;  %5291 = vmatprep.subr.bf16.mxu0 %v2500_v19  ;;  %v2596_v19 = vunpack.c.l.s8.bf16 %v2020_v53  ;;  %v2526_v17 = vunpack.c.l.s8.bf16 %v1986_v16  ;;  %v2535_v24 = vunpack.c.h.s8.bf16 %v1986_v16 }
 0x4c2   :  { %v7523_v46 = vpop.f32.mrb[44].mxu0  ;;  %v7568_v28 = vpop.f32.mrb[33].mxu1 }
 0x4c3   :  { %v7524_v54 = vpop.f32.mrb[45].mxu0  ;;  %v10960_v61 = vadd.f32 %v7568_v28, %v7567_v29  ;;  %v7570_v56 = vpop.f32.mrb[34].mxu1  ;;  %5103 = vmatpush1.bf16.msra.mxu1 %v2569_v57  ;;  %v2606_v57 = vunpack.c.h.s8.bf16 %v2021_v30  ;;  %v1996_v29 = vld [vmem:[%s12360_s3 + $0x600] sm:$0xff]  ;;  %v2029_v28 = vld [vmem:[%s12360_s3 + $0x708] sm:$0xff] }
 0x4c4   :  { %v10962_v43 = vadd.f32 %v7524_v54, %v7523_v46  ;;  %v7526_v45 = vpop.f32.mrb[46].mxu0  ;;  %5292 = vmatpush1.bf16.msra.mxu0 %v2499_v49  ;;  %v7571_v51 = vpop.f32.mrb[35].mxu1  ;;  %5104 = vmatprep.subr.bf16.mxu1 %v2579_v59  ;;  %v10978_v49 = vpack.c.bf16 %v8097_v21, %v8097_v21  ;;  %v2536_v59 = vunpack.c.h.s8.bf16 %v1987_v38  ;;  %v2615_v46 = vunpack.c.l.s8.bf16 %v2030_v20  ;;  %v1995_v56 = vld [vmem:[%s12360_s3 + $0x5f8] sm:$0xff]  ;;  %v2048_v21 = vld [vmem:[%s12360_s3 + $0x7a0] sm:$0xff] }
 0x4c5   :  { %v7527_v63 = vpop.f32.mrb[47].mxu0  ;;  %5293 = vmatprep.subr.bf16.mxu0 %v2509_v31  ;;  %v2605_v31 = vunpack.c.h.s8.bf16 %v2020_v53  ;;  %v2545_v54 = vunpack.c.l.s8.bf16 %v1996_v29  ;;  %v2544_v45 = vunpack.c.l.s8.bf16 %v1995_v56  ;;  %v2624_v51 = vunpack.c.h.s8.bf16 %v2030_v20  ;;  %v2047_v20 = vld [vmem:[%s12360_s3 + $0x798] sm:$0xff] }
 0x4c6   :  { %v2005_v63 = vld [vmem:[%s12360_s3 + $0x648] sm:$0xff]  ;;  %v2553_v30 = vunpack.c.h.s8.bf16 %v1995_v56 }
 0x4c7   :  { %5105 = vmatpush1.bf16.msra.mxu1 %v2578_v23  ;;  %v2614_v23 = vunpack.c.l.s8.bf16 %v2029_v28  ;;  %v2572_v16 = vunpack.c.h.s8.bf16 %v2005_v63 }
 0x4c8   :  { %5294 = vmatpush1.bf16.msra.mxu0 %v2508_v27  ;;  %5106 = vmatprep.subr.bf16.mxu1 %v2588_v52  ;;  %v2554_v27 = vunpack.c.h.s8.bf16 %v1996_v29  ;;  %v2039_v52 = vld [vmem:[%s12360_s3 + $0x758] sm:$0xff] }
 0x4c9   :  { %5295 = vmatprep.subr.bf16.mxu0 %v2518_v35  ;;  %v2623_v35 = vunpack.c.h.s8.bf16 %v2029_v28  ;;  %v2633_v38 = vunpack.c.l.s8.bf16 %v2039_v52 }
 0x4cb   :  { %5107 = vmatpush1.bf16.msra.mxu1 %v2587_v55  ;;  %v2038_v55 = vld [vmem:[%s12360_s3 + $0x750] sm:$0xff] }
 0x4cc   :  { %5296 = vmatpush1.bf16.msra.mxu0 %v2517_v14  ;;  %5117 = vmatprep.subr.bf16.mxu1 %v2597_v62  ;;  %v2563_v14 = vunpack.c.l.s8.bf16 %v2005_v63  ;;  %v2004_v62 = vld [vmem:[%s12360_s3 + $0x640] sm:$0xff]  ;;  %v2632_v53 = vunpack.c.l.s8.bf16 %v2038_v55 }
 0x4cd   :  { %5297 = vmatprep.subr.bf16.mxu0 %v2527_v44  ;;  %v2562_v50 = vunpack.c.l.s8.bf16 %v2004_v62  ;;  %v2642_v44 = vunpack.c.h.s8.bf16 %v2039_v52 }
 0x4ce   :  { %5109 = vmatmul.mubr.bf16.vlgmr.msra.gmra.mrb[24].mxu1 %v10976_v12 }
 0x4cf   :  { %5118 = vmatpush1.bf16.msra.mxu1 %v2596_v19  ;;  %5149 = vmatprep.mubr.bf16.mxu1 %v10978_v49  ;;  %v2014_v19 = vld [vmem:[%s12360_s3 + $0x690] sm:$0xff] }
 0x4d0   :  { %5298 = vmatpush1.bf16.msra.mxu0 %v2526_v17  ;;  %5119 = vmatprep.subr.bf16.mxu1 %v2606_v57  ;;  %v2641_v17 = vunpack.c.h.s8.bf16 %v2038_v55  ;;  %v2571_v57 = vunpack.c.h.s8.bf16 %v2004_v62  ;;  %v2057_v55 = vld [vmem:[%s12360_s3 + $0x7e8] sm:$0xff]  ;;  %v2023_v62 = vld [vmem:[%s12360_s3 + $0x6d8] sm:$0xff] }
 0x4d1   :  { %5299 = vmatprep.subr.bf16.mxu0 %v2536_v59  ;;  %v2651_v59 = vunpack.c.l.s8.bf16 %v2048_v21 }
 0x4d3   :  { %5120 = vmatpush1.bf16.msra.mxu1 %v2605_v31  ;;  %v2581_v31 = vunpack.c.l.s8.bf16 %v2014_v19 }
 0x4d4   :  { %5300 = vmatpush1.bf16.msra.mxu0 %v2535_v24  ;;  %5121 = vmatprep.subr.bf16.mxu1 %v2615_v46  ;;  %v2013_v24 = vld [vmem:[%s12360_s3 + $0x688] sm:$0xff] }
 0x4d5   :  { %5301 = vmatprep.subr.bf16.mxu0 %v2545_v54  ;;  %v2580_v63 = vunpack.c.l.s8.bf16 %v2013_v24 }
 0x4d7   :  { %5122 = vmatpush1.bf16.msra.mxu1 %v2614_v23 }
 0x4d8   :  { %5302 = vmatpush1.bf16.msra.mxu0 %v2544_v45  ;;  %5123 = vmatprep.subr.bf16.mxu1 %v2624_v51  ;;  %v2650_v45 = vunpack.c.l.s8.bf16 %v2047_v20 }
 0x4d9   :  { %5303 = vmatprep.subr.bf16.mxu0 %v2554_v27 }
 0x4db   :  { %5124 = vmatpush1.bf16.msra.mxu1 %v2623_v35  ;;  %v2660_v35 = vunpack.c.h.s8.bf16 %v2048_v21 }
 0x4dc   :  { %5304 = vmatpush1.bf16.msra.mxu0 %v2553_v30  ;;  %5125 = vmatprep.subr.bf16.mxu1 %v2633_v38  ;;  %v2590_v38 = vunpack.c.h.s8.bf16 %v2014_v19  ;;  %v2599_v19 = vunpack.c.l.s8.bf16 %v2023_v62 }
 0x4dd   :  { %5305 = vmatprep.subr.bf16.mxu0 %v2563_v14 }
 0x4df   :  { %5126 = vmatpush1.bf16.msra.mxu1 %v2632_v53  ;;  %v2659_v53 = vunpack.c.h.s8.bf16 %v2047_v20  ;;  %v2608_v20 = vunpack.c.h.s8.bf16 %v2023_v62  ;;  %v2074_v62 = vld [vmem:[%s12360_s3 + $0x870] sm:$0xff] }
 0x4e0   :  { %5306 = vmatpush1.bf16.msra.mxu0 %v2562_v50  ;;  %5127 = vmatprep.subr.bf16.mxu1 %v2642_v44  ;;  %v2589_v50 = vunpack.c.h.s8.bf16 %v2013_v24  ;;  %v2669_v44 = vunpack.c.l.s8.bf16 %v2057_v55 }
 0x4e1   :  { %v7611_v29 = vpop.f32.mrb[36].mxu1  ;;  %5307 = vmatprep.subr.bf16.mxu0 %v2572_v16  ;;  %v2056_v16 = vld [vmem:[%s12360_s3 + $0x7e0] sm:$0xff] }
 0x4e2   :  { %v7545_v46 = vpop.f32.mrb[48].mxu0  ;;  %v7612_v28 = vpop.f32.mrb[37].mxu1 }
 0x4e3   :  { %v7546_v54 = vpop.f32.mrb[49].mxu0  ;;  %v11018_v56 = vadd.f32 %v7612_v28, %v7611_v29  ;;  %v7614_v23 = vpop.f32.mrb[38].mxu1  ;;  %5128 = vmatpush1.bf16.msra.mxu1 %v2641_v17  ;;  %v2668_v17 = vunpack.c.l.s8.bf16 %v2056_v16  ;;  %v2066_v29 = vld [vmem:[%s12360_s3 + $0x830] sm:$0xff]  ;;  %v2065_v28 = vld [vmem:[%s12360_s3 + $0x828] sm:$0xff] }
 0x4e4   :  { %v7547_v51 = vadd.f32 %v7546_v54, %v7545_v46  ;;  %v7548_v27 = vpop.f32.mrb[50].mxu0  ;;  %5308 = vmatpush1.bf16.msra.mxu0 %v2571_v57  ;;  %v7615_v52 = vpop.f32.mrb[39].mxu1  ;;  %5129 = vmatprep.subr.bf16.mxu1 %v2651_v59  ;;  %v2678_v59 = vunpack.c.h.s8.bf16 %v2057_v55  ;;  %v2687_v46 = vunpack.c.l.s8.bf16 %v2066_v29  ;;  %v2031_v23 = vld [vmem:[%s12360_s3 + $0x718] sm:$0xff] }
 0x4e5   :  { %v7549_v30 = vpop.f32.mrb[51].mxu0  ;;  %5309 = vmatprep.subr.bf16.mxu0 %v2581_v31  ;;  %v2677_v31 = vunpack.c.h.s8.bf16 %v2056_v16  ;;  %v2696_v27 = vunpack.c.h.s8.bf16 %v2066_v29  ;;  %v2625_v55 = vunpack.c.h.s8.bf16 %v2031_v23  ;;  %v2083_v29 = vld [vmem:[%s12360_s3 + $0x8b8] sm:$0xff] }
 0x4e6   :  { %v4869_v14 = vadd.f32 %v7547_v51, %v10962_v43  ;;  %v2022_v43 = vld [vmem:[%s12360_s3 + $0x6d0] sm:$0xff]  ;;  %v2616_v51 = vunpack.c.l.s8.bf16 %v2031_v23  ;;  %v918_v30 = vrot.slane %v10934_v41, %v9470_v60  ;;  %v2704_v41 = vunpack.c.l.s8.bf16 %v2074_v62 }
 0x4e7   :  { %5130 = vmatpush1.bf16.msra.mxu1 %v2650_v45  ;;  %v2598_v57 = vunpack.c.l.s8.bf16 %v2022_v43  ;;  %v2607_v24 = vunpack.c.h.s8.bf16 %v2022_v43  ;;  %v2686_v45 = vunpack.c.l.s8.bf16 %v2065_v28 }
 0x4e8   :  { %5310 = vmatpush1.bf16.msra.mxu0 %v2580_v63  ;;  %5131 = vmatprep.subr.bf16.mxu1 %v2660_v35  ;;  %v11031_v21 = vadd.f32 %v10960_v61, %v4869_v14  ;;  %v2032_v61 = vld [vmem:[%s12360_s3 + $0x720] sm:$0xff]  ;;  %v2075_v63 = vld [vmem:[%s12360_s3 + $0x878] sm:$0xff]  ;;  %v2041_v35 = vld [vmem:[%s12360_s3 + $0x768] sm:$0xff] }
 0x4e9   :  { %5311 = vmatprep.subr.bf16.mxu0 %v2590_v38  ;;  %v2617_v54 = vunpack.c.l.s8.bf16 %v2032_v61  ;;  %v2626_v52 = vunpack.c.h.s8.bf16 %v2032_v61  ;;  %v2695_v38 = vunpack.c.h.s8.bf16 %v2065_v28  ;;  %v2705_v14 = vunpack.c.l.s8.bf16 %v2075_v63 }
 0x4ea   :  { %v2644_v43 = vunpack.c.h.s8.bf16 %v2041_v35  ;;  %v2722_v28 = vunpack.c.l.s8.bf16 %v2083_v29 }
 0x4eb   :  { %5132 = vmatpush1.bf16.msra.mxu1 %v2659_v53  ;;  %v2635_v53 = vunpack.c.l.s8.bf16 %v2041_v35  ;;  %v2059_v35 = vld [vmem:[%s12360_s3 + $0x7f8] sm:$0xff] }
 0x4ec   :  { %5312 = vmatpush1.bf16.msra.mxu0 %v2589_v50  ;;  %5133 = vmatprep.subr.bf16.mxu1 %v2669_v44  ;;  %v2040_v50 = vld [vmem:[%s12360_s3 + $0x760] sm:$0xff]  ;;  %v1297_v44 = vadd.f32 %v9458_v48, %v918_v30  ;;  %v2731_v30 = vunpack.c.h.s8.bf16 %v2083_v29 }
 0x4ed   :  { %5322 = vmatprep.subr.bf16.mxu0 %v2599_v19  ;;  %v2634_v16 = vunpack.c.l.s8.bf16 %v2040_v50  ;;  %v2714_v19 = vunpack.c.h.s8.bf16 %v2075_v63  ;;  %v2643_v48 = vunpack.c.h.s8.bf16 %v2040_v50  ;;  %v2058_v50 = vld [vmem:[%s12360_s3 + $0x7f0] sm:$0xff] }
 0x4ee   :  { %8098 = vtanh.f32 %v1297_v44 }
 0x4ef   :  { %5314 = vmatmul.mubr.bf16.vlgmr.msra.gmra.mrb[36].mxu0 %v10976_v12  ;;  %5134 = vmatpush1.bf16.msra.mxu1 %v2668_v17  ;;  %v2084_v17 = vld [vmem:[%s12360_s3 + $0x8c0] sm:$0xff]  ;;  %8100 = vtanh.f32 %v9514_v33 }
 0x4f0   :  { %5323 = vmatpush1.bf16.msra.mxu0 %v2598_v57  ;;  %5354 = vmatprep.mubr.bf16.mxu0 %v10978_v49  ;;  %v2050_v57 = vld [vmem:[%s12360_s3 + $0x7b0] sm:$0xff]  ;;  %8102 = vtanh.f32 %v9512_v58 }
 0x4f1   :  { %5135 = vmatprep.subr.bf16.mxu1 %v2678_v59  ;;  %5324 = vmatprep.subr.bf16.mxu0 %v2608_v20  ;;  %v2713_v59 = vunpack.c.h.s8.bf16 %v2074_v62  ;;  %v2723_v20 = vunpack.c.l.s8.bf16 %v2084_v17  ;;  %v2653_v61 = vunpack.c.l.s8.bf16 %v2050_v57 }
 0x4f3   :  { %5136 = vmatpush1.bf16.msra.mxu1 %v2677_v31  ;;  %v2049_v31 = vld [vmem:[%s12360_s3 + $0x7a8] sm:$0xff] }
 0x4f4   :  { %5325 = vmatpush1.bf16.msra.mxu0 %v2607_v24  ;;  %5137 = vmatprep.subr.bf16.mxu1 %v2687_v46  ;;  %v2652_v23 = vunpack.c.l.s8.bf16 %v2049_v31 }
 0x4f5   :  { %5326 = vmatprep.subr.bf16.mxu0 %v2617_v54 }
 0x4f7   :  { %5138 = vmatpush1.bf16.msra.mxu1 %v2686_v45  ;;  %v2732_v45 = vunpack.c.h.s8.bf16 %v2084_v17 }
 0x4f8   :  { %5327 = vmatpush1.bf16.msra.mxu0 %v2616_v51  ;;  %5139 = vmatprep.subr.bf16.mxu1 %v2696_v27  ;;  %v2662_v27 = vunpack.c.h.s8.bf16 %v2050_v57  ;;  %v2102_v57 = vld [vmem:[%s12360_s3 + $0x950] sm:$0xff] }
 0x4f9   :  { %5328 = vmatprep.subr.bf16.mxu0 %v2626_v52  ;;  %v2093_v52 = vld [vmem:[%s12360_s3 + $0x908] sm:$0xff]  ;;  %v2759_v29 = vunpack.c.l.s8.bf16 %v2102_v57 }
 0x4fb   :  { %5140 = vmatpush1.bf16.msra.mxu1 %v2695_v38  ;;  %v2661_v38 = vunpack.c.h.s8.bf16 %v2049_v31 }
 0x4fc   :  { %5329 = vmatpush1.bf16.msra.mxu0 %v2625_v55  ;;  %5141 = vmatprep.subr.bf16.mxu1 %v2705_v14  ;;  %v2741_v55 = vunpack.c.l.s8.bf16 %v2093_v52  ;;  %v2092_v14 = vld [vmem:[%s12360_s3 + $0x900] sm:$0xff] }
 0x4fd   :  { %5330 = vmatprep.subr.bf16.mxu0 %v2635_v53  ;;  %v8099_v53 = vpop.eup %8098 }
 0x4fe   :  { %v8101_v44 = vpop.eup %8100 }
 0x4ff   :  { %5142 = vmatpush1.bf16.msra.mxu1 %v2704_v41  ;;  %v2740_v41 = vunpack.c.l.s8.bf16 %v2092_v14  ;;  %v11096_v17 = vpack.c.bf16 %v8101_v44, %v8101_v44 }
 0x500   :  { %5331 = vmatpush1.bf16.msra.mxu0 %v2634_v16  ;;  %5143 = vmatprep.subr.bf16.mxu1 %v2714_v19  ;;  %v11094_v16 = vpack.c.bf16 %v8099_v53, %v8099_v53  ;;  %v2670_v19 = vunpack.c.l.s8.bf16 %v2058_v50 }
 0x501   :  { %5332 = vmatprep.subr.bf16.mxu0 %v2644_v43  ;;  %v2750_v43 = vunpack.c.h.s8.bf16 %v2093_v52 }
 0x502   :  { %v7589_v24 = vpop.f32.mrb[52].mxu0 }
 0x503   :  { %v7590_v46 = vpop.f32.mrb[53].mxu0  ;;  %5144 = vmatpush1.bf16.msra.mxu1 %v2713_v59  ;;  %v2068_v59 = vld [vmem:[%s12360_s3 + $0x840] sm:$0xff] }
 0x504   :  { %v7591_v54 = vadd.f32 %v7590_v46, %v7589_v24  ;;  %v7592_v33 = vpop.f32.mrb[54].mxu0  ;;  %5333 = vmatpush1.bf16.msra.mxu0 %v2643_v48  ;;  %5145 = vmatprep.subr.bf16.mxu1 %v2723_v20  ;;  %v2749_v48 = vunpack.c.h.s8.bf16 %v2092_v14  ;;  %v2679_v20 = vunpack.c.h.s8.bf16 %v2058_v50  ;;  %v2689_v31 = vunpack.c.l.s8.bf16 %v2068_v59  ;;  %v2067_v24 = vld [vmem:[%s12360_s3 + $0x838] sm:$0xff]  ;;  %v2086_v50 = vld [vmem:[%s12360_s3 + $0x8d0] sm:$0xff] }
 0x505   :  { %v7593_v51 = vpop.f32.mrb[55].mxu0  ;;  %5334 = vmatprep.subr.bf16.mxu0 %v2653_v61  ;;  %v2101_v61 = vld [vmem:[%s12360_s3 + $0x948] sm:$0xff]  ;;  %v2698_v33 = vunpack.c.h.s8.bf16 %v2068_v59 }
 0x506   :  { %v4949_v63 = vadd.f32 %v7591_v54, %v11031_v21  ;;  %v2671_v21 = vunpack.c.l.s8.bf16 %v2059_v35  ;;  %v2758_v46 = vunpack.c.l.s8.bf16 %v2101_v61  ;;  %v2768_v54 = vunpack.c.h.s8.bf16 %v2102_v57  ;;  %v2085_v57 = vld [vmem:[%s12360_s3 + $0x8c8] sm:$0xff] }
 0x507   :  { %5146 = vmatpush1.bf16.msra.mxu1 %v2722_v28  ;;  %v2688_v28 = vunpack.c.l.s8.bf16 %v2067_v24  ;;  %v2767_v51 = vunpack.c.h.s8.bf16 %v2101_v61  ;;  %v2129_v61 = vld [vmem:[%s12360_s3 + $0xa28] sm:$0xff] }
 0x508   :  { %5335 = vmatpush1.bf16.msra.mxu0 %v2652_v23  ;;  %5147 = vmatprep.subr.bf16.mxu1 %v2732_v45  ;;  %v11089_v62 = vadd.f32 %v11018_v56, %v4949_v63  ;;  %v2680_v56 = vunpack.c.h.s8.bf16 %v2059_v35  ;;  %v2111_v23 = vld [vmem:[%s12360_s3 + $0x998] sm:$0xff]  ;;  %v2077_v45 = vld [vmem:[%s12360_s3 + $0x888] sm:$0xff]  ;;  %v2110_v63 = vld [vmem:[%s12360_s3 + $0x990] sm:$0xff] }
 0x509   :  { %5336 = vmatprep.subr.bf16.mxu0 %v2662_v27  ;;  %v2697_v27 = vunpack.c.h.s8.bf16 %v2067_v24  ;;  %v2777_v52 = vunpack.c.l.s8.bf16 %v2111_v23  ;;  %v2707_v35 = vunpack.c.l.s8.bf16 %v2077_v45  ;;  %v2786_v14 = vunpack.c.h.s8.bf16 %v2111_v23  ;;  %v2094_v23 = vld [vmem:[%s12360_s3 + $0x910] sm:$0xff] }
 0x50a   :  { %v2716_v53 = vunpack.c.h.s8.bf16 %v2077_v45  ;;  %v2785_v44 = vunpack.c.h.s8.bf16 %v2110_v63 }
 0x50b   :  { %5148 = vmatpush1.bf16.msra.mxu1 %v2731_v30  ;;  %v2076_v30 = vld [vmem:[%s12360_s3 + $0x880] sm:$0xff] }
 0x50c   :  { %5337 = vmatpush1.bf16.msra.mxu0 %v2661_v38  ;;  %5158 = vmatprep.subr.bf16.mxu1 %v2741_v55  ;;  %v2776_v38 = vunpack.c.l.s8.bf16 %v2110_v63  ;;  %v2706_v55 = vunpack.c.l.s8.bf16 %v2076_v30  ;;  %v2138_v63 = vld [vmem:[%s12360_s3 + $0xa70] sm:$0xff] }
 0x50d   :  { %5338 = vmatprep.subr.bf16.mxu0 %v2671_v21  ;;  %v2120_v21 = vld [vmem:[%s12360_s3 + $0x9e0] sm:$0xff] }
 0x50e   :  { %5150 = vmatmul.mubr.bf16.vlgmr.msra.gmra.mrb[24].mxu1 %v11094_v16 }
 0x50f   :  { %5159 = vmatpush1.bf16.msra.mxu1 %v2740_v41  ;;  %5190 = vmatprep.mubr.bf16.mxu1 %v11096_v17  ;;  %v2715_v41 = vunpack.c.h.s8.bf16 %v2076_v30 }
 0x510   :  { %5339 = vmatpush1.bf16.msra.mxu0 %v2670_v19  ;;  %5160 = vmatprep.subr.bf16.mxu1 %v2750_v43  ;;  %v2795_v19 = vunpack.c.l.s8.bf16 %v2120_v21  ;;  %v2119_v43 = vld [vmem:[%s12360_s3 + $0x9d8] sm:$0xff] }
 0x511   :  { %5340 = vmatprep.subr.bf16.mxu0 %v2680_v56  ;;  %v2725_v56 = vunpack.c.l.s8.bf16 %v2086_v50  ;;  %v2794_v59 = vunpack.c.l.s8.bf16 %v2119_v43  ;;  %v2803_v24 = vunpack.c.h.s8.bf16 %v2119_v43  ;;  %v2147_v43 = vld [vmem:[%s12360_s3 + $0xab8] sm:$0xff] }
 0x513   :  { %5161 = vmatpush1.bf16.msra.mxu1 %v2749_v48  ;;  %v2724_v48 = vunpack.c.l.s8.bf16 %v2085_v57 }
 0x514   :  { %5341 = vmatpush1.bf16.msra.mxu0 %v2679_v20  ;;  %5162 = vmatprep.subr.bf16.mxu1 %v2759_v29  ;;  %v2804_v20 = vunpack.c.h.s8.bf16 %v2120_v21  ;;  %v2734_v29 = vunpack.c.h.s8.bf16 %v2086_v50  ;;  %v2103_v21 = vld [vmem:[%s12360_s3 + $0x958] sm:$0xff] }
 0x515   :  { %5342 = vmatprep.subr.bf16.mxu0 %v2689_v31  ;;  %v2095_v31 = vld [vmem:[%s12360_s3 + $0x918] sm:$0xff] }
 0x517   :  { %5163 = vmatpush1.bf16.msra.mxu1 %v2758_v46  ;;  %v2733_v46 = vunpack.c.h.s8.bf16 %v2085_v57 }
 0x518   :  { %5343 = vmatpush1.bf16.msra.mxu0 %v2688_v28  ;;  %5164 = vmatprep.subr.bf16.mxu1 %v2768_v54  ;;  %v2813_v28 = vunpack.c.l.s8.bf16 %v2129_v61  ;;  %v2128_v54 = vld [vmem:[%s12360_s3 + $0xa20] sm:$0xff] }
 0x519   :  { %5344 = vmatprep.subr.bf16.mxu0 %v2698_v33  ;;  %v2743_v33 = vunpack.c.l.s8.bf16 %v2095_v31  ;;  %v2812_v45 = vunpack.c.l.s8.bf16 %v2128_v54  ;;  %v2821_v30 = vunpack.c.h.s8.bf16 %v2128_v54  ;;  %v2156_v54 = vld [vmem:[%s12360_s3 + $0xb00] sm:$0xff] }
 0x51b   :  { %5165 = vmatpush1.bf16.msra.mxu1 %v2767_v51  ;;  %v2742_v51 = vunpack.c.l.s8.bf16 %v2094_v23 }
 0x51c   :  { %5345 = vmatpush1.bf16.msra.mxu0 %v2697_v27  ;;  %5166 = vmatprep.subr.bf16.mxu1 %v2777_v52  ;;  %v2822_v27 = vunpack.c.h.s8.bf16 %v2129_v61  ;;  %v2752_v52 = vunpack.c.h.s8.bf16 %v2095_v31  ;;  %v2112_v61 = vld [vmem:[%s12360_s3 + $0x9a0] sm:$0xff] }
 0x51d   :  { %5346 = vmatprep.subr.bf16.mxu0 %v2707_v35  ;;  %v2104_v35 = vld [vmem:[%s12360_s3 + $0x960] sm:$0xff] }
 0x51f   :  { %5167 = vmatpush1.bf16.msra.mxu1 %v2776_v38  ;;  %v2751_v38 = vunpack.c.h.s8.bf16 %v2094_v23 }
 0x520   :  { %5347 = vmatpush1.bf16.msra.mxu0 %v2706_v55  ;;  %5168 = vmatprep.subr.bf16.mxu1 %v2786_v14  ;;  %v2831_v55 = vunpack.c.l.s8.bf16 %v2138_v63  ;;  %v2137_v14 = vld [vmem:[%s12360_s3 + $0xa68] sm:$0xff] }
 0x521   :  { %5348 = vmatprep.subr.bf16.mxu0 %v2716_v53  ;;  %v2761_v53 = vunpack.c.l.s8.bf16 %v2104_v35  ;;  %v2830_v50 = vunpack.c.l.s8.bf16 %v2137_v14  ;;  %v2839_v57 = vunpack.c.h.s8.bf16 %v2137_v14  ;;  %v2131_v14 = vld [vmem:[%s12360_s3 + $0xa38] sm:$0xff] }
 0x523   :  { %5169 = vmatpush1.bf16.msra.mxu1 %v2785_v44  ;;  %v2760_v44 = vunpack.c.l.s8.bf16 %v2103_v21 }
 0x524   :  { %5349 = vmatpush1.bf16.msra.mxu0 %v2715_v41  ;;  %5170 = vmatprep.subr.bf16.mxu1 %v2795_v19  ;;  %v2840_v41 = vunpack.c.h.s8.bf16 %v2138_v63  ;;  %v2770_v19 = vunpack.c.h.s8.bf16 %v2104_v35  ;;  %v2121_v63 = vld [vmem:[%s12360_s3 + $0x9e8] sm:$0xff] }
 0x525   :  { %5350 = vmatprep.subr.bf16.mxu0 %v2725_v56  ;;  %v2113_v56 = vld [vmem:[%s12360_s3 + $0x9a8] sm:$0xff]  ;;  %v2796_v58 = vunpack.c.l.s8.bf16 %v2121_v63 }
 0x527   :  { %5171 = vmatpush1.bf16.msra.mxu1 %v2794_v59  ;;  %v2769_v59 = vunpack.c.h.s8.bf16 %v2103_v21  ;;  %v2805_v21 = vunpack.c.h.s8.bf16 %v2121_v63  ;;  %v2149_v63 = vld [vmem:[%s12360_s3 + $0xac8] sm:$0xff] }
 0x528   :  { %5351 = vmatpush1.bf16.msra.mxu0 %v2724_v48  ;;  %5172 = vmatprep.subr.bf16.mxu1 %v2804_v20  ;;  %v2849_v48 = vunpack.c.l.s8.bf16 %v2147_v43  ;;  %v2146_v20 = vld [vmem:[%s12360_s3 + $0xab0] sm:$0xff] }
 0x529   :  { %5352 = vmatprep.subr.bf16.mxu0 %v2734_v29  ;;  %v2779_v29 = vunpack.c.l.s8.bf16 %v2113_v56  ;;  %v2848_v31 = vunpack.c.l.s8.bf16 %v2146_v20  ;;  %v2857_v23 = vunpack.c.h.s8.bf16 %v2146_v20  ;;  %v2824_v20 = vunpack.c.h.s8.bf16 %v2131_v14 }
 0x52b   :  { %5173 = vmatpush1.bf16.msra.mxu1 %v2803_v24  ;;  %v2778_v24 = vunpack.c.l.s8.bf16 %v2112_v61 }
 0x52c   :  { %5353 = vmatpush1.bf16.msra.mxu0 %v2733_v46  ;;  %5174 = vmatprep.subr.bf16.mxu1 %v2813_v28  ;;  %v2858_v46 = vunpack.c.h.s8.bf16 %v2147_v43  ;;  %v2788_v28 = vunpack.c.h.s8.bf16 %v2113_v56  ;;  %v2130_v43 = vld [vmem:[%s12360_s3 + $0xa30] sm:$0xff] }
 0x52d   :  { %5363 = vmatprep.subr.bf16.mxu0 %v2743_v33  ;;  %v2122_v33 = vld [vmem:[%s12360_s3 + $0x9f0] sm:$0xff] }
 0x52f   :  { %5355 = vmatmul.mubr.bf16.vlgmr.msra.gmra.mrb[36].mxu0 %v11094_v16  ;;  %5175 = vmatpush1.bf16.msra.mxu1 %v2812_v45  ;;  %v2787_v45 = vunpack.c.h.s8.bf16 %v2112_v61  ;;  %v2140_v61 = vld [vmem:[%s12360_s3 + $0xa80] sm:$0xff] }
 0x530   :  { %5364 = vmatpush1.bf16.msra.mxu0 %v2742_v51  ;;  %5395 = vmatprep.mubr.bf16.mxu0 %v11096_v17  ;;  %v2867_v51 = vunpack.c.l.s8.bf16 %v2156_v54 }
 0x531   :  { %5176 = vmatprep.subr.bf16.mxu1 %v2822_v27  ;;  %5365 = vmatprep.subr.bf16.mxu0 %v2752_v52  ;;  %v2155_v27 = vld [vmem:[%s12360_s3 + $0xaf8] sm:$0xff]  ;;  %v2797_v52 = vunpack.c.l.s8.bf16 %v2122_v33 }
 0x532   :  { %v2866_v35 = vunpack.c.l.s8.bf16 %v2155_v27 }
 0x533   :  { %5177 = vmatpush1.bf16.msra.mxu1 %v2821_v30  ;;  %v2876_v30 = vunpack.c.h.s8.bf16 %v2156_v54  ;;  %v2833_v54 = vunpack.c.l.s8.bf16 %v2140_v61 }
 0x534   :  { %5366 = vmatpush1.bf16.msra.mxu0 %v2751_v38  ;;  %5178 = vmatprep.subr.bf16.mxu1 %v2831_v55  ;;  %v2806_v38 = vunpack.c.h.s8.bf16 %v2122_v33  ;;  %v1809_v55 = vld [vmem:[%s12360_s3 + $0x28] sm:$0xff]  ;;  %v2139_v33 = vld [vmem:[%s12360_s3 + $0xa78] sm:$0xff] }
 0x535   :  { %5367 = vmatprep.subr.bf16.mxu0 %v2761_v53  ;;  %v2875_v53 = vunpack.c.h.s8.bf16 %v2155_v27  ;;  %v2842_v27 = vunpack.c.h.s8.bf16 %v2140_v61 }
 0x537   :  { %5179 = vmatpush1.bf16.msra.mxu1 %v2830_v50  ;;  %v2169_v50 = vunpack.c.l.s8.bf16 %v1809_v55 }
 0x538   :  { %5368 = vmatpush1.bf16.msra.mxu0 %v2760_v44  ;;  %5180 = vmatprep.subr.bf16.mxu1 %v2840_v41  ;;  %v1808_v44 = vld [vmem:[%s12360_s3 + $0x20] sm:$0xff]  ;;  %v8103_v41 = vpop.eup %8102 }
 0x539   :  { %5369 = vmatprep.subr.bf16.mxu0 %v2770_v19  ;;  %v2815_v19 = vunpack.c.l.s8.bf16 %v2131_v14  ;;  %v2168_v56 = vunpack.c.l.s8.bf16 %v1808_v44  ;;  %v2148_v14 = vld [vmem:[%s12360_s3 + $0xac0] sm:$0xff] }
 0x53b   :  { %5181 = vmatpush1.bf16.msra.mxu1 %v2839_v57  ;;  %v11199_v57 = vpack.c.bf16 %v8103_v41, %v8103_v41  ;;  %v1836_v41 = vld [vmem:[%s12360_s3 + $0x100] sm:$0xff] }
 0x53c   :  { %5370 = vmatpush1.bf16.msra.mxu0 %v2769_v59  ;;  %5182 = vmatprep.subr.bf16.mxu1 %v2849_v48  ;;  %v2814_v59 = vunpack.c.l.s8.bf16 %v2130_v43  ;;  %v2178_v48 = vunpack.c.h.s8.bf16 %v1809_v55  ;;  %v2851_v55 = vunpack.c.l.s8.bf16 %v2149_v63 }
 0x53d   :  { %5371 = vmatprep.subr.bf16.mxu0 %v2779_v29  ;;  %v1818_v29 = vld [vmem:[%s12360_s3 + $0x70] sm:$0xff] }
 0x53f   :  { %5183 = vmatpush1.bf16.msra.mxu1 %v2848_v31  ;;  %v2177_v31 = vunpack.c.h.s8.bf16 %v1808_v44  ;;  %v2860_v44 = vunpack.c.h.s8.bf16 %v2149_v63 }
 0x540   :  { %5372 = vmatpush1.bf16.msra.mxu0 %v2778_v24  ;;  %5184 = vmatprep.subr.bf16.mxu1 %v2858_v46  ;;  %v2823_v24 = vunpack.c.h.s8.bf16 %v2130_v43  ;;  %v2187_v46 = vunpack.c.l.s8.bf16 %v1818_v29 }
 0x541   :  { %5373 = vmatprep.subr.bf16.mxu0 %v2788_v28  ;;  %v1817_v28 = vld [vmem:[%s12360_s3 + $0x68] sm:$0xff] }
 0x543   :  { %5185 = vmatpush1.bf16.msra.mxu1 %v2857_v23  ;;  %v2186_v23 = vunpack.c.l.s8.bf16 %v1817_v28 }
 0x544   :  { %5374 = vmatpush1.bf16.msra.mxu0 %v2787_v45  ;;  %5186 = vmatprep.subr.bf16.mxu1 %v2867_v51  ;;  %v2832_v45 = vunpack.c.l.s8.bf16 %v2139_v33  ;;  %v2196_v51 = vunpack.c.h.s8.bf16 %v1818_v29  ;;  %v2157_v29 = vld [vmem:[%s12360_s3 + $0xb08] sm:$0xff] }
 0x545   :  { %5375 = vmatprep.subr.bf16.mxu0 %v2797_v52  ;;  %v1827_v52 = vld [vmem:[%s12360_s3 + $0xb8] sm:$0xff] }
 0x547   :  { %5187 = vmatpush1.bf16.msra.mxu1 %v2866_v35  ;;  %v2195_v35 = vunpack.c.h.s8.bf16 %v1817_v28  ;;  %v1845_v28 = vld [vmem:[%s12360_s3 + $0x148] sm:$0xff] }
 0x548   :  { %5376 = vmatpush1.bf16.msra.mxu0 %v2796_v58  ;;  %5188 = vmatprep.subr.bf16.mxu1 %v2876_v30  ;;  %v2841_v58 = vunpack.c.h.s8.bf16 %v2139_v33  ;;  %v2205_v30 = vunpack.c.l.s8.bf16 %v1827_v52 }
 0x549   :  { %5377 = vmatprep.subr.bf16.mxu0 %v2806_v38  ;;  %v1826_v38 = vld [vmem:[%s12360_s3 + $0xb0] sm:$0xff] }
 0x54a   :  { %v2213_v43 = vunpack.c.h.s8.bf16 %v1826_v38 }
 0x54b   :  { %5189 = vmatpush1.bf16.msra.mxu1 %v2875_v53  ;;  %v2204_v53 = vunpack.c.l.s8.bf16 %v1826_v38  ;;  %v1854_v38 = vld [vmem:[%s12360_s3 + $0x190] sm:$0xff] }
 0x54c   :  { %5378 = vmatpush1.bf16.msra.mxu0 %v2805_v21  ;;  %5404 = vmatprep.subr.bf16.mxu1 %v2169_v50  ;;  %v2850_v21 = vunpack.c.l.s8.bf16 %v2148_v14  ;;  %v2214_v50 = vunpack.c.h.s8.bf16 %v1827_v52  ;;  %v1810_v52 = vld [vmem:[%s12360_s3 + $0x30] sm:$0xff] }
 0x54d   :  { %5379 = vmatprep.subr.bf16.mxu0 %v2815_v19  ;;  %v2158_v19 = vld [vmem:[%s12360_s3 + $0xb10] sm:$0xff] }
 0x54e   :  { %5191 = vmatmul.mubr.bf16.vlgmr.msra.gmra.mrb[24].mxu1 %v11199_v57 }
 0x54f   :  { %5405 = vmatpush1.bf16.msra.mxu1 %v2168_v56  ;;  %5436 = vmatprep.mubr.bf16.mxu1 %v10644_v18  ;;  %v2859_v56 = vunpack.c.h.s8.bf16 %v2148_v14 }
 0x550   :  { %5380 = vmatpush1.bf16.msra.mxu0 %v2814_v59  ;;  %5406 = vmatprep.subr.bf16.mxu1 %v2178_v48  ;;  %v2223_v59 = vunpack.c.l.s8.bf16 %v1836_v41  ;;  %v1835_v48 = vld [vmem:[%s12360_s3 + $0xf8] sm:$0xff] }
 0x551   :  { %5381 = vmatprep.subr.bf16.mxu0 %v2824_v20  ;;  %v2869_v20 = vunpack.c.l.s8.bf16 %v2158_v19  ;;  %v2222_v61 = vunpack.c.l.s8.bf16 %v1835_v48  ;;  %v2231_v33 = vunpack.c.h.s8.bf16 %v1835_v48  ;;  %v1863_v48 = vld [vmem:[%s12360_s3 + $0x1d8] sm:$0xff] }
 0x553   :  { %5407 = vmatpush1.bf16.msra.mxu1 %v2177_v31  ;;  %v2868_v31 = vunpack.c.l.s8.bf16 %v2157_v29 }
 0x554   :  { %5382 = vmatpush1.bf16.msra.mxu0 %v2823_v24  ;;  %5408 = vmatprep.subr.bf16.mxu1 %v2187_v46  ;;  %v2232_v24 = vunpack.c.h.s8.bf16 %v1836_v41  ;;  %v2878_v46 = vunpack.c.h.s8.bf16 %v2158_v19  ;;  %v1819_v41 = vld [vmem:[%s12360_s3 + $0x78] sm:$0xff] }
 0x555   :  { %5383 = vmatprep.subr.bf16.mxu0 %v2833_v54  ;;  %v1811_v54 = vld [vmem:[%s12360_s3 + $0x38] sm:$0xff] }
 0x557   :  { %5409 = vmatpush1.bf16.msra.mxu1 %v2186_v23  ;;  %v2877_v23 = vunpack.c.h.s8.bf16 %v2157_v29 }
 0x558   :  { %5384 = vmatpush1.bf16.msra.mxu0 %v2832_v45  ;;  %5410 = vmatprep.subr.bf16.mxu1 %v2196_v51  ;;  %v2241_v45 = vunpack.c.l.s8.bf16 %v1845_v28  ;;  %v1844_v51 = vld [vmem:[%s12360_s3 + $0x140] sm:$0xff] }
 0x559   :  { %5385 = vmatprep.subr.bf16.mxu0 %v2842_v27  ;;  %v2171_v27 = vunpack.c.l.s8.bf16 %v1811_v54  ;;  %v2240_v63 = vunpack.c.l.s8.bf16 %v1844_v51  ;;  %v2249_v14 = vunpack.c.h.s8.bf16 %v1844_v51  ;;  %v1872_v51 = vld [vmem:[%s12360_s3 + $0x220] sm:$0xff] }
 0x55b   :  { %5411 = vmatpush1.bf16.msra.mxu1 %v2195_v35  ;;  %v2170_v35 = vunpack.c.l.s8.bf16 %v1810_v52 }
 0x55c   :  { %5386 = vmatpush1.bf16.msra.mxu0 %v2841_v58  ;;  %5412 = vmatprep.subr.bf16.mxu1 %v2205_v30  ;;  %v2250_v58 = vunpack.c.h.s8.bf16 %v1845_v28  ;;  %v2180_v30 = vunpack.c.h.s8.bf16 %v1811_v54  ;;  %v1828_v28 = vld [vmem:[%s12360_s3 + $0xc0] sm:$0xff] }
 0x55d   :  { %5387 = vmatprep.subr.bf16.mxu0 %v2851_v55  ;;  %v1820_v55 = vld [vmem:[%s12360_s3 + $0x80] sm:$0xff] }
 0x55f   :  { %5413 = vmatpush1.bf16.msra.mxu1 %v2204_v53  ;;  %v2179_v53 = vunpack.c.h.s8.bf16 %v1810_v52 }
 0x560   :  { %5388 = vmatpush1.bf16.msra.mxu0 %v2850_v21  ;;  %5414 = vmatprep.subr.bf16.mxu1 %v2214_v50  ;;  %v2259_v21 = vunpack.c.l.s8.bf16 %v1854_v38  ;;  %v1853_v50 = vld [vmem:[%s12360_s3 + $0x188] sm:$0xff] }
 0x561   :  { %5389 = vmatprep.subr.bf16.mxu0 %v2860_v44  ;;  %v2189_v44 = vunpack.c.l.s8.bf16 %v1820_v55  ;;  %v2258_v19 = vunpack.c.l.s8.bf16 %v1853_v50  ;;  %v2267_v29 = vunpack.c.h.s8.bf16 %v1853_v50  ;;  %v1881_v50 = vld [vmem:[%s12360_s3 + $0x268] sm:$0xff] }
 0x563   :  { %5415 = vmatpush1.bf16.msra.mxu1 %v2213_v43  ;;  %v2188_v43 = vunpack.c.l.s8.bf16 %v1819_v41 }
 0x564   :  { %5390 = vmatpush1.bf16.msra.mxu0 %v2859_v56  ;;  %5416 = vmatprep.subr.bf16.mxu1 %v2223_v59  ;;  %v2268_v56 = vunpack.c.h.s8.bf16 %v1854_v38  ;;  %v2198_v59 = vunpack.c.h.s8.bf16 %v1820_v55  ;;  %v1837_v38 = vld [vmem:[%s12360_s3 + $0x108] sm:$0xff] }
 0x565   :  { %5391 = vmatprep.subr.bf16.mxu0 %v2869_v20  ;;  %v1829_v20 = vld [vmem:[%s12360_s3 + $0xc8] sm:$0xff] }
 0x567   :  { %5417 = vmatpush1.bf16.msra.mxu1 %v2222_v61  ;;  %v2197_v61 = vunpack.c.h.s8.bf16 %v1819_v41 }
 0x568   :  { %5392 = vmatpush1.bf16.msra.mxu0 %v2868_v31  ;;  %5418 = vmatprep.subr.bf16.mxu1 %v2232_v24  ;;  %v2277_v31 = vunpack.c.l.s8.bf16 %v1863_v48  ;;  %v1862_v24 = vld [vmem:[%s12360_s3 + $0x1d0] sm:$0xff] }
 0x569   :  { %5393 = vmatprep.subr.bf16.mxu0 %v2878_v46  ;;  %v2207_v46 = vunpack.c.l.s8.bf16 %v1829_v20  ;;  %v2276_v54 = vunpack.c.l.s8.bf16 %v1862_v24  ;;  %v2285_v52 = vunpack.c.h.s8.bf16 %v1862_v24  ;;  %v1890_v24 = vld [vmem:[%s12360_s3 + $0x2b0] sm:$0xff] }
 0x56b   :  { %5419 = vmatpush1.bf16.msra.mxu1 %v2231_v33  ;;  %v2206_v33 = vunpack.c.l.s8.bf16 %v1828_v28 }
 0x56c   :  { %5394 = vmatpush1.bf16.msra.mxu0 %v2877_v23  ;;  %5420 = vmatprep.subr.bf16.mxu1 %v2241_v45  ;;  %v2286_v23 = vunpack.c.h.s8.bf16 %v1863_v48  ;;  %v2216_v45 = vunpack.c.h.s8.bf16 %v1829_v20  ;;  %v1846_v48 = vld [vmem:[%s12360_s3 + $0x150] sm:$0xff] }
 0x56d   :  { %5609 = vmatprep.subr.bf16.mxu0 %v2171_v27  ;;  %v1838_v27 = vld [vmem:[%s12360_s3 + $0x110] sm:$0xff] }
 0x56f   :  { %5396 = vmatmul.mubr.bf16.vlgmr.msra.gmra.mrb[36].mxu0 %v11199_v57  ;;  %5421 = vmatpush1.bf16.msra.mxu1 %v2240_v63  ;;  %v2215_v63 = vunpack.c.h.s8.bf16 %v1828_v28 }
 0x570   :  { %5610 = vmatpush1.bf16.msra.mxu0 %v2170_v35  ;;  %5641 = vmatprep.mubr.bf16.mxu0 %v10644_v18  ;;  %v2295_v35 = vunpack.c.l.s8.bf16 %v1872_v51 }
 0x571   :  { %5422 = vmatprep.subr.bf16.mxu1 %v2250_v58  ;;  %5611 = vmatprep.subr.bf16.mxu0 %v2180_v30  ;;  %v1871_v58 = vld [vmem:[%s12360_s3 + $0x218] sm:$0xff]  ;;  %v2225_v30 = vunpack.c.l.s8.bf16 %v1838_v27 }
 0x572   :  { %v2294_v55 = vunpack.c.l.s8.bf16 %v1871_v58  ;;  %v2303_v41 = vunpack.c.h.s8.bf16 %v1871_v58  ;;  %v1899_v58 = vld [vmem:[%s12360_s3 + $0x2f8] sm:$0xff] }
 0x573   :  { %5423 = vmatpush1.bf16.msra.mxu1 %v2249_v14  ;;  %v2224_v14 = vunpack.c.l.s8.bf16 %v1837_v38 }
 0x574   :  { %5612 = vmatpush1.bf16.msra.mxu0 %v2179_v53  ;;  %5424 = vmatprep.subr.bf16.mxu1 %v2259_v21  ;;  %v2304_v53 = vunpack.c.h.s8.bf16 %v1872_v51  ;;  %v2234_v21 = vunpack.c.h.s8.bf16 %v1838_v27  ;;  %v1855_v51 = vld [vmem:[%s12360_s3 + $0x198] sm:$0xff] }
 0x575   :  { %5613 = vmatprep.subr.bf16.mxu0 %v2189_v44  ;;  %v1847_v44 = vld [vmem:[%s12360_s3 + $0x158] sm:$0xff] }
 0x577   :  { %5425 = vmatpush1.bf16.msra.mxu1 %v2258_v19  ;;  %v2233_v19 = vunpack.c.h.s8.bf16 %v1837_v38 }
 0x578   :  { %5614 = vmatpush1.bf16.msra.mxu0 %v2188_v43  ;;  %5426 = vmatprep.subr.bf16.mxu1 %v2268_v56  ;;  %v2313_v43 = vunpack.c.l.s8.bf16 %v1881_v50  ;;  %v1880_v56 = vld [vmem:[%s12360_s3 + $0x260] sm:$0xff] }
 0x579   :  { %5615 = vmatprep.subr.bf16.mxu0 %v2198_v59  ;;  %v2243_v59 = vunpack.c.l.s8.bf16 %v1847_v44  ;;  %v2312_v20 = vunpack.c.l.s8.bf16 %v1880_v56  ;;  %v2321_v28 = vunpack.c.h.s8.bf16 %v1880_v56  ;;  %v1908_v56 = vld [vmem:[%s12360_s3 + $0x340] sm:$0xff] }
 0x57b   :  { %5427 = vmatpush1.bf16.msra.mxu1 %v2267_v29  ;;  %v2242_v29 = vunpack.c.l.s8.bf16 %v1846_v48 }
 0x57c   :  { %5616 = vmatpush1.bf16.msra.mxu0 %v2197_v61  ;;  %5428 = vmatprep.subr.bf16.mxu1 %v2277_v31  ;;  %v2322_v61 = vunpack.c.h.s8.bf16 %v1881_v50  ;;  %v2252_v31 = vunpack.c.h.s8.bf16 %v1847_v44  ;;  %v1864_v50 = vld [vmem:[%s12360_s3 + $0x1e0] sm:$0xff] }
 0x57d   :  { %5617 = vmatprep.subr.bf16.mxu0 %v2207_v46  ;;  %v1856_v46 = vld [vmem:[%s12360_s3 + $0x1a0] sm:$0xff] }
 0x57f   :  { %5429 = vmatpush1.bf16.msra.mxu1 %v2276_v54  ;;  %v2251_v54 = vunpack.c.h.s8.bf16 %v1846_v48 }
 0x580   :  { %5618 = vmatpush1.bf16.msra.mxu0 %v2206_v33  ;;  %5430 = vmatprep.subr.bf16.mxu1 %v2286_v23  ;;  %v2331_v33 = vunpack.c.l.s8.bf16 %v1890_v24  ;;  %v1889_v23 = vld [vmem:[%s12360_s3 + $0x2a8] sm:$0xff] }
 0x581   :  { %5619 = vmatprep.subr.bf16.mxu0 %v2216_v45  ;;  %v2261_v45 = vunpack.c.l.s8.bf16 %v1856_v46  ;;  %v2330_v27 = vunpack.c.l.s8.bf16 %v1889_v23  ;;  %v2339_v38 = vunpack.c.h.s8.bf16 %v1889_v23  ;;  %v1917_v23 = vld [vmem:[%s12360_s3 + $0x388] sm:$0xff] }
 0x583   :  { %5431 = vmatpush1.bf16.msra.mxu1 %v2285_v52  ;;  %v2260_v52 = vunpack.c.l.s8.bf16 %v1855_v51 }
 0x584   :  { %5620 = vmatpush1.bf16.msra.mxu0 %v2215_v63  ;;  %5432 = vmatprep.subr.bf16.mxu1 %v2295_v35  ;;  %v2340_v63 = vunpack.c.h.s8.bf16 %v1890_v24  ;;  %v2270_v35 = vunpack.c.h.s8.bf16 %v1856_v46  ;;  %v1873_v24 = vld [vmem:[%s12360_s3 + $0x228] sm:$0xff] }
 0x585   :  { %5621 = vmatprep.subr.bf16.mxu0 %v2225_v30  ;;  %v1865_v30 = vld [vmem:[%s12360_s3 + $0x1e8] sm:$0xff] }
 0x587   :  { %5433 = vmatpush1.bf16.msra.mxu1 %v2294_v55  ;;  %v2269_v55 = vunpack.c.h.s8.bf16 %v1855_v51 }
 0x588   :  { %5622 = vmatpush1.bf16.msra.mxu0 %v2224_v14  ;;  %5434 = vmatprep.subr.bf16.mxu1 %v2304_v53  ;;  %v2349_v14 = vunpack.c.l.s8.bf16 %v1899_v58  ;;  %v1898_v53 = vld [vmem:[%s12360_s3 + $0x2f0] sm:$0xff] }
 0x589   :  { %5623 = vmatprep.subr.bf16.mxu0 %v2234_v21  ;;  %v2279_v21 = vunpack.c.l.s8.bf16 %v1865_v30  ;;  %v2348_v44 = vunpack.c.l.s8.bf16 %v1898_v53  ;;  %v2357_v48 = vunpack.c.h.s8.bf16 %v1898_v53  ;;  %v1926_v53 = vld [vmem:[%s12360_s3 + $0x3d0] sm:$0xff] }
 0x58b   :  { %5435 = vmatpush1.bf16.msra.mxu1 %v2303_v41  ;;  %v2278_v41 = vunpack.c.l.s8.bf16 %v1864_v50 }
 0x58c   :  { %5624 = vmatpush1.bf16.msra.mxu0 %v2233_v19  ;;  %5445 = vmatprep.subr.bf16.mxu1 %v2313_v43  ;;  %v2358_v19 = vunpack.c.h.s8.bf16 %v1899_v58  ;;  %v2288_v43 = vunpack.c.h.s8.bf16 %v1865_v30  ;;  %v1882_v58 = vld [vmem:[%s12360_s3 + $0x270] sm:$0xff] }
 0x58d   :  { %5625 = vmatprep.subr.bf16.mxu0 %v2243_v59  ;;  %v1874_v59 = vld [vmem:[%s12360_s3 + $0x230] sm:$0xff] }
 0x58e   :  { %5437 = vmatmul.mubr.bf16.vlgmr.msra.gmra.mrb[28].mxu1 %v10747_v26 }
 0x58f   :  { %5446 = vmatpush1.bf16.msra.mxu1 %v2312_v20  ;;  %5477 = vmatprep.mubr.bf16.mxu1 %v10749_v36  ;;  %v2287_v20 = vunpack.c.h.s8.bf16 %v1864_v50 }
 0x590   :  { %5626 = vmatpush1.bf16.msra.mxu0 %v2242_v29  ;;  %5447 = vmatprep.subr.bf16.mxu1 %v2322_v61  ;;  %v2367_v29 = vunpack.c.l.s8.bf16 %v1908_v56  ;;  %v1907_v61 = vld [vmem:[%s12360_s3 + $0x338] sm:$0xff] }
 0x591   :  { %5627 = vmatprep.subr.bf16.mxu0 %v2252_v31  ;;  %v2297_v31 = vunpack.c.l.s8.bf16 %v1874_v59  ;;  %v2366_v46 = vunpack.c.l.s8.bf16 %v1907_v61  ;;  %v2375_v51 = vunpack.c.h.s8.bf16 %v1907_v61  ;;  %v1935_v61 = vld [vmem:[%s12360_s3 + $0x418] sm:$0xff] }
 0x593   :  { %5448 = vmatpush1.bf16.msra.mxu1 %v2321_v28  ;;  %v2296_v28 = vunpack.c.l.s8.bf16 %v1873_v24 }
 0x594   :  { %5628 = vmatpush1.bf16.msra.mxu0 %v2251_v54  ;;  %5449 = vmatprep.subr.bf16.mxu1 %v2331_v33  ;;  %v2376_v54 = vunpack.c.h.s8.bf16 %v1908_v56  ;;  %v2306_v33 = vunpack.c.h.s8.bf16 %v1874_v59  ;;  %v1891_v56 = vld [vmem:[%s12360_s3 + $0x2b8] sm:$0xff] }
 0x595   :  { %5629 = vmatprep.subr.bf16.mxu0 %v2261_v45  ;;  %v1883_v45 = vld [vmem:[%s12360_s3 + $0x278] sm:$0xff] }
 0x597   :  { %5450 = vmatpush1.bf16.msra.mxu1 %v2330_v27  ;;  %v2305_v27 = vunpack.c.h.s8.bf16 %v1873_v24 }
 0x598   :  { %5630 = vmatpush1.bf16.msra.mxu0 %v2260_v52  ;;  %5451 = vmatprep.subr.bf16.mxu1 %v2340_v63  ;;  %v2385_v52 = vunpack.c.l.s8.bf16 %v1917_v23  ;;  %v1916_v63 = vld [vmem:[%s12360_s3 + $0x380] sm:$0xff] }
 0x599   :  { %5631 = vmatprep.subr.bf16.mxu0 %v2270_v35  ;;  %v2315_v35 = vunpack.c.l.s8.bf16 %v1883_v45  ;;  %v2384_v30 = vunpack.c.l.s8.bf16 %v1916_v63  ;;  %v2393_v50 = vunpack.c.h.s8.bf16 %v1916_v63  ;;  %v1944_v63 = vld [vmem:[%s12360_s3 + $0x460] sm:$0xff] }
 0x59b   :  { %5452 = vmatpush1.bf16.msra.mxu1 %v2339_v38  ;;  %v2314_v38 = vunpack.c.l.s8.bf16 %v1882_v58 }
 0x59c   :  { %5632 = vmatpush1.bf16.msra.mxu0 %v2269_v55  ;;  %5453 = vmatprep.subr.bf16.mxu1 %v2349_v14  ;;  %v2394_v55 = vunpack.c.h.s8.bf16 %v1917_v23  ;;  %v2324_v14 = vunpack.c.h.s8.bf16 %v1883_v45  ;;  %v1900_v23 = vld [vmem:[%s12360_s3 + $0x300] sm:$0xff] }
 0x59d   :  { %5633 = vmatprep.subr.bf16.mxu0 %v2279_v21  ;;  %v1892_v21 = vld [vmem:[%s12360_s3 + $0x2c0] sm:$0xff] }
 0x59f   :  { %5454 = vmatpush1.bf16.msra.mxu1 %v2348_v44  ;;  %v2323_v44 = vunpack.c.h.s8.bf16 %v1882_v58 }
 0x5a0   :  { %5634 = vmatpush1.bf16.msra.mxu0 %v2278_v41  ;;  %5455 = vmatprep.subr.bf16.mxu1 %v2358_v19  ;;  %v2403_v41 = vunpack.c.l.s8.bf16 %v1926_v53  ;;  %v1925_v19 = vld [vmem:[%s12360_s3 + $0x3c8] sm:$0xff] }
 0x5a1   :  { %5635 = vmatprep.subr.bf16.mxu0 %v2288_v43  ;;  %v2333_v43 = vunpack.c.l.s8.bf16 %v1892_v21  ;;  %v2402_v59 = vunpack.c.l.s8.bf16 %v1925_v19  ;;  %v2411_v24 = vunpack.c.h.s8.bf16 %v1925_v19  ;;  %v1953_v19 = vld [vmem:[%s12360_s3 + $0x4a8] sm:$0xff] }
 0x5a3   :  { %5456 = vmatpush1.bf16.msra.mxu1 %v2357_v48  ;;  %v2332_v48 = vunpack.c.l.s8.bf16 %v1891_v56 }
 0x5a4   :  { %5636 = vmatpush1.bf16.msra.mxu0 %v2287_v20  ;;  %5457 = vmatprep.subr.bf16.mxu1 %v2367_v29  ;;  %v2412_v20 = vunpack.c.h.s8.bf16 %v1926_v53  ;;  %v2342_v29 = vunpack.c.h.s8.bf16 %v1892_v21  ;;  %v1909_v53 = vld [vmem:[%s12360_s3 + $0x348] sm:$0xff] }
 0x5a5   :  { %5637 = vmatprep.subr.bf16.mxu0 %v2297_v31  ;;  %v1901_v31 = vld [vmem:[%s12360_s3 + $0x308] sm:$0xff] }
 0x5a7   :  { %5458 = vmatpush1.bf16.msra.mxu1 %v2366_v46  ;;  %v2341_v46 = vunpack.c.h.s8.bf16 %v1891_v56 }
 0x5a8   :  { %5638 = vmatpush1.bf16.msra.mxu0 %v2296_v28  ;;  %5459 = vmatprep.subr.bf16.mxu1 %v2376_v54  ;;  %v2421_v28 = vunpack.c.l.s8.bf16 %v1935_v61  ;;  %v1934_v54 = vld [vmem:[%s12360_s3 + $0x410] sm:$0xff] }
 0x5a9   :  { %5639 = vmatprep.subr.bf16.mxu0 %v2306_v33  ;;  %v2351_v33 = vunpack.c.l.s8.bf16 %v1901_v31  ;;  %v2420_v45 = vunpack.c.l.s8.bf16 %v1934_v54  ;;  %v2429_v58 = vunpack.c.h.s8.bf16 %v1934_v54  ;;  %v1962_v54 = vld [vmem:[%s12360_s3 + $0x4f0] sm:$0xff] }
 0x5ab   :  { %5460 = vmatpush1.bf16.msra.mxu1 %v2375_v51  ;;  %v2350_v51 = vunpack.c.l.s8.bf16 %v1900_v23 }
 0x5ac   :  { %5640 = vmatpush1.bf16.msra.mxu0 %v2305_v27  ;;  %5461 = vmatprep.subr.bf16.mxu1 %v2385_v52  ;;  %v2430_v27 = vunpack.c.h.s8.bf16 %v1935_v61  ;;  %v2360_v52 = vunpack.c.h.s8.bf16 %v1901_v31  ;;  %v1918_v61 = vld [vmem:[%s12360_s3 + $0x390] sm:$0xff] }
 0x5ad   :  { %5650 = vmatprep.subr.bf16.mxu0 %v2315_v35  ;;  %v1910_v35 = vld [vmem:[%s12360_s3 + $0x350] sm:$0xff] }
 0x5af   :  { %5642 = vmatmul.mubr.bf16.vlgmr.msra.gmra.mrb[40].mxu0 %v10747_v26  ;;  %5462 = vmatpush1.bf16.msra.mxu1 %v2384_v30  ;;  %v2359_v30 = vunpack.c.h.s8.bf16 %v1900_v23 }
 0x5b0   :  { %5651 = vmatpush1.bf16.msra.mxu0 %v2314_v38  ;;  %5682 = vmatprep.mubr.bf16.mxu0 %v10749_v36  ;;  %v2439_v38 = vunpack.c.l.s8.bf16 %v1944_v63 }
 0x5b1   :  { %5463 = vmatprep.subr.bf16.mxu1 %v2394_v55  ;;  %5652 = vmatprep.subr.bf16.mxu0 %v2324_v14  ;;  %v1943_v55 = vld [vmem:[%s12360_s3 + $0x458] sm:$0xff]  ;;  %v2369_v14 = vunpack.c.l.s8.bf16 %v1910_v35 }
 0x5b2   :  { %v2438_v21 = vunpack.c.l.s8.bf16 %v1943_v55  ;;  %v2447_v56 = vunpack.c.h.s8.bf16 %v1943_v55  ;;  %v1971_v55 = vld [vmem:[%s12360_s3 + $0x538] sm:$0xff] }
 0x5b3   :  { %5464 = vmatpush1.bf16.msra.mxu1 %v2393_v50  ;;  %v2368_v50 = vunpack.c.l.s8.bf16 %v1909_v53 }
 0x5b4   :  { %5653 = vmatpush1.bf16.msra.mxu0 %v2323_v44  ;;  %5465 = vmatprep.subr.bf16.mxu1 %v2403_v41  ;;  %v2448_v44 = vunpack.c.h.s8.bf16 %v1944_v63  ;;  %v2378_v41 = vunpack.c.h.s8.bf16 %v1910_v35  ;;  %v1927_v63 = vld [vmem:[%s12360_s3 + $0x3d8] sm:$0xff] }
 0x5b5   :  { %5654 = vmatprep.subr.bf16.mxu0 %v2333_v43  ;;  %v1919_v43 = vld [vmem:[%s12360_s3 + $0x398] sm:$0xff] }
 0x5b7   :  { %5466 = vmatpush1.bf16.msra.mxu1 %v2402_v59  ;;  %v2377_v59 = vunpack.c.h.s8.bf16 %v1909_v53 }
 0x5b8   :  { %5655 = vmatpush1.bf16.msra.mxu0 %v2332_v48  ;;  %5467 = vmatprep.subr.bf16.mxu1 %v2412_v20  ;;  %v2457_v48 = vunpack.c.l.s8.bf16 %v1953_v19  ;;  %v1952_v20 = vld [vmem:[%s12360_s3 + $0x4a0] sm:$0xff] }
 0x5b9   :  { %5656 = vmatprep.subr.bf16.mxu0 %v2342_v29  ;;  %v2387_v29 = vunpack.c.l.s8.bf16 %v1919_v43  ;;  %v2456_v31 = vunpack.c.l.s8.bf16 %v1952_v20  ;;  %v2465_v23 = vunpack.c.h.s8.bf16 %v1952_v20  ;;  %v1980_v20 = vld [vmem:[%s12360_s3 + $0x580] sm:$0xff] }
 0x5bb   :  { %5468 = vmatpush1.bf16.msra.mxu1 %v2411_v24  ;;  %v2386_v24 = vunpack.c.l.s8.bf16 %v1918_v61 }
 0x5bc   :  { %5657 = vmatpush1.bf16.msra.mxu0 %v2341_v46  ;;  %5469 = vmatprep.subr.bf16.mxu1 %v2421_v28  ;;  %v2466_v46 = vunpack.c.h.s8.bf16 %v1953_v19  ;;  %v2396_v28 = vunpack.c.h.s8.bf16 %v1919_v43  ;;  %v1936_v19 = vld [vmem:[%s12360_s3 + $0x420] sm:$0xff] }
 0x5bd   :  { %5658 = vmatprep.subr.bf16.mxu0 %v2351_v33  ;;  %v1928_v33 = vld [vmem:[%s12360_s3 + $0x3e0] sm:$0xff] }
 0x5bf   :  { %5470 = vmatpush1.bf16.msra.mxu1 %v2420_v45  ;;  %v2395_v45 = vunpack.c.h.s8.bf16 %v1918_v61 }
 0x5c0   :  { %5659 = vmatpush1.bf16.msra.mxu0 %v2350_v51  ;;  %5471 = vmatprep.subr.bf16.mxu1 %v2430_v27  ;;  %v2475_v51 = vunpack.c.l.s8.bf16 %v1962_v54  ;;  %v1961_v27 = vld [vmem:[%s12360_s3 + $0x4e8] sm:$0xff] }
 0x5c1   :  { %5660 = vmatprep.subr.bf16.mxu0 %v2360_v52  ;;  %v2405_v52 = vunpack.c.l.s8.bf16 %v1928_v33  ;;  %v2474_v35 = vunpack.c.l.s8.bf16 %v1961_v27  ;;  %v2483_v53 = vunpack.c.h.s8.bf16 %v1961_v27  ;;  %v1989_v27 = vld [vmem:[%s12360_s3 + $0x5c8] sm:$0xff] }
 0x5c3   :  { %5472 = vmatpush1.bf16.msra.mxu1 %v2429_v58  ;;  %v2404_v58 = vunpack.c.l.s8.bf16 %v1927_v63 }
 0x5c4   :  { %5661 = vmatpush1.bf16.msra.mxu0 %v2359_v30  ;;  %5473 = vmatprep.subr.bf16.mxu1 %v2439_v38  ;;  %v2484_v30 = vunpack.c.h.s8.bf16 %v1962_v54  ;;  %v2414_v38 = vunpack.c.h.s8.bf16 %v1928_v33  ;;  %v1945_v54 = vld [vmem:[%s12360_s3 + $0x468] sm:$0xff] }
 0x5c5   :  { %5662 = vmatprep.subr.bf16.mxu0 %v2369_v14  ;;  %v1937_v14 = vld [vmem:[%s12360_s3 + $0x428] sm:$0xff] }
 0x5c7   :  { %5474 = vmatpush1.bf16.msra.mxu1 %v2438_v21  ;;  %v2413_v21 = vunpack.c.h.s8.bf16 %v1927_v63 }
 0x5c8   :  { %5663 = vmatpush1.bf16.msra.mxu0 %v2368_v50  ;;  %5475 = vmatprep.subr.bf16.mxu1 %v2448_v44  ;;  %v2493_v50 = vunpack.c.l.s8.bf16 %v1971_v55  ;;  %v1970_v44 = vld [vmem:[%s12360_s3 + $0x530] sm:$0xff] }
 0x5c9   :  { %5664 = vmatprep.subr.bf16.mxu0 %v2378_v41  ;;  %v2423_v41 = vunpack.c.l.s8.bf16 %v1937_v14  ;;  %v2492_v43 = vunpack.c.l.s8.bf16 %v1970_v44  ;;  %v2501_v61 = vunpack.c.h.s8.bf16 %v1970_v44  ;;  %v1998_v44 = vld [vmem:[%s12360_s3 + $0x610] sm:$0xff] }
 0x5cb   :  { %5476 = vmatpush1.bf16.msra.mxu1 %v2447_v56  ;;  %v2422_v56 = vunpack.c.l.s8.bf16 %v1936_v19 }
 0x5cc   :  { %5665 = vmatpush1.bf16.msra.mxu0 %v2377_v59  ;;  %5486 = vmatprep.subr.bf16.mxu1 %v2457_v48  ;;  %v2502_v59 = vunpack.c.h.s8.bf16 %v1971_v55  ;;  %v2432_v48 = vunpack.c.h.s8.bf16 %v1937_v14  ;;  %v1954_v55 = vld [vmem:[%s12360_s3 + $0x4b0] sm:$0xff] }
 0x5cd   :  { %5666 = vmatprep.subr.bf16.mxu0 %v2387_v29  ;;  %v1946_v29 = vld [vmem:[%s12360_s3 + $0x470] sm:$0xff] }
 0x5ce   :  { %5478 = vmatmul.mubr.bf16.vlgmr.msra.gmra.mrb[28].mxu1 %v10857_v47 }
 0x5cf   :  { %5487 = vmatpush1.bf16.msra.mxu1 %v2456_v31  ;;  %5518 = vmatprep.mubr.bf16.mxu1 %v10859_v40  ;;  %v2431_v31 = vunpack.c.h.s8.bf16 %v1936_v19 }
 0x5d0   :  { %5667 = vmatpush1.bf16.msra.mxu0 %v2386_v24  ;;  %5488 = vmatprep.subr.bf16.mxu1 %v2466_v46  ;;  %v2511_v24 = vunpack.c.l.s8.bf16 %v1980_v20  ;;  %v1979_v46 = vld [vmem:[%s12360_s3 + $0x578] sm:$0xff] }
 0x5d1   :  { %5668 = vmatprep.subr.bf16.mxu0 %v2396_v28  ;;  %v2441_v28 = vunpack.c.l.s8.bf16 %v1946_v29  ;;  %v2510_v33 = vunpack.c.l.s8.bf16 %v1979_v46  ;;  %v2519_v63 = vunpack.c.h.s8.bf16 %v1979_v46  ;;  %v2007_v46 = vld [vmem:[%s12360_s3 + $0x658] sm:$0xff] }
 0x5d3   :  { %5489 = vmatpush1.bf16.msra.mxu1 %v2465_v23  ;;  %v2440_v23 = vunpack.c.l.s8.bf16 %v1945_v54 }
 0x5d4   :  { %5669 = vmatpush1.bf16.msra.mxu0 %v2395_v45  ;;  %5490 = vmatprep.subr.bf16.mxu1 %v2475_v51  ;;  %v2520_v45 = vunpack.c.h.s8.bf16 %v1980_v20  ;;  %v2450_v51 = vunpack.c.h.s8.bf16 %v1946_v29  ;;  %v1963_v20 = vld [vmem:[%s12360_s3 + $0x4f8] sm:$0xff] }
 0x5d5   :  { %5670 = vmatprep.subr.bf16.mxu0 %v2405_v52  ;;  %v1955_v52 = vld [vmem:[%s12360_s3 + $0x4b8] sm:$0xff] }
 0x5d7   :  { %5491 = vmatpush1.bf16.msra.mxu1 %v2474_v35  ;;  %v2449_v35 = vunpack.c.h.s8.bf16 %v1945_v54 }
 0x5d8   :  { %5671 = vmatpush1.bf16.msra.mxu0 %v2404_v58  ;;  %5492 = vmatprep.subr.bf16.mxu1 %v2484_v30  ;;  %v2529_v58 = vunpack.c.l.s8.bf16 %v1989_v27  ;;  %v1988_v30 = vld [vmem:[%s12360_s3 + $0x5c0] sm:$0xff] }
 0x5d9   :  { %5672 = vmatprep.subr.bf16.mxu0 %v2414_v38  ;;  %v2459_v38 = vunpack.c.l.s8.bf16 %v1955_v52  ;;  %v2528_v14 = vunpack.c.l.s8.bf16 %v1988_v30  ;;  %v2537_v19 = vunpack.c.h.s8.bf16 %v1988_v30  ;;  %v2016_v30 = vld [vmem:[%s12360_s3 + $0x6a0] sm:$0xff] }
 0x5db   :  { %5493 = vmatpush1.bf16.msra.mxu1 %v2483_v53  ;;  %v2458_v53 = vunpack.c.l.s8.bf16 %v1954_v55 }
 0x5dc   :  { %5673 = vmatpush1.bf16.msra.mxu0 %v2413_v21  ;;  %5494 = vmatprep.subr.bf16.mxu1 %v2493_v50  ;;  %v2538_v21 = vunpack.c.h.s8.bf16 %v1989_v27  ;;  %v2468_v50 = vunpack.c.h.s8.bf16 %v1955_v52  ;;  %v1972_v27 = vld [vmem:[%s12360_s3 + $0x540] sm:$0xff] }
 0x5dd   :  { %5674 = vmatprep.subr.bf16.mxu0 %v2423_v41  ;;  %v1964_v41 = vld [vmem:[%s12360_s3 + $0x500] sm:$0xff] }
 0x5df   :  { %5495 = vmatpush1.bf16.msra.mxu1 %v2492_v43  ;;  %v2467_v43 = vunpack.c.h.s8.bf16 %v1954_v55 }
 0x5e0   :  { %5675 = vmatpush1.bf16.msra.mxu0 %v2422_v56  ;;  %5496 = vmatprep.subr.bf16.mxu1 %v2502_v59  ;;  %v2547_v56 = vunpack.c.l.s8.bf16 %v1998_v44  ;;  %v1997_v59 = vld [vmem:[%s12360_s3 + $0x608] sm:$0xff] }
 0x5e1   :  { %5676 = vmatprep.subr.bf16.mxu0 %v2432_v48  ;;  %v2477_v48 = vunpack.c.l.s8.bf16 %v1964_v41  ;;  %v2546_v29 = vunpack.c.l.s8.bf16 %v1997_v59  ;;  %v2555_v54 = vunpack.c.h.s8.bf16 %v1997_v59  ;;  %v2025_v59 = vld [vmem:[%s12360_s3 + $0x6e8] sm:$0xff] }
 0x5e3   :  { %5497 = vmatpush1.bf16.msra.mxu1 %v2501_v61  ;;  %v2476_v61 = vunpack.c.l.s8.bf16 %v1963_v20 }
 0x5e4   :  { %5677 = vmatpush1.bf16.msra.mxu0 %v2431_v31  ;;  %5498 = vmatprep.subr.bf16.mxu1 %v2511_v24  ;;  %v2556_v31 = vunpack.c.h.s8.bf16 %v1998_v44  ;;  %v2486_v24 = vunpack.c.h.s8.bf16 %v1964_v41  ;;  %v1981_v44 = vld [vmem:[%s12360_s3 + $0x588] sm:$0xff] }
 0x5e5   :  { %5678 = vmatprep.subr.bf16.mxu0 %v2441_v28  ;;  %v1973_v28 = vld [vmem:[%s12360_s3 + $0x548] sm:$0xff] }
 0x5e7   :  { %5499 = vmatpush1.bf16.msra.mxu1 %v2510_v33  ;;  %v2485_v33 = vunpack.c.h.s8.bf16 %v1963_v20 }
 0x5e8   :  { %5679 = vmatpush1.bf16.msra.mxu0 %v2440_v23  ;;  %5500 = vmatprep.subr.bf16.mxu1 %v2520_v45  ;;  %v2565_v23 = vunpack.c.l.s8.bf16 %v2007_v46  ;;  %v2006_v45 = vld [vmem:[%s12360_s3 + $0x650] sm:$0xff] }
 0x5e9   :  { %5680 = vmatprep.subr.bf16.mxu0 %v2450_v51  ;;  %v2495_v51 = vunpack.c.l.s8.bf16 %v1973_v28  ;;  %v2564_v52 = vunpack.c.l.s8.bf16 %v2006_v45  ;;  %v2573_v55 = vunpack.c.h.s8.bf16 %v2006_v45  ;;  %v2034_v45 = vld [vmem:[%s12360_s3 + $0x730] sm:$0xff] }
 0x5eb   :  { %5501 = vmatpush1.bf16.msra.mxu1 %v2519_v63  ;;  %v2494_v63 = vunpack.c.l.s8.bf16 %v1972_v27 }
 0x5ec   :  { %5681 = vmatpush1.bf16.msra.mxu0 %v2449_v35  ;;  %5502 = vmatprep.subr.bf16.mxu1 %v2529_v58  ;;  %v2574_v35 = vunpack.c.h.s8.bf16 %v2007_v46  ;;  %v2504_v58 = vunpack.c.h.s8.bf16 %v1973_v28  ;;  %v1990_v46 = vld [vmem:[%s12360_s3 + $0x5d0] sm:$0xff] }
 0x5ed   :  { %5691 = vmatprep.subr.bf16.mxu0 %v2459_v38  ;;  %v1982_v38 = vld [vmem:[%s12360_s3 + $0x590] sm:$0xff] }
 0x5ef   :  { %5683 = vmatmul.mubr.bf16.vlgmr.msra.gmra.mrb[40].mxu0 %v10857_v47  ;;  %5503 = vmatpush1.bf16.msra.mxu1 %v2528_v14  ;;  %v2503_v14 = vunpack.c.h.s8.bf16 %v1972_v27 }
 0x5f0   :  { %5692 = vmatpush1.bf16.msra.mxu0 %v2458_v53  ;;  %5723 = vmatprep.mubr.bf16.mxu0 %v10859_v40  ;;  %v2583_v53 = vunpack.c.l.s8.bf16 %v2016_v30 }
 0x5f1   :  { %5504 = vmatprep.subr.bf16.mxu1 %v2538_v21  ;;  %5693 = vmatprep.subr.bf16.mxu0 %v2468_v50  ;;  %v2015_v21 = vld [vmem:[%s12360_s3 + $0x698] sm:$0xff]  ;;  %v2513_v50 = vunpack.c.l.s8.bf16 %v1982_v38 }
 0x5f2   :  { %v2582_v41 = vunpack.c.l.s8.bf16 %v2015_v21  ;;  %v2591_v20 = vunpack.c.h.s8.bf16 %v2015_v21  ;;  %v2043_v21 = vld [vmem:[%s12360_s3 + $0x778] sm:$0xff] }
 0x5f3   :  { %5505 = vmatpush1.bf16.msra.mxu1 %v2537_v19  ;;  %v2512_v19 = vunpack.c.l.s8.bf16 %v1981_v44 }
 0x5f4   :  { %5694 = vmatpush1.bf16.msra.mxu0 %v2467_v43  ;;  %5506 = vmatprep.subr.bf16.mxu1 %v2547_v56  ;;  %v2592_v43 = vunpack.c.h.s8.bf16 %v2016_v30  ;;  %v2522_v56 = vunpack.c.h.s8.bf16 %v1982_v38  ;;  %v1999_v30 = vld [vmem:[%s12360_s3 + $0x618] sm:$0xff] }
 0x5f5   :  { %5695 = vmatprep.subr.bf16.mxu0 %v2477_v48  ;;  %v1991_v48 = vld [vmem:[%s12360_s3 + $0x5d8] sm:$0xff] }
 0x5f7   :  { %5507 = vmatpush1.bf16.msra.mxu1 %v2546_v29  ;;  %v2521_v29 = vunpack.c.h.s8.bf16 %v1981_v44 }
 0x5f8   :  { %5696 = vmatpush1.bf16.msra.mxu0 %v2476_v61  ;;  %5508 = vmatprep.subr.bf16.mxu1 %v2556_v31  ;;  %v2601_v61 = vunpack.c.l.s8.bf16 %v2025_v59  ;;  %v2024_v31 = vld [vmem:[%s12360_s3 + $0x6e0] sm:$0xff] }
 0x5f9   :  { %5697 = vmatprep.subr.bf16.mxu0 %v2486_v24  ;;  %v2531_v24 = vunpack.c.l.s8.bf16 %v1991_v48  ;;  %v2600_v28 = vunpack.c.l.s8.bf16 %v2024_v31  ;;  %v2609_v27 = vunpack.c.h.s8.bf16 %v2024_v31  ;;  %v11535_v31 = vld [vmem:[%s12365_s8 + $0x1] ss:$4 sm:$0xff] }
 0x5fb   :  { %5509 = vmatpush1.bf16.msra.mxu1 %v2555_v54  ;;  %v2530_v54 = vunpack.c.l.s8.bf16 %v1990_v46 }
 0x5fc   :  { %5698 = vmatpush1.bf16.msra.mxu0 %v2485_v33  ;;  %5510 = vmatprep.subr.bf16.mxu1 %v2565_v23  ;;  %v2610_v33 = vunpack.c.h.s8.bf16 %v2025_v59  ;;  %v2540_v23 = vunpack.c.h.s8.bf16 %v1991_v48  ;;  %v2008_v59 = vld [vmem:[%s12360_s3 + $0x660] sm:$0xff] }
 0x5fd   :  { %5699 = vmatprep.subr.bf16.mxu0 %v2495_v51  ;;  %v2000_v51 = vld [vmem:[%s12360_s3 + $0x620] sm:$0xff] }
 0x5ff   :  { %5511 = vmatpush1.bf16.msra.mxu1 %v2564_v52  ;;  %v2539_v52 = vunpack.c.h.s8.bf16 %v1990_v46  ;;  %v2052_v46 = vld [vmem:[%s12360_s3 + $0x7c0] sm:$0xff] }
 0x600   :  { %5700 = vmatpush1.bf16.msra.mxu0 %v2494_v63  ;;  %5512 = vmatprep.subr.bf16.mxu1 %v2574_v35  ;;  %v2619_v63 = vunpack.c.l.s8.bf16 %v2034_v45  ;;  %v2033_v35 = vld [vmem:[%s12360_s3 + $0x728] sm:$0xff] }
 0x601   :  { %5701 = vmatprep.subr.bf16.mxu0 %v2504_v58  ;;  %v2549_v58 = vunpack.c.l.s8.bf16 %v2000_v51  ;;  %v2618_v38 = vunpack.c.l.s8.bf16 %v2033_v35  ;;  %v2627_v44 = vunpack.c.h.s8.bf16 %v2033_v35  ;;  %v6086_v35 = vrot.slane %v11535_v31, %v9493_v37 }
 0x603   :  { %5513 = vmatpush1.bf16.msra.mxu1 %v2573_v55  ;;  %v2548_v55 = vunpack.c.l.s8.bf16 %v1999_v30 }
 0x604   :  { %5702 = vmatpush1.bf16.msra.mxu0 %v2503_v14  ;;  %5514 = vmatprep.subr.bf16.mxu1 %v2583_v53  ;;  %v2628_v14 = vunpack.c.h.s8.bf16 %v2034_v45  ;;  %v2558_v53 = vunpack.c.h.s8.bf16 %v2000_v51  ;;  %v6082_v45 = vrot.slane %v11535_v31, %v9491_v39  ;;  %v2575_v51 = vunpack.c.h.s8.bf16 %v2008_v59 }
 0x605   :  { %5703 = vmatprep.subr.bf16.mxu0 %v2513_v50  ;;  %v2009_v50 = vld [vmem:[%s12360_s3 + $0x668] sm:$0xff] }
 0x607   :  { %5515 = vmatpush1.bf16.msra.mxu1 %v2582_v41  ;;  %v2557_v41 = vunpack.c.h.s8.bf16 %v1999_v30  ;;  %v2017_v30 = vld [vmem:[%s12360_s3 + $0x6a8] sm:$0xff] }
 0x608   :  { %5704 = vmatpush1.bf16.msra.mxu0 %v2512_v19  ;;  %5516 = vmatprep.subr.bf16.mxu1 %v2592_v43  ;;  %v2637_v19 = vunpack.c.l.s8.bf16 %v2043_v21  ;;  %v2042_v43 = vld [vmem:[%s12360_s3 + $0x770] sm:$0xff] }
 0x609   :  { %5705 = vmatprep.subr.bf16.mxu0 %v2522_v56  ;;  %v2567_v56 = vunpack.c.l.s8.bf16 %v2009_v50  ;;  %v2636_v48 = vunpack.c.l.s8.bf16 %v2042_v43 }
 0x60b   :  { %5517 = vmatpush1.bf16.msra.mxu1 %v2591_v20  ;;  %v11530_v20 = vld [vmem:[%s12365_s8] ss:$4 sm:$0xff] }
 0x60c   :  { %5706 = vmatpush1.bf16.msra.mxu0 %v2521_v29  ;;  %5527 = vmatprep.subr.bf16.mxu1 %v2601_v61  ;;  %v2566_v29 = vunpack.c.l.s8.bf16 %v2008_v59  ;;  %v2646_v61 = vunpack.c.h.s8.bf16 %v2043_v21  ;;  %v2061_v59 = vld [vmem:[%s12360_s3 + $0x808] sm:$0xff] }
 0x60d   :  { %5707 = vmatprep.subr.bf16.mxu0 %v2531_v24  ;;  %v2576_v24 = vunpack.c.h.s8.bf16 %v2009_v50 }
 0x60e   :  { %5519 = vmatmul.mubr.bf16.vlgmr.msra.gmra.mrb[28].mxu1 %v10976_v12 }
 0x60f   :  { %5528 = vmatpush1.bf16.msra.mxu1 %v2600_v28  ;;  %5559 = vmatprep.mubr.bf16.mxu1 %v10978_v49  ;;  %v6022_v28 = vrot.slane %v11530_v20, %v9491_v39 }
 0x610   :  { %5708 = vmatpush1.bf16.msra.mxu0 %v2530_v54  ;;  %5529 = vmatprep.subr.bf16.mxu1 %v2610_v33  ;;  %v2018_v54 = vld [vmem:[%s12360_s3 + $0x6b0] sm:$0xff]  ;;  %v6026_v33 = vrot.slane %v11530_v20, %v9493_v37 }
 0x611   :  { %5709 = vmatprep.subr.bf16.mxu0 %v2540_v23  ;;  %v2645_v23 = vunpack.c.h.s8.bf16 %v2042_v43 }
 0x613   :  { %5530 = vmatpush1.bf16.msra.mxu1 %v2609_v27  ;;  %v2655_v27 = vunpack.c.l.s8.bf16 %v2052_v46 }
 0x614   :  { %5710 = vmatpush1.bf16.msra.mxu0 %v2539_v52  ;;  %5531 = vmatprep.subr.bf16.mxu1 %v2619_v63  ;;  %v2051_v52 = vld [vmem:[%s12360_s3 + $0x7b8] sm:$0xff] }
 0x615   :  { %5711 = vmatprep.subr.bf16.mxu0 %v2549_v58  ;;  %v2585_v58 = vunpack.c.l.s8.bf16 %v2018_v54  ;;  %v2654_v21 = vunpack.c.l.s8.bf16 %v2051_v52 }
 0x617   :  { %5532 = vmatpush1.bf16.msra.mxu1 %v2618_v38 }
 0x618   :  { %5712 = vmatpush1.bf16.msra.mxu0 %v2548_v55  ;;  %5533 = vmatprep.subr.bf16.mxu1 %v2628_v14 }
 0x619   :  { %5713 = vmatprep.subr.bf16.mxu0 %v2558_v53 }
 0x61b   :  { %5534 = vmatpush1.bf16.msra.mxu1 %v2627_v44 }
 0x61c   :  { %5714 = vmatpush1.bf16.msra.mxu0 %v2557_v41  ;;  %5535 = vmatprep.subr.bf16.mxu1 %v2637_v19  ;;  %v2584_v41 = vunpack.c.l.s8.bf16 %v2017_v30  ;;  %v2664_v19 = vunpack.c.h.s8.bf16 %v2052_v46  ;;  %v2060_v46 = vld [vmem:[%s12360_s3 + $0x800] sm:$0xff] }
 0x61d   :  { %5715 = vmatprep.subr.bf16.mxu0 %v2567_v56  ;;  %v2594_v56 = vunpack.c.h.s8.bf16 %v2018_v54  ;;  %v2026_v54 = vld [vmem:[%s12360_s3 + $0x6f0] sm:$0xff] }
 0x61f   :  { %5536 = vmatpush1.bf16.msra.mxu1 %v2636_v48  ;;  %v2027_v48 = vld [vmem:[%s12360_s3 + $0x6f8] sm:$0xff] }
 0x620   :  { %5716 = vmatpush1.bf16.msra.mxu0 %v2566_v29  ;;  %5537 = vmatprep.subr.bf16.mxu1 %v2646_v61  ;;  %v2663_v29 = vunpack.c.h.s8.bf16 %v2051_v52  ;;  %v2593_v61 = vunpack.c.h.s8.bf16 %v2017_v30  ;;  %v2036_v52 = vld [vmem:[%s12360_s3 + $0x740] sm:$0xff] }
 0x621   :  { %v5192_v63 = vpop.f32.mrb[24].mxu1  ;;  %5717 = vmatprep.subr.bf16.mxu0 %v2576_v24  ;;  %v2673_v24 = vunpack.c.l.s8.bf16 %v2061_v59 }
 0x622   :  { %v6064_v38 = vmul.f32 %v6022_v28, %v5192_v63  ;;  %v5194_v55 = vpop.f32.mrb[25].mxu1  ;;  %v2603_v28 = vunpack.c.l.s8.bf16 %v2027_v48  ;;  %v2681_v63 = vunpack.c.h.s8.bf16 %v2060_v46 }
 0x623   :  { %v6065_v14 = vmul.f32 %v6026_v33, %v5194_v55  ;;  %v5196_v53 = vpop.f32.mrb[26].mxu1  ;;  %5538 = vmatpush1.bf16.msra.mxu1 %v2645_v23  ;;  %v2672_v33 = vunpack.c.l.s8.bf16 %v2060_v46  ;;  %v2602_v23 = vunpack.c.l.s8.bf16 %v2026_v54 }
 0x624   :  { %v6124_v50 = vadd.f32 %v6082_v45, %v6064_v38  ;;  %5718 = vmatpush1.bf16.msra.mxu0 %v2575_v51  ;;  %v5197_v44 = vpop.f32.mrb[27].mxu1  ;;  %5539 = vmatprep.subr.bf16.mxu1 %v2655_v27  ;;  %v2682_v45 = vunpack.c.h.s8.bf16 %v2061_v59  ;;  %v2612_v51 = vunpack.c.h.s8.bf16 %v2027_v48  ;;  %v2070_v27 = vld [vmem:[%s12360_s3 + $0x850] sm:$0xff]  ;;  %v2069_v38 = vld [vmem:[%s12360_s3 + $0x848] sm:$0xff]  ;;  %v2035_v53 = vld [vmem:[%s12360_s3 + $0x738] sm:$0xff] }
 0x625   :  { %v6125_v43 = vadd.f32 %v6086_v35, %v6065_v14  ;;  %5719 = vmatprep.subr.bf16.mxu0 %v2585_v58  ;;  %v2611_v58 = vunpack.c.h.s8.bf16 %v2026_v54  ;;  %v2691_v30 = vunpack.c.l.s8.bf16 %v2070_v27  ;;  %v2621_v14 = vunpack.c.l.s8.bf16 %v2036_v52 }
 0x626   :  { %8104 = vtanh.f32 %v6124_v50  ;;  %v2620_v50 = vunpack.c.l.s8.bf16 %v2035_v53  ;;  %v2700_v44 = vunpack.c.h.s8.bf16 %v2070_v27  ;;  %v2629_v59 = vunpack.c.h.s8.bf16 %v2035_v53  ;;  %v2053_v53 = vld [vmem:[%s12360_s3 + $0x7c8] sm:$0xff] }
 0x627   :  { %8106 = vtanh.f32 %v6125_v43  ;;  %5540 = vmatpush1.bf16.msra.mxu1 %v2654_v21  ;;  %v2690_v21 = vunpack.c.l.s8.bf16 %v2069_v38  ;;  %v2045_v43 = vld [vmem:[%s12360_s3 + $0x788] sm:$0xff] }
 0x628   :  { %5720 = vmatpush1.bf16.msra.mxu0 %v2584_v41  ;;  %5541 = vmatprep.subr.bf16.mxu1 %v2664_v19  ;;  %v2630_v41 = vunpack.c.h.s8.bf16 %v2036_v52  ;;  %v2079_v19 = vld [vmem:[%s12360_s3 + $0x898] sm:$0xff]  ;;  %v6034_v52 = vrot.slane %v11530_v20, %v9497_v32 }
 0x629   :  { %5721 = vmatprep.subr.bf16.mxu0 %v2594_v56  ;;  %v2699_v56 = vunpack.c.h.s8.bf16 %v2069_v38  ;;  %v2709_v48 = vunpack.c.l.s8.bf16 %v2079_v19  ;;  %v2718_v54 = vunpack.c.h.s8.bf16 %v2079_v19  ;;  %v6090_v38 = vrot.slane %v11535_v31, %v9495_v34 }
 0x62b   :  { %5542 = vmatpush1.bf16.msra.mxu1 %v2663_v29  ;;  %v2078_v29 = vld [vmem:[%s12360_s3 + $0x890] sm:$0xff] }
 0x62c   :  { %5722 = vmatpush1.bf16.msra.mxu0 %v2593_v61  ;;  %5543 = vmatprep.subr.bf16.mxu1 %v2673_v24  ;;  %v2639_v61 = vunpack.c.l.s8.bf16 %v2045_v43  ;;  %v2044_v24 = vld [vmem:[%s12360_s3 + $0x780] sm:$0xff]  ;;  %v2708_v46 = vunpack.c.l.s8.bf16 %v2078_v29  ;;  %v2717_v27 = vunpack.c.h.s8.bf16 %v2078_v29 }
 0x62d   :  { %5732 = vmatprep.subr.bf16.mxu0 %v2603_v28  ;;  %v2638_v28 = vunpack.c.l.s8.bf16 %v2044_v24 }
 0x62f   :  { %5724 = vmatmul.mubr.bf16.vlgmr.msra.gmra.mrb[40].mxu0 %v10976_v12  ;;  %5544 = vmatpush1.bf16.msra.mxu1 %v2672_v33  ;;  %v2648_v33 = vunpack.c.h.s8.bf16 %v2045_v43 }
 0x630   :  { %v11576_v35 = vpop.eup %8104  ;;  %5733 = vmatpush1.bf16.msra.mxu0 %v2602_v23  ;;  %5764 = vmatprep.mubr.bf16.mxu0 %v10978_v49  ;;  %v2088_v23 = vld [vmem:[%s12360_s3 + $0x8e0] sm:$0xff] }
 0x631   :  { %v11582_v55 = vpop.eup %8106  ;;  %5545 = vmatprep.subr.bf16.mxu1 %v2682_v45  ;;  %5734 = vmatprep.subr.bf16.mxu0 %v2612_v51  ;;  %v2054_v45 = vld [vmem:[%s12360_s3 + $0x7d0] sm:$0xff]  ;;  %v6030_v51 = vrot.slane %v11530_v20, %v9495_v34  ;;  %v6094_v20 = vrot.slane %v11535_v31, %v9497_v32  ;;  %v2063_v31 = vld [vmem:[%s12360_s3 + $0x818] sm:$0xff] }
 0x633   :  { %5546 = vmatpush1.bf16.msra.mxu1 %v2681_v63  ;;  %v2647_v63 = vunpack.c.h.s8.bf16 %v2044_v24  ;;  %v2097_v24 = vld [vmem:[%s12360_s3 + $0x928] sm:$0xff] }
 0x634   :  { %5735 = vmatpush1.bf16.msra.mxu0 %v2611_v58  ;;  %5547 = vmatprep.subr.bf16.mxu1 %v2691_v30  ;;  %v2727_v58 = vunpack.c.l.s8.bf16 %v2088_v23  ;;  %v2087_v30 = vld [vmem:[%s12360_s3 + $0x8d8] sm:$0xff] }
 0x635   :  { %5736 = vmatprep.subr.bf16.mxu0 %v2621_v14  ;;  %v2657_v14 = vunpack.c.l.s8.bf16 %v2054_v45 }
 0x637   :  { %5548 = vmatpush1.bf16.msra.mxu1 %v2690_v21 }
 0x638   :  { %5737 = vmatpush1.bf16.msra.mxu0 %v2620_v50  ;;  %5549 = vmatprep.subr.bf16.mxu1 %v2700_v44 }
 0x639   :  { %5738 = vmatprep.subr.bf16.mxu0 %v2630_v41  ;;  %v2726_v41 = vunpack.c.l.s8.bf16 %v2087_v30 }
 0x63b   :  { %5550 = vmatpush1.bf16.msra.mxu1 %v2699_v56  ;;  %v2656_v56 = vunpack.c.l.s8.bf16 %v2053_v53 }
 0x63c   :  { %5739 = vmatpush1.bf16.msra.mxu0 %v2629_v59  ;;  %5551 = vmatprep.subr.bf16.mxu1 %v2709_v48  ;;  %v2736_v59 = vunpack.c.h.s8.bf16 %v2088_v23  ;;  %v2096_v23 = vld [vmem:[%s12360_s3 + $0x920] sm:$0xff] }
 0x63d   :  { %5740 = vmatprep.subr.bf16.mxu0 %v2639_v61  ;;  %v2666_v61 = vunpack.c.h.s8.bf16 %v2054_v45  ;;  %v2675_v45 = vunpack.c.l.s8.bf16 %v2063_v31 }
 0x63f   :  { %5552 = vmatpush1.bf16.msra.mxu1 %v2708_v46 }
 0x640   :  { %5741 = vmatpush1.bf16.msra.mxu0 %v2638_v28  ;;  %5553 = vmatprep.subr.bf16.mxu1 %v2718_v54  ;;  %v2735_v28 = vunpack.c.h.s8.bf16 %v2087_v30  ;;  %v2665_v54 = vunpack.c.h.s8.bf16 %v2053_v53  ;;  %v2106_v30 = vld [vmem:[%s12360_s3 + $0x970] sm:$0xff] }
 0x641   :  { %5742 = vmatprep.subr.bf16.mxu0 %v2648_v33  ;;  %v2745_v33 = vunpack.c.l.s8.bf16 %v2097_v24 }
 0x642   :  { %v5397_v21 = vpop.f32.mrb[36].mxu0 }
 0x643   :  { %v6066_v50 = vmul.f32 %v6030_v51, %v5397_v21  ;;  %v5399_v44 = vpop.f32.mrb[37].mxu0  ;;  %5554 = vmatpush1.bf16.msra.mxu1 %v2717_v27  ;;  %v2062_v51 = vld [vmem:[%s12360_s3 + $0x810] sm:$0xff]  ;;  %v2744_v27 = vunpack.c.l.s8.bf16 %v2096_v23  ;;  %v2763_v21 = vunpack.c.l.s8.bf16 %v2106_v30 }
 0x644   :  { %v6067_v19 = vmul.f32 %v6034_v52, %v5399_v44  ;;  %v5401_v43 = vpop.f32.mrb[38].mxu0  ;;  %5743 = vmatpush1.bf16.msra.mxu0 %v2647_v63  ;;  %5555 = vmatprep.subr.bf16.mxu1 %v2727_v58  ;;  %v2674_v52 = vunpack.c.l.s8.bf16 %v2062_v51  ;;  %v2754_v63 = vunpack.c.h.s8.bf16 %v2097_v24  ;;  %v2684_v58 = vunpack.c.h.s8.bf16 %v2063_v31 }
 0x645   :  { %v6126_v48 = vadd.f32 %v6090_v38, %v6066_v50  ;;  %v5402_v29 = vpop.f32.mrb[39].mxu0  ;;  %5744 = vmatprep.subr.bf16.mxu0 %v2657_v14  ;;  %v2072_v38 = vld [vmem:[%s12360_s3 + $0x860] sm:$0xff]  ;;  %v2753_v14 = vunpack.c.h.s8.bf16 %v2096_v23  ;;  %v2683_v53 = vunpack.c.h.s8.bf16 %v2062_v51 }
 0x646   :  { %v6127_v46 = vadd.f32 %v6094_v20, %v6067_v19  ;;  %v2105_v20 = vld [vmem:[%s12360_s3 + $0x968] sm:$0xff]  ;;  %v2693_v44 = vunpack.c.l.s8.bf16 %v2072_v38  ;;  %v2115_v29 = vld [vmem:[%s12360_s3 + $0x9b8] sm:$0xff] }
 0x647   :  { %8108 = vtanh.f32 %v6126_v48  ;;  %5556 = vmatpush1.bf16.msra.mxu1 %v2726_v41  ;;  %v2071_v41 = vld [vmem:[%s12360_s3 + $0x858] sm:$0xff]  ;;  %v2762_v43 = vunpack.c.l.s8.bf16 %v2105_v20  ;;  %v2702_v48 = vunpack.c.h.s8.bf16 %v2072_v38  ;;  %v2771_v24 = vunpack.c.h.s8.bf16 %v2105_v20 }
 0x648   :  { %8110 = vtanh.f32 %v6127_v46  ;;  %5745 = vmatpush1.bf16.msra.mxu0 %v2656_v56  ;;  %5557 = vmatprep.subr.bf16.mxu1 %v2736_v59  ;;  %v2692_v56 = vunpack.c.l.s8.bf16 %v2071_v41  ;;  %v2772_v59 = vunpack.c.h.s8.bf16 %v2106_v30  ;;  %v2701_v46 = vunpack.c.h.s8.bf16 %v2071_v41 }
 0x649   :  { %5746 = vmatprep.subr.bf16.mxu0 %v2666_v61  ;;  %v2081_v61 = vld [vmem:[%s12360_s3 + $0x8a8] sm:$0xff]  ;;  %v2781_v31 = vunpack.c.l.s8.bf16 %v2115_v29  ;;  %v2790_v51 = vunpack.c.h.s8.bf16 %v2115_v29 }
 0x64b   :  { %5558 = vmatpush1.bf16.msra.mxu1 %v2735_v28  ;;  %v2114_v28 = vld [vmem:[%s12360_s3 + $0x9b0] sm:$0xff] }
 0x64c   :  { %5747 = vmatpush1.bf16.msra.mxu0 %v2665_v54  ;;  %5568 = vmatprep.subr.bf16.mxu1 %v2745_v33  ;;  %v2711_v54 = vunpack.c.l.s8.bf16 %v2081_v61  ;;  %v2080_v33 = vld [vmem:[%s12360_s3 + $0x8a0] sm:$0xff]  ;;  %v2780_v23 = vunpack.c.l.s8.bf16 %v2114_v28 }
 0x64d   :  { %5748 = vmatprep.subr.bf16.mxu0 %v2675_v45  ;;  %v2710_v45 = vunpack.c.l.s8.bf16 %v2080_v33  ;;  %v2719_v30 = vunpack.c.h.s8.bf16 %v2080_v33 }
 0x64e   :  { %5560 = vmatmul.mubr.bf16.vlgmr.msra.gmra.mrb[28].mxu1 %v11094_v16 }
 0x64f   :  { %5569 = vmatpush1.bf16.msra.mxu1 %v2744_v27  ;;  %5600 = vmatprep.mubr.bf16.mxu1 %v11096_v17  ;;  %v2720_v27 = vunpack.c.h.s8.bf16 %v2081_v61 }
 0x650   :  { %5749 = vmatpush1.bf16.msra.mxu0 %v2674_v52  ;;  %5570 = vmatprep.subr.bf16.mxu1 %v2754_v63  ;;  %v2124_v52 = vld [vmem:[%s12360_s3 + $0xa00] sm:$0xff]  ;;  %v2090_v63 = vld [vmem:[%s12360_s3 + $0x8f0] sm:$0xff] }
 0x651   :  { %v11642_v50 = vpop.eup %8108  ;;  %5750 = vmatprep.subr.bf16.mxu0 %v2684_v58  ;;  %v2789_v58 = vunpack.c.h.s8.bf16 %v2114_v28  ;;  %v2799_v38 = vunpack.c.l.s8.bf16 %v2124_v52  ;;  %v2808_v41 = vunpack.c.h.s8.bf16 %v2124_v52 }
 0x652   :  { %v11647_v19 = vpop.eup %8110 }
 0x653   :  { %5571 = vmatpush1.bf16.msra.mxu1 %v2753_v14  ;;  %v2123_v14 = vld [vmem:[%s12360_s3 + $0x9f8] sm:$0xff] }
 0x654   :  { %5751 = vmatpush1.bf16.msra.mxu0 %v2683_v53  ;;  %5572 = vmatprep.subr.bf16.mxu1 %v2763_v21  ;;  %v2729_v53 = vunpack.c.l.s8.bf16 %v2090_v63  ;;  %v2089_v21 = vld [vmem:[%s12360_s3 + $0x8e8] sm:$0xff]  ;;  %v2798_v20 = vunpack.c.l.s8.bf16 %v2123_v14 }
 0x655   :  { %5752 = vmatprep.subr.bf16.mxu0 %v2693_v44  ;;  %v2728_v44 = vunpack.c.l.s8.bf16 %v2089_v21  ;;  %v2737_v29 = vunpack.c.h.s8.bf16 %v2089_v21 }
 0x657   :  { %5573 = vmatpush1.bf16.msra.mxu1 %v2762_v43  ;;  %v2738_v43 = vunpack.c.h.s8.bf16 %v2090_v63 }
 0x658   :  { %5753 = vmatpush1.bf16.msra.mxu0 %v2692_v56  ;;  %5574 = vmatprep.subr.bf16.mxu1 %v2772_v59  ;;  %v2133_v56 = vld [vmem:[%s12360_s3 + $0xa48] sm:$0xff]  ;;  %v2099_v59 = vld [vmem:[%s12360_s3 + $0x938] sm:$0xff] }
 0x659   :  { %5754 = vmatprep.subr.bf16.mxu0 %v2702_v48  ;;  %v2807_v48 = vunpack.c.h.s8.bf16 %v2123_v14  ;;  %v2817_v61 = vunpack.c.l.s8.bf16 %v2133_v56  ;;  %v2826_v33 = vunpack.c.h.s8.bf16 %v2133_v56 }
 0x65b   :  { %5575 = vmatpush1.bf16.msra.mxu1 %v2771_v24  ;;  %v2132_v24 = vld [vmem:[%s12360_s3 + $0xa40] sm:$0xff] }
 0x65c   :  { %5755 = vmatpush1.bf16.msra.mxu0 %v2701_v46  ;;  %5576 = vmatprep.subr.bf16.mxu1 %v2781_v31  ;;  %v2747_v46 = vunpack.c.l.s8.bf16 %v2099_v59  ;;  %v2098_v31 = vld [vmem:[%s12360_s3 + $0x930] sm:$0xff]  ;;  %v2816_v28 = vunpack.c.l.s8.bf16 %v2132_v24 }
 0x65d   :  { %5756 = vmatprep.subr.bf16.mxu0 %v2711_v54  ;;  %v2746_v54 = vunpack.c.l.s8.bf16 %v2098_v31  ;;  %v2755_v52 = vunpack.c.h.s8.bf16 %v2098_v31 }
 0x65f   :  { %5577 = vmatpush1.bf16.msra.mxu1 %v2780_v23  ;;  %v2756_v23 = vunpack.c.h.s8.bf16 %v2099_v59 }
 0x660   :  { %5757 = vmatpush1.bf16.msra.mxu0 %v2710_v45  ;;  %5578 = vmatprep.subr.bf16.mxu1 %v2790_v51  ;;  %v2142_v45 = vld [vmem:[%s12360_s3 + $0xa90] sm:$0xff]  ;;  %v2108_v51 = vld [vmem:[%s12360_s3 + $0x980] sm:$0xff] }
 0x661   :  { %5758 = vmatprep.subr.bf16.mxu0 %v2720_v27  ;;  %v2825_v27 = vunpack.c.h.s8.bf16 %v2132_v24  ;;  %v2835_v63 = vunpack.c.l.s8.bf16 %v2142_v45  ;;  %v2844_v21 = vunpack.c.h.s8.bf16 %v2142_v45 }
 0x663   :  { %5579 = vmatpush1.bf16.msra.mxu1 %v2789_v58  ;;  %v2141_v58 = vld [vmem:[%s12360_s3 + $0xa88] sm:$0xff] }
 0x664   :  { %5759 = vmatpush1.bf16.msra.mxu0 %v2719_v30  ;;  %5580 = vmatprep.subr.bf16.mxu1 %v2799_v38  ;;  %v2765_v30 = vunpack.c.l.s8.bf16 %v2108_v51  ;;  %v2107_v38 = vld [vmem:[%s12360_s3 + $0x978] sm:$0xff]  ;;  %v2834_v14 = vunpack.c.l.s8.bf16 %v2141_v58 }
 0x665   :  { %5760 = vmatprep.subr.bf16.mxu0 %v2729_v53  ;;  %v2764_v53 = vunpack.c.l.s8.bf16 %v2107_v38  ;;  %v2773_v56 = vunpack.c.h.s8.bf16 %v2107_v38 }
 0x667   :  { %5581 = vmatpush1.bf16.msra.mxu1 %v2798_v20  ;;  %v2774_v20 = vunpack.c.h.s8.bf16 %v2108_v51 }
 0x668   :  { %5761 = vmatpush1.bf16.msra.mxu0 %v2728_v44  ;;  %5582 = vmatprep.subr.bf16.mxu1 %v2808_v41  ;;  %v2151_v44 = vld [vmem:[%s12360_s3 + $0xad8] sm:$0xff]  ;;  %v2117_v41 = vld [vmem:[%s12360_s3 + $0x9c8] sm:$0xff] }
 0x669   :  { %5762 = vmatprep.subr.bf16.mxu0 %v2738_v43  ;;  %v2843_v43 = vunpack.c.h.s8.bf16 %v2141_v58  ;;  %v2853_v59 = vunpack.c.l.s8.bf16 %v2151_v44  ;;  %v2862_v31 = vunpack.c.h.s8.bf16 %v2151_v44 }
 0x66b   :  { %5583 = vmatpush1.bf16.msra.mxu1 %v2807_v48  ;;  %v2150_v48 = vld [vmem:[%s12360_s3 + $0xad0] sm:$0xff] }
 0x66c   :  { %5763 = vmatpush1.bf16.msra.mxu0 %v2737_v29  ;;  %5584 = vmatprep.subr.bf16.mxu1 %v2817_v61  ;;  %v2783_v29 = vunpack.c.l.s8.bf16 %v2117_v41  ;;  %v2116_v61 = vld [vmem:[%s12360_s3 + $0x9c0] sm:$0xff]  ;;  %v2852_v24 = vunpack.c.l.s8.bf16 %v2150_v48 }
 0x66d   :  { %5773 = vmatprep.subr.bf16.mxu0 %v2747_v46  ;;  %v2782_v46 = vunpack.c.l.s8.bf16 %v2116_v61  ;;  %v2791_v45 = vunpack.c.h.s8.bf16 %v2116_v61 }
 0x66f   :  { %5765 = vmatmul.mubr.bf16.vlgmr.msra.gmra.mrb[40].mxu0 %v11094_v16  ;;  %5585 = vmatpush1.bf16.msra.mxu1 %v2816_v28  ;;  %v2792_v28 = vunpack.c.h.s8.bf16 %v2117_v41 }
 0x670   :  { %5774 = vmatpush1.bf16.msra.mxu0 %v2746_v54  ;;  %5805 = vmatprep.mubr.bf16.mxu0 %v11096_v17  ;;  %v2160_v54 = vld [vmem:[%s12360_s3 + $0xb20] sm:$0xff] }
 0x671   :  { %5586 = vmatprep.subr.bf16.mxu1 %v2826_v33  ;;  %5775 = vmatprep.subr.bf16.mxu0 %v2756_v23  ;;  %v2126_v33 = vld [vmem:[%s12360_s3 + $0xa10] sm:$0xff]  ;;  %v2861_v23 = vunpack.c.h.s8.bf16 %v2150_v48  ;;  %v2871_v51 = vunpack.c.l.s8.bf16 %v2160_v54  ;;  %v2880_v38 = vunpack.c.h.s8.bf16 %v2160_v54 }
 0x673   :  { %5587 = vmatpush1.bf16.msra.mxu1 %v2825_v27  ;;  %v2159_v27 = vld [vmem:[%s12360_s3 + $0xb18] sm:$0xff] }
 0x674   :  { %5776 = vmatpush1.bf16.msra.mxu0 %v2755_v52  ;;  %5588 = vmatprep.subr.bf16.mxu1 %v2835_v63  ;;  %v2801_v52 = vunpack.c.l.s8.bf16 %v2126_v33  ;;  %v2125_v63 = vld [vmem:[%s12360_s3 + $0xa08] sm:$0xff]  ;;  %v2870_v58 = vunpack.c.l.s8.bf16 %v2159_v27 }
 0x675   :  { %5777 = vmatprep.subr.bf16.mxu0 %v2765_v30  ;;  %v2800_v30 = vunpack.c.l.s8.bf16 %v2125_v63  ;;  %v2809_v44 = vunpack.c.h.s8.bf16 %v2125_v63 }
 0x677   :  { %5589 = vmatpush1.bf16.msra.mxu1 %v2834_v14  ;;  %v2810_v14 = vunpack.c.h.s8.bf16 %v2126_v33 }
 0x678   :  { %5778 = vmatpush1.bf16.msra.mxu0 %v2764_v53  ;;  %5590 = vmatprep.subr.bf16.mxu1 %v2844_v21  ;;  %v1920_v53 = vld [vmem:[%s12360_s3 + $0x3a0] sm:$0xff]  ;;  %v2135_v21 = vld [vmem:[%s12360_s3 + $0xa58] sm:$0xff] }
 0x679   :  { %5779 = vmatprep.subr.bf16.mxu0 %v2774_v20  ;;  %v2879_v20 = vunpack.c.h.s8.bf16 %v2159_v27  ;;  %v2388_v41 = vunpack.c.l.s8.bf16 %v1920_v53  ;;  %v2397_v61 = vunpack.c.h.s8.bf16 %v1920_v53 }
 0x67b   :  { %5591 = vmatpush1.bf16.msra.mxu1 %v2843_v43  ;;  %v1884_v43 = vld [vmem:[%s12360_s3 + $0x280] sm:$0xff] }
 0x67c   :  { %5780 = vmatpush1.bf16.msra.mxu0 %v2773_v56  ;;  %5592 = vmatprep.subr.bf16.mxu1 %v2853_v59  ;;  %v2819_v56 = vunpack.c.l.s8.bf16 %v2135_v21  ;;  %v2134_v59 = vld [vmem:[%s12360_s3 + $0xa50] sm:$0xff]  ;;  %v2316_v48 = vunpack.c.l.s8.bf16 %v1884_v43 }
 0x67d   :  { %5781 = vmatprep.subr.bf16.mxu0 %v2783_v29  ;;  %v2818_v29 = vunpack.c.l.s8.bf16 %v2134_v59  ;;  %v2827_v54 = vunpack.c.h.s8.bf16 %v2134_v59 }
 0x67f   :  { %5593 = vmatpush1.bf16.msra.mxu1 %v2852_v24  ;;  %v2828_v24 = vunpack.c.h.s8.bf16 %v2135_v21  ;;  %v1902_v21 = vld [vmem:[%s12360_s3 + $0x310] sm:$0xff] }
 0x680   :  { %5782 = vmatpush1.bf16.msra.mxu0 %v2782_v46  ;;  %5594 = vmatprep.subr.bf16.mxu1 %v2862_v31  ;;  %v1929_v46 = vld [vmem:[%s12360_s3 + $0x3e8] sm:$0xff]  ;;  %v2144_v31 = vld [vmem:[%s12360_s3 + $0xaa0] sm:$0xff] }
 0x681   :  { %5783 = vmatprep.subr.bf16.mxu0 %v2792_v28  ;;  %v2325_v28 = vunpack.c.h.s8.bf16 %v1884_v43  ;;  %v2406_v33 = vunpack.c.l.s8.bf16 %v1929_v46  ;;  %v2846_v63 = vunpack.c.h.s8.bf16 %v2144_v31 }
 0x683   :  { %5595 = vmatpush1.bf16.msra.mxu1 %v2861_v23  ;;  %v1893_v23 = vld [vmem:[%s12360_s3 + $0x2c8] sm:$0xff] }
 0x684   :  { %5784 = vmatpush1.bf16.msra.mxu0 %v2791_v45  ;;  %5596 = vmatprep.subr.bf16.mxu1 %v2871_v51  ;;  %v2837_v45 = vunpack.c.l.s8.bf16 %v2144_v31  ;;  %v2143_v51 = vld [vmem:[%s12360_s3 + $0xa98] sm:$0xff]  ;;  %v2334_v27 = vunpack.c.l.s8.bf16 %v1893_v23 }
 0x685   :  { %5785 = vmatprep.subr.bf16.mxu0 %v2801_v52  ;;  %v2415_v52 = vunpack.c.h.s8.bf16 %v1929_v46  ;;  %v1911_v31 = vld [vmem:[%s12360_s3 + $0x358] sm:$0xff] }
 0x687   :  { %5597 = vmatpush1.bf16.msra.mxu1 %v2870_v58  ;;  %v1938_v58 = vld [vmem:[%s12360_s3 + $0x430] sm:$0xff] }
 0x688   :  { %5786 = vmatpush1.bf16.msra.mxu0 %v2800_v30  ;;  %5598 = vmatprep.subr.bf16.mxu1 %v2880_v38  ;;  %v2153_v30 = vld [vmem:[%s12360_s3 + $0xae8] sm:$0xff]  ;;  %v2343_v38 = vunpack.c.h.s8.bf16 %v1893_v23  ;;  %v2424_v53 = vunpack.c.l.s8.bf16 %v1938_v58 }
 0x689   :  { %5787 = vmatprep.subr.bf16.mxu0 %v2810_v14  ;;  %v2845_v14 = vunpack.c.h.s8.bf16 %v2143_v51  ;;  %v2864_v59 = vunpack.c.h.s8.bf16 %v2153_v30 }
 0x68b   :  { %5599 = vmatpush1.bf16.msra.mxu1 %v2879_v20  ;;  %v2855_v20 = vunpack.c.l.s8.bf16 %v2153_v30  ;;  %v2028_v30 = vld [vmem:[%s12360_s3 + $0x700] sm:$0xff] }
 0x68c   :  { %5788 = vmatpush1.bf16.msra.mxu0 %v2809_v44  ;;  %7639 = vmatprep.subr.bf16.mxu1 %v2388_v41  ;;  %v2152_v44 = vld [vmem:[%s12360_s3 + $0xae0] sm:$0xff]  ;;  %v2352_v41 = vunpack.c.l.s8.bf16 %v1902_v21 }
 0x68d   :  { %5789 = vmatprep.subr.bf16.mxu0 %v2819_v56  ;;  %v2854_v43 = vunpack.c.l.s8.bf16 %v2152_v44  ;;  %v2433_v56 = vunpack.c.h.s8.bf16 %v1938_v58 }
 0x68e   :  { %5601 = vmatmul.mubr.bf16.vlgmr.msra.gmra.mrb[28].mxu1 %v11199_v57 }
 0x68f   :  { %7640 = vmatpush3.bf16.msra.mxu1 %v2316_v48  ;;  %5886 = vmatprep.mubr.bf16.mxu1 %v10749_v36  ;;  %v2836_v36 = vunpack.c.l.s8.bf16 %v2143_v51  ;;  %v1947_v48 = vld [vmem:[%s12360_s3 + $0x478] sm:$0xff] }
 0x690   :  { %5790 = vmatpush1.bf16.msra.mxu0 %v2818_v29  ;;  %7641 = vmatprep.subr.bf16.mxu1 %v2397_v61  ;;  %v2162_v29 = vld [vmem:[%s12360_s3 + $0xb30] sm:$0xff]  ;;  %v2361_v61 = vunpack.c.h.s8.bf16 %v1902_v21  ;;  %v2442_v46 = vunpack.c.l.s8.bf16 %v1947_v48 }
 0x691   :  { %5791 = vmatprep.subr.bf16.mxu0 %v2828_v24  ;;  %v2863_v24 = vunpack.c.h.s8.bf16 %v2152_v44  ;;  %v2882_v51 = vunpack.c.h.s8.bf16 %v2162_v29  ;;  %v2073_v44 = vld [vmem:[%s12360_s3 + $0x868] sm:$0xff] }
 0x693   :  { %7642 = vmatpush3.bf16.msra.mxu1 %v2325_v28  ;;  %v2873_v28 = vunpack.c.l.s8.bf16 %v2162_v29  ;;  %v2037_v29 = vld [vmem:[%s12360_s3 + $0x748] sm:$0xff] }
 0x694   :  { %5792 = vmatpush1.bf16.msra.mxu0 %v2827_v54  ;;  %7643 = vmatprep.subr.bf16.mxu1 %v2406_v33  ;;  %v2161_v54 = vld [vmem:[%s12360_s3 + $0xb28] sm:$0xff]  ;;  %v2370_v33 = vunpack.c.l.s8.bf16 %v1911_v31 }
 0x695   :  { %5793 = vmatprep.subr.bf16.mxu0 %v2837_v45  ;;  %v2872_v23 = vunpack.c.l.s8.bf16 %v2161_v54  ;;  %v2451_v45 = vunpack.c.h.s8.bf16 %v1947_v48  ;;  %v2694_v48 = vunpack.c.l.s8.bf16 %v2073_v44 }
 0x697   :  { %7644 = vmatpush3.bf16.msra.mxu1 %v2334_v27  ;;  %v2064_v27 = vld [vmem:[%s12360_s3 + $0x820] sm:$0xff] }
 0x698   :  { %5794 = vmatpush1.bf16.msra.mxu0 %v2836_v36  ;;  %7645 = vmatprep.subr.bf16.mxu1 %v2415_v52  ;;  %v1848_v36 = vld [vmem:[%s12360_s3 + $0x160] sm:$0xff]  ;;  %v2379_v52 = vunpack.c.h.s8.bf16 %v1911_v31  ;;  %v2676_v58 = vunpack.c.l.s8.bf16 %v2064_v27 }
 0x699   :  { %5795 = vmatprep.subr.bf16.mxu0 %v2846_v63  ;;  %v2881_v63 = vunpack.c.h.s8.bf16 %v2161_v54  ;;  %v2631_v54 = vunpack.c.h.s8.bf16 %v2037_v29 }
 0x69b   :  { %7646 = vmatpush3.bf16.msra.mxu1 %v2343_v38  ;;  %v2244_v38 = vunpack.c.l.s8.bf16 %v1848_v36 }
 0x69c   :  { %5796 = vmatpush1.bf16.msra.mxu0 %v2845_v14  ;;  %7647 = vmatprep.subr.bf16.mxu1 %v2424_v53  ;;  %v1812_v14 = vld [vmem:[%s12360_s3 + $0x40] sm:$0xff]  ;;  %v2604_v53 = vunpack.c.l.s8.bf16 %v2028_v30 }
 0x69d   :  { %5797 = vmatprep.subr.bf16.mxu0 %v2855_v20  ;;  %v2172_v21 = vunpack.c.l.s8.bf16 %v1812_v14  ;;  %v2253_v20 = vunpack.c.h.s8.bf16 %v1848_v36 }
 0x69f   :  { %7648 = vmatpush3.bf16.msra.mxu1 %v2352_v41  ;;  %v2685_v41 = vunpack.c.h.s8.bf16 %v2064_v27  ;;  %v1830_v27 = vld [vmem:[%s12360_s3 + $0xd0] sm:$0xff] }
 0x6a0   :  { %5798 = vmatpush1.bf16.msra.mxu0 %v2854_v43  ;;  %7649 = vmatprep.subr.bf16.mxu1 %v2433_v56  ;;  %v1857_v43 = vld [vmem:[%s12360_s3 + $0x1a8] sm:$0xff]  ;;  %v2613_v56 = vunpack.c.h.s8.bf16 %v2028_v30  ;;  %v2091_v30 = vld [vmem:[%s12360_s3 + $0x8f8] sm:$0xff] }
 0x6a1   :  { %5799 = vmatprep.subr.bf16.mxu0 %v2864_v59  ;;  %v2181_v59 = vunpack.c.h.s8.bf16 %v1812_v14  ;;  %v2271_v31 = vunpack.c.h.s8.bf16 %v1857_v43 }
 0x6a3   :  { %7650 = vmatpush3.bf16.msra.mxu1 %v2361_v61  ;;  %v1821_v61 = vld [vmem:[%s12360_s3 + $0x88] sm:$0xff] }
 0x6a4   :  { %5800 = vmatpush1.bf16.msra.mxu0 %v2863_v24  ;;  %7651 = vmatprep.subr.bf16.mxu1 %v2442_v46  ;;  %v2622_v24 = vunpack.c.l.s8.bf16 %v2037_v29  ;;  %v2703_v46 = vunpack.c.h.s8.bf16 %v2073_v44  ;;  %v1992_v29 = vld [vmem:[%s12360_s3 + $0x5e0] sm:$0xff] }
 0x6a5   :  { %5801 = vmatprep.subr.bf16.mxu0 %v2873_v28  ;;  %v2082_v28 = vld [vmem:[%s12360_s3 + $0x8b0] sm:$0xff] }
 0x6a7   :  { %7652 = vmatpush3.bf16.msra.mxu1 %v2370_v33  ;;  %v2199_v33 = vunpack.c.h.s8.bf16 %v1821_v61 }
 0x6a8   :  { %5802 = vmatpush1.bf16.msra.mxu0 %v2872_v23  ;;  %7653 = vmatprep.subr.bf16.mxu1 %v2451_v45  ;;  %v2712_v23 = vunpack.c.l.s8.bf16 %v2082_v28  ;;  %v2046_v45 = vld [vmem:[%s12360_s3 + $0x790] sm:$0xff] }
 0x6a9   :  { %5803 = vmatprep.subr.bf16.mxu0 %v2882_v51  ;;  %v2640_v36 = vunpack.c.l.s8.bf16 %v2046_v45  ;;  %v2649_v14 = vunpack.c.h.s8.bf16 %v2046_v45  ;;  %v2010_v45 = vld [vmem:[%s12360_s3 + $0x670] sm:$0xff] }
 0x6ab   :  { %7654 = vmatpush3.bf16.msra.mxu1 %v2379_v52  ;;  %v2208_v52 = vunpack.c.l.s8.bf16 %v1830_v27 }
 0x6ac   :  { %5804 = vmatpush1.bf16.msra.mxu0 %v2881_v63  ;;  %7683 = vmatprep.subr.bf16.mxu1 %v2676_v58  ;;  %v2721_v63 = vunpack.c.h.s8.bf16 %v2082_v28  ;;  %v2001_v28 = vld [vmem:[%s12360_s3 + $0x628] sm:$0xff] }
 0x6ad   :  { %7617 = vmatprep.subr.bf16.mxu0 %v2244_v38  ;;  %v1875_v38 = vld [vmem:[%s12360_s3 + $0x238] sm:$0xff] }
 0x6ae   :  { %5887 = vmatmul.mubr.bf16.vlgmr.msra.gmra.mrb[40].mxu1 %v10857_v47  ;;  %v2262_v47 = vunpack.c.l.s8.bf16 %v1857_v43  ;;  %v2298_v44 = vunpack.c.l.s8.bf16 %v1875_v38 }
 0x6af   :  { %5806 = vmatmul.mubr.bf16.vlgmr.msra.gmra.mrb[40].mxu0 %v11199_v57  ;;  %7684 = vmatpush3.bf16.msra.mxu1 %v2604_v53  ;;  %v2217_v53 = vunpack.c.h.s8.bf16 %v1830_v27 }
 0x6b0   :  { %7618 = vmatpush3.bf16.msra.mxu0 %v2172_v21  ;;  %5846 = vmatprep.mubr.bf16.mxu0 %v10644_v18  ;;  %v2190_v18 = vunpack.c.l.s8.bf16 %v1821_v61  ;;  %v2730_v21 = vunpack.c.l.s8.bf16 %v2091_v30 }
 0x6b1   :  { %5966 = vmatprep.mubr.bf16.mxu1 %v10978_v49  ;;  %7619 = vmatprep.subr.bf16.mxu0 %v2253_v20  ;;  %v1866_v49 = vld [vmem:[%s12360_s3 + $0x1f0] sm:$0xff]  ;;  %v2055_v20 = vld [vmem:[%s12360_s3 + $0x7d8] sm:$0xff] }
 0x6b2   :  { %7685 = vmatprep.subr.bf16.mxu1 %v2685_v41  ;;  %v2280_v51 = vunpack.c.l.s8.bf16 %v1866_v49  ;;  %v2289_v58 = vunpack.c.h.s8.bf16 %v1866_v49  ;;  %v1839_v41 = vld [vmem:[%s12360_s3 + $0x118] sm:$0xff]  ;;  %v2658_v43 = vunpack.c.l.s8.bf16 %v2055_v20 }
 0x6b3   :  { %7686 = vmatpush3.bf16.msra.mxu1 %v2613_v56  ;;  %v2226_v56 = vunpack.c.l.s8.bf16 %v1839_v41  ;;  %v2235_v61 = vunpack.c.h.s8.bf16 %v1839_v41 }
 0x6b4   :  { %7620 = vmatpush3.bf16.msra.mxu0 %v2181_v59  ;;  %7687 = vmatprep.subr.bf16.mxu1 %v2694_v48  ;;  %v2739_v59 = vunpack.c.h.s8.bf16 %v2091_v30  ;;  %v2307_v48 = vunpack.c.h.s8.bf16 %v1875_v38  ;;  %v1983_v30 = vld [vmem:[%s12360_s3 + $0x598] sm:$0xff] }
 0x6b5   :  { %7621 = vmatprep.subr.bf16.mxu0 %v2262_v47  ;;  %v2667_v47 = vunpack.c.h.s8.bf16 %v2055_v20  ;;  %v2514_v38 = vunpack.c.l.s8.bf16 %v1983_v30 }
 0x6b7   :  { %7688 = vmatpush3.bf16.msra.mxu1 %v2622_v24  ;;  %v2532_v24 = vunpack.c.l.s8.bf16 %v1992_v29 }
 0x6b8   :  { %7622 = vmatpush3.bf16.msra.mxu0 %v2190_v18  ;;  %7689 = vmatprep.subr.bf16.mxu1 %v2703_v46  ;;  %v1956_v18 = vld [vmem:[%s12360_s3 + $0x4c0] sm:$0xff] }
 0x6b9   :  { %7623 = vmatprep.subr.bf16.mxu0 %v2271_v31  ;;  %v2460_v46 = vunpack.c.l.s8.bf16 %v1956_v18  ;;  %v2541_v31 = vunpack.c.h.s8.bf16 %v1992_v29  ;;  %v2469_v49 = vunpack.c.h.s8.bf16 %v1956_v18  ;;  %v2109_v29 = vld [vmem:[%s12360_s3 + $0x988] sm:$0xff] }
 0x6bb   :  { %7690 = vmatpush3.bf16.msra.mxu1 %v2631_v54  ;;  %v2550_v54 = vunpack.c.l.s8.bf16 %v2001_v28 }
 0x6bc   :  { %7624 = vmatpush3.bf16.msra.mxu0 %v2199_v33  ;;  %7691 = vmatprep.subr.bf16.mxu1 %v2712_v23  ;;  %v1965_v33 = vld [vmem:[%s12360_s3 + $0x508] sm:$0xff] }
 0x6bd   :  { %7625 = vmatprep.subr.bf16.mxu0 %v2280_v51  ;;  %v2478_v23 = vunpack.c.l.s8.bf16 %v1965_v33  ;;  %v2568_v51 = vunpack.c.l.s8.bf16 %v2010_v45 }
 0x6bf   :  { %7692 = vmatpush3.bf16.msra.mxu1 %v2640_v36  ;;  %v2577_v36 = vunpack.c.h.s8.bf16 %v2010_v45 }
 0x6c0   :  { %7626 = vmatpush3.bf16.msra.mxu0 %v2208_v52  ;;  %7693 = vmatprep.subr.bf16.mxu1 %v2721_v63  ;;  %v2019_v52 = vld [vmem:[%s12360_s3 + $0x6b8] sm:$0xff] }
 0x6c1   :  { %7627 = vmatprep.subr.bf16.mxu0 %v2289_v58  ;;  %v2586_v58 = vunpack.c.l.s8.bf16 %v2019_v52 }
 0x6c3   :  { %7694 = vmatpush3.bf16.msra.mxu1 %v2649_v14  ;;  %v2595_v14 = vunpack.c.h.s8.bf16 %v2019_v52 }
 0x6c4   :  { %7628 = vmatpush3.bf16.msra.mxu0 %v2217_v53  ;;  %7695 = vmatprep.subr.bf16.mxu1 %v2730_v21  ;;  %v2136_v53 = vld [vmem:[%s12360_s3 + $0xa60] sm:$0xff]  ;;  %v2523_v21 = vunpack.c.h.s8.bf16 %v1983_v30 }
 0x6c5   :  { %7629 = vmatprep.subr.bf16.mxu0 %v2298_v44  ;;  %v2820_v20 = vunpack.c.l.s8.bf16 %v2136_v53  ;;  %v2100_v44 = vld [vmem:[%s12360_s3 + $0x940] sm:$0xff] }
 0x6c6   :  { %v2748_v41 = vunpack.c.l.s8.bf16 %v2100_v44 }
 0x6c7   :  { %7696 = vmatpush3.bf16.msra.mxu1 %v2658_v43  ;;  %v2829_v43 = vunpack.c.h.s8.bf16 %v2136_v53 }
 0x6c8   :  { %7630 = vmatpush3.bf16.msra.mxu0 %v2226_v56  ;;  %7697 = vmatprep.subr.bf16.mxu1 %v2739_v59  ;;  %v2145_v56 = vld [vmem:[%s12360_s3 + $0xaa8] sm:$0xff]  ;;  %v2757_v59 = vunpack.c.h.s8.bf16 %v2100_v44 }
 0x6c9   :  { %7631 = vmatprep.subr.bf16.mxu0 %v2307_v48  ;;  %v2838_v48 = vunpack.c.l.s8.bf16 %v2145_v56 }
 0x6cb   :  { %7698 = vmatpush3.bf16.msra.mxu1 %v2667_v47  ;;  %v2766_v47 = vunpack.c.l.s8.bf16 %v2109_v29 }
 0x6cc   :  { %7632 = vmatpush3.bf16.msra.mxu0 %v2235_v61  ;;  %v2847_v61 = vunpack.c.h.s8.bf16 %v2145_v56 }
 0x6cd   :  { %7661 = vmatprep.subr.bf16.mxu0 %v2532_v24  ;;  %v2154_v24 = vld [vmem:[%s12360_s3 + $0xaf0] sm:$0xff] }
 0x6ce   :  { %5967 = vmatmul.mubr.bf16.vlgmr.msra.gmra.mrb[44].mxu1 %v11094_v16  ;;  %v2559_v16 = vunpack.c.h.s8.bf16 %v2001_v28  ;;  %v2856_v18 = vunpack.c.l.s8.bf16 %v2154_v24  ;;  %v2163_v28 = vld [vmem:[%s12360_s3 + $0xb38] sm:$0xff] }
 0x6cf   :  { %5847 = vmatmul.mubr.bf16.vlgmr.msra.gmra.mrb[56].mxu0 %v10747_v26  ;;  %v2487_v26 = vunpack.c.h.s8.bf16 %v1965_v33  ;;  %v2127_v33 = vld [vmem:[%s12360_s3 + $0xa18] sm:$0xff] }
 0x6d0   :  { %7662 = vmatpush3.bf16.msra.mxu0 %v2460_v46  ;;  %5926 = vmatprep.mubr.bf16.mxu0 %v10859_v40  ;;  %v1974_v40 = vld [vmem:[%s12360_s3 + $0x550] sm:$0xff]  ;;  %v2811_v45 = vunpack.c.h.s8.bf16 %v2127_v33 }
 0x6d1   :  { %7663 = vmatprep.subr.bf16.mxu0 %v2541_v31  ;;  %v2496_v27 = vunpack.c.l.s8.bf16 %v1974_v40  ;;  %v2505_v63 = vunpack.c.h.s8.bf16 %v1974_v40  ;;  %v2865_v31 = vunpack.c.h.s8.bf16 %v2154_v24 }
 0x6d4   :  { %7664 = vmatpush3.bf16.msra.mxu0 %v2469_v49 }
 0x6d5   :  { %7665 = vmatprep.subr.bf16.mxu0 %v2550_v54  ;;  %v2874_v54 = vunpack.c.l.s8.bf16 %v2163_v28 }
 0x6d8   :  { %7666 = vmatpush3.bf16.msra.mxu0 %v2478_v23  ;;  %v2802_v23 = vunpack.c.l.s8.bf16 %v2127_v33 }
 0x6d9   :  { %7667 = vmatprep.subr.bf16.mxu0 %v2559_v16  ;;  %v2883_v16 = vunpack.c.h.s8.bf16 %v2163_v28 }
 0x6dc   :  { %7668 = vmatpush3.bf16.msra.mxu0 %v2487_v26  ;;  %v8123_v26 = vld [vmem:[%s12365_s8] ss:$4 sm:$0xff] }
 0x6dd   :  { %7669 = vmatprep.subr.bf16.mxu0 %v2568_v51  ;;  %v6038_v51 = vrot.slane %v8123_v26, %v9520_v25  ;;  %v6042_v40 = vrot.slane %v8123_v26, %v9522_v22 }
 0x6e0   :  { %7670 = vmatpush3.bf16.msra.mxu0 %v2496_v27  ;;  %v8124_v27 = vld [vmem:[%s12365_s8 + $0x1] ss:$4 sm:$0xff] }
 0x6e1   :  { %7671 = vmatprep.subr.bf16.mxu0 %v2577_v36  ;;  %v6098_v36 = vrot.slane %v8124_v27, %v9520_v25  ;;  %v6050_v25 = vrot.slane %v8123_v26, %v9472_v42 }
 0x6e4   :  { %7672 = vmatpush3.bf16.msra.mxu0 %v2505_v63  ;;  %v6102_v63 = vrot.slane %v8124_v27, %v9522_v22 }
 0x6e5   :  { %7673 = vmatprep.subr.bf16.mxu0 %v2586_v58 }
 0x6e8   :  { %7674 = vmatpush3.bf16.msra.mxu0 %v2514_v38 }
 0x6e9   :  { %7675 = vmatprep.subr.bf16.mxu0 %v2595_v14 }
 0x6ec   :  { %7676 = vmatpush3.bf16.msra.mxu0 %v2523_v21 }
 0x6ed   :  { %7705 = vmatprep.subr.bf16.mxu0 %v2820_v20 }
 0x6ef   :  { %5927 = vmatmul.mubr.bf16.vlgmr.msra.gmra.mrb[60].mxu0 %v10976_v12  ;;  %v2775_v12 = vunpack.c.h.s8.bf16 %v2109_v29 }
 0x6f0   :  { %7706 = vmatpush3.bf16.msra.mxu0 %v2748_v41  ;;  %6006 = vmatprep.mubr.bf16.mxu0 %v11096_v17  ;;  %v2118_v17 = vld [vmem:[%s12360_s3 + $0x9d0] sm:$0xff]  ;;  %v6046_v41 = vrot.slane %v8123_v26, %v9470_v60 }
 0x6f1   :  { %7707 = vmatprep.subr.bf16.mxu0 %v2829_v43  ;;  %v2784_v46 = vunpack.c.l.s8.bf16 %v2118_v17  ;;  %v2793_v49 = vunpack.c.h.s8.bf16 %v2118_v17  ;;  %v6106_v43 = vrot.slane %v8124_v27, %v9470_v60 }
 0x6f4   :  { %7708 = vmatpush3.bf16.msra.mxu0 %v2757_v59  ;;  %v6110_v59 = vrot.slane %v8124_v27, %v9472_v42 }
 0x6f5   :  { %7709 = vmatprep.subr.bf16.mxu0 %v2838_v48 }
 0x6f8   :  { %7710 = vmatpush3.bf16.msra.mxu0 %v2766_v47 }
 0x6f9   :  { %7711 = vmatprep.subr.bf16.mxu0 %v2847_v61 }
 0x6fc   :  { %7712 = vmatpush3.bf16.msra.mxu0 %v2775_v12 }
 0x6fd   :  { %7713 = vmatprep.subr.bf16.mxu0 %v2856_v18 }
 0x700   :  { %7714 = vmatpush3.bf16.msra.mxu0 %v2784_v46 }
 0x701   :  { %7715 = vmatprep.subr.bf16.mxu0 %v2865_v31 }
 0x704   :  { %7716 = vmatpush3.bf16.msra.mxu0 %v2793_v49 }
 0x705   :  { %7717 = vmatprep.subr.bf16.mxu0 %v2874_v54 }
 0x708   :  { %7718 = vmatpush3.bf16.msra.mxu0 %v2802_v23 }
 0x709   :  { %7719 = vmatprep.subr.bf16.mxu0 %v2883_v16 }
 0x70c   :  { %7720 = vmatpush3.bf16.msra.mxu0 %v2811_v45 }
 0x70f   :  { %6007 = vmatmul.mubr.bf16.vlgmr.msra.gmra.mrb[64].mxu0 %v11199_v57 }
 0x761   :  { %v5602_v52 = vpop.f32.mrb[28].mxu1 }
 0x762   :  { %v6068_v58 = vmul.f32 %v6038_v51, %v5602_v52  ;;  %v5604_v30 = vpop.f32.mrb[29].mxu1 }
 0x763   :  { %v6069_v57 = vmul.f32 %v6042_v40, %v5604_v30  ;;  %v5606_v38 = vpop.f32.mrb[30].mxu1 }
 0x764   :  { %v6128_v14 = vadd.f32 %v6098_v36, %v6068_v58  ;;  %v5607_v53 = vpop.f32.mrb[31].mxu1 }
 0x765   :  { %v6129_v21 = vadd.f32 %v6102_v63, %v6069_v57 }
 0x766   :  { %8112 = vtanh.f32 %v6128_v14 }
 0x767   :  { %8114 = vtanh.f32 %v6129_v21  ;;  %v7482_v21 = vld [vmem:[%s12365_s8 + $0x20] ss:$4 sm:$0x1] }
 0x770   :  { %v11889_v20 = vpop.eup %8112 }
 0x771   :  { %v11891_v44 = vpop.eup %8114 }
 0x781   :  { %v7655_v22 = vpop.f32.mrb[40].mxu1 }
 0x782   :  { %v5807_v56 = vpop.f32.mrb[40].mxu0  ;;  %v7656_v48 = vpop.f32.mrb[41].mxu1 }
 0x783   :  { %v6070_v29 = vmul.f32 %v6046_v41, %v5807_v56  ;;  %v5809_v47 = vpop.f32.mrb[41].mxu0  ;;  %v7657_v61 = vadd.f32 %v7656_v48, %v7655_v22  ;;  %v7658_v24 = vpop.f32.mrb[42].mxu1 }
 0x784   :  { %v6071_v12 = vmul.f32 %v6050_v25, %v5809_v47  ;;  %v5811_v18 = vpop.f32.mrb[42].mxu0  ;;  %v7659_v17 = vpop.f32.mrb[43].mxu1 }
 0x785   :  { %v6130_v46 = vadd.f32 %v6106_v43, %v6070_v29  ;;  %v5812_v31 = vpop.f32.mrb[43].mxu0  ;;  %v7484_v43 = vld [vmem:[%s12365_s8 + $0x21] ss:$4 sm:$0x1]  ;;  %v6285_v18 = vunpack.c.l.s8.bf16 %v8256_v3  ;;  %v6282_v17 = vunpack.c.l.s8.bf16 %v8241_v0 }
 0x786   :  { %v6131_v28 = vadd.f32 %v6110_v59, %v6071_v12  ;;  %v6114_v29 = vrot.slane %v7484_v43, %v9491_v39  ;;  %v6283_v12 = vunpack.c.l.s8.bf16 %v8246_v1 }
 0x787   :  { %8116 = vtanh.f32 %v6130_v46  ;;  %v6284_v46 = vunpack.c.l.s8.bf16 %v8251_v2 }
 0x788   :  { %8118 = vtanh.f32 %v6131_v28 }
 0x791   :  { %v11897_v49 = vpop.eup %8116 }
 0x792   :  { %v11899_v60 = vpop.eup %8118 }
 0x7a1   :  { %v7699_v54 = vpop.f32.mrb[44].mxu1 }
 0x7a2   :  { %v7633_v33 = vpop.f32.mrb[56].mxu0  ;;  %v7700_v42 = vpop.f32.mrb[45].mxu1 }
 0x7a3   :  { %v7634_v23 = vpop.f32.mrb[57].mxu0  ;;  %v7701_v16 = vadd.f32 %v7700_v42, %v7699_v54  ;;  %v7702_v45 = vpop.f32.mrb[46].mxu1 }
 0x7a4   :  { %v7635_v26 = vadd.f32 %v7634_v23, %v7633_v33  ;;  %v7636_v51 = vpop.f32.mrb[58].mxu0  ;;  %v7703_v40 = vpop.f32.mrb[47].mxu1 }
 0x7a5   :  { %v7637_v27 = vpop.f32.mrb[59].mxu0 }
 0x7a6   :  { %v5849_v36 = vadd.f32 %v7635_v26, %v11089_v62  ;;  %v6054_v62 = vrot.slane %v7482_v21, %v9491_v39 }
 0x7a8   :  { %v5889_v52 = vadd.f32 %v7657_v61, %v5849_v36 }
 0x7c2   :  { %v7677_v63 = vpop.f32.mrb[60].mxu0 }
 0x7c3   :  { %v7678_v58 = vpop.f32.mrb[61].mxu0 }
 0x7c4   :  { %v7679_v30 = vadd.f32 %v7678_v58, %v7677_v63  ;;  %v7680_v57 = vpop.f32.mrb[62].mxu0 }
 0x7c5   :  { %v7681_v38 = vpop.f32.mrb[63].mxu0 }
 0x7c6   :  { %v5929_v14 = vadd.f32 %v7679_v30, %v5889_v52 }
 0x7c8   :  { %v5969_v53 = vadd.f32 %v7701_v16, %v5929_v14 }
 0x7e2   :  { %v7721_v41 = vpop.f32.mrb[64].mxu0 }
 0x7e3   :  { %v7722_v25 = vpop.f32.mrb[65].mxu0 }
 0x7e4   :  { %v7723_v22 = vadd.f32 %v7722_v25, %v7721_v41  ;;  %v7724_v56 = vpop.f32.mrb[66].mxu0 }
 0x7e5   :  { %v7725_v59 = vpop.f32.mrb[67].mxu0 }
 0x7e6   :  { %v6009_v48 = vadd.f32 %v7723_v22, %v5969_v53 }
 0x7e8   :  { %v6072_v47 = vmul.f32 %v6054_v62, %v6009_v48 }
 0x7ea   :  { %v6132_v61 = vadd.f32 %v6114_v29, %v6072_v47 }
 0x7ec   :  { %8120 = vtanh.f32 %v6132_v61 }
 0x7f6   :  { %v11910_v24 = vpop.eup %8120 }
 0x7f7   :  { %8179 = dma.done.wait [#allocation4], 16384 }
 0x7f8   :  { %8180 = vsyncadd [#allocation4], 4294950912  ;;  %v6287_v31 = vunpack.c.h.s8.bf16 %v8246_v1  ;;  %v6289_v28 = vunpack.c.h.s8.bf16 %v8256_v3  ;;  %6538 = vmatprep.subr.bf16.mxu1 %v6283_v12  ;;  %6702 = vmatprep.subr.bf16.mxu0 %v6285_v18  ;;  %v6286_v54 = vunpack.c.h.s8.bf16 %v8241_v0  ;;  %v6288_v33 = vunpack.c.h.s8.bf16 %v8251_v2  ;;  %v12663_v58 = vld [vmem:[#allocation13_spill] sm:$0xff]  ;;  %v12664_v38 = vld [vmem:[#allocation15_spill] sm:$0xff] }
 0x7f9   :  { %6539 = vmatpush1.bf16.msra.mxu1 %v6282_v17  ;;  %6703 = vmatpush1.bf16.msra.mxu0 %v6284_v46  ;;  %v6291_v42 = vunpack.c.l.s8.bf16 %v8266_v5  ;;  %v6293_v23 = vunpack.c.l.s8.bf16 %v8276_v7  ;;  %v6290_v1 = vunpack.c.l.s8.bf16 %v8261_v4  ;;  %v6292_v3 = vunpack.c.l.s8.bf16 %v8271_v6  ;;  %v12665_v53 = vld [vmem:[#allocation17_spill] sm:$0xff]  ;;  %v12666_v41 = vld [vmem:[#allocation14_spill] sm:$0xff]  ;;  %v12667_v43 = vld [vmem:[#allocation16_spill] sm:$0xff] }
 0x7fa   :  { %6540 = vmatprep.subr.bf16.mxu1 %v6287_v31  ;;  %6704 = vmatprep.subr.bf16.mxu0 %v6289_v28  ;;  %v6295_v16 = vunpack.c.h.s8.bf16 %v8266_v5  ;;  %v6297_v0 = vunpack.c.h.s8.bf16 %v8276_v7  ;;  %v6294_v2 = vunpack.c.h.s8.bf16 %v8261_v4  ;;  %v6296_v45 = vunpack.c.h.s8.bf16 %v8271_v6  ;;  %v12668_v59 = vld [vmem:[#allocation19_spill] sm:$0xff]  ;;  %v12669_v29 = vld [vmem:[#allocation21_spill] sm:$0xff]  ;;  %v12670_v61 = vld [vmem:[#allocation18_spill] sm:$0xff] }
 0x7fb   :  { %v6299_v26 = vunpack.c.l.s8.bf16 %v8286_v9  ;;  %v6301_v51 = vunpack.c.l.s8.bf16 %v8296_v11  ;;  %v6298_v40 = vunpack.c.l.s8.bf16 %v8281_v8  ;;  %v6300_v5 = vunpack.c.l.s8.bf16 %v8291_v10  ;;  %v12671_v18 = vld [vmem:[#allocation20_spill] sm:$0xff] }
 0x7fc   :  { %v6303_v7 = vunpack.c.h.s8.bf16 %v8286_v9  ;;  %v6305_v4 = vunpack.c.h.s8.bf16 %v8296_v11  ;;  %v6147_v6 = vpack.c.bf16 %v11582_v55, %v11582_v55  ;;  %v6302_v27 = vunpack.c.h.s8.bf16 %v8281_v8  ;;  %v12662_v9 = vld [vmem:[#allocation12_spill] sm:$0xff] }
 0x7fd   :  { %6541 = vmatpush1.bf16.msra.mxu1 %v6286_v54  ;;  %6705 = vmatpush1.bf16.msra.mxu0 %v6288_v33  ;;  %v6304_v36 = vunpack.c.h.s8.bf16 %v8291_v10  ;;  %v6307_v52 = vunpack.c.l.s8.bf16 %v8306_v13  ;;  %v6309_v63 = vunpack.c.l.s8.bf16 %v8316_v15  ;;  %v6306_v11 = vunpack.c.l.s8.bf16 %v12662_v9  ;;  %v12672_v33 = vld [vmem:[#allocation23_spill] sm:$0xff] }
 0x7fe   :  { %6542 = vmatprep.subr.bf16.mxu1 %v6291_v42  ;;  %6706 = vmatprep.subr.bf16.mxu0 %v6293_v23  ;;  %v6308_v55 = vunpack.c.l.s8.bf16 %v12663_v58  ;;  %v6311_v30 = vunpack.c.h.s8.bf16 %v8306_v13  ;;  %v6313_v8 = vunpack.c.h.s8.bf16 %v8316_v15  ;;  %v6310_v10 = vunpack.c.h.s8.bf16 %v12662_v9  ;;  %v12673_v23 = vld [vmem:[#allocation25_spill] sm:$0xff] }
 0x7ff   :  { %6570 = vmatprep.mubr.bf16.mxu1 %v6147_v6  ;;  %6734 = vmatprep.mubr.bf16.mxu0 %v6147_v6  ;;  %v6312_v57 = vunpack.c.h.s8.bf16 %v12663_v58  ;;  %v6315_v14 = vunpack.c.l.s8.bf16 %v12664_v38  ;;  %v6317_v21 = vunpack.c.l.s8.bf16 %v12665_v53  ;;  %v6314_v25 = vunpack.c.l.s8.bf16 %v12666_v41 }
 0x800   :  { %v6316_v13 = vunpack.c.l.s8.bf16 %v12667_v43  ;;  %v6319_v15 = vunpack.c.h.s8.bf16 %v12664_v38  ;;  %v6321_v22 = vunpack.c.h.s8.bf16 %v12665_v53  ;;  %v6318_v62 = vunpack.c.h.s8.bf16 %v12666_v41 }
 0x801   :  { %6543 = vmatpush1.bf16.msra.mxu1 %v6290_v1  ;;  %6707 = vmatpush1.bf16.msra.mxu0 %v6292_v3  ;;  %v6320_v56 = vunpack.c.h.s8.bf16 %v12667_v43  ;;  %v6323_v48 = vunpack.c.l.s8.bf16 %v12668_v59  ;;  %v6325_v47 = vunpack.c.l.s8.bf16 %v12669_v29  ;;  %v6322_v12 = vunpack.c.l.s8.bf16 %v12670_v61  ;;  %v12674_v3 = vld [vmem:[#allocation22_spill] sm:$0xff] }
 0x802   :  { %6544 = vmatprep.subr.bf16.mxu1 %v6295_v16  ;;  %6708 = vmatprep.subr.bf16.mxu0 %v6297_v0  ;;  %v6324_v17 = vunpack.c.l.s8.bf16 %v12671_v18  ;;  %v6327_v46 = vunpack.c.h.s8.bf16 %v12668_v59  ;;  %v6329_v31 = vunpack.c.h.s8.bf16 %v12669_v29  ;;  %v6326_v28 = vunpack.c.h.s8.bf16 %v12670_v61  ;;  %v12675_v0 = vld [vmem:[#allocation24_spill] sm:$0xff] }
 0x803   :  { %v6328_v54 = vunpack.c.h.s8.bf16 %v12671_v18  ;;  %v6331_v42 = vunpack.c.l.s8.bf16 %v12672_v33  ;;  %v6333_v1 = vunpack.c.l.s8.bf16 %v12673_v23  ;;  %v6330_v16 = vunpack.c.l.s8.bf16 %v12674_v3  ;;  %v12687_v29 = vld [vmem:[#allocation36_spill] sm:$0xff] }
 0x804   :  { %v6146_v38 = vpack.c.bf16 %v11576_v35, %v11576_v35 }
 0x805   :  { %6545 = vmatpush1.bf16.msra.mxu1 %v6294_v2  ;;  %6709 = vmatpush1.bf16.msra.mxu0 %v6296_v45  ;;  %v6332_v2 = vunpack.c.l.s8.bf16 %v12675_v0  ;;  %v6335_v45 = vunpack.c.h.s8.bf16 %v12672_v33  ;;  %v12690_v33 = vld [vmem:[#allocation38_spill] sm:$0xff] }
 0x806   :  { %6546 = vmatprep.subr.bf16.mxu1 %v6299_v26  ;;  %6710 = vmatprep.subr.bf16.mxu0 %v6301_v51  ;;  %v6337_v26 = vunpack.c.h.s8.bf16 %v12673_v23  ;;  %v6334_v51 = vunpack.c.h.s8.bf16 %v12674_v3  ;;  %v12691_v23 = vld [vmem:[#allocation40_spill] sm:$0xff] }
 0x809   :  { %6547 = vmatpush1.bf16.msra.mxu1 %v6298_v40  ;;  %6711 = vmatpush1.bf16.msra.mxu0 %v6300_v5  ;;  %v6336_v40 = vunpack.c.h.s8.bf16 %v12675_v0  ;;  %v12676_v5 = vld [vmem:[#allocation27_spill] sm:$0xff]  ;;  %v6366_v0 = vunpack.c.h.s8.bf16 %v12690_v33 }
 0x80a   :  { %6548 = vmatprep.subr.bf16.mxu1 %v6303_v7  ;;  %6712 = vmatprep.subr.bf16.mxu0 %v6305_v4  ;;  %v6339_v7 = vunpack.c.l.s8.bf16 %v12676_v5  ;;  %v12677_v4 = vld [vmem:[#allocation29_spill] sm:$0xff]  ;;  %v6343_v9 = vunpack.c.h.s8.bf16 %v12676_v5  ;;  %v12694_v5 = vld [vmem:[#allocation42_spill] sm:$0xff] }
 0x80b   :  { %v6341_v6 = vunpack.c.l.s8.bf16 %v12677_v4 }
 0x80d   :  { %6549 = vmatpush1.bf16.msra.mxu1 %v6302_v27  ;;  %6713 = vmatpush1.bf16.msra.mxu0 %v6304_v36  ;;  %v12678_v27 = vld [vmem:[#allocation26_spill] sm:$0xff] }
 0x80e   :  { %6550 = vmatprep.subr.bf16.mxu1 %v6307_v52  ;;  %6714 = vmatprep.subr.bf16.mxu0 %v6309_v63  ;;  %v6338_v36 = vunpack.c.l.s8.bf16 %v12678_v27  ;;  %v12679_v52 = vld [vmem:[#allocation28_spill] sm:$0xff]  ;;  %v6342_v58 = vunpack.c.h.s8.bf16 %v12678_v27 }
 0x80f   :  { %v6340_v63 = vunpack.c.l.s8.bf16 %v12679_v52 }
 0x811   :  { %6551 = vmatpush1.bf16.msra.mxu1 %v6306_v11  ;;  %6715 = vmatpush1.bf16.msra.mxu0 %v6308_v55  ;;  %v6345_v11 = vunpack.c.h.s8.bf16 %v12677_v4  ;;  %v6344_v55 = vunpack.c.h.s8.bf16 %v12679_v52  ;;  %v12695_v4 = vld [vmem:[#allocation44_spill] sm:$0xff]  ;;  %v6374_v52 = vunpack.c.h.s8.bf16 %v12694_v5 }
 0x812   :  { %6552 = vmatprep.subr.bf16.mxu1 %v6311_v30  ;;  %6716 = vmatprep.subr.bf16.mxu0 %v6313_v8  ;;  %v12680_v30 = vld [vmem:[#allocation31_spill] sm:$0xff] }
 0x813   :  { %v6347_v8 = vunpack.c.l.s8.bf16 %v12680_v30 }
 0x815   :  { %6553 = vmatpush1.bf16.msra.mxu1 %v6310_v10  ;;  %6717 = vmatpush1.bf16.msra.mxu0 %v6312_v57  ;;  %v12681_v10 = vld [vmem:[#allocation33_spill] sm:$0xff] }
 0x816   :  { %6554 = vmatprep.subr.bf16.mxu1 %v6315_v14  ;;  %6718 = vmatprep.subr.bf16.mxu0 %v6317_v21  ;;  %v6349_v57 = vunpack.c.l.s8.bf16 %v12681_v10  ;;  %v12682_v14 = vld [vmem:[#allocation30_spill] sm:$0xff]  ;;  %v12683_v21 = vld [vmem:[#allocation32_spill] sm:$0xff]  ;;  %v6353_v43 = vunpack.c.h.s8.bf16 %v12681_v10 }
 0x817   :  { %v6346_v53 = vunpack.c.l.s8.bf16 %v12682_v14  ;;  %v6348_v41 = vunpack.c.l.s8.bf16 %v12683_v21  ;;  %v6350_v35 = vunpack.c.h.s8.bf16 %v12682_v14  ;;  %v12699_v10 = vld [vmem:[#allocation48_spill] sm:$0xff] }
 0x819   :  { %6555 = vmatpush1.bf16.msra.mxu1 %v6314_v25  ;;  %6719 = vmatpush1.bf16.msra.mxu0 %v6316_v13  ;;  %v6351_v25 = vunpack.c.h.s8.bf16 %v12680_v30  ;;  %v6149_v13 = vpack.c.bf16 %v11647_v19, %v11647_v19  ;;  %v12698_v30 = vld [vmem:[#allocation46_spill] sm:$0xff] }
 0x81a   :  { %6556 = vmatprep.subr.bf16.mxu1 %v6319_v15  ;;  %6720 = vmatprep.subr.bf16.mxu0 %v6321_v22  ;;  %v6352_v15 = vunpack.c.h.s8.bf16 %v12683_v21  ;;  %v12684_v22 = vld [vmem:[#allocation35_spill] sm:$0xff]  ;;  %v6384_v21 = vunpack.c.h.s8.bf16 %v12699_v10 }
 0x81b   :  { %v6359_v61 = vunpack.c.h.s8.bf16 %v12684_v22 }
 0x81d   :  { %6557 = vmatpush1.bf16.msra.mxu1 %v6318_v62  ;;  %6721 = vmatpush1.bf16.msra.mxu0 %v6320_v56  ;;  %v6355_v62 = vunpack.c.l.s8.bf16 %v12684_v22  ;;  %v12685_v56 = vld [vmem:[#allocation37_spill] sm:$0xff]  ;;  %v12703_v22 = vld [vmem:[#allocation52_spill] sm:$0xff] }
 0x81e   :  { %6558 = vmatprep.subr.bf16.mxu1 %v6323_v48  ;;  %6722 = vmatprep.subr.bf16.mxu0 %v6325_v47  ;;  %v6357_v59 = vunpack.c.l.s8.bf16 %v12685_v56  ;;  %v12686_v48 = vld [vmem:[#allocation34_spill] sm:$0xff]  ;;  %v6356_v47 = vunpack.c.l.s8.bf16 %v12687_v29 }
 0x81f   :  { %v6354_v19 = vunpack.c.l.s8.bf16 %v12686_v48  ;;  %v6358_v18 = vunpack.c.h.s8.bf16 %v12686_v48 }
 0x821   :  { %6559 = vmatpush1.bf16.msra.mxu1 %v6322_v12  ;;  %6723 = vmatpush1.bf16.msra.mxu0 %v6324_v17  ;;  %v6361_v12 = vunpack.c.h.s8.bf16 %v12685_v56  ;;  %v6360_v17 = vunpack.c.h.s8.bf16 %v12687_v29  ;;  %v12704_v29 = vld [vmem:[#allocation55_spill] sm:$0xff] }
 0x822   :  { %6560 = vmatprep.subr.bf16.mxu1 %v6327_v46  ;;  %6724 = vmatprep.subr.bf16.mxu0 %v6329_v31  ;;  %v12688_v46 = vld [vmem:[#allocation39_spill] sm:$0xff] }
 0x823   :  { %v6363_v31 = vunpack.c.l.s8.bf16 %v12688_v46  ;;  %v6367_v3 = vunpack.c.h.s8.bf16 %v12688_v46  ;;  %v12707_v46 = vld [vmem:[#allocation56_spill] sm:$0xff] }
 0x825   :  { %6561 = vmatpush1.bf16.msra.mxu1 %v6326_v28  ;;  %6725 = vmatpush1.bf16.msra.mxu0 %v6328_v54  ;;  %v12689_v28 = vld [vmem:[#allocation41_spill] sm:$0xff] }
 0x826   :  { %6562 = vmatprep.subr.bf16.mxu1 %v6331_v42  ;;  %6726 = vmatprep.subr.bf16.mxu0 %v6333_v1  ;;  %v6365_v54 = vunpack.c.l.s8.bf16 %v12689_v28  ;;  %v6362_v42 = vunpack.c.l.s8.bf16 %v12690_v33  ;;  %v6364_v1 = vunpack.c.l.s8.bf16 %v12691_v23 }
 0x829   :  { %6563 = vmatpush1.bf16.msra.mxu1 %v6330_v16  ;;  %6727 = vmatpush1.bf16.msra.mxu0 %v6332_v2  ;;  %v6369_v16 = vunpack.c.h.s8.bf16 %v12689_v28  ;;  %v6368_v2 = vunpack.c.h.s8.bf16 %v12691_v23  ;;  %v6399_v28 = vunpack.c.h.s8.bf16 %v12704_v29  ;;  %v12708_v23 = vld [vmem:[#allocation59_spill] sm:$0xff] }
 0x82a   :  { %6564 = vmatprep.subr.bf16.mxu1 %v6335_v45  ;;  %6728 = vmatprep.subr.bf16.mxu0 %v6337_v26  ;;  %v12692_v45 = vld [vmem:[#allocation43_spill] sm:$0xff] }
 0x82b   :  { %v6371_v26 = vunpack.c.l.s8.bf16 %v12692_v45  ;;  %v6375_v27 = vunpack.c.h.s8.bf16 %v12692_v45  ;;  %v12711_v45 = vld [vmem:[#allocation60_spill] sm:$0xff] }
 0x82d   :  { %6565 = vmatpush1.bf16.msra.mxu1 %v6334_v51  ;;  %6729 = vmatpush1.bf16.msra.mxu0 %v6336_v40  ;;  %v12693_v51 = vld [vmem:[#allocation45_spill] sm:$0xff] }
 0x82e   :  { %6566 = vmatprep.subr.bf16.mxu1 %v6339_v7  ;;  %6730 = vmatprep.subr.bf16.mxu0 %v6341_v6  ;;  %v6373_v40 = vunpack.c.l.s8.bf16 %v12693_v51  ;;  %v6370_v7 = vunpack.c.l.s8.bf16 %v12694_v5  ;;  %v6372_v6 = vunpack.c.l.s8.bf16 %v12695_v4 }
 0x831   :  { %6567 = vmatpush1.bf16.msra.mxu1 %v6338_v36  ;;  %6731 = vmatpush1.bf16.msra.mxu0 %v6340_v63  ;;  %v6377_v36 = vunpack.c.h.s8.bf16 %v12693_v51  ;;  %v6376_v63 = vunpack.c.h.s8.bf16 %v12695_v4  ;;  %v6407_v51 = vunpack.c.h.s8.bf16 %v12708_v23  ;;  %v12712_v4 = vld [vmem:[#allocation63_spill] sm:$0xff] }
 0x832   :  { %6568 = vmatprep.subr.bf16.mxu1 %v6343_v9  ;;  %6732 = vmatprep.subr.bf16.mxu0 %v6345_v11  ;;  %v12696_v9 = vld [vmem:[#allocation47_spill] sm:$0xff] }
 0x833   :  { %v6379_v11 = vunpack.c.l.s8.bf16 %v12696_v9 }
 0x835   :  { %6569 = vmatpush1.bf16.msra.mxu1 %v6342_v58  ;;  %6733 = vmatpush1.bf16.msra.mxu0 %v6344_v55  ;;  %v12697_v58 = vld [vmem:[#allocation49_spill] sm:$0xff] }
 0x836   :  { %6579 = vmatprep.subr.bf16.mxu1 %v6347_v8  ;;  %6743 = vmatprep.subr.bf16.mxu0 %v6349_v57  ;;  %v6381_v55 = vunpack.c.l.s8.bf16 %v12697_v58  ;;  %v6378_v8 = vunpack.c.l.s8.bf16 %v12698_v30  ;;  %v6380_v57 = vunpack.c.l.s8.bf16 %v12699_v10  ;;  %v6385_v14 = vunpack.c.h.s8.bf16 %v12697_v58 }
 0x838   :  { %6571 = vmatmul.mubr.bf16.vlgmr.msra.gmra.mrb[48].mxu1 %v6146_v38  ;;  %6735 = vmatmul.mubr.bf16.vlgmr.msra.gmra.mrb[68].mxu0 %v6146_v38  ;;  %v6383_v38 = vunpack.c.h.s8.bf16 %v12696_v9 }
 0x839   :  { %6580 = vmatpush1.bf16.msra.mxu1 %v6346_v53  ;;  %6744 = vmatpush1.bf16.msra.mxu0 %v6348_v41  ;;  %v6382_v53 = vunpack.c.h.s8.bf16 %v12698_v30  ;;  %v12700_v41 = vld [vmem:[#allocation51_spill] sm:$0xff] }
 0x83a   :  { %6581 = vmatprep.subr.bf16.mxu1 %v6351_v25  ;;  %6745 = vmatprep.subr.bf16.mxu0 %v6353_v43  ;;  %v6387_v25 = vunpack.c.l.s8.bf16 %v12700_v41  ;;  %v12701_v43 = vld [vmem:[#allocation53_spill] sm:$0xff]  ;;  %v6391_v56 = vunpack.c.h.s8.bf16 %v12700_v41  ;;  %v12719_v41 = vld [vmem:[#allocation68_spill] sm:$0xff] }
 0x83b   :  { %6611 = vmatprep.mubr.bf16.mxu1 %v6149_v13  ;;  %6775 = vmatprep.mubr.bf16.mxu0 %v6149_v13  ;;  %v6389_v13 = vunpack.c.l.s8.bf16 %v12701_v43 }
 0x83d   :  { %6582 = vmatpush1.bf16.msra.mxu1 %v6350_v35  ;;  %6746 = vmatpush1.bf16.msra.mxu0 %v6352_v15  ;;  %v12702_v35 = vld [vmem:[#allocation50_spill] sm:$0xff] }
 0x83e   :  { %6583 = vmatprep.subr.bf16.mxu1 %v6355_v62  ;;  %6747 = vmatprep.subr.bf16.mxu0 %v6357_v59  ;;  %v6386_v15 = vunpack.c.l.s8.bf16 %v12702_v35  ;;  %v6388_v62 = vunpack.c.l.s8.bf16 %v12703_v22  ;;  %v6393_v59 = vunpack.c.h.s8.bf16 %v12701_v43  ;;  %v6390_v48 = vunpack.c.h.s8.bf16 %v12702_v35 }
 0x841   :  { %6584 = vmatpush1.bf16.msra.mxu1 %v6354_v19  ;;  %6748 = vmatpush1.bf16.msra.mxu0 %v6356_v47  ;;  %v6392_v19 = vunpack.c.h.s8.bf16 %v12703_v22  ;;  %v6395_v47 = vunpack.c.l.s8.bf16 %v12704_v29  ;;  %v12720_v22 = vld [vmem:[#allocation71_spill] sm:$0xff]  ;;  %v12723_v29 = vld [vmem:[#allocation72_spill] sm:$0xff] }
 0x842   :  { %6585 = vmatprep.subr.bf16.mxu1 %v6359_v61  ;;  %6749 = vmatprep.subr.bf16.mxu0 %v6361_v12  ;;  %v12705_v61 = vld [vmem:[#allocation57_spill] sm:$0xff] }
 0x843   :  { %v6397_v12 = vunpack.c.l.s8.bf16 %v12705_v61 }
 0x845   :  { %6586 = vmatpush1.bf16.msra.mxu1 %v6358_v18  ;;  %6750 = vmatpush1.bf16.msra.mxu0 %v6360_v17  ;;  %v12706_v18 = vld [vmem:[#allocation54_spill] sm:$0xff] }
 0x846   :  { %6587 = vmatprep.subr.bf16.mxu1 %v6363_v31  ;;  %6751 = vmatprep.subr.bf16.mxu0 %v6365_v54  ;;  %v6394_v17 = vunpack.c.l.s8.bf16 %v12706_v18  ;;  %v6396_v31 = vunpack.c.l.s8.bf16 %v12707_v46  ;;  %v6401_v54 = vunpack.c.h.s8.bf16 %v12705_v61  ;;  %v6398_v33 = vunpack.c.h.s8.bf16 %v12706_v18 }
 0x847   :  { %v6431_v61 = vunpack.c.h.s8.bf16 %v12720_v22 }
 0x849   :  { %6588 = vmatpush1.bf16.msra.mxu1 %v6362_v42  ;;  %6752 = vmatpush1.bf16.msra.mxu0 %v6364_v1  ;;  %v6400_v42 = vunpack.c.h.s8.bf16 %v12707_v46  ;;  %v6403_v1 = vunpack.c.l.s8.bf16 %v12708_v23  ;;  %v12724_v46 = vld [vmem:[#allocation75_spill] sm:$0xff]  ;;  %v12727_v23 = vld [vmem:[#allocation76_spill] sm:$0xff] }
 0x84a   :  { %6589 = vmatprep.subr.bf16.mxu1 %v6367_v3  ;;  %6753 = vmatprep.subr.bf16.mxu0 %v6369_v16  ;;  %v12709_v3 = vld [vmem:[#allocation61_spill] sm:$0xff] }
 0x84b   :  { %v6405_v16 = vunpack.c.l.s8.bf16 %v12709_v3 }
 0x84d   :  { %6590 = vmatpush1.bf16.msra.mxu1 %v6366_v0  ;;  %6754 = vmatpush1.bf16.msra.mxu0 %v6368_v2  ;;  %v12710_v0 = vld [vmem:[#allocation58_spill] sm:$0xff] }
 0x84e   :  { %6591 = vmatprep.subr.bf16.mxu1 %v6371_v26  ;;  %6755 = vmatprep.subr.bf16.mxu0 %v6373_v40  ;;  %v6402_v2 = vunpack.c.l.s8.bf16 %v12710_v0  ;;  %v6404_v26 = vunpack.c.l.s8.bf16 %v12711_v45  ;;  %v6409_v40 = vunpack.c.h.s8.bf16 %v12709_v3  ;;  %v6406_v5 = vunpack.c.h.s8.bf16 %v12710_v0 }
 0x84f   :  { %v6439_v3 = vunpack.c.h.s8.bf16 %v12724_v46 }
 0x851   :  { %6592 = vmatpush1.bf16.msra.mxu1 %v6370_v7  ;;  %6756 = vmatpush1.bf16.msra.mxu0 %v6372_v6  ;;  %v6408_v7 = vunpack.c.h.s8.bf16 %v12711_v45  ;;  %v6411_v6 = vunpack.c.l.s8.bf16 %v12712_v4  ;;  %v12728_v45 = vld [vmem:[#allocation79_spill] sm:$0xff] }
 0x852   :  { %6593 = vmatprep.subr.bf16.mxu1 %v6375_v27  ;;  %6757 = vmatprep.subr.bf16.mxu0 %v6377_v36  ;;  %v12713_v27 = vld [vmem:[#allocation65_spill] sm:$0xff] }
 0x853   :  { %v6413_v36 = vunpack.c.l.s8.bf16 %v12713_v27  ;;  %v6417_v30 = vunpack.c.h.s8.bf16 %v12713_v27  ;;  %v6447_v27 = vunpack.c.h.s8.bf16 %v12728_v45 }
 0x855   :  { %6594 = vmatpush1.bf16.msra.mxu1 %v6374_v52  ;;  %6758 = vmatpush1.bf16.msra.mxu0 %v6376_v63  ;;  %v6148_v52 = vpack.c.bf16 %v11642_v50, %v11642_v50  ;;  %v12714_v63 = vld [vmem:[#allocation62_spill] sm:$0xff] }
 0x856   :  { %6595 = vmatprep.subr.bf16.mxu1 %v6379_v11  ;;  %6759 = vmatprep.subr.bf16.mxu0 %v6381_v55  ;;  %v6410_v9 = vunpack.c.l.s8.bf16 %v12714_v63  ;;  %v12715_v11 = vld [vmem:[#allocation64_spill] sm:$0xff]  ;;  %v6415_v55 = vunpack.c.h.s8.bf16 %v12712_v4  ;;  %v6414_v50 = vunpack.c.h.s8.bf16 %v12714_v63 }
 0x857   :  { %v6412_v58 = vunpack.c.l.s8.bf16 %v12715_v11  ;;  %v6416_v10 = vunpack.c.h.s8.bf16 %v12715_v11  ;;  %v12731_v4 = vld [vmem:[#allocation80_spill] sm:$0xff] }
 0x858   :  { %v6448_v63 = vunpack.c.h.s8.bf16 %v12731_v4 }
 0x859   :  { %6596 = vmatpush1.bf16.msra.mxu1 %v6378_v8  ;;  %6760 = vmatpush1.bf16.msra.mxu0 %v6380_v57  ;;  %v6151_v8 = vpack.c.bf16 %v11891_v44, %v11891_v44  ;;  %v12716_v57 = vld [vmem:[#allocation67_spill] sm:$0xff] }
 0x85a   :  { %6597 = vmatprep.subr.bf16.mxu1 %v6383_v38  ;;  %6761 = vmatprep.subr.bf16.mxu0 %v6385_v14  ;;  %v6419_v38 = vunpack.c.l.s8.bf16 %v12716_v57  ;;  %v12717_v14 = vld [vmem:[#allocation69_spill] sm:$0xff]  ;;  %v6423_v43 = vunpack.c.h.s8.bf16 %v12716_v57 }
 0x85d   :  { %6598 = vmatpush1.bf16.msra.mxu1 %v6382_v53  ;;  %6762 = vmatpush1.bf16.msra.mxu0 %v6384_v21  ;;  %v6421_v53 = vunpack.c.l.s8.bf16 %v12717_v14  ;;  %v12718_v21 = vld [vmem:[#allocation66_spill] sm:$0xff] }
 0x85e   :  { %6599 = vmatprep.subr.bf16.mxu1 %v6387_v25  ;;  %6763 = vmatprep.subr.bf16.mxu0 %v6389_v13  ;;  %v6418_v44 = vunpack.c.l.s8.bf16 %v12718_v21  ;;  %v6420_v25 = vunpack.c.l.s8.bf16 %v12719_v41  ;;  %v6425_v13 = vunpack.c.h.s8.bf16 %v12717_v14  ;;  %v6422_v35 = vunpack.c.h.s8.bf16 %v12718_v21  ;;  %v12736_v21 = vld [vmem:[#allocation87_spill] sm:$0xff] }
 0x861   :  { %6600 = vmatpush1.bf16.msra.mxu1 %v6386_v15  ;;  %6764 = vmatpush1.bf16.msra.mxu0 %v6388_v62  ;;  %v6424_v15 = vunpack.c.h.s8.bf16 %v12719_v41  ;;  %v6427_v62 = vunpack.c.l.s8.bf16 %v12720_v22  ;;  %v12737_v41 = vld [vmem:[#allocation89_spill] sm:$0xff]  ;;  %v6463_v22 = vunpack.c.h.s8.bf16 %v12736_v21 }
 0x862   :  { %6601 = vmatprep.subr.bf16.mxu1 %v6391_v56  ;;  %6765 = vmatprep.subr.bf16.mxu0 %v6393_v59  ;;  %v12721_v56 = vld [vmem:[#allocation73_spill] sm:$0xff] }
 0x863   :  { %v6429_v59 = vunpack.c.l.s8.bf16 %v12721_v56 }
 0x865   :  { %6602 = vmatpush1.bf16.msra.mxu1 %v6390_v48  ;;  %6766 = vmatpush1.bf16.msra.mxu0 %v6392_v19  ;;  %v12722_v48 = vld [vmem:[#allocation70_spill] sm:$0xff] }
 0x866   :  { %6603 = vmatprep.subr.bf16.mxu1 %v6395_v47  ;;  %6767 = vmatprep.subr.bf16.mxu0 %v6397_v12  ;;  %v6426_v19 = vunpack.c.l.s8.bf16 %v12722_v48  ;;  %v6428_v47 = vunpack.c.l.s8.bf16 %v12723_v29  ;;  %v6433_v12 = vunpack.c.h.s8.bf16 %v12721_v56  ;;  %v6430_v18 = vunpack.c.h.s8.bf16 %v12722_v48  ;;  %v12740_v48 = vld [vmem:[#allocation91_spill] sm:$0xff] }
 0x869   :  { %6604 = vmatpush1.bf16.msra.mxu1 %v6394_v17  ;;  %6768 = vmatpush1.bf16.msra.mxu0 %v6396_v31  ;;  %v6432_v17 = vunpack.c.h.s8.bf16 %v12723_v29  ;;  %v6435_v31 = vunpack.c.l.s8.bf16 %v12724_v46  ;;  %v12741_v29 = vld [vmem:[#allocation93_spill] sm:$0xff]  ;;  %v6471_v46 = vunpack.c.h.s8.bf16 %v12740_v48 }
 0x86a   :  { %6605 = vmatprep.subr.bf16.mxu1 %v6399_v28  ;;  %6769 = vmatprep.subr.bf16.mxu0 %v6401_v54  ;;  %v12725_v28 = vld [vmem:[#allocation77_spill] sm:$0xff] }
 0x86b   :  { %v6437_v54 = vunpack.c.l.s8.bf16 %v12725_v28 }
 0x86d   :  { %6606 = vmatpush1.bf16.msra.mxu1 %v6398_v33  ;;  %6770 = vmatpush1.bf16.msra.mxu0 %v6400_v42  ;;  %v12726_v33 = vld [vmem:[#allocation74_spill] sm:$0xff] }
 0x86e   :  { %6607 = vmatprep.subr.bf16.mxu1 %v6403_v1  ;;  %6771 = vmatprep.subr.bf16.mxu0 %v6405_v16  ;;  %v6434_v42 = vunpack.c.l.s8.bf16 %v12726_v33  ;;  %v6436_v1 = vunpack.c.l.s8.bf16 %v12727_v23  ;;  %v6441_v16 = vunpack.c.h.s8.bf16 %v12725_v28  ;;  %v6438_v0 = vunpack.c.h.s8.bf16 %v12726_v33  ;;  %v12744_v33 = vld [vmem:[#allocation95_spill] sm:$0xff] }
 0x871   :  { %6608 = vmatpush1.bf16.msra.mxu1 %v6402_v2  ;;  %6772 = vmatpush1.bf16.msra.mxu0 %v6404_v26  ;;  %v6440_v2 = vunpack.c.h.s8.bf16 %v12727_v23  ;;  %v6443_v26 = vunpack.c.l.s8.bf16 %v12728_v45  ;;  %v12745_v23 = vld [vmem:[#allocation97_spill] sm:$0xff] }
 0x872   :  { %6609 = vmatprep.subr.bf16.mxu1 %v6407_v51  ;;  %6773 = vmatprep.subr.bf16.mxu0 %v6409_v40  ;;  %v12729_v51 = vld [vmem:[#allocation81_spill] sm:$0xff] }
 0x873   :  { %v6445_v40 = vunpack.c.l.s8.bf16 %v12729_v51 }
 0x875   :  { %6610 = vmatpush1.bf16.msra.mxu1 %v6406_v5  ;;  %6774 = vmatpush1.bf16.msra.mxu0 %v6408_v7  ;;  %v12730_v5 = vld [vmem:[#allocation78_spill] sm:$0xff] }
 0x876   :  { %6620 = vmatprep.subr.bf16.mxu1 %v6411_v6  ;;  %6784 = vmatprep.subr.bf16.mxu0 %v6413_v36  ;;  %v6442_v7 = vunpack.c.l.s8.bf16 %v12730_v5  ;;  %v6444_v6 = vunpack.c.l.s8.bf16 %v12731_v4  ;;  %v6449_v36 = vunpack.c.h.s8.bf16 %v12729_v51  ;;  %v6481_v51 = vunpack.c.h.s8.bf16 %v12745_v23 }
 0x878   :  { %6612 = vmatmul.mubr.bf16.vlgmr.msra.gmra.mrb[48].mxu1 %v6148_v52  ;;  %6776 = vmatmul.mubr.bf16.vlgmr.msra.gmra.mrb[68].mxu0 %v6148_v52  ;;  %v6446_v52 = vunpack.c.h.s8.bf16 %v12730_v5 }
 0x879   :  { %6621 = vmatpush1.bf16.msra.mxu1 %v6410_v9  ;;  %6785 = vmatpush1.bf16.msra.mxu0 %v6412_v58  ;;  %v12732_v9 = vld [vmem:[#allocation83_spill] sm:$0xff]  ;;  %v12733_v58 = vld [vmem:[#allocation85_spill] sm:$0xff] }
 0x87a   :  { %6622 = vmatprep.subr.bf16.mxu1 %v6415_v55  ;;  %6786 = vmatprep.subr.bf16.mxu0 %v6417_v30  ;;  %v6451_v11 = vunpack.c.l.s8.bf16 %v12732_v9  ;;  %v6453_v55 = vunpack.c.l.s8.bf16 %v12733_v58  ;;  %v12734_v30 = vld [vmem:[#allocation82_spill] sm:$0xff]  ;;  %v6455_v57 = vunpack.c.h.s8.bf16 %v12732_v9 }
 0x87b   :  { %6652 = vmatprep.mubr.bf16.mxu1 %v6151_v8  ;;  %6816 = vmatprep.mubr.bf16.mxu0 %v6151_v8  ;;  %v6450_v8 = vunpack.c.l.s8.bf16 %v12734_v30  ;;  %v6454_v14 = vunpack.c.h.s8.bf16 %v12734_v30  ;;  %v12752_v30 = vld [vmem:[#allocation103_spill] sm:$0xff] }
 0x87d   :  { %6623 = vmatpush1.bf16.msra.mxu1 %v6414_v50  ;;  %6787 = vmatpush1.bf16.msra.mxu0 %v6416_v10  ;;  %v12735_v50 = vld [vmem:[#allocation84_spill] sm:$0xff] }
 0x87e   :  { %6624 = vmatprep.subr.bf16.mxu1 %v6419_v38  ;;  %6788 = vmatprep.subr.bf16.mxu0 %v6421_v53  ;;  %v6452_v10 = vunpack.c.l.s8.bf16 %v12735_v50  ;;  %v6457_v38 = vunpack.c.h.s8.bf16 %v12733_v58  ;;  %v6456_v53 = vunpack.c.h.s8.bf16 %v12735_v50  ;;  %v12753_v50 = vld [vmem:[#allocation105_spill] sm:$0xff] }
 0x881   :  { %6625 = vmatpush1.bf16.msra.mxu1 %v6418_v44  ;;  %6789 = vmatpush1.bf16.msra.mxu0 %v6420_v25  ;;  %v6459_v44 = vunpack.c.l.s8.bf16 %v12736_v21  ;;  %v6461_v25 = vunpack.c.l.s8.bf16 %v12737_v41  ;;  %v6495_v21 = vunpack.c.h.s8.bf16 %v12752_v30 }
 0x882   :  { %6626 = vmatprep.subr.bf16.mxu1 %v6423_v43  ;;  %6790 = vmatprep.subr.bf16.mxu0 %v6425_v13  ;;  %v12738_v43 = vld [vmem:[#allocation86_spill] sm:$0xff] }
 0x883   :  { %v6458_v13 = vunpack.c.l.s8.bf16 %v12738_v43  ;;  %v6462_v56 = vunpack.c.h.s8.bf16 %v12738_v43  ;;  %v12756_v43 = vld [vmem:[#allocation107_spill] sm:$0xff] }
 0x885   :  { %6627 = vmatpush1.bf16.msra.mxu1 %v6422_v35  ;;  %6791 = vmatpush1.bf16.msra.mxu0 %v6424_v15  ;;  %v12739_v35 = vld [vmem:[#allocation88_spill] sm:$0xff] }
 0x886   :  { %6628 = vmatprep.subr.bf16.mxu1 %v6427_v62  ;;  %6792 = vmatprep.subr.bf16.mxu0 %v6429_v59  ;;  %v6460_v15 = vunpack.c.l.s8.bf16 %v12739_v35  ;;  %v6465_v62 = vunpack.c.h.s8.bf16 %v12737_v41  ;;  %v6464_v59 = vunpack.c.h.s8.bf16 %v12739_v35  ;;  %v12757_v35 = vld [vmem:[#allocation109_spill] sm:$0xff] }
 0x889   :  { %6629 = vmatpush1.bf16.msra.mxu1 %v6426_v19  ;;  %6793 = vmatpush1.bf16.msra.mxu0 %v6428_v47  ;;  %v6467_v19 = vunpack.c.l.s8.bf16 %v12740_v48  ;;  %v6469_v47 = vunpack.c.l.s8.bf16 %v12741_v29  ;;  %v6503_v48 = vunpack.c.h.s8.bf16 %v12756_v43 }
 0x88a   :  { %6630 = vmatprep.subr.bf16.mxu1 %v6431_v61  ;;  %6794 = vmatprep.subr.bf16.mxu0 %v6433_v12  ;;  %v12742_v61 = vld [vmem:[#allocation90_spill] sm:$0xff] }
 0x88b   :  { %v6466_v12 = vunpack.c.l.s8.bf16 %v12742_v61  ;;  %v6470_v28 = vunpack.c.h.s8.bf16 %v12742_v61  ;;  %v12760_v61 = vld [vmem:[#allocation111_spill] sm:$0xff] }
 0x88d   :  { %6631 = vmatpush1.bf16.msra.mxu1 %v6430_v18  ;;  %6795 = vmatpush1.bf16.msra.mxu0 %v6432_v17  ;;  %v12743_v18 = vld [vmem:[#allocation92_spill] sm:$0xff] }
 0x88e   :  { %6632 = vmatprep.subr.bf16.mxu1 %v6435_v31  ;;  %6796 = vmatprep.subr.bf16.mxu0 %v6437_v54  ;;  %v6468_v17 = vunpack.c.l.s8.bf16 %v12743_v18  ;;  %v6473_v31 = vunpack.c.h.s8.bf16 %v12741_v29  ;;  %v6472_v54 = vunpack.c.h.s8.bf16 %v12743_v18  ;;  %v12761_v18 = vld [vmem:[#allocation113_spill] sm:$0xff] }
 0x891   :  { %6633 = vmatpush1.bf16.msra.mxu1 %v6434_v42  ;;  %6797 = vmatpush1.bf16.msra.mxu0 %v6436_v1  ;;  %v6475_v42 = vunpack.c.l.s8.bf16 %v12744_v33  ;;  %v6477_v1 = vunpack.c.l.s8.bf16 %v12745_v23 }
 0x892   :  { %6634 = vmatprep.subr.bf16.mxu1 %v6439_v3  ;;  %6798 = vmatprep.subr.bf16.mxu0 %v6441_v16  ;;  %v6150_v3 = vpack.c.bf16 %v11889_v20, %v11889_v20  ;;  %v12746_v16 = vld [vmem:[#allocation94_spill] sm:$0xff] }
 0x893   :  { %v6478_v20 = vunpack.c.h.s8.bf16 %v12746_v16 }
 0x895   :  { %6635 = vmatpush1.bf16.msra.mxu1 %v6438_v0  ;;  %6799 = vmatpush1.bf16.msra.mxu0 %v6440_v2  ;;  %v6474_v0 = vunpack.c.l.s8.bf16 %v12746_v16  ;;  %v12747_v2 = vld [vmem:[#allocation96_spill] sm:$0xff] }
 0x896   :  { %6636 = vmatprep.subr.bf16.mxu1 %v6443_v26  ;;  %6800 = vmatprep.subr.bf16.mxu0 %v6445_v40  ;;  %v6476_v45 = vunpack.c.l.s8.bf16 %v12747_v2  ;;  %v6479_v26 = vunpack.c.h.s8.bf16 %v12744_v33  ;;  %v6153_v40 = vpack.c.bf16 %v11899_v60, %v11899_v60  ;;  %v6480_v5 = vunpack.c.h.s8.bf16 %v12747_v2 }
 0x897   :  { %v6511_v33 = vunpack.c.h.s8.bf16 %v12760_v61 }
 0x899   :  { %6637 = vmatpush1.bf16.msra.mxu1 %v6442_v7  ;;  %6801 = vmatpush1.bf16.msra.mxu0 %v6444_v6  ;;  %v12748_v7 = vld [vmem:[#allocation99_spill] sm:$0xff]  ;;  %v12749_v6 = vld [vmem:[#allocation101_spill] sm:$0xff] }
 0x89a   :  { %6638 = vmatprep.subr.bf16.mxu1 %v6447_v27  ;;  %6802 = vmatprep.subr.bf16.mxu0 %v6449_v36  ;;  %v6483_v4 = vunpack.c.l.s8.bf16 %v12748_v7  ;;  %v6485_v27 = vunpack.c.l.s8.bf16 %v12749_v6  ;;  %v12750_v36 = vld [vmem:[#allocation98_spill] sm:$0xff]  ;;  %v6487_v9 = vunpack.c.h.s8.bf16 %v12748_v7 }
 0x89b   :  { %v6482_v60 = vunpack.c.l.s8.bf16 %v12750_v36  ;;  %v6486_v58 = vunpack.c.h.s8.bf16 %v12750_v36  ;;  %v12769_v36 = vld [vmem:[#allocation121_spill] sm:$0xff] }
 0x89d   :  { %6639 = vmatpush1.bf16.msra.mxu1 %v6446_v52  ;;  %6803 = vmatpush1.bf16.msra.mxu0 %v6448_v63  ;;  %v12751_v52 = vld [vmem:[#allocation100_spill] sm:$0xff] }
 0x89e   :  { %6640 = vmatprep.subr.bf16.mxu1 %v6451_v11  ;;  %6804 = vmatprep.subr.bf16.mxu0 %v6453_v55  ;;  %v6484_v63 = vunpack.c.l.s8.bf16 %v12751_v52  ;;  %v6489_v11 = vunpack.c.h.s8.bf16 %v12749_v6  ;;  %v6488_v55 = vunpack.c.h.s8.bf16 %v12751_v52  ;;  %v12768_v6 = vld [vmem:[#allocation119_spill] sm:$0xff]  ;;  %v12770_v52 = vld [vmem:[#allocation118_spill] sm:$0xff] }
 0x8a1   :  { %6641 = vmatpush1.bf16.msra.mxu1 %v6450_v8  ;;  %6805 = vmatpush1.bf16.msra.mxu0 %v6452_v10  ;;  %v6491_v8 = vunpack.c.l.s8.bf16 %v12752_v30  ;;  %v6493_v10 = vunpack.c.l.s8.bf16 %v12753_v50  ;;  %v6526_v30 = vunpack.c.h.s8.bf16 %v12770_v52 }
 0x8a2   :  { %6642 = vmatprep.subr.bf16.mxu1 %v6455_v57  ;;  %6806 = vmatprep.subr.bf16.mxu0 %v6457_v38  ;;  %v12754_v57 = vld [vmem:[#allocation102_spill] sm:$0xff] }
 0x8a3   :  { %v6490_v38 = vunpack.c.l.s8.bf16 %v12754_v57  ;;  %v6494_v41 = vunpack.c.h.s8.bf16 %v12754_v57  ;;  %v12773_v57 = vld [vmem:[#allocation125_spill] sm:$0xff] }
 0x8a5   :  { %6643 = vmatpush1.bf16.msra.mxu1 %v6454_v14  ;;  %6807 = vmatpush1.bf16.msra.mxu0 %v6456_v53  ;;  %v12755_v14 = vld [vmem:[#allocation104_spill] sm:$0xff] }
 0x8a6   :  { %6644 = vmatprep.subr.bf16.mxu1 %v6459_v44  ;;  %6808 = vmatprep.subr.bf16.mxu0 %v6461_v25  ;;  %v6492_v53 = vunpack.c.l.s8.bf16 %v12755_v14  ;;  %v6497_v44 = vunpack.c.h.s8.bf16 %v12753_v50  ;;  %v6496_v25 = vunpack.c.h.s8.bf16 %v12755_v14  ;;  %v12772_v50 = vld [vmem:[#allocation123_spill] sm:$0xff]  ;;  %v12774_v14 = vld [vmem:[#allocation122_spill] sm:$0xff] }
 0x8a9   :  { %6645 = vmatpush1.bf16.msra.mxu1 %v6458_v13  ;;  %6809 = vmatpush1.bf16.msra.mxu0 %v6460_v15  ;;  %v6499_v13 = vunpack.c.l.s8.bf16 %v12756_v43  ;;  %v6501_v15 = vunpack.c.l.s8.bf16 %v12757_v35  ;;  %v6534_v43 = vunpack.c.h.s8.bf16 %v12774_v14 }
 0x8aa   :  { %6646 = vmatprep.subr.bf16.mxu1 %v6463_v22  ;;  %6810 = vmatprep.subr.bf16.mxu0 %v6465_v62  ;;  %v12758_v22 = vld [vmem:[#allocation106_spill] sm:$0xff] }
 0x8ab   :  { %v6498_v62 = vunpack.c.l.s8.bf16 %v12758_v22  ;;  %v6502_v29 = vunpack.c.h.s8.bf16 %v12758_v22  ;;  %v7486_v22 = vld [vmem:[%s12365_s8 + $0x12] ss:$4 sm:$0xf] }
 0x8ad   :  { %6647 = vmatpush1.bf16.msra.mxu1 %v6462_v56  ;;  %6811 = vmatpush1.bf16.msra.mxu0 %v6464_v59  ;;  %v12759_v56 = vld [vmem:[#allocation108_spill] sm:$0xff] }
 0x8ae   :  { %6648 = vmatprep.subr.bf16.mxu1 %v6467_v19  ;;  %6812 = vmatprep.subr.bf16.mxu0 %v6469_v47  ;;  %v6500_v59 = vunpack.c.l.s8.bf16 %v12759_v56  ;;  %v6505_v19 = vunpack.c.h.s8.bf16 %v12757_v35  ;;  %v6504_v47 = vunpack.c.h.s8.bf16 %v12759_v56  ;;  %v6152_v35 = vpack.c.bf16 %v11897_v49, %v11897_v49 }
 0x8b1   :  { %6649 = vmatpush1.bf16.msra.mxu1 %v6466_v12  ;;  %6813 = vmatpush1.bf16.msra.mxu0 %v6468_v17  ;;  %v6507_v12 = vunpack.c.l.s8.bf16 %v12760_v61  ;;  %v6509_v17 = vunpack.c.l.s8.bf16 %v12761_v18  ;;  %v6903_v61 = vrot.slane %v7486_v22, %v9493_v37 }
 0x8b2   :  { %6650 = vmatprep.subr.bf16.mxu1 %v6471_v46  ;;  %6814 = vmatprep.subr.bf16.mxu0 %v6473_v31  ;;  %v12762_v46 = vld [vmem:[#allocation110_spill] sm:$0xff] }
 0x8b3   :  { %v6506_v31 = vunpack.c.l.s8.bf16 %v12762_v46  ;;  %v6510_v23 = vunpack.c.h.s8.bf16 %v12762_v46 }
 0x8b5   :  { %6651 = vmatpush1.bf16.msra.mxu1 %v6470_v28  ;;  %6815 = vmatpush1.bf16.msra.mxu0 %v6472_v54  ;;  %v12763_v28 = vld [vmem:[#allocation112_spill] sm:$0xff] }
 0x8b6   :  { %6661 = vmatprep.subr.bf16.mxu1 %v6475_v42  ;;  %6825 = vmatprep.subr.bf16.mxu0 %v6477_v1  ;;  %v6508_v54 = vunpack.c.l.s8.bf16 %v12763_v28  ;;  %v6513_v42 = vunpack.c.h.s8.bf16 %v12761_v18  ;;  %v6512_v1 = vunpack.c.h.s8.bf16 %v12763_v28 }
 0x8b8   :  { %6653 = vmatmul.mubr.bf16.vlgmr.msra.gmra.mrb[48].mxu1 %v6150_v3  ;;  %6817 = vmatmul.mubr.bf16.vlgmr.msra.gmra.mrb[68].mxu0 %v6150_v3  ;;  %v12764_v3 = vld [vmem:[#allocation115_spill] sm:$0xff] }
 0x8b9   :  { %6662 = vmatpush1.bf16.msra.mxu1 %v6474_v0  ;;  %6826 = vmatpush1.bf16.msra.mxu0 %v6476_v45  ;;  %v6515_v16 = vunpack.c.l.s8.bf16 %v12764_v3  ;;  %v12765_v0 = vld [vmem:[#allocation117_spill] sm:$0xff]  ;;  %v12766_v45 = vld [vmem:[#allocation114_spill] sm:$0xff] }
 0x8ba   :  { %6663 = vmatprep.subr.bf16.mxu1 %v6479_v26  ;;  %6827 = vmatprep.subr.bf16.mxu0 %v6481_v51  ;;  %v6517_v2 = vunpack.c.l.s8.bf16 %v12765_v0  ;;  %v6514_v26 = vunpack.c.l.s8.bf16 %v12766_v45  ;;  %v12767_v51 = vld [vmem:[#allocation116_spill] sm:$0xff]  ;;  %v6518_v7 = vunpack.c.h.s8.bf16 %v12766_v45 }
 0x8bb   :  { %6693 = vmatprep.mubr.bf16.mxu1 %v6153_v40  ;;  %6857 = vmatprep.mubr.bf16.mxu0 %v6153_v40  ;;  %v6516_v40 = vunpack.c.l.s8.bf16 %v12767_v51 }
 0x8bd   :  { %6664 = vmatpush1.bf16.msra.mxu1 %v6478_v20  ;;  %6828 = vmatpush1.bf16.msra.mxu0 %v6480_v5  ;;  %v6519_v20 = vunpack.c.h.s8.bf16 %v12764_v3  ;;  %v6521_v5 = vunpack.c.h.s8.bf16 %v12765_v0 }
 0x8be   :  { %6665 = vmatprep.subr.bf16.mxu1 %v6483_v4  ;;  %6829 = vmatprep.subr.bf16.mxu0 %v6485_v27  ;;  %v6520_v4 = vunpack.c.h.s8.bf16 %v12767_v51  ;;  %v6523_v27 = vunpack.c.l.s8.bf16 %v12768_v6  ;;  %v12776_v51 = vld [vmem:[#allocation127_spill] sm:$0xff] }
 0x8c1   :  { %6666 = vmatpush1.bf16.msra.mxu1 %v6482_v60  ;;  %6830 = vmatpush1.bf16.msra.mxu0 %v6484_v63  ;;  %v6525_v60 = vunpack.c.l.s8.bf16 %v12769_v36  ;;  %v6522_v63 = vunpack.c.l.s8.bf16 %v12770_v52 }
 0x8c2   :  { %6667 = vmatprep.subr.bf16.mxu1 %v6487_v9  ;;  %6831 = vmatprep.subr.bf16.mxu0 %v6489_v11  ;;  %v12771_v9 = vld [vmem:[#allocation120_spill] sm:$0xff] }
 0x8c3   :  { %v6524_v11 = vunpack.c.l.s8.bf16 %v12771_v9 }
 0x8c5   :  { %6668 = vmatpush1.bf16.msra.mxu1 %v6486_v58  ;;  %6832 = vmatpush1.bf16.msra.mxu0 %v6488_v55  ;;  %v6527_v58 = vunpack.c.h.s8.bf16 %v12768_v6  ;;  %v6529_v55 = vunpack.c.h.s8.bf16 %v12769_v36 }
 0x8c6   :  { %6669 = vmatprep.subr.bf16.mxu1 %v6491_v8  ;;  %6833 = vmatprep.subr.bf16.mxu0 %v6493_v10  ;;  %v6528_v8 = vunpack.c.h.s8.bf16 %v12771_v9  ;;  %v6531_v10 = vunpack.c.l.s8.bf16 %v12772_v50 }
 0x8c9   :  { %6670 = vmatpush1.bf16.msra.mxu1 %v6490_v38  ;;  %6834 = vmatpush1.bf16.msra.mxu0 %v6492_v53  ;;  %v6533_v38 = vunpack.c.l.s8.bf16 %v12773_v57  ;;  %v6530_v53 = vunpack.c.l.s8.bf16 %v12774_v14 }
 0x8ca   :  { %6671 = vmatprep.subr.bf16.mxu1 %v6495_v21  ;;  %6835 = vmatprep.subr.bf16.mxu0 %v6497_v44  ;;  %v12775_v21 = vld [vmem:[#allocation124_spill] sm:$0xff] }
 0x8cb   :  { %v6532_v44 = vunpack.c.l.s8.bf16 %v12775_v21 }
 0x8cd   :  { %6672 = vmatpush1.bf16.msra.mxu1 %v6494_v41  ;;  %6836 = vmatpush1.bf16.msra.mxu0 %v6496_v25  ;;  %v6535_v41 = vunpack.c.h.s8.bf16 %v12772_v50  ;;  %v6537_v25 = vunpack.c.h.s8.bf16 %v12773_v57 }
 0x8ce   :  { %6673 = vmatprep.subr.bf16.mxu1 %v6499_v13  ;;  %6837 = vmatprep.subr.bf16.mxu0 %v6501_v15  ;;  %v6536_v13 = vunpack.c.h.s8.bf16 %v12775_v21  ;;  %v7485_v15 = vld [vmem:[%s12365_s8 + $0x2] ss:$4 sm:$0xf] }
 0x8cf   :  { %v6880_v56 = vrot.slane %v7485_v15, %v9495_v34  ;;  %v6884_v49 = vrot.slane %v7485_v15, %v9497_v32 }
 0x8d1   :  { %6674 = vmatpush1.bf16.msra.mxu1 %v6498_v62  ;;  %6838 = vmatpush1.bf16.msra.mxu0 %v6500_v59  ;;  %v6872_v62 = vrot.slane %v7485_v15, %v9491_v39  ;;  %v6876_v59 = vrot.slane %v7485_v15, %v9493_v37 }
 0x8d2   :  { %6675 = vmatprep.subr.bf16.mxu1 %v6503_v48  ;;  %6839 = vmatprep.subr.bf16.mxu0 %v6505_v19  ;;  %v6899_v48 = vrot.slane %v7486_v22, %v9491_v39  ;;  %v6907_v19 = vrot.slane %v7486_v22, %v9495_v34 }
 0x8d5   :  { %6676 = vmatpush1.bf16.msra.mxu1 %v6502_v29  ;;  %6840 = vmatpush1.bf16.msra.mxu0 %v6504_v47 }
 0x8d6   :  { %6677 = vmatprep.subr.bf16.mxu1 %v6507_v12  ;;  %6841 = vmatprep.subr.bf16.mxu0 %v6509_v17  ;;  %v6911_v12 = vrot.slane %v7486_v22, %v9497_v32 }
 0x8d9   :  { %6678 = vmatpush1.bf16.msra.mxu1 %v6506_v31  ;;  %6842 = vmatpush1.bf16.msra.mxu0 %v6508_v54 }
 0x8da   :  { %6679 = vmatprep.subr.bf16.mxu1 %v6511_v33  ;;  %6843 = vmatprep.subr.bf16.mxu0 %v6513_v42 }
 0x8dd   :  { %6680 = vmatpush1.bf16.msra.mxu1 %v6510_v23  ;;  %6844 = vmatpush1.bf16.msra.mxu0 %v6512_v1 }
 0x8de   :  { %6681 = vmatprep.subr.bf16.mxu1 %v6515_v16  ;;  %6845 = vmatprep.subr.bf16.mxu0 %v6517_v2 }
 0x8e1   :  { %6682 = vmatpush1.bf16.msra.mxu1 %v6514_v26  ;;  %6846 = vmatpush1.bf16.msra.mxu0 %v6516_v40  ;;  %v6965_v40 = vunpack.c.l.s8.bf16 %v12776_v51 }
 0x8e2   :  { %6683 = vmatprep.subr.bf16.mxu1 %v6519_v20  ;;  %6847 = vmatprep.subr.bf16.mxu0 %v6521_v5  ;;  %v12777_v20 = vld [vmem:[#allocation126_spill] sm:$0xff] }
 0x8e3   :  { %v6964_v5 = vunpack.c.l.s8.bf16 %v12777_v20 }
 0x8e5   :  { %6684 = vmatpush1.bf16.msra.mxu1 %v6518_v7  ;;  %6848 = vmatpush1.bf16.msra.mxu0 %v6520_v4  ;;  %v6967_v7 = vunpack.c.h.s8.bf16 %v12776_v51 }
 0x8e6   :  { %6685 = vmatprep.subr.bf16.mxu1 %v6523_v27  ;;  %6849 = vmatprep.subr.bf16.mxu0 %v6525_v60 }
 0x8e9   :  { %6686 = vmatpush1.bf16.msra.mxu1 %v6522_v63  ;;  %6850 = vmatpush1.bf16.msra.mxu0 %v6524_v11 }
 0x8ea   :  { %6687 = vmatprep.subr.bf16.mxu1 %v6527_v58  ;;  %6851 = vmatprep.subr.bf16.mxu0 %v6529_v55 }
 0x8ed   :  { %6688 = vmatpush1.bf16.msra.mxu1 %v6526_v30  ;;  %6852 = vmatpush1.bf16.msra.mxu0 %v6528_v8 }
 0x8ee   :  { %6689 = vmatprep.subr.bf16.mxu1 %v6531_v10  ;;  %6853 = vmatprep.subr.bf16.mxu0 %v6533_v38 }
 0x8f1   :  { %6690 = vmatpush1.bf16.msra.mxu1 %v6530_v53  ;;  %6854 = vmatpush1.bf16.msra.mxu0 %v6532_v44 }
 0x8f2   :  { %6691 = vmatprep.subr.bf16.mxu1 %v6535_v41  ;;  %6855 = vmatprep.subr.bf16.mxu0 %v6537_v25 }
 0x8f5   :  { %6692 = vmatpush1.bf16.msra.mxu1 %v6534_v43  ;;  %6856 = vmatpush1.bf16.msra.mxu0 %v6536_v13 }
 0x8f8   :  { %6694 = vmatmul.mubr.bf16.vlgmr.msra.gmra.mrb[48].mxu1 %v6152_v35  ;;  %6858 = vmatmul.mubr.bf16.vlgmr.msra.gmra.mrb[68].mxu0 %v6152_v35 }
 0x9cb   :  { %v6695_v29 = vpop.f32.mrb[48].mxu1  ;;  %v6859_v47 = vpop.f32.mrb[68].mxu0 }
 0x9cc   :  { %v6889_v18 = vmul.f32 %v6872_v62, %v6695_v29  ;;  %v6891_v17 = vmul.f32 %v6880_v56, %v6859_v47  ;;  %v6697_v46 = vpop.f32.mrb[49].mxu1  ;;  %v6861_v31 = vpop.f32.mrb[69].mxu0 }
 0x9cd   :  { %v6890_v28 = vmul.f32 %v6876_v59, %v6697_v46  ;;  %v6892_v54 = vmul.f32 %v6884_v49, %v6861_v31  ;;  %v6699_v33 = vpop.f32.mrb[50].mxu1  ;;  %v6863_v42 = vpop.f32.mrb[70].mxu0 }
 0x9ce   :  { %v6916_v23 = vadd.f32 %v6899_v48, %v6889_v18  ;;  %v6918_v1 = vadd.f32 %v6907_v19, %v6891_v17  ;;  %v6700_v3 = vpop.f32.mrb[51].mxu1  ;;  %v6864_v16 = vpop.f32.mrb[71].mxu0 }
 0x9cf   :  { %v6917_v0 = vadd.f32 %v6903_v61, %v6890_v28  ;;  %v6919_v34 = vadd.f32 %v6911_v12, %v6892_v54 }
 0x9d0   :  { %8125 = vtanh.f32 %v6916_v23 }
 0x9d1   :  { %8127 = vtanh.f32 %v6918_v1 }
 0x9d2   :  { %8129 = vtanh.f32 %v6917_v0 }
 0x9d3   :  { %8131 = vtanh.f32 %v6919_v34 }
 0x9da   :  { %v12198_v2 = vpop.eup %8125 }
 0x9db   :  { %v12200_v32 = vpop.eup %8127 }
 0x9dc   :  { %v8130_v45 = vpop.eup %8129 }
 0x9dd   :  { %v12202_v26 = vpop.eup %8131 }
 0x9de   :  { %8181 = dma.done.wait [#allocation4 + $0x1], 4096 }
 0x9df   :  { %8182 = vsyncadd [#allocation4 + $0x1], 4294963200  ;;  %7028 = vmatprep.subr.bf16.mxu1 %v6965_v40  ;;  %v6966_v4 = vunpack.c.h.s8.bf16 %v12777_v20  ;;  %v12778_v6 = vld [vmem:[#allocation129_spill] sm:$0xff]  ;;  %v12779_v36 = vld [vmem:[#allocation128_spill] sm:$0xff]  ;;  %v6929_v9 = vpack.c.bf16 %v8130_v45, %v8130_v45  ;;  %v6928_v45 = vpack.c.bf16 %v12198_v2, %v12198_v2  ;;  %v6931_v20 = vpack.c.bf16 %v12202_v26, %v12202_v26  ;;  %s8187_s21 = smov [#allocation5]  }
 0x9e0   :  { %7029 = vmatpush1.bf16.msra.mxu1 %v6964_v5  ;;  %v6969_v27 = vunpack.c.l.s8.bf16 %v12778_v6  ;;  %v6968_v60 = vunpack.c.l.s8.bf16 %v12779_v36  ;;  %v8133_v52 = vld [vmem:[%s12364_s7 + $0x40] sm:$0xff]   ;;  %v6971_v63 = vunpack.c.h.s8.bf16 %v12778_v6  ;;  %v8135_v58 = vld [vmem:[%s12364_s7 + $0x48] sm:$0xff]   ;;  %v6970_v30 = vunpack.c.h.s8.bf16 %v12779_v36  ;;  %v8137_v8 = vld [vmem:[%s12364_s7 + $0x50] sm:$0xff]   ;;  %s7340_s22 = sshll.u32 %s8187_s21, 4  ;;  %s7341_s22 = int_to_ptr.vmem [resolvable:$true] %s7340_s22 }
 0x9e1   :  { %7030 = vmatprep.subr.bf16.mxu1 %v6967_v7  ;;  %v8134_v11 = vld [vmem:[%s12364_s7] sm:$0xff]   ;;  %7727 = vmatprep.subr.bf16.mxu0 %v8133_v52  ;;  %v8136_v55 = vld [vmem:[%s12364_s7 + $0x8] sm:$0xff]   ;;  %v12780_v50 = vld [vmem:[#allocation131_spill] sm:$0xff]  ;;  %vm7316_vm3 = vcmask 1040384   ;;  %vm7322_vm4 = vcmask 253952   ;;  %vm7332_vm5 = vcmask 0   ;;  %p8162_p1 = scmp.lt.s32.totalorder %s7341_s22, %s7341_s22 }
 0x9e2   :  { %7060 = vmatprep.mubr.bf16.mxu1 %v6929_v9  ;;  %7728 = vmatpush3.bf16.msra.mxu0 %v8134_v11  ;;  %v6973_v10 = vunpack.c.l.s8.bf16 %v12780_v50  ;;  %v8138_v57 = vld [vmem:[%s12364_s7 + $0x10] sm:$0xff]   ;;  %v6975_v53 = vunpack.c.h.s8.bf16 %v12780_v50  ;;  %v12782_v44 = vld [vmem:[#allocation133_spill] sm:$0xff]  ;;  %v12783_v25 = vld [vmem:[#allocation132_spill] sm:$0xff]  ;;  %s8157_s23 = scalar_lea.vmem %s7341_s22, 16  ;;  %s8161_s24 = scalar_lea.vmem %s7341_s22, 32 }
 0x9e3   :  { %7729 = vmatprep.subr.bf16.mxu0 %v8135_v58  ;;  %v12781_v38 = vld [vmem:[#allocation130_spill] sm:$0xff]  ;;  %v6977_v41 = vunpack.c.l.s8.bf16 %v12782_v44  ;;  %v6976_v43 = vunpack.c.l.s8.bf16 %v12783_v25  ;;  %v6979_v13 = vunpack.c.h.s8.bf16 %v12782_v44  ;;  %v6978_v35 = vunpack.c.h.s8.bf16 %v12783_v25  ;;  %v12784_v15 = vld [vmem:[#allocation135_spill] sm:$0xff]  ;;  %v12786_v48 = vld [vmem:[#allocation137_spill] sm:$0xff]  ;;  %p8158_p0 = scmp.ne.s32.totalorder %s7341_s22, %s8157_s23  ;;  %p8163_p2 = scmp.lt.s32.totalorder %s8161_s24, %s8157_s23 }
 0x9e4   :  { %7031 = vmatpush1.bf16.msra.mxu1 %v6966_v4  ;;  %v6972_v14 = vunpack.c.l.s8.bf16 %v12781_v38  ;;  %v6974_v21 = vunpack.c.h.s8.bf16 %v12781_v38  ;;  %v6981_v22 = vunpack.c.l.s8.bf16 %v12784_v15  ;;  %v12785_v62 = vld [vmem:[#allocation134_spill] sm:$0xff]  ;;  %v6983_v59 = vunpack.c.h.s8.bf16 %v12784_v15  ;;  %v12787_v29 = vld [vmem:[#allocation136_spill] sm:$0xff]  ;;  %v12788_v18 = vld [vmem:[#allocation139_spill] sm:$0xff] }
 0x9e5   :  { %7032 = vmatprep.subr.bf16.mxu1 %v6969_v27  ;;  %v6980_v56 = vunpack.c.l.s8.bf16 %v12785_v62  ;;  %v6982_v49 = vunpack.c.h.s8.bf16 %v12785_v62  ;;  %v6985_v19 = vunpack.c.l.s8.bf16 %v12786_v48  ;;  %v6984_v47 = vunpack.c.l.s8.bf16 %v12787_v29  ;;  %v12789_v46 = vld [vmem:[#allocation138_spill] sm:$0xff]  ;;  %v12790_v33 = vld [vmem:[#allocation141_spill] sm:$0xff]  ;;  %v12791_v23 = vld [vmem:[#allocation140_spill] sm:$0xff]  ;;  %p8164_p3 = por %p8163_p2, %p8162_p1 }
 0x9e6   :  { %7730 = vmatpush3.bf16.msra.mxu0 %v8136_v55  ;;  %v6987_v61 = vunpack.c.h.s8.bf16 %v12786_v48  ;;  %v6986_v12 = vunpack.c.h.s8.bf16 %v12787_v29  ;;  %v6989_v17 = vunpack.c.l.s8.bf16 %v12788_v18  ;;  %v6988_v31 = vunpack.c.l.s8.bf16 %v12789_v46  ;;  %v12792_v0 = vld [vmem:[#allocation143_spill] sm:$0xff]  ;;  %v12793_v51 = vld [vmem:[#allocation142_spill] sm:$0xff]  ;;  %v12794_v4 = vld [vmem:[#allocation145_spill] sm:$0xff] }
 0x9e7   :  { %7731 = vmatprep.subr.bf16.mxu0 %v8137_v8  ;;  %v6991_v28 = vunpack.c.h.s8.bf16 %v12788_v18  ;;  %v6990_v54 = vunpack.c.h.s8.bf16 %v12789_v46  ;;  %v6993_v42 = vunpack.c.l.s8.bf16 %v12790_v33  ;;  %v6992_v1 = vunpack.c.l.s8.bf16 %v12791_v23  ;;  %v12795_v27 = vld [vmem:[#allocation144_spill] sm:$0xff]  ;;  %v12798_v55 = vld [vmem:[#allocation149_spill] sm:$0xff]  ;;  %v12800_v38 = vld [vmem:[#allocation151_spill] sm:$0xff]  ;;  %p8165_p4 = pnand %p8164_p3, %p8158_p0 }
 0x9e8   :  { %7033 = vmatpush1.bf16.msra.mxu1 %v6968_v60  ;;  %v6995_v3 = vunpack.c.h.s8.bf16 %v12790_v33  ;;  %v6994_v16 = vunpack.c.h.s8.bf16 %v12791_v23  ;;  %v6997_v34 = vunpack.c.l.s8.bf16 %v12792_v0  ;;  %v6996_v40 = vunpack.c.l.s8.bf16 %v12793_v51  ;;  %v12796_v60 = vld [vmem:[#allocation147_spill] sm:$0xff]  ;;  %v12799_v8 = vld [vmem:[#allocation148_spill] sm:$0xff]  ;;  %v12802_v25 = vld [vmem:[#allocation153_spill] sm:$0xff] }
 0x9e9   :  { %7034 = vmatprep.subr.bf16.mxu1 %v6971_v63  ;;  %v6999_v5 = vunpack.c.h.s8.bf16 %v12792_v0  ;;  %v6998_v7 = vunpack.c.h.s8.bf16 %v12793_v51  ;;  %v7001_v6 = vunpack.c.l.s8.bf16 %v12794_v4  ;;  %v7000_v2 = vunpack.c.l.s8.bf16 %v12795_v27  ;;  %v12797_v63 = vld [vmem:[#allocation146_spill] sm:$0xff]  ;;  %v12804_v62 = vld [vmem:[#allocation155_spill] sm:$0xff]  ;;  %v12806_v29 = vld [vmem:[#allocation157_spill] sm:$0xff] }
 0x9ea   :  { %7732 = vmatpush3.bf16.msra.mxu0 %v8138_v57  ;;  %v7003_v36 = vunpack.c.h.s8.bf16 %v12794_v4  ;;  %v7002_v26 = vunpack.c.h.s8.bf16 %v12795_v27  ;;  %v7005_v52 = vunpack.c.l.s8.bf16 %v12796_v60  ;;  %v7004_v9 = vunpack.c.l.s8.bf16 %v12797_v63  ;;  %v8143_v33 = vld [vmem:[%s12364_s7 + $0x68] sm:$0xff]   ;;  %v8145_v23 = vld [vmem:[%s12364_s7 + $0x70] sm:$0xff]   ;;  %v7487_v0 = vld [vmem:[%s12365_s8 + $0x3] ss:$4 sm:$0x3] }
 0x9eb   :  { %v7007_v11 = vunpack.c.h.s8.bf16 %v12796_v60  ;;  %v7006_v58 = vunpack.c.h.s8.bf16 %v12797_v63  ;;  %v7008_v50 = vunpack.c.l.s8.bf16 %v12799_v8  ;;  %v7010_v57 = vunpack.c.h.s8.bf16 %v12799_v8 }
 0x9ec   :  { %7035 = vmatpush1.bf16.msra.mxu1 %v6970_v30  ;;  %v7009_v30 = vunpack.c.l.s8.bf16 %v12798_v55  ;;  %v7015_v44 = vunpack.c.h.s8.bf16 %v12800_v38  ;;  %v7019_v15 = vunpack.c.h.s8.bf16 %v12802_v25  ;;  %v7023_v48 = vunpack.c.h.s8.bf16 %v12804_v62 }
 0x9ed   :  { %7036 = vmatprep.subr.bf16.mxu1 %v6973_v10  ;;  %v7011_v10 = vunpack.c.h.s8.bf16 %v12798_v55  ;;  %v7027_v18 = vunpack.c.h.s8.bf16 %v12806_v29  ;;  %v6930_v46 = vpack.c.bf16 %v12200_v32, %v12200_v32  ;;  %v8142_v32 = vld [vmem:[%s12364_s7 + $0x20] sm:$0xff]   ;;  %v7120_v51 = vrot.slane %v7487_v0, %v9493_v37 }
 0x9f0   :  { %7037 = vmatpush1.bf16.msra.mxu1 %v6972_v14  ;;  %v7013_v14 = vunpack.c.l.s8.bf16 %v12800_v38 }
 0x9f1   :  { %7038 = vmatprep.subr.bf16.mxu1 %v6975_v53  ;;  %v12801_v53 = vld [vmem:[#allocation150_spill] sm:$0xff] }
 0x9f4   :  { %7039 = vmatpush1.bf16.msra.mxu1 %v6974_v21  ;;  %v7012_v21 = vunpack.c.l.s8.bf16 %v12801_v53 }
 0x9f5   :  { %7040 = vmatprep.subr.bf16.mxu1 %v6977_v41  ;;  %v7014_v41 = vunpack.c.h.s8.bf16 %v12801_v53 }
 0x9f8   :  { %7041 = vmatpush1.bf16.msra.mxu1 %v6976_v43  ;;  %v7017_v43 = vunpack.c.l.s8.bf16 %v12802_v25 }
 0x9f9   :  { %7042 = vmatprep.subr.bf16.mxu1 %v6979_v13  ;;  %v12803_v13 = vld [vmem:[#allocation152_spill] sm:$0xff] }
 0x9fc   :  { %7043 = vmatpush1.bf16.msra.mxu1 %v6978_v35  ;;  %v7016_v35 = vunpack.c.l.s8.bf16 %v12803_v13 }
 0x9fd   :  { %7044 = vmatprep.subr.bf16.mxu1 %v6981_v22  ;;  %v7018_v22 = vunpack.c.h.s8.bf16 %v12803_v13 }
 0xa00   :  { %7045 = vmatpush1.bf16.msra.mxu1 %v6980_v56  ;;  %v7021_v56 = vunpack.c.l.s8.bf16 %v12804_v62 }
 0xa01   :  { %7046 = vmatprep.subr.bf16.mxu1 %v6983_v59  ;;  %v12805_v59 = vld [vmem:[#allocation154_spill] sm:$0xff] }
 0xa04   :  { %7047 = vmatpush1.bf16.msra.mxu1 %v6982_v49  ;;  %v7020_v49 = vunpack.c.l.s8.bf16 %v12805_v59 }
 0xa05   :  { %7048 = vmatprep.subr.bf16.mxu1 %v6985_v19  ;;  %v7022_v19 = vunpack.c.h.s8.bf16 %v12805_v59 }
 0xa08   :  { %7049 = vmatpush1.bf16.msra.mxu1 %v6984_v47  ;;  %v7025_v47 = vunpack.c.l.s8.bf16 %v12806_v29 }
 0xa09   :  { %7050 = vmatprep.subr.bf16.mxu1 %v6987_v61  ;;  %v12807_v61 = vld [vmem:[#allocation156_spill] sm:$0xff] }
 0xa0c   :  { %7051 = vmatpush1.bf16.msra.mxu1 %v6986_v12  ;;  %v7024_v12 = vunpack.c.l.s8.bf16 %v12807_v61 }
 0xa0d   :  { %7052 = vmatprep.subr.bf16.mxu1 %v6989_v17  ;;  %v7026_v17 = vunpack.c.h.s8.bf16 %v12807_v61 }
 0xa10   :  { %7053 = vmatpush1.bf16.msra.mxu1 %v6988_v31  ;;  %v8139_v31 = vld [vmem:[%s12364_s7 + $0x58] sm:$0xff]  }
 0xa11   :  { %7054 = vmatprep.subr.bf16.mxu1 %v6991_v28  ;;  %v8140_v28 = vld [vmem:[%s12364_s7 + $0x18] sm:$0xff]   ;;  %7733 = vmatprep.subr.bf16.mxu0 %v8139_v31 }
 0xa12   :  { %7734 = vmatpush3.bf16.msra.mxu0 %v8140_v28 }
 0xa14   :  { %7055 = vmatpush1.bf16.msra.mxu1 %v6990_v54  ;;  %v8141_v54 = vld [vmem:[%s12364_s7 + $0x60] sm:$0xff]  }
 0xa15   :  { %7056 = vmatprep.subr.bf16.mxu1 %v6993_v42  ;;  %7735 = vmatprep.subr.bf16.mxu0 %v8141_v54  ;;  %v8144_v42 = vld [vmem:[%s12364_s7 + $0x28] sm:$0xff]  }
 0xa16   :  { %7736 = vmatpush3.bf16.msra.mxu0 %v8142_v32 }
 0xa17   :  { %7737 = vmatprep.subr.bf16.mxu0 %v8143_v33 }
 0xa18   :  { %7057 = vmatpush1.bf16.msra.mxu1 %v6992_v1  ;;  %v8146_v1 = vld [vmem:[%s12364_s7 + $0x30] sm:$0xff]  }
 0xa19   :  { %7058 = vmatprep.subr.bf16.mxu1 %v6995_v3  ;;  %v8147_v3 = vld [vmem:[%s12364_s7 + $0x78] sm:$0xff]  }
 0xa1a   :  { %7738 = vmatpush3.bf16.msra.mxu0 %v8144_v42 }
 0xa1b   :  { %7739 = vmatprep.subr.bf16.mxu0 %v8145_v23 }
 0xa1c   :  { %7059 = vmatpush1.bf16.msra.mxu1 %v6994_v16  ;;  %v8148_v16 = vld [vmem:[%s12364_s7 + $0x38] sm:$0xff]  }
 0xa1d   :  { %7069 = vmatprep.subr.bf16.mxu1 %v6997_v34  ;;  %v7488_v34 = vld [vmem:[%s12365_s8 + $0xb] ss:$4 sm:$0x3] }
 0xa1e   :  { %7740 = vmatpush3.bf16.msra.mxu0 %v8146_v1 }
 0xa1f   :  { %7061 = vmatmul.mubr.bf16.vlgmr.msra.gmra.mrb[52].mxu1 %v6928_v45  ;;  %7741 = vmatprep.subr.bf16.mxu0 %v8147_v3  ;;  %v7116_v45 = vrot.slane %v7487_v0, %v9491_v39 }
 0xa20   :  { %7070 = vmatpush1.bf16.msra.mxu1 %v6996_v40  ;;  %7101 = vmatprep.mubr.bf16.mxu1 %v6931_v20  ;;  %v7131_v40 = vrot.slane %v7488_v34, %v9491_v39 }
 0xa21   :  { %7071 = vmatprep.subr.bf16.mxu1 %v6999_v5  ;;  %v7135_v5 = vrot.slane %v7488_v34, %v9493_v37  ;;  %v7176_v37 = vld [vmem:[%s12365_s8 + $0x22] sm:$0x1] }
 0xa22   :  { %7742 = vmatpush3.bf16.msra.mxu0 %v8148_v16 }
 0xa24   :  { %7072 = vmatpush1.bf16.msra.mxu1 %v6998_v7 }
 0xa25   :  { %7073 = vmatprep.subr.bf16.mxu1 %v7001_v6 }
 0xa28   :  { %7074 = vmatpush1.bf16.msra.mxu1 %v7000_v2 }
 0xa29   :  { %7075 = vmatprep.subr.bf16.mxu1 %v7003_v36 }
 0xa2c   :  { %7076 = vmatpush1.bf16.msra.mxu1 %v7002_v26 }
 0xa2d   :  { %7077 = vmatprep.subr.bf16.mxu1 %v7005_v52 }
 0xa30   :  { %7078 = vmatpush1.bf16.msra.mxu1 %v7004_v9 }
 0xa31   :  { %7079 = vmatprep.subr.bf16.mxu1 %v7007_v11 }
 0xa34   :  { %7080 = vmatpush1.bf16.msra.mxu1 %v7006_v58 }
 0xa35   :  { %7081 = vmatprep.subr.bf16.mxu1 %v7009_v30 }
 0xa38   :  { %7082 = vmatpush1.bf16.msra.mxu1 %v7008_v50  ;;  %v7314_v50 = vld [vmem:[%s12365_s8 + $0x13] sm:$0x1] }
 0xa39   :  { %7083 = vmatprep.subr.bf16.mxu1 %v7011_v10  ;;  %v7320_v10 = vld [vmem:[%s12365_s8 + $0x17] sm:$0x1] }
 0xa3c   :  { %7084 = vmatpush1.bf16.msra.mxu1 %v7010_v57 }
 0xa3d   :  { %7085 = vmatprep.subr.bf16.mxu1 %v7013_v14  ;;  %v7321_v14 = vmul.f32 %v11910_v24, %v7320_v10 }
 0xa40   :  { %7086 = vmatpush1.bf16.msra.mxu1 %v7012_v21  ;;  %v7323_v21 = vsel %vm7322_vm4, %v7321_v14, 0.0 }
 0xa41   :  { %7087 = vmatprep.subr.bf16.mxu1 %v7015_v44 }
 0xa44   :  { %7088 = vmatpush1.bf16.msra.mxu1 %v7014_v41  ;;  %v7327_v41 = vld [vmem:[%s12365_s8 + $0x1b] sm:$0x1] }
 0xa45   :  { %7089 = vmatprep.subr.bf16.mxu1 %v7017_v43 }
 0xa48   :  { %7090 = vmatpush1.bf16.msra.mxu1 %v7016_v35 }
 0xa49   :  { %7091 = vmatprep.subr.bf16.mxu1 %v7019_v15 }
 0xa4c   :  { %7092 = vmatpush1.bf16.msra.mxu1 %v7018_v22 }
 0xa4d   :  { %7093 = vmatprep.subr.bf16.mxu1 %v7021_v56 }
 0xa50   :  { %7094 = vmatpush1.bf16.msra.mxu1 %v7020_v49 }
 0xa51   :  { %7095 = vmatprep.subr.bf16.mxu1 %v7023_v48 }
 0xa54   :  { %7096 = vmatpush1.bf16.msra.mxu1 %v7022_v19 }
 0xa55   :  { %7097 = vmatprep.subr.bf16.mxu1 %v7025_v47 }
 0xa58   :  { %7098 = vmatpush1.bf16.msra.mxu1 %v7024_v12 }
 0xa59   :  { %7099 = vmatprep.subr.bf16.mxu1 %v7027_v18 }
 0xa5c   :  { %7100 = vmatpush1.bf16.msra.mxu1 %v7026_v17 }
 0xa5f   :  { %7102 = vmatmul.mubr.bf16.vlgmr.msra.gmra.mrb[52].mxu1 %v6930_v46 }
 0xb32   :  { %v7103_v20 = vpop.f32.mrb[52].mxu1 }
 0xb33   :  { %v7123_v7 = vmul.f32 %v7116_v45, %v7103_v20  ;;  %v7105_v4 = vpop.f32.mrb[53].mxu1 }
 0xb34   :  { %v7124_v6 = vmul.f32 %v7120_v51, %v7105_v4  ;;  %v7107_v27 = vpop.f32.mrb[54].mxu1 }
 0xb35   :  { %v7138_v2 = vadd.f32 %v7131_v40, %v7123_v7  ;;  %v7108_v36 = vpop.f32.mrb[55].mxu1 }
 0xb36   :  { %v7139_v26 = vadd.f32 %v7135_v5, %v7124_v6 }
 0xb37   :  { %8149 = vtanh.f32 %v7138_v2 }
 0xb38   :  { %8151 = vtanh.f32 %v7139_v26 }
 0xb41   :  { %v8150_v60 = vpop.eup %8149 }
 0xb42   :  { %v8152_v52 = vpop.eup %8151  ;;  %v7142_v9 = vpack.c.bf16 %v8150_v60, %v8150_v60 }
 0xb43   :  { %v7143_v63 = vpack.c.bf16 %v8152_v52, %v8152_v52 }
 0xb45   :  { %7305 = vmatprep.mubr.bf16.mxu0 %v7143_v63 }
 0xb46   :  { %7306 = vmatmul.mubr.bf16.vlgmr.msra.gmra.mrb[72].mxu0 %v7142_v9 }
 0xc19   :  { %v7743_v11 = vpop.f32.mrb[72].mxu0 }
 0xc1a   :  { %v7744_v39 = vpop.f32.mrb[73].mxu0 }
 0xc1b   :  { %v7745_v58 = vadd.f32 %v7744_v39, %v7743_v11  ;;  %v7746_v55 = vpop.f32.mrb[74].mxu0 }
 0xc1c   :  { %v7747_v30 = vpop.f32.mrb[75].mxu0 }
 0xc1d   :  { %v7308_v8 = vadd.f32 %v7745_v58, %v7176_v37 }
 0xc1f   :  { %8153 = vtanh.f32 %v7308_v8 }
 0xc29   :  { %v8154_v57 = vpop.eup %8153 }
 0xc2a   :  { %v7315_v38 = vmul.f32 %v8154_v57, %v7314_v50 }
 0xc2c   :  { %v7317_v53 = vsel %vm7316_vm3, %v7315_v38, 0.0 }
 0xc2d   :  { %7318 = vadd.xlane.f32.xlu0 %v7317_v53 }
 0xc31   :  { %7324 = vadd.xlane.f32.xlu0 %v7323_v21 }
 0xcba   :  { %v7319_v44 = vpop.xlane.xlu0 %7318 }
 0xcbe   :  { %v7325_v25 = vpop.xlane.xlu0 %7324 }
 0xcbf   :  { %v7326_v43 = vadd.f32 %v7325_v25, %v7319_v44 }
 0xcc1   :  { %v7328_v13 = vadd.f32 %v7327_v41, %v7326_v43 }
 0xcc3   :  { %8155 = vtanh.f32 %v7328_v13 }
 0xccd   :  { %v8156_v35 = vpop.eup %8155 }
 0xcce   :  { %v7331_v15 = vmul.f32 0.1, %v8156_v35 }
 0xcd0   :  { %7333 = vst.msk [vmem:[#allocation5] sm:$0x1] %vm7332_vm5, %v7331_v15 }
 0xcd1   :  { %8168 = shalt.err (!%p8165_p4)
}
 0xcd2   :  { %s8169_s25 = scalar_lea.hbm %s12366_s9, 16 }
 0xcd3   :  { %p8170_p5 = scmp.ne.s32.totalorder %s12366_s9, %s8169_s25  ;;  %p8173_p6 = scmp.lt.u32.totalorder %s8169_s25, %s12366_s9 }
 0xcd5   :  { %p8175_p7 = pnand %p8173_p6, %p8170_p5 }
 0xcd7   :  { %8178 = shalt.err (!%p8175_p7)
}
 0xcd8   :  { %7343 = dma.vmem_to_hbm [thread:$0]  %s7341_s22, 16, %s12366_s9, [#allocation6]  }
 0xcd9   :  { %8183 = dma.done.wait [#allocation6], 16  }
 0xcda   :  { %8184 = vsyncadd [#allocation6], 4294967280 }
 0xcdb   :  { %7347 = vsyncpa [#allocation6], 1 }
 0xcdc   :  { %7348 = vsyncmov [#allocation4] }
 0xcdf   :  { %s7349_s10 = vpop.sfrf %7348 }
 0xce0   :  { %p7505_p8 = scmp.ne.s32.totalorder %s7349_s10, 0 }
 0xce2   :  { %7353 = shalt.err (%p7505_p8)  }
 0xce3   :  { %7355 = vsyncmov [#allocation4 + $0x1] }
 0xce6   :  { %s7356_s11 = vpop.sfrf %7355 }
 0xce7   :  { %p7506_p9 = scmp.ne.s32.totalorder %s7356_s11, 0 }
 0xce9   :  { %7360 = shalt.err (%p7506_p9)  }

</bundles_post_ra>
